<compile_context>
chip_gen: v5e
topology: v5e:2x2
jax: 0.10.0
libtpu: 0.0.40
codegen_flags: <defaults>
</compile_context>

<pallas_src>
import functools

import jax
import jax.numpy as jnp
from jax.experimental import pallas as pl
from jax.experimental.pallas import tpu as pltpu

_FPAD = 8   # front pad rows of the flattened branch-2 scratch
_BPAD = 8   # back pad rows (covers the +1 column-shift overhang of the last tap)


def _inception_kernel(x_ref, w12a_ref, b12a_ref, w2b_ref, b2b_ref, wbd_ref, bbd_ref,
                      out_ref,
                      t2a_ref, s_ref, ce_ref, co_ref, ce2_ref,
                      *, H, W, Ho, Wo, chunk, Cin, c1r, c2r, c2):
    f32 = jnp.float32
    bf16 = jnp.bfloat16
    W2 = W // 2
    HW2 = H * W2
    CH = chunk * W                     # flattened rows per fused-matmul chunk
    Cs = c1r + Cin + c2                # shared-scratch lanes: [t1 | x-copy | t2b]
    c12 = wbd_ref.shape[-1]            # c1 + c2

    # --- zero the halo rows of the pad-1 scratch (front pad + row -1, row H + back
    # pad).  Re-done every grid step (cheap) so a core-sharded batch axis stays safe.
    t2a_ref[pl.ds(0, _FPAD + W), :] = jnp.zeros((_FPAD + W, c2r), f32)
    t2a_ref[pl.ds(_FPAD + (H + 1) * W, W + _BPAD), :] = (
        jnp.zeros((W + _BPAD, c2r), f32))

    w12a = w12a_ref[...]
    b12a = b12a_ref[...]
    b2b = b2b_ref[...]

    # --- phase 1: both 1x1 reduce convs (conv + folded BN + ReLU) as ONE fused matmul
    # per chunk; also copy x into the shared scratch for the maxpool branch.
    for c in range(H // chunk):
        r0 = c * CH
        xc = x_ref[0, pl.ds(r0, CH), :]                                # (CH, Cin) f32
        h = jnp.dot(xc.astype(bf16), w12a, preferred_element_type=f32) + b12a
        h = jnp.maximum(h, 0.0)                                        # (CH, c1r+c2r)
        s_ref[pl.ds(r0, CH), 0:c1r] = h[:, 0:c1r]                      # t1 lanes
        s_ref[pl.ds(r0, CH), c1r:c1r + Cin] = xc                       # x lanes (pool)
        t2a_ref[pl.ds(_FPAD + W + r0, CH), :] = h[:, c1r:c1r + c2r]    # t2a interior

    # --- phase 2: branch2 3x3 conv, stride 1, padding 1, as 9 shifted full-chunk
    # matmuls over the halo-padded flattened scratch.  Column padding is handled by
    # 0/1 edge masks (built in-kernel) applied to the narrow bf16 operand.
    for c in range(H // chunk):
        r0 = c * CH
        col = (jax.lax.broadcasted_iota(jnp.int32, (CH, 1), 0) + r0) % W
        mlo = (col != 0).astype(bf16)           # zero taps that would read col -1
        mhi = (col != W - 1).astype(bf16)       # zero taps that would read col W
        acc = jnp.zeros((CH, c2), f32)
        for i in range(3):
            for j in range(3):
                start = _FPAD + i * W + (j - 1) + r0
                op = t2a_ref[pl.ds(start, CH), :].astype(bf16)         # (CH, c2r)
                if j == 0:
                    op = op * mlo
                elif j == 2:
                    op = op * mhi
                acc = acc + jnp.dot(op, w2b_ref[i, j], preferred_element_type=f32)
        s_ref[pl.ds(r0, CH), c1r + Cin:Cs] = jnp.maximum(acc + b2b, 0.0)   # t2b lanes

    # --- phase 2.5: column compaction (3 bulk stride-2 copies) so the stride-2 tap
    # loads below are contiguous and 8-row aligned.  ce2's last row may read the
    # (never-consumed) pad rows of s_ref; it is never used by phase 3.
    ce_ref[...] = s_ref[pl.ds(0, HW2, stride=2), :]       # cols {0,2,...}  (j = 0)
    co_ref[...] = s_ref[pl.ds(1, HW2, stride=2), :]       # cols {1,3,...}  (j = 1)
    ce2_ref[...] = s_ref[pl.ds(2, HW2, stride=2), :]      # cols {2,4,...}  (j = 2)

    # --- phase 3: merged stride-2 3x3 convs (block-diagonal weights -> one matmul per
    # tap, output already lane-contiguous) + the 3x3 stride-2 maxpool on the x lanes.
    # Static Python loop keeps every slice start a compile-time constant.
    wbd = [[wbd_ref[i, j] for j in range(3)] for i in range(3)]
    bbd = bbd_ref[...]
    planes = (ce_ref, co_ref, ce2_ref)
    for ho in range(Ho):
        acc = jnp.zeros((Wo, c12), f32)
        mx = None
        for i in range(3):
            base = (2 * ho + i) * W2
            for j in range(3):
                op = planes[j][pl.ds(base, Wo), :]                     # (Wo, Cs) f32
                acc = acc + jnp.dot(op.astype(bf16), wbd[i][j],
                                    preferred_element_type=f32)
                px = op[:, c1r:c1r + Cin]                              # pool lanes
                mx = px if mx is None else jnp.maximum(mx, px)
        out_ref[0, ho, :, 0:c12] = jnp.maximum(acc + bbd, 0.0)         # branch1|branch2
        out_ref[0, ho, :, c12:c12 + Cin] = mx                          # branch3 (pool)


def _fold_bn(w, b, gamma, beta, mean, var, eps=1e-5):
    scale = gamma / jnp.sqrt(var + eps)
    return w * scale, (b - mean) * scale + beta


def make_params(key, in_channels, ch3x3red, ch3x3, ch3x3redX2, ch3x3X2):
    """Deterministic synthetic parameters (conv weight/bias + BN folded in)."""
    def basic(k, cin, cout, ksize):
        ks = jax.random.split(k, 6)
        w = 0.2 * jax.random.normal(ks[0], (ksize, ksize, cin, cout), jnp.float32)
        b = 0.1 * jax.random.normal(ks[1], (cout,), jnp.float32)
        gamma = 1.0 + 0.1 * jax.random.normal(ks[2], (cout,), jnp.float32)
        beta = 0.1 * jax.random.normal(ks[3], (cout,), jnp.float32)
        mean = 0.1 * jax.random.normal(ks[4], (cout,), jnp.float32)
        var = 0.5 + 0.25 * jax.random.uniform(ks[5], (cout,), jnp.float32)
        return _fold_bn(w, b, gamma, beta, mean, var)

    ks = jax.random.split(key, 5)
    p = {}
    p["w1a"], p["b1a"] = basic(ks[0], in_channels, ch3x3red, 1)
    p["w1b"], p["b1b"] = basic(ks[1], ch3x3red, ch3x3, 3)
    p["w2a"], p["b2a"] = basic(ks[2], in_channels, ch3x3redX2, 1)
    p["w2b"], p["b2b"] = basic(ks[3], ch3x3redX2, ch3x3X2, 3)
    p["w2c"], p["b2c"] = basic(ks[4], ch3x3X2, ch3x3X2, 3)
    return p


def _full_spec(a):
    nd = a.ndim
    return pl.BlockSpec(a.shape, lambda n, _nd=nd: (0,) * _nd)


def inception_v3d(x_nchw, p):
    N, Cin, H, W = x_nchw.shape
    assert H % 2 == 0 and W % 2 == 0, "even spatial dims assumed (flattened-plane tricks)"
    x = jnp.transpose(x_nchw, (0, 2, 3, 1)).astype(jnp.float32)        # NCHW -> NHWC
    x2d = x.reshape(N, H * W, Cin)                                     # flatten pixels

    c1r = p["w1a"].shape[3]
    c1 = p["w1b"].shape[3]
    c2r = p["w2a"].shape[3]
    c2 = p["w2b"].shape[3]
    Ho = (H - 3) // 2 + 1
    Wo = (W - 3) // 2 + 1
    Cp = c1 + c2 + Cin                 # packed output channels (branch1|branch2|pool)
    Cs = c1r + Cin + c2                # shared scratch lanes [t1 | x | t2b]

    bf16 = jnp.bfloat16
    # fused 1x1 weights (branch1 | branch2 reduce) and bias
    w12a = jnp.concatenate([p["w1a"].reshape(Cin, c1r),
                            p["w2a"].reshape(Cin, c2r)], axis=1).astype(bf16)
    b12a = jnp.concatenate([p["b1a"], p["b2a"]]).reshape(1, c1r + c2r)
    # branch2 pad-1 conv
    w2b = p["w2b"].astype(bf16)
    b2b = p["b2b"].reshape(1, c2)
    # block-diagonal per-tap weight merging both stride-2 convs; x lanes get zeros
    wbd = jnp.zeros((3, 3, Cs, c1 + c2), jnp.float32)
    wbd = wbd.at[:, :, 0:c1r, 0:c1].set(p["w1b"])
    wbd = wbd.at[:, :, c1r + Cin:Cs, c1:c1 + c2].set(p["w2c"])
    wbd = wbd.astype(bf16)
    bbd = jnp.concatenate([p["b1b"], p["b2c"]]).reshape(1, c1 + c2)

    args = (x2d, w12a, b12a, w2b, b2b, wbd, bbd)
    in_specs = [pl.BlockSpec((1, H * W, Cin), lambda n: (n, 0, 0))]
    in_specs += [_full_spec(a) for a in args[1:]]

    # image rows per fused-matmul chunk: largest divisor of H with chunk*W <= 512
    # (never empty: chunk=1 always divides H, so no crash for large W).
    divisors = [d for d in range(1, H + 1) if H % d == 0 and d * W <= 512]
    chunk = max(divisors) if divisors else 1

    kernel = functools.partial(_inception_kernel, H=H, W=W, Ho=Ho, Wo=Wo, chunk=chunk,
                               Cin=Cin, c1r=c1r, c2r=c2r, c2=c2)

    flops = 2 * N * (H * W * Cin * (c1r + c2r)
                     + 9 * H * W * c2r * c2
                     + 9 * Ho * Wo * Cs * (c1 + c2))
    bytes_accessed = 4 * (x2d.size + N * Ho * Wo * Cp) + 2 * (w12a.size + w2b.size + wbd.size)

    grid_spec = pltpu.PrefetchScalarGridSpec(
        num_scalar_prefetch=0,
        grid=(N,),
        in_specs=in_specs,
        out_specs=pl.BlockSpec((1, Ho, Wo, Cp), lambda n: (n, 0, 0, 0)),
        scratch_shapes=[
            pltpu.VMEM((_FPAD + (H + 2) * W + _BPAD, c2r), jnp.float32),  # t2a (+halo)
            pltpu.VMEM((H * W + 8, Cs), jnp.float32),                     # shared [t1|x|t2b]
            pltpu.VMEM((H * (W // 2), Cs), jnp.float32),                  # even cols
            pltpu.VMEM((H * (W // 2), Cs), jnp.float32),                  # odd cols
            pltpu.VMEM((H * (W // 2), Cs), jnp.float32),                  # even+2 cols
        ],
    )

    out = pl.pallas_call(
        kernel,
        out_shape=jax.ShapeDtypeStruct((N, Ho, Wo, Cp), jnp.float32),
        grid_spec=grid_spec,
        compiler_params=pltpu.CompilerParams(dimension_semantics=("parallel",)),
        cost_estimate=pl.CostEstimate(flops=flops, transcendentals=0,
                                      bytes_accessed=bytes_accessed),
    )(*args)

    return jnp.transpose(out, (0, 3, 1, 2))                            # NHWC -> NCHW


# ---------------- pure-JAX reference (for correctness check only) ----------------
def _conv_bnfold_relu_ref(x, w, b, stride, pad):
    # same precision as the kernel: bf16 operands, f32 accumulation, f32 bias/ReLU
    y = jax.lax.conv_general_dilated(
        x.astype(jnp.bfloat16), w.astype(jnp.bfloat16),
        window_strides=(stride, stride),
        padding=[(pad, pad), (pad, pad)],
        dimension_numbers=("NHWC", "HWIO", "NHWC"),
        preferred_element_type=jnp.float32)
    return jnp.maximum(y + b, 0.0)


def inception_v3d_ref(x_nchw, p):
    x = jnp.transpose(x_nchw, (0, 2, 3, 1)).astype(jnp.float32)
    b1 = _conv_bnfold_relu_ref(x, p["w1a"], p["b1a"], 1, 0)
    b1 = _conv_bnfold_relu_ref(b1, p["w1b"], p["b1b"], 2, 0)
    b2 = _conv_bnfold_relu_ref(x, p["w2a"], p["b2a"], 1, 0)
    b2 = _conv_bnfold_relu_ref(b2, p["w2b"], p["b2b"], 1, 1)
    b2 = _conv_bnfold_relu_ref(b2, p["w2c"], p["b2c"], 2, 0)
    b3 = jax.lax.reduce_window(x, -jnp.inf, jax.lax.max,
                               (1, 3, 3, 1), (1, 2, 2, 1), "VALID")
    out = jnp.concatenate([b1, b2, b3], axis=-1)
    return jnp.transpose(out, (0, 3, 1, 2))


if __name__ == "__main__":
    key = jax.random.PRNGKey(0)
    kx, kp = jax.random.split(key)

    # small shapes consistent with the module's forward
    N, Cin, H, W = 2, 4, 16, 16
    ch1x1, ch3x3red, ch3x3, ch3x3redX2, ch3x3X2, pool_proj = 8, 8, 16, 8, 16, 8
    # (ch1x1 and pool_proj are unused by InceptionV3D.__init__, as in the PyTorch code)

    x = jax.random.normal(kx, (N, Cin, H, W), jnp.float32)
    params = make_params(kp, Cin, ch3x3red, ch3x3, ch3x3redX2, ch3x3X2)

    out = inception_v3d(x, params)
    out = jax.block_until_ready(out)

    ref = inception_v3d_ref(x, params)
    Ho = (H - 3) // 2 + 1
    assert out.shape == (N, ch3x3 + ch3x3X2 + Cin, Ho, Ho), out.shape
    err = float(jnp.max(jnp.abs(out - ref)))
    assert jnp.allclose(out, ref, atol=1e-2, rtol=1e-2), err
    print("KERNEL_OK")
</pallas_src>

<mosaic_0001>
module attributes {stable_mosaic.version = 11 : i64} {
  func.func @_inception_kernel(%arg0: i32, %arg1: memref<1x256x4xf32, #tpu.memory_space<vmem>>, %arg2: memref<4x16xbf16, #tpu.memory_space<vmem>>, %arg3: memref<1x16xf32, #tpu.memory_space<vmem>>, %arg4: memref<3x3x8x16xbf16, #tpu.memory_space<vmem>>, %arg5: memref<1x16xf32, #tpu.memory_space<vmem>>, %arg6: memref<3x3x28x32xbf16, #tpu.memory_space<vmem>>, %arg7: memref<1x32xf32, #tpu.memory_space<vmem>>, %arg8: memref<1x7x7x36xf32, #tpu.memory_space<vmem>>, %arg9: memref<304x8xf32, #tpu.memory_space<vmem>>, %arg10: memref<264x28xf32, #tpu.memory_space<vmem>>, %arg11: memref<128x28xf32, #tpu.memory_space<vmem>>, %arg12: memref<128x28xf32, #tpu.memory_space<vmem>>, %arg13: memref<128x28xf32, #tpu.memory_space<vmem>>) attributes {dimension_semantics = [#tpu.dimension_semantics<parallel>], iteration_bounds = array<i64: 2>, scalar_prefetch = 0 : i64, scratch_operands = 5 : i64, tpu.core_type = #tpu.core_type<tc>, window_params = [{transform_indices = @transform_0, window_bounds = array<i64: 1, 256, 4>}, {pipeline_mode = #tpu.pipeline_mode<synchronous>, transform_indices = @transform_1, window_bounds = array<i64: 4, 16>}, {pipeline_mode = #tpu.pipeline_mode<synchronous>, transform_indices = @transform_2, window_bounds = array<i64: 1, 16>}, {pipeline_mode = #tpu.pipeline_mode<synchronous>, transform_indices = @transform_3, window_bounds = array<i64: 3, 3, 8, 16>}, {pipeline_mode = #tpu.pipeline_mode<synchronous>, transform_indices = @transform_4, window_bounds = array<i64: 1, 16>}, {pipeline_mode = #tpu.pipeline_mode<synchronous>, transform_indices = @transform_5, window_bounds = array<i64: 3, 3, 28, 32>}, {pipeline_mode = #tpu.pipeline_mode<synchronous>, transform_indices = @transform_6, window_bounds = array<i64: 1, 32>}, {transform_indices = @transform_7, window_bounds = array<i64: 1, 7, 7, 36>}]} {
    %cst = arith.constant 0.000000e+00 : f32
    %0 = vector.broadcast %cst : f32 to vector<24x8xf32>
    %c0 = arith.constant 0 : index
    %c0_0 = arith.constant 0 : index
    %1 = vector.load %arg9[%c0, %c0_0] : memref<304x8xf32, #tpu.memory_space<vmem>>, vector<24x8xf32>
    tpu.vector_store %arg9[%c0, %c0_0], %0 {strides = array<i32>} : memref<304x8xf32, #tpu.memory_space<vmem>>, vector<24x8xf32>,
    %cst_1 = arith.constant 0.000000e+00 : f32
    %2 = vector.broadcast %cst_1 : f32 to vector<24x8xf32>
    %c280 = arith.constant 280 : index
    %c0_2 = arith.constant 0 : index
    %3 = vector.load %arg9[%c280, %c0_2] : memref<304x8xf32, #tpu.memory_space<vmem>>, vector<24x8xf32>
    tpu.vector_store %arg9[%c280, %c0_2], %2 {strides = array<i32>} : memref<304x8xf32, #tpu.memory_space<vmem>>, vector<24x8xf32>,
    %c0_3 = arith.constant 0 : index
    %c0_4 = arith.constant 0 : index
    %4 = vector.load %arg2[%c0_3, %c0_4] : memref<4x16xbf16, #tpu.memory_space<vmem>>, vector<4x16xbf16>
    %c0_5 = arith.constant 0 : index
    %c0_6 = arith.constant 0 : index
    %5 = vector.load %arg3[%c0_5, %c0_6] : memref<1x16xf32, #tpu.memory_space<vmem>>, vector<1x16xf32>
    %c0_7 = arith.constant 0 : index
    %c0_8 = arith.constant 0 : index
    %6 = vector.load %arg5[%c0_7, %c0_8] : memref<1x16xf32, #tpu.memory_space<vmem>>, vector<1x16xf32>
    %c0_9 = arith.constant 0 : index
    %c0_10 = arith.constant 0 : index
    %c0_11 = arith.constant 0 : index
    %7 = vector.load %arg1[%c0_9, %c0_10, %c0_11] : memref<1x256x4xf32, #tpu.memory_space<vmem>>, vector<1x256x4xf32>
    %8 = vector.shape_cast %7 : vector<1x256x4xf32> to vector<256x4xf32>
    %9 = arith.truncf %8 : vector<256x4xf32> to vector<256x4xbf16>
    %cst_12 = arith.constant dense<0.000000e+00> : vector<256x16xf32>
    %10 = tpu.matmul %9, %4, %cst_12 {dimension_numbers = #tpu.dot_dimension_numbers<[1], [0], [0], [1], [0, 0, 1, 1], [], []>} : vector<256x4xbf16>, vector<4x16xbf16>, vector<256x16xf32> -> vector<256x16xf32>
    %11 = vector.broadcast %5 : vector<1x16xf32> to vector<256x16xf32>
    %12 = arith.addf %10, %11 : vector<256x16xf32>
    %cst_13 = arith.constant 0.000000e+00 : f32
    %13 = vector.broadcast %cst_13 : f32 to vector<256x16xf32>
    %14 = arith.maximumf %12, %13 : vector<256x16xf32>
    %15 = vector.extract_strided_slice %14 {offsets = [0, 0], sizes = [256, 8], strides = [1, 1]} : vector<256x16xf32> to vector<256x8xf32>
    %c0_14 = arith.constant 0 : index
    %c0_15 = arith.constant 0 : index
    %16 = vector.load %arg10[%c0_14, %c0_15] : memref<264x28xf32, #tpu.memory_space<vmem>>, vector<256x8xf32>
    tpu.vector_store %arg10[%c0_14, %c0_15], %15 {strides = array<i32>} : memref<264x28xf32, #tpu.memory_space<vmem>>, vector<256x8xf32>,
    %c0_16 = arith.constant 0 : index
    %c8 = arith.constant 8 : index
    %17 = vector.load %arg10[%c0_16, %c8] : memref<264x28xf32, #tpu.memory_space<vmem>>, vector<256x4xf32>
    tpu.vector_store %arg10[%c0_16, %c8], %8 {strides = array<i32>} : memref<264x28xf32, #tpu.memory_space<vmem>>, vector<256x4xf32>,
    %18 = vector.extract_strided_slice %14 {offsets = [0, 8], sizes = [256, 8], strides = [1, 1]} : vector<256x16xf32> to vector<256x8xf32>
    %c24 = arith.constant 24 : index
    %c0_17 = arith.constant 0 : index
    %19 = vector.load %arg9[%c24, %c0_17] : memref<304x8xf32, #tpu.memory_space<vmem>>, vector<256x8xf32>
    tpu.vector_store %arg9[%c24, %c0_17], %18 {strides = array<i32>} : memref<304x8xf32, #tpu.memory_space<vmem>>, vector<256x8xf32>,
    %20 = tpu.iota {dimensions = array<i32: 0>} : vector<256x1xi32>
    %c0_i32 = arith.constant 0 : i32
    %21 = vector.broadcast %c0_i32 : i32 to vector<256x1xi32>
    %22 = arith.addi %20, %21 : vector<256x1xi32>
    %c16_i32 = arith.constant 16 : i32
    %c0_i32_18 = arith.constant 0 : i32
    %23 = arith.cmpi eq, %c16_i32, %c0_i32_18 : i32
    %c1_i32 = arith.constant 1 : i32
    %24 = arith.select %23, %c1_i32, %c16_i32 : i32
    %25 = vector.broadcast %24 : i32 to vector<256x1xi32>
    %26 = arith.remsi %22, %25 : vector<256x1xi32>
    %c0_i32_19 = arith.constant 0 : i32
    %27 = vector.broadcast %c0_i32_19 : i32 to vector<256x1xi32>
    %28 = arith.cmpi ne, %26, %27 : vector<256x1xi32>
    %c0_i32_20 = arith.constant 0 : i32
    %29 = vector.broadcast %c0_i32_20 : i32 to vector<256x1xi32>
    %30 = arith.cmpi slt, %26, %29 : vector<256x1xi32>
    %c0_i32_21 = arith.constant 0 : i32
    %31 = arith.cmpi slt, %24, %c0_i32_21 : i32
    %32 = vector.broadcast %31 : i1 to vector<256x1xi1>
    %33 = vector.broadcast %32 : vector<256x1xi1> to vector<256x1xi1>
    %34 = arith.xori %30, %33 : vector<256x1xi1>
    %35 = arith.andi %34, %28 : vector<256x1xi1>
    %36 = vector.broadcast %24 : i32 to vector<256x1xi32>
    %37 = arith.addi %26, %36 : vector<256x1xi32>
    %38 = arith.select %35, %37, %26 : vector<256x1xi1>, vector<256x1xi32>
    %c0_i32_22 = arith.constant 0 : i32
    %39 = vector.broadcast %c0_i32_22 : i32 to vector<256x1xi32>
    %40 = arith.cmpi ne, %38, %39 : vector<256x1xi32>
    %41 = arith.extui %40 : vector<256x1xi1> to vector<256x1xi32>
    %42 = arith.sitofp %41 : vector<256x1xi32> to vector<256x1xf32>
    %43 = arith.truncf %42 : vector<256x1xf32> to vector<256x1xbf16>
    %c15_i32 = arith.constant 15 : i32
    %44 = vector.broadcast %c15_i32 : i32 to vector<256x1xi32>
    %45 = arith.cmpi ne, %38, %44 : vector<256x1xi32>
    %46 = arith.extui %45 : vector<256x1xi1> to vector<256x1xi32>
    %47 = arith.sitofp %46 : vector<256x1xi32> to vector<256x1xf32>
    %48 = arith.truncf %47 : vector<256x1xf32> to vector<256x1xbf16>
    %cst_23 = arith.constant 0.000000e+00 : f32
    %49 = vector.broadcast %cst_23 : f32 to vector<256x16xf32>
    %c7 = arith.constant 7 : index
    %c0_24 = arith.constant 0 : index
    %50 = vector.load %arg9[%c7, %c0_24] : memref<304x8xf32, #tpu.memory_space<vmem>>, vector<256x8xf32>
    %51 = arith.truncf %50 : vector<256x8xf32> to vector<256x8xbf16>
    %52 = vector.broadcast %43 : vector<256x1xbf16> to vector<256x8xbf16>
    %53 = arith.mulf %51, %52 : vector<256x8xbf16>
    %c0_25 = arith.constant 0 : index
    %c0_26 = arith.constant 0 : index
    %c0_27 = arith.constant 0 : index
    %c0_28 = arith.constant 0 : index
    %54 = vector.load %arg4[%c0_25, %c0_26, %c0_27, %c0_28] : memref<3x3x8x16xbf16, #tpu.memory_space<vmem>>, vector<1x1x8x16xbf16>
    %55 = vector.shape_cast %54 : vector<1x1x8x16xbf16> to vector<8x16xbf16>
    %cst_29 = arith.constant dense<0.000000e+00> : vector<256x16xf32>
    %56 = tpu.matmul %53, %55, %cst_29 {dimension_numbers = #tpu.dot_dimension_numbers<[1], [0], [0], [1], [0, 0, 1, 1], [], []>} : vector<256x8xbf16>, vector<8x16xbf16>, vector<256x16xf32> -> vector<256x16xf32>
    %57 = arith.addf %49, %56 : vector<256x16xf32>
    %c8_30 = arith.constant 8 : index
    %c0_31 = arith.constant 0 : index
    %58 = vector.load %arg9[%c8_30, %c0_31] : memref<304x8xf32, #tpu.memory_space<vmem>>, vector<256x8xf32>
    %59 = arith.truncf %58 : vector<256x8xf32> to vector<256x8xbf16>
    %c0_32 = arith.constant 0 : index
    %c1 = arith.constant 1 : index
    %c0_33 = arith.constant 0 : index
    %c0_34 = arith.constant 0 : index
    %60 = vector.load %arg4[%c0_32, %c1, %c0_33, %c0_34] : memref<3x3x8x16xbf16, #tpu.memory_space<vmem>>, vector<1x1x8x16xbf16>
    %61 = vector.shape_cast %60 : vector<1x1x8x16xbf16> to vector<8x16xbf16>
    %cst_35 = arith.constant dense<0.000000e+00> : vector<256x16xf32>
    %62 = tpu.matmul %59, %61, %cst_35 {dimension_numbers = #tpu.dot_dimension_numbers<[1], [0], [0], [1], [0, 0, 1, 1], [], []>} : vector<256x8xbf16>, vector<8x16xbf16>, vector<256x16xf32> -> vector<256x16xf32>
    %63 = arith.addf %57, %62 : vector<256x16xf32>
    %c9 = arith.constant 9 : index
    %c0_36 = arith.constant 0 : index
    %64 = vector.load %arg9[%c9, %c0_36] : memref<304x8xf32, #tpu.memory_space<vmem>>, vector<256x8xf32>
    %65 = arith.truncf %64 : vector<256x8xf32> to vector<256x8xbf16>
    %66 = vector.broadcast %48 : vector<256x1xbf16> to vector<256x8xbf16>
    %67 = arith.mulf %65, %66 : vector<256x8xbf16>
    %c0_37 = arith.constant 0 : index
    %c2 = arith.constant 2 : index
    %c0_38 = arith.constant 0 : index
    %c0_39 = arith.constant 0 : index
    %68 = vector.load %arg4[%c0_37, %c2, %c0_38, %c0_39] : memref<3x3x8x16xbf16, #tpu.memory_space<vmem>>, vector<1x1x8x16xbf16>
    %69 = vector.shape_cast %68 : vector<1x1x8x16xbf16> to vector<8x16xbf16>
    %cst_40 = arith.constant dense<0.000000e+00> : vector<256x16xf32>
    %70 = tpu.matmul %67, %69, %cst_40 {dimension_numbers = #tpu.dot_dimension_numbers<[1], [0], [0], [1], [0, 0, 1, 1], [], []>} : vector<256x8xbf16>, vector<8x16xbf16>, vector<256x16xf32> -> vector<256x16xf32>
    %71 = arith.addf %63, %70 : vector<256x16xf32>
    %c23 = arith.constant 23 : index
    %c0_41 = arith.constant 0 : index
    %72 = vector.load %arg9[%c23, %c0_41] : memref<304x8xf32, #tpu.memory_space<vmem>>, vector<256x8xf32>
    %73 = arith.truncf %72 : vector<256x8xf32> to vector<256x8xbf16>
    %74 = vector.broadcast %43 : vector<256x1xbf16> to vector<256x8xbf16>
    %75 = arith.mulf %73, %74 : vector<256x8xbf16>
    %c1_42 = arith.constant 1 : index
    %c0_43 = arith.constant 0 : index
    %c0_44 = arith.constant 0 : index
    %c0_45 = arith.constant 0 : index
    %76 = vector.load %arg4[%c1_42, %c0_43, %c0_44, %c0_45] : memref<3x3x8x16xbf16, #tpu.memory_space<vmem>>, vector<1x1x8x16xbf16>
    %77 = vector.shape_cast %76 : vector<1x1x8x16xbf16> to vector<8x16xbf16>
    %cst_46 = arith.constant dense<0.000000e+00> : vector<256x16xf32>
    %78 = tpu.matmul %75, %77, %cst_46 {dimension_numbers = #tpu.dot_dimension_numbers<[1], [0], [0], [1], [0, 0, 1, 1], [], []>} : vector<256x8xbf16>, vector<8x16xbf16>, vector<256x16xf32> -> vector<256x16xf32>
    %79 = arith.addf %71, %78 : vector<256x16xf32>
    %c24_47 = arith.constant 24 : index
    %c0_48 = arith.constant 0 : index
    %80 = vector.load %arg9[%c24_47, %c0_48] : memref<304x8xf32, #tpu.memory_space<vmem>>, vector<256x8xf32>
    %81 = arith.truncf %80 : vector<256x8xf32> to vector<256x8xbf16>
    %c1_49 = arith.constant 1 : index
    %c1_50 = arith.constant 1 : index
    %c0_51 = arith.constant 0 : index
    %c0_52 = arith.constant 0 : index
    %82 = vector.load %arg4[%c1_49, %c1_50, %c0_51, %c0_52] : memref<3x3x8x16xbf16, #tpu.memory_space<vmem>>, vector<1x1x8x16xbf16>
    %83 = vector.shape_cast %82 : vector<1x1x8x16xbf16> to vector<8x16xbf16>
    %cst_53 = arith.constant dense<0.000000e+00> : vector<256x16xf32>
    %84 = tpu.matmul %81, %83, %cst_53 {dimension_numbers = #tpu.dot_dimension_numbers<[1], [0], [0], [1], [0, 0, 1, 1], [], []>} : vector<256x8xbf16>, vector<8x16xbf16>, vector<256x16xf32> -> vector<256x16xf32>
    %85 = arith.addf %79, %84 : vector<256x16xf32>
    %c25 = arith.constant 25 : index
    %c0_54 = arith.constant 0 : index
    %86 = vector.load %arg9[%c25, %c0_54] : memref<304x8xf32, #tpu.memory_space<vmem>>, vector<256x8xf32>
    %87 = arith.truncf %86 : vector<256x8xf32> to vector<256x8xbf16>
    %88 = vector.broadcast %48 : vector<256x1xbf16> to vector<256x8xbf16>
    %89 = arith.mulf %87, %88 : vector<256x8xbf16>
    %c1_55 = arith.constant 1 : index
    %c2_56 = arith.constant 2 : index
    %c0_57 = arith.constant 0 : index
    %c0_58 = arith.constant 0 : index
    %90 = vector.load %arg4[%c1_55, %c2_56, %c0_57, %c0_58] : memref<3x3x8x16xbf16, #tpu.memory_space<vmem>>, vector<1x1x8x16xbf16>
    %91 = vector.shape_cast %90 : vector<1x1x8x16xbf16> to vector<8x16xbf16>
    %cst_59 = arith.constant dense<0.000000e+00> : vector<256x16xf32>
    %92 = tpu.matmul %89, %91, %cst_59 {dimension_numbers = #tpu.dot_dimension_numbers<[1], [0], [0], [1], [0, 0, 1, 1], [], []>} : vector<256x8xbf16>, vector<8x16xbf16>, vector<256x16xf32> -> vector<256x16xf32>
    %93 = arith.addf %85, %92 : vector<256x16xf32>
    %c39 = arith.constant 39 : index
    %c0_60 = arith.constant 0 : index
    %94 = vector.load %arg9[%c39, %c0_60] : memref<304x8xf32, #tpu.memory_space<vmem>>, vector<256x8xf32>
    %95 = arith.truncf %94 : vector<256x8xf32> to vector<256x8xbf16>
    %96 = vector.broadcast %43 : vector<256x1xbf16> to vector<256x8xbf16>
    %97 = arith.mulf %95, %96 : vector<256x8xbf16>
    %c2_61 = arith.constant 2 : index
    %c0_62 = arith.constant 0 : index
    %c0_63 = arith.constant 0 : index
    %c0_64 = arith.constant 0 : index
    %98 = vector.load %arg4[%c2_61, %c0_62, %c0_63, %c0_64] : memref<3x3x8x16xbf16, #tpu.memory_space<vmem>>, vector<1x1x8x16xbf16>
    %99 = vector.shape_cast %98 : vector<1x1x8x16xbf16> to vector<8x16xbf16>
    %cst_65 = arith.constant dense<0.000000e+00> : vector<256x16xf32>
    %100 = tpu.matmul %97, %99, %cst_65 {dimension_numbers = #tpu.dot_dimension_numbers<[1], [0], [0], [1], [0, 0, 1, 1], [], []>} : vector<256x8xbf16>, vector<8x16xbf16>, vector<256x16xf32> -> vector<256x16xf32>
    %101 = arith.addf %93, %100 : vector<256x16xf32>
    %c40 = arith.constant 40 : index
    %c0_66 = arith.constant 0 : index
    %102 = vector.load %arg9[%c40, %c0_66] : memref<304x8xf32, #tpu.memory_space<vmem>>, vector<256x8xf32>
    %103 = arith.truncf %102 : vector<256x8xf32> to vector<256x8xbf16>
    %c2_67 = arith.constant 2 : index
    %c1_68 = arith.constant 1 : index
    %c0_69 = arith.constant 0 : index
    %c0_70 = arith.constant 0 : index
    %104 = vector.load %arg4[%c2_67, %c1_68, %c0_69, %c0_70] : memref<3x3x8x16xbf16, #tpu.memory_space<vmem>>, vector<1x1x8x16xbf16>
    %105 = vector.shape_cast %104 : vector<1x1x8x16xbf16> to vector<8x16xbf16>
    %cst_71 = arith.constant dense<0.000000e+00> : vector<256x16xf32>
    %106 = tpu.matmul %103, %105, %cst_71 {dimension_numbers = #tpu.dot_dimension_numbers<[1], [0], [0], [1], [0, 0, 1, 1], [], []>} : vector<256x8xbf16>, vector<8x16xbf16>, vector<256x16xf32> -> vector<256x16xf32>
    %107 = arith.addf %101, %106 : vector<256x16xf32>
    %c41 = arith.constant 41 : index
    %c0_72 = arith.constant 0 : index
    %108 = vector.load %arg9[%c41, %c0_72] : memref<304x8xf32, #tpu.memory_space<vmem>>, vector<256x8xf32>
    %109 = arith.truncf %108 : vector<256x8xf32> to vector<256x8xbf16>
    %110 = vector.broadcast %48 : vector<256x1xbf16> to vector<256x8xbf16>
    %111 = arith.mulf %109, %110 : vector<256x8xbf16>
    %c2_73 = arith.constant 2 : index
    %c2_74 = arith.constant 2 : index
    %c0_75 = arith.constant 0 : index
    %c0_76 = arith.constant 0 : index
    %112 = vector.load %arg4[%c2_73, %c2_74, %c0_75, %c0_76] : memref<3x3x8x16xbf16, #tpu.memory_space<vmem>>, vector<1x1x8x16xbf16>
    %113 = vector.shape_cast %112 : vector<1x1x8x16xbf16> to vector<8x16xbf16>
    %cst_77 = arith.constant dense<0.000000e+00> : vector<256x16xf32>
    %114 = tpu.matmul %111, %113, %cst_77 {dimension_numbers = #tpu.dot_dimension_numbers<[1], [0], [0], [1], [0, 0, 1, 1], [], []>} : vector<256x8xbf16>, vector<8x16xbf16>, vector<256x16xf32> -> vector<256x16xf32>
    %115 = arith.addf %107, %114 : vector<256x16xf32>
    %116 = vector.broadcast %6 : vector<1x16xf32> to vector<256x16xf32>
    %117 = arith.addf %115, %116 : vector<256x16xf32>
    %cst_78 = arith.constant 0.000000e+00 : f32
    %118 = vector.broadcast %cst_78 : f32 to vector<256x16xf32>
    %119 = arith.maximumf %117, %118 : vector<256x16xf32>
    %c0_79 = arith.constant 0 : index
    %c12 = arith.constant 12 : index
    %120 = vector.load %arg10[%c0_79, %c12] : memref<264x28xf32, #tpu.memory_space<vmem>>, vector<256x16xf32>
    tpu.vector_store %arg10[%c0_79, %c12], %119 {strides = array<i32>} : memref<264x28xf32, #tpu.memory_space<vmem>>, vector<256x16xf32>,
    %c0_80 = arith.constant 0 : index
    %c0_81 = arith.constant 0 : index
    %121 = tpu.strided_load %arg10[%c0_80, %c0_81] {strides = array<i32: 2, 1>} : memref<264x28xf32, #tpu.memory_space<vmem>>, vector<128x28xf32>
    %c0_82 = arith.constant 0 : index
    %c0_83 = arith.constant 0 : index
    %122 = vector.load %arg11[%c0_82, %c0_83] : memref<128x28xf32, #tpu.memory_space<vmem>>, vector<128x28xf32>
    tpu.vector_store %arg11[%c0_82, %c0_83], %121 {strides = array<i32>} : memref<128x28xf32, #tpu.memory_space<vmem>>, vector<128x28xf32>,
    %c1_84 = arith.constant 1 : index
    %c0_85 = arith.constant 0 : index
    %123 = tpu.strided_load %arg10[%c1_84, %c0_85] {strides = array<i32: 2, 1>} : memref<264x28xf32, #tpu.memory_space<vmem>>, vector<128x28xf32>
    %c0_86 = arith.constant 0 : index
    %c0_87 = arith.constant 0 : index
    %124 = vector.load %arg12[%c0_86, %c0_87] : memref<128x28xf32, #tpu.memory_space<vmem>>, vector<128x28xf32>
    tpu.vector_store %arg12[%c0_86, %c0_87], %123 {strides = array<i32>} : memref<128x28xf32, #tpu.memory_space<vmem>>, vector<128x28xf32>,
    %c2_88 = arith.constant 2 : index
    %c0_89 = arith.constant 0 : index
    %125 = tpu.strided_load %arg10[%c2_88, %c0_89] {strides = array<i32: 2, 1>} : memref<264x28xf32, #tpu.memory_space<vmem>>, vector<128x28xf32>
    %c0_90 = arith.constant 0 : index
    %c0_91 = arith.constant 0 : index
    %126 = vector.load %arg13[%c0_90, %c0_91] : memref<128x28xf32, #tpu.memory_space<vmem>>, vector<128x28xf32>
    tpu.vector_store %arg13[%c0_90, %c0_91], %125 {strides = array<i32>} : memref<128x28xf32, #tpu.memory_space<vmem>>, vector<128x28xf32>,
    %c0_92 = arith.constant 0 : index
    %c0_93 = arith.constant 0 : index
    %c0_94 = arith.constant 0 : index
    %c0_95 = arith.constant 0 : index
    %127 = vector.load %arg6[%c0_92, %c0_93, %c0_94, %c0_95] : memref<3x3x28x32xbf16, #tpu.memory_space<vmem>>, vector<1x1x28x32xbf16>
    %128 = vector.shape_cast %127 : vector<1x1x28x32xbf16> to vector<28x32xbf16>
    %c0_96 = arith.constant 0 : index
    %c1_97 = arith.constant 1 : index
    %c0_98 = arith.constant 0 : index
    %c0_99 = arith.constant 0 : index
    %129 = vector.load %arg6[%c0_96, %c1_97, %c0_98, %c0_99] : memref<3x3x28x32xbf16, #tpu.memory_space<vmem>>, vector<1x1x28x32xbf16>
    %130 = vector.shape_cast %129 : vector<1x1x28x32xbf16> to vector<28x32xbf16>
    %c0_100 = arith.constant 0 : index
    %c2_101 = arith.constant 2 : index
    %c0_102 = arith.constant 0 : index
    %c0_103 = arith.constant 0 : index
    %131 = vector.load %arg6[%c0_100, %c2_101, %c0_102, %c0_103] : memref<3x3x28x32xbf16, #tpu.memory_space<vmem>>, vector<1x1x28x32xbf16>
    %132 = vector.shape_cast %131 : vector<1x1x28x32xbf16> to vector<28x32xbf16>
    %c1_104 = arith.constant 1 : index
    %c0_105 = arith.constant 0 : index
    %c0_106 = arith.constant 0 : index
    %c0_107 = arith.constant 0 : index
    %133 = vector.load %arg6[%c1_104, %c0_105, %c0_106, %c0_107] : memref<3x3x28x32xbf16, #tpu.memory_space<vmem>>, vector<1x1x28x32xbf16>
    %134 = vector.shape_cast %133 : vector<1x1x28x32xbf16> to vector<28x32xbf16>
    %c1_108 = arith.constant 1 : index
    %c1_109 = arith.constant 1 : index
    %c0_110 = arith.constant 0 : index
    %c0_111 = arith.constant 0 : index
    %135 = vector.load %arg6[%c1_108, %c1_109, %c0_110, %c0_111] : memref<3x3x28x32xbf16, #tpu.memory_space<vmem>>, vector<1x1x28x32xbf16>
    %136 = vector.shape_cast %135 : vector<1x1x28x32xbf16> to vector<28x32xbf16>
    %c1_112 = arith.constant 1 : index
    %c2_113 = arith.constant 2 : index
    %c0_114 = arith.constant 0 : index
    %c0_115 = arith.constant 0 : index
    %137 = vector.load %arg6[%c1_112, %c2_113, %c0_114, %c0_115] : memref<3x3x28x32xbf16, #tpu.memory_space<vmem>>, vector<1x1x28x32xbf16>
    %138 = vector.shape_cast %137 : vector<1x1x28x32xbf16> to vector<28x32xbf16>
    %c2_116 = arith.constant 2 : index
    %c0_117 = arith.constant 0 : index
    %c0_118 = arith.constant 0 : index
    %c0_119 = arith.constant 0 : index
    %139 = vector.load %arg6[%c2_116, %c0_117, %c0_118, %c0_119] : memref<3x3x28x32xbf16, #tpu.memory_space<vmem>>, vector<1x1x28x32xbf16>
    %140 = vector.shape_cast %139 : vector<1x1x28x32xbf16> to vector<28x32xbf16>
    %c2_120 = arith.constant 2 : index
    %c1_121 = arith.constant 1 : index
    %c0_122 = arith.constant 0 : index
    %c0_123 = arith.constant 0 : index
    %141 = vector.load %arg6[%c2_120, %c1_121, %c0_122, %c0_123] : memref<3x3x28x32xbf16, #tpu.memory_space<vmem>>, vector<1x1x28x32xbf16>
    %142 = vector.shape_cast %141 : vector<1x1x28x32xbf16> to vector<28x32xbf16>
    %c2_124 = arith.constant 2 : index
    %c2_125 = arith.constant 2 : index
    %c0_126 = arith.constant 0 : index
    %c0_127 = arith.constant 0 : index
    %143 = vector.load %arg6[%c2_124, %c2_125, %c0_126, %c0_127] : memref<3x3x28x32xbf16, #tpu.memory_space<vmem>>, vector<1x1x28x32xbf16>
    %144 = vector.shape_cast %143 : vector<1x1x28x32xbf16> to vector<28x32xbf16>
    %c0_128 = arith.constant 0 : index
    %c0_129 = arith.constant 0 : index
    %145 = vector.load %arg7[%c0_128, %c0_129] : memref<1x32xf32, #tpu.memory_space<vmem>>, vector<1x32xf32>
    %cst_130 = arith.constant 0.000000e+00 : f32
    %146 = vector.broadcast %cst_130 : f32 to vector<7x32xf32>
    %c0_131 = arith.constant 0 : index
    %c0_132 = arith.constant 0 : index
    %147 = vector.load %arg11[%c0_131, %c0_132] : memref<128x28xf32, #tpu.memory_space<vmem>>, vector<7x28xf32>
    %148 = arith.truncf %147 : vector<7x28xf32> to vector<7x28xbf16>
    %cst_133 = arith.constant dense<0.000000e+00> : vector<7x32xf32>
    %149 = tpu.matmul %148, %128, %cst_133 {dimension_numbers = #tpu.dot_dimension_numbers<[1], [0], [0], [1], [0, 0, 1, 1], [], []>} : vector<7x28xbf16>, vector<28x32xbf16>, vector<7x32xf32> -> vector<7x32xf32>
    %150 = arith.addf %146, %149 : vector<7x32xf32>
    %151 = vector.extract_strided_slice %147 {offsets = [0, 8], sizes = [7, 4], strides = [1, 1]} : vector<7x28xf32> to vector<7x4xf32>
    %c0_134 = arith.constant 0 : index
    %c0_135 = arith.constant 0 : index
    %152 = vector.load %arg12[%c0_134, %c0_135] : memref<128x28xf32, #tpu.memory_space<vmem>>, vector<7x28xf32>
    %153 = arith.truncf %152 : vector<7x28xf32> to vector<7x28xbf16>
    %cst_136 = arith.constant dense<0.000000e+00> : vector<7x32xf32>
    %154 = tpu.matmul %153, %130, %cst_136 {dimension_numbers = #tpu.dot_dimension_numbers<[1], [0], [0], [1], [0, 0, 1, 1], [], []>} : vector<7x28xbf16>, vector<28x32xbf16>, vector<7x32xf32> -> vector<7x32xf32>
    %155 = arith.addf %150, %154 : vector<7x32xf32>
    %156 = vector.extract_strided_slice %152 {offsets = [0, 8], sizes = [7, 4], strides = [1, 1]} : vector<7x28xf32> to vector<7x4xf32>
    %157 = arith.maximumf %151, %156 : vector<7x4xf32>
    %c0_137 = arith.constant 0 : index
    %c0_138 = arith.constant 0 : index
    %158 = vector.load %arg13[%c0_137, %c0_138] : memref<128x28xf32, #tpu.memory_space<vmem>>, vector<7x28xf32>
    %159 = arith.truncf %158 : vector<7x28xf32> to vector<7x28xbf16>
    %cst_139 = arith.constant dense<0.000000e+00> : vector<7x32xf32>
    %160 = tpu.matmul %159, %132, %cst_139 {dimension_numbers = #tpu.dot_dimension_numbers<[1], [0], [0], [1], [0, 0, 1, 1], [], []>} : vector<7x28xbf16>, vector<28x32xbf16>, vector<7x32xf32> -> vector<7x32xf32>
    %161 = arith.addf %155, %160 : vector<7x32xf32>
    %162 = vector.extract_strided_slice %158 {offsets = [0, 8], sizes = [7, 4], strides = [1, 1]} : vector<7x28xf32> to vector<7x4xf32>
    %163 = arith.maximumf %157, %162 : vector<7x4xf32>
    %c8_140 = arith.constant 8 : index
    %c0_141 = arith.constant 0 : index
    %164 = vector.load %arg11[%c8_140, %c0_141] : memref<128x28xf32, #tpu.memory_space<vmem>>, vector<7x28xf32>
    %165 = arith.truncf %164 : vector<7x28xf32> to vector<7x28xbf16>
    %cst_142 = arith.constant dense<0.000000e+00> : vector<7x32xf32>
    %166 = tpu.matmul %165, %134, %cst_142 {dimension_numbers = #tpu.dot_dimension_numbers<[1], [0], [0], [1], [0, 0, 1, 1], [], []>} : vector<7x28xbf16>, vector<28x32xbf16>, vector<7x32xf32> -> vector<7x32xf32>
    %167 = arith.addf %161, %166 : vector<7x32xf32>
    %168 = vector.extract_strided_slice %164 {offsets = [0, 8], sizes = [7, 4], strides = [1, 1]} : vector<7x28xf32> to vector<7x4xf32>
    %169 = arith.maximumf %163, %168 : vector<7x4xf32>
    %c8_143 = arith.constant 8 : index
    %c0_144 = arith.constant 0 : index
    %170 = vector.load %arg12[%c8_143, %c0_144] : memref<128x28xf32, #tpu.memory_space<vmem>>, vector<7x28xf32>
    %171 = arith.truncf %170 : vector<7x28xf32> to vector<7x28xbf16>
    %cst_145 = arith.constant dense<0.000000e+00> : vector<7x32xf32>
    %172 = tpu.matmul %171, %136, %cst_145 {dimension_numbers = #tpu.dot_dimension_numbers<[1], [0], [0], [1], [0, 0, 1, 1], [], []>} : vector<7x28xbf16>, vector<28x32xbf16>, vector<7x32xf32> -> vector<7x32xf32>
    %173 = arith.addf %167, %172 : vector<7x32xf32>
    %174 = vector.extract_strided_slice %170 {offsets = [0, 8], sizes = [7, 4], strides = [1, 1]} : vector<7x28xf32> to vector<7x4xf32>
    %175 = arith.maximumf %169, %174 : vector<7x4xf32>
    %c8_146 = arith.constant 8 : index
    %c0_147 = arith.constant 0 : index
    %176 = vector.load %arg13[%c8_146, %c0_147] : memref<128x28xf32, #tpu.memory_space<vmem>>, vector<7x28xf32>
    %177 = arith.truncf %176 : vector<7x28xf32> to vector<7x28xbf16>
    %cst_148 = arith.constant dense<0.000000e+00> : vector<7x32xf32>
    %178 = tpu.matmul %177, %138, %cst_148 {dimension_numbers = #tpu.dot_dimension_numbers<[1], [0], [0], [1], [0, 0, 1, 1], [], []>} : vector<7x28xbf16>, vector<28x32xbf16>, vector<7x32xf32> -> vector<7x32xf32>
    %179 = arith.addf %173, %178 : vector<7x32xf32>
    %180 = vector.extract_strided_slice %176 {offsets = [0, 8], sizes = [7, 4], strides = [1, 1]} : vector<7x28xf32> to vector<7x4xf32>
    %181 = arith.maximumf %175, %180 : vector<7x4xf32>
    %c16 = arith.constant 16 : index
    %c0_149 = arith.constant 0 : index
    %182 = vector.load %arg11[%c16, %c0_149] : memref<128x28xf32, #tpu.memory_space<vmem>>, vector<7x28xf32>
    %183 = arith.truncf %182 : vector<7x28xf32> to vector<7x28xbf16>
    %cst_150 = arith.constant dense<0.000000e+00> : vector<7x32xf32>
    %184 = tpu.matmul %183, %140, %cst_150 {dimension_numbers = #tpu.dot_dimension_numbers<[1], [0], [0], [1], [0, 0, 1, 1], [], []>} : vector<7x28xbf16>, vector<28x32xbf16>, vector<7x32xf32> -> vector<7x32xf32>
    %185 = arith.addf %179, %184 : vector<7x32xf32>
    %186 = vector.extract_strided_slice %182 {offsets = [0, 8], sizes = [7, 4], strides = [1, 1]} : vector<7x28xf32> to vector<7x4xf32>
    %187 = arith.maximumf %181, %186 : vector<7x4xf32>
    %c16_151 = arith.constant 16 : index
    %c0_152 = arith.constant 0 : index
    %188 = vector.load %arg12[%c16_151, %c0_152] : memref<128x28xf32, #tpu.memory_space<vmem>>, vector<7x28xf32>
    %189 = arith.truncf %188 : vector<7x28xf32> to vector<7x28xbf16>
    %cst_153 = arith.constant dense<0.000000e+00> : vector<7x32xf32>
    %190 = tpu.matmul %189, %142, %cst_153 {dimension_numbers = #tpu.dot_dimension_numbers<[1], [0], [0], [1], [0, 0, 1, 1], [], []>} : vector<7x28xbf16>, vector<28x32xbf16>, vector<7x32xf32> -> vector<7x32xf32>
    %191 = arith.addf %185, %190 : vector<7x32xf32>
    %192 = vector.extract_strided_slice %188 {offsets = [0, 8], sizes = [7, 4], strides = [1, 1]} : vector<7x28xf32> to vector<7x4xf32>
    %193 = arith.maximumf %187, %192 : vector<7x4xf32>
    %c16_154 = arith.constant 16 : index
    %c0_155 = arith.constant 0 : index
    %194 = vector.load %arg13[%c16_154, %c0_155] : memref<128x28xf32, #tpu.memory_space<vmem>>, vector<7x28xf32>
    %195 = arith.truncf %194 : vector<7x28xf32> to vector<7x28xbf16>
    %cst_156 = arith.constant dense<0.000000e+00> : vector<7x32xf32>
    %196 = tpu.matmul %195, %144, %cst_156 {dimension_numbers = #tpu.dot_dimension_numbers<[1], [0], [0], [1], [0, 0, 1, 1], [], []>} : vector<7x28xbf16>, vector<28x32xbf16>, vector<7x32xf32> -> vector<7x32xf32>
    %197 = arith.addf %191, %196 : vector<7x32xf32>
    %198 = vector.extract_strided_slice %194 {offsets = [0, 8], sizes = [7, 4], strides = [1, 1]} : vector<7x28xf32> to vector<7x4xf32>
    %199 = arith.maximumf %193, %198 : vector<7x4xf32>
    %200 = vector.broadcast %145 : vector<1x32xf32> to vector<7x32xf32>
    %201 = arith.addf %197, %200 : vector<7x32xf32>
    %cst_157 = arith.constant 0.000000e+00 : f32
    %202 = vector.broadcast %cst_157 : f32 to vector<7x32xf32>
    %203 = arith.maximumf %201, %202 : vector<7x32xf32>
    %c0_158 = arith.constant 0 : index
    %c0_159 = arith.constant 0 : index
    %c0_160 = arith.constant 0 : index
    %c0_161 = arith.constant 0 : index
    %204 = vector.load %arg8[%c0_158, %c0_159, %c0_160, %c0_161] : memref<1x7x7x36xf32, #tpu.memory_space<vmem>>, vector<1x1x7x32xf32>
    %205 = vector.shape_cast %204 : vector<1x1x7x32xf32> to vector<7x32xf32>
    %206 = vector.shape_cast %203 : vector<7x32xf32> to vector<1x1x7x32xf32>
    tpu.vector_store %arg8[%c0_158, %c0_159, %c0_160, %c0_161], %206 {strides = array<i32>} : memref<1x7x7x36xf32, #tpu.memory_space<vmem>>, vector<1x1x7x32xf32>,
    %c0_162 = arith.constant 0 : index
    %c0_163 = arith.constant 0 : index
    %c0_164 = arith.constant 0 : index
    %c32 = arith.constant 32 : index
    %207 = vector.load %arg8[%c0_162, %c0_163, %c0_164, %c32] : memref<1x7x7x36xf32, #tpu.memory_space<vmem>>, vector<1x1x7x4xf32>
    %208 = vector.shape_cast %207 : vector<1x1x7x4xf32> to vector<7x4xf32>
    %209 = vector.shape_cast %199 : vector<7x4xf32> to vector<1x1x7x4xf32>
    tpu.vector_store %arg8[%c0_162, %c0_163, %c0_164, %c32], %209 {strides = array<i32>} : memref<1x7x7x36xf32, #tpu.memory_space<vmem>>, vector<1x1x7x4xf32>,
    %cst_165 = arith.constant 0.000000e+00 : f32
    %210 = vector.broadcast %cst_165 : f32 to vector<7x32xf32>
    %c16_166 = arith.constant 16 : index
    %c0_167 = arith.constant 0 : index
    %211 = vector.load %arg11[%c16_166, %c0_167] : memref<128x28xf32, #tpu.memory_space<vmem>>, vector<7x28xf32>
    %212 = arith.truncf %211 : vector<7x28xf32> to vector<7x28xbf16>
    %cst_168 = arith.constant dense<0.000000e+00> : vector<7x32xf32>
    %213 = tpu.matmul %212, %128, %cst_168 {dimension_numbers = #tpu.dot_dimension_numbers<[1], [0], [0], [1], [0, 0, 1, 1], [], []>} : vector<7x28xbf16>, vector<28x32xbf16>, vector<7x32xf32> -> vector<7x32xf32>
    %214 = arith.addf %210, %213 : vector<7x32xf32>
    %215 = vector.extract_strided_slice %211 {offsets = [0, 8], sizes = [7, 4], strides = [1, 1]} : vector<7x28xf32> to vector<7x4xf32>
    %c16_169 = arith.constant 16 : index
    %c0_170 = arith.constant 0 : index
    %216 = vector.load %arg12[%c16_169, %c0_170] : memref<128x28xf32, #tpu.memory_space<vmem>>, vector<7x28xf32>
    %217 = arith.truncf %216 : vector<7x28xf32> to vector<7x28xbf16>
    %cst_171 = arith.constant dense<0.000000e+00> : vector<7x32xf32>
    %218 = tpu.matmul %217, %130, %cst_171 {dimension_numbers = #tpu.dot_dimension_numbers<[1], [0], [0], [1], [0, 0, 1, 1], [], []>} : vector<7x28xbf16>, vector<28x32xbf16>, vector<7x32xf32> -> vector<7x32xf32>
    %219 = arith.addf %214, %218 : vector<7x32xf32>
    %220 = vector.extract_strided_slice %216 {offsets = [0, 8], sizes = [7, 4], strides = [1, 1]} : vector<7x28xf32> to vector<7x4xf32>
    %221 = arith.maximumf %215, %220 : vector<7x4xf32>
    %c16_172 = arith.constant 16 : index
    %c0_173 = arith.constant 0 : index
    %222 = vector.load %arg13[%c16_172, %c0_173] : memref<128x28xf32, #tpu.memory_space<vmem>>, vector<7x28xf32>
    %223 = arith.truncf %222 : vector<7x28xf32> to vector<7x28xbf16>
    %cst_174 = arith.constant dense<0.000000e+00> : vector<7x32xf32>
    %224 = tpu.matmul %223, %132, %cst_174 {dimension_numbers = #tpu.dot_dimension_numbers<[1], [0], [0], [1], [0, 0, 1, 1], [], []>} : vector<7x28xbf16>, vector<28x32xbf16>, vector<7x32xf32> -> vector<7x32xf32>
    %225 = arith.addf %219, %224 : vector<7x32xf32>
    %226 = vector.extract_strided_slice %222 {offsets = [0, 8], sizes = [7, 4], strides = [1, 1]} : vector<7x28xf32> to vector<7x4xf32>
    %227 = arith.maximumf %221, %226 : vector<7x4xf32>
    %c24_175 = arith.constant 24 : index
    %c0_176 = arith.constant 0 : index
    %228 = vector.load %arg11[%c24_175, %c0_176] : memref<128x28xf32, #tpu.memory_space<vmem>>, vector<7x28xf32>
    %229 = arith.truncf %228 : vector<7x28xf32> to vector<7x28xbf16>
    %cst_177 = arith.constant dense<0.000000e+00> : vector<7x32xf32>
    %230 = tpu.matmul %229, %134, %cst_177 {dimension_numbers = #tpu.dot_dimension_numbers<[1], [0], [0], [1], [0, 0, 1, 1], [], []>} : vector<7x28xbf16>, vector<28x32xbf16>, vector<7x32xf32> -> vector<7x32xf32>
    %231 = arith.addf %225, %230 : vector<7x32xf32>
    %232 = vector.extract_strided_slice %228 {offsets = [0, 8], sizes = [7, 4], strides = [1, 1]} : vector<7x28xf32> to vector<7x4xf32>
    %233 = arith.maximumf %227, %232 : vector<7x4xf32>
    %c24_178 = arith.constant 24 : index
    %c0_179 = arith.constant 0 : index
    %234 = vector.load %arg12[%c24_178, %c0_179] : memref<128x28xf32, #tpu.memory_space<vmem>>, vector<7x28xf32>
    %235 = arith.truncf %234 : vector<7x28xf32> to vector<7x28xbf16>
    %cst_180 = arith.constant dense<0.000000e+00> : vector<7x32xf32>
    %236 = tpu.matmul %235, %136, %cst_180 {dimension_numbers = #tpu.dot_dimension_numbers<[1], [0], [0], [1], [0, 0, 1, 1], [], []>} : vector<7x28xbf16>, vector<28x32xbf16>, vector<7x32xf32> -> vector<7x32xf32>
    %237 = arith.addf %231, %236 : vector<7x32xf32>
    %238 = vector.extract_strided_slice %234 {offsets = [0, 8], sizes = [7, 4], strides = [1, 1]} : vector<7x28xf32> to vector<7x4xf32>
    %239 = arith.maximumf %233, %238 : vector<7x4xf32>
    %c24_181 = arith.constant 24 : index
    %c0_182 = arith.constant 0 : index
    %240 = vector.load %arg13[%c24_181, %c0_182] : memref<128x28xf32, #tpu.memory_space<vmem>>, vector<7x28xf32>
    %241 = arith.truncf %240 : vector<7x28xf32> to vector<7x28xbf16>
    %cst_183 = arith.constant dense<0.000000e+00> : vector<7x32xf32>
    %242 = tpu.matmul %241, %138, %cst_183 {dimension_numbers = #tpu.dot_dimension_numbers<[1], [0], [0], [1], [0, 0, 1, 1], [], []>} : vector<7x28xbf16>, vector<28x32xbf16>, vector<7x32xf32> -> vector<7x32xf32>
    %243 = arith.addf %237, %242 : vector<7x32xf32>
    %244 = vector.extract_strided_slice %240 {offsets = [0, 8], sizes = [7, 4], strides = [1, 1]} : vector<7x28xf32> to vector<7x4xf32>
    %245 = arith.maximumf %239, %244 : vector<7x4xf32>
    %c32_184 = arith.constant 32 : index
    %c0_185 = arith.constant 0 : index
    %246 = vector.load %arg11[%c32_184, %c0_185] : memref<128x28xf32, #tpu.memory_space<vmem>>, vector<7x28xf32>
    %247 = arith.truncf %246 : vector<7x28xf32> to vector<7x28xbf16>
    %cst_186 = arith.constant dense<0.000000e+00> : vector<7x32xf32>
    %248 = tpu.matmul %247, %140, %cst_186 {dimension_numbers = #tpu.dot_dimension_numbers<[1], [0], [0], [1], [0, 0, 1, 1], [], []>} : vector<7x28xbf16>, vector<28x32xbf16>, vector<7x32xf32> -> vector<7x32xf32>
    %249 = arith.addf %243, %248 : vector<7x32xf32>
    %250 = vector.extract_strided_slice %246 {offsets = [0, 8], sizes = [7, 4], strides = [1, 1]} : vector<7x28xf32> to vector<7x4xf32>
    %251 = arith.maximumf %245, %250 : vector<7x4xf32>
    %c32_187 = arith.constant 32 : index
    %c0_188 = arith.constant 0 : index
    %252 = vector.load %arg12[%c32_187, %c0_188] : memref<128x28xf32, #tpu.memory_space<vmem>>, vector<7x28xf32>
    %253 = arith.truncf %252 : vector<7x28xf32> to vector<7x28xbf16>
    %cst_189 = arith.constant dense<0.000000e+00> : vector<7x32xf32>
    %254 = tpu.matmul %253, %142, %cst_189 {dimension_numbers = #tpu.dot_dimension_numbers<[1], [0], [0], [1], [0, 0, 1, 1], [], []>} : vector<7x28xbf16>, vector<28x32xbf16>, vector<7x32xf32> -> vector<7x32xf32>
    %255 = arith.addf %249, %254 : vector<7x32xf32>
    %256 = vector.extract_strided_slice %252 {offsets = [0, 8], sizes = [7, 4], strides = [1, 1]} : vector<7x28xf32> to vector<7x4xf32>
    %257 = arith.maximumf %251, %256 : vector<7x4xf32>
    %c32_190 = arith.constant 32 : index
    %c0_191 = arith.constant 0 : index
    %258 = vector.load %arg13[%c32_190, %c0_191] : memref<128x28xf32, #tpu.memory_space<vmem>>, vector<7x28xf32>
    %259 = arith.truncf %258 : vector<7x28xf32> to vector<7x28xbf16>
    %cst_192 = arith.constant dense<0.000000e+00> : vector<7x32xf32>
    %260 = tpu.matmul %259, %144, %cst_192 {dimension_numbers = #tpu.dot_dimension_numbers<[1], [0], [0], [1], [0, 0, 1, 1], [], []>} : vector<7x28xbf16>, vector<28x32xbf16>, vector<7x32xf32> -> vector<7x32xf32>
    %261 = arith.addf %255, %260 : vector<7x32xf32>
    %262 = vector.extract_strided_slice %258 {offsets = [0, 8], sizes = [7, 4], strides = [1, 1]} : vector<7x28xf32> to vector<7x4xf32>
    %263 = arith.maximumf %257, %262 : vector<7x4xf32>
    %264 = vector.broadcast %145 : vector<1x32xf32> to vector<7x32xf32>
    %265 = arith.addf %261, %264 : vector<7x32xf32>
    %cst_193 = arith.constant 0.000000e+00 : f32
    %266 = vector.broadcast %cst_193 : f32 to vector<7x32xf32>
    %267 = arith.maximumf %265, %266 : vector<7x32xf32>
    %c0_194 = arith.constant 0 : index
    %c1_195 = arith.constant 1 : index
    %c0_196 = arith.constant 0 : index
    %c0_197 = arith.constant 0 : index
    %268 = vector.load %arg8[%c0_194, %c1_195, %c0_196, %c0_197] : memref<1x7x7x36xf32, #tpu.memory_space<vmem>>, vector<1x1x7x32xf32>
    %269 = vector.shape_cast %268 : vector<1x1x7x32xf32> to vector<7x32xf32>
    %270 = vector.shape_cast %267 : vector<7x32xf32> to vector<1x1x7x32xf32>
    tpu.vector_store %arg8[%c0_194, %c1_195, %c0_196, %c0_197], %270 {strides = array<i32>} : memref<1x7x7x36xf32, #tpu.memory_space<vmem>>, vector<1x1x7x32xf32>,
    %c0_198 = arith.constant 0 : index
    %c1_199 = arith.constant 1 : index
    %c0_200 = arith.constant 0 : index
    %c32_201 = arith.constant 32 : index
    %271 = vector.load %arg8[%c0_198, %c1_199, %c0_200, %c32_201] : memref<1x7x7x36xf32, #tpu.memory_space<vmem>>, vector<1x1x7x4xf32>
    %272 = vector.shape_cast %271 : vector<1x1x7x4xf32> to vector<7x4xf32>
    %273 = vector.shape_cast %263 : vector<7x4xf32> to vector<1x1x7x4xf32>
    tpu.vector_store %arg8[%c0_198, %c1_199, %c0_200, %c32_201], %273 {strides = array<i32>} : memref<1x7x7x36xf32, #tpu.memory_space<vmem>>, vector<1x1x7x4xf32>,
    %cst_202 = arith.constant 0.000000e+00 : f32
    %274 = vector.broadcast %cst_202 : f32 to vector<7x32xf32>
    %c32_203 = arith.constant 32 : index
    %c0_204 = arith.constant 0 : index
    %275 = vector.load %arg11[%c32_203, %c0_204] : memref<128x28xf32, #tpu.memory_space<vmem>>, vector<7x28xf32>
    %276 = arith.truncf %275 : vector<7x28xf32> to vector<7x28xbf16>
    %cst_205 = arith.constant dense<0.000000e+00> : vector<7x32xf32>
    %277 = tpu.matmul %276, %128, %cst_205 {dimension_numbers = #tpu.dot_dimension_numbers<[1], [0], [0], [1], [0, 0, 1, 1], [], []>} : vector<7x28xbf16>, vector<28x32xbf16>, vector<7x32xf32> -> vector<7x32xf32>
    %278 = arith.addf %274, %277 : vector<7x32xf32>
    %279 = vector.extract_strided_slice %275 {offsets = [0, 8], sizes = [7, 4], strides = [1, 1]} : vector<7x28xf32> to vector<7x4xf32>
    %c32_206 = arith.constant 32 : index
    %c0_207 = arith.constant 0 : index
    %280 = vector.load %arg12[%c32_206, %c0_207] : memref<128x28xf32, #tpu.memory_space<vmem>>, vector<7x28xf32>
    %281 = arith.truncf %280 : vector<7x28xf32> to vector<7x28xbf16>
    %cst_208 = arith.constant dense<0.000000e+00> : vector<7x32xf32>
    %282 = tpu.matmul %281, %130, %cst_208 {dimension_numbers = #tpu.dot_dimension_numbers<[1], [0], [0], [1], [0, 0, 1, 1], [], []>} : vector<7x28xbf16>, vector<28x32xbf16>, vector<7x32xf32> -> vector<7x32xf32>
    %283 = arith.addf %278, %282 : vector<7x32xf32>
    %284 = vector.extract_strided_slice %280 {offsets = [0, 8], sizes = [7, 4], strides = [1, 1]} : vector<7x28xf32> to vector<7x4xf32>
    %285 = arith.maximumf %279, %284 : vector<7x4xf32>
    %c32_209 = arith.constant 32 : index
    %c0_210 = arith.constant 0 : index
    %286 = vector.load %arg13[%c32_209, %c0_210] : memref<128x28xf32, #tpu.memory_space<vmem>>, vector<7x28xf32>
    %287 = arith.truncf %286 : vector<7x28xf32> to vector<7x28xbf16>
    %cst_211 = arith.constant dense<0.000000e+00> : vector<7x32xf32>
    %288 = tpu.matmul %287, %132, %cst_211 {dimension_numbers = #tpu.dot_dimension_numbers<[1], [0], [0], [1], [0, 0, 1, 1], [], []>} : vector<7x28xbf16>, vector<28x32xbf16>, vector<7x32xf32> -> vector<7x32xf32>
    %289 = arith.addf %283, %288 : vector<7x32xf32>
    %290 = vector.extract_strided_slice %286 {offsets = [0, 8], sizes = [7, 4], strides = [1, 1]} : vector<7x28xf32> to vector<7x4xf32>
    %291 = arith.maximumf %285, %290 : vector<7x4xf32>
    %c40_212 = arith.constant 40 : index
    %c0_213 = arith.constant 0 : index
    %292 = vector.load %arg11[%c40_212, %c0_213] : memref<128x28xf32, #tpu.memory_space<vmem>>, vector<7x28xf32>
    %293 = arith.truncf %292 : vector<7x28xf32> to vector<7x28xbf16>
    %cst_214 = arith.constant dense<0.000000e+00> : vector<7x32xf32>
    %294 = tpu.matmul %293, %134, %cst_214 {dimension_numbers = #tpu.dot_dimension_numbers<[1], [0], [0], [1], [0, 0, 1, 1], [], []>} : vector<7x28xbf16>, vector<28x32xbf16>, vector<7x32xf32> -> vector<7x32xf32>
    %295 = arith.addf %289, %294 : vector<7x32xf32>
    %296 = vector.extract_strided_slice %292 {offsets = [0, 8], sizes = [7, 4], strides = [1, 1]} : vector<7x28xf32> to vector<7x4xf32>
    %297 = arith.maximumf %291, %296 : vector<7x4xf32>
    %c40_215 = arith.constant 40 : index
    %c0_216 = arith.constant 0 : index
    %298 = vector.load %arg12[%c40_215, %c0_216] : memref<128x28xf32, #tpu.memory_space<vmem>>, vector<7x28xf32>
    %299 = arith.truncf %298 : vector<7x28xf32> to vector<7x28xbf16>
    %cst_217 = arith.constant dense<0.000000e+00> : vector<7x32xf32>
    %300 = tpu.matmul %299, %136, %cst_217 {dimension_numbers = #tpu.dot_dimension_numbers<[1], [0], [0], [1], [0, 0, 1, 1], [], []>} : vector<7x28xbf16>, vector<28x32xbf16>, vector<7x32xf32> -> vector<7x32xf32>
    %301 = arith.addf %295, %300 : vector<7x32xf32>
    %302 = vector.extract_strided_slice %298 {offsets = [0, 8], sizes = [7, 4], strides = [1, 1]} : vector<7x28xf32> to vector<7x4xf32>
    %303 = arith.maximumf %297, %302 : vector<7x4xf32>
    %c40_218 = arith.constant 40 : index
    %c0_219 = arith.constant 0 : index
    %304 = vector.load %arg13[%c40_218, %c0_219] : memref<128x28xf32, #tpu.memory_space<vmem>>, vector<7x28xf32>
    %305 = arith.truncf %304 : vector<7x28xf32> to vector<7x28xbf16>
    %cst_220 = arith.constant dense<0.000000e+00> : vector<7x32xf32>
    %306 = tpu.matmul %305, %138, %cst_220 {dimension_numbers = #tpu.dot_dimension_numbers<[1], [0], [0], [1], [0, 0, 1, 1], [], []>} : vector<7x28xbf16>, vector<28x32xbf16>, vector<7x32xf32> -> vector<7x32xf32>
    %307 = arith.addf %301, %306 : vector<7x32xf32>
    %308 = vector.extract_strided_slice %304 {offsets = [0, 8], sizes = [7, 4], strides = [1, 1]} : vector<7x28xf32> to vector<7x4xf32>
    %309 = arith.maximumf %303, %308 : vector<7x4xf32>
    %c48 = arith.constant 48 : index
    %c0_221 = arith.constant 0 : index
    %310 = vector.load %arg11[%c48, %c0_221] : memref<128x28xf32, #tpu.memory_space<vmem>>, vector<7x28xf32>
    %311 = arith.truncf %310 : vector<7x28xf32> to vector<7x28xbf16>
    %cst_222 = arith.constant dense<0.000000e+00> : vector<7x32xf32>
    %312 = tpu.matmul %311, %140, %cst_222 {dimension_numbers = #tpu.dot_dimension_numbers<[1], [0], [0], [1], [0, 0, 1, 1], [], []>} : vector<7x28xbf16>, vector<28x32xbf16>, vector<7x32xf32> -> vector<7x32xf32>
    %313 = arith.addf %307, %312 : vector<7x32xf32>
    %314 = vector.extract_strided_slice %310 {offsets = [0, 8], sizes = [7, 4], strides = [1, 1]} : vector<7x28xf32> to vector<7x4xf32>
    %315 = arith.maximumf %309, %314 : vector<7x4xf32>
    %c48_223 = arith.constant 48 : index
    %c0_224 = arith.constant 0 : index
    %316 = vector.load %arg12[%c48_223, %c0_224] : memref<128x28xf32, #tpu.memory_space<vmem>>, vector<7x28xf32>
    %317 = arith.truncf %316 : vector<7x28xf32> to vector<7x28xbf16>
    %cst_225 = arith.constant dense<0.000000e+00> : vector<7x32xf32>
    %318 = tpu.matmul %317, %142, %cst_225 {dimension_numbers = #tpu.dot_dimension_numbers<[1], [0], [0], [1], [0, 0, 1, 1], [], []>} : vector<7x28xbf16>, vector<28x32xbf16>, vector<7x32xf32> -> vector<7x32xf32>
    %319 = arith.addf %313, %318 : vector<7x32xf32>
    %320 = vector.extract_strided_slice %316 {offsets = [0, 8], sizes = [7, 4], strides = [1, 1]} : vector<7x28xf32> to vector<7x4xf32>
    %321 = arith.maximumf %315, %320 : vector<7x4xf32>
    %c48_226 = arith.constant 48 : index
    %c0_227 = arith.constant 0 : index
    %322 = vector.load %arg13[%c48_226, %c0_227] : memref<128x28xf32, #tpu.memory_space<vmem>>, vector<7x28xf32>
    %323 = arith.truncf %322 : vector<7x28xf32> to vector<7x28xbf16>
    %cst_228 = arith.constant dense<0.000000e+00> : vector<7x32xf32>
    %324 = tpu.matmul %323, %144, %cst_228 {dimension_numbers = #tpu.dot_dimension_numbers<[1], [0], [0], [1], [0, 0, 1, 1], [], []>} : vector<7x28xbf16>, vector<28x32xbf16>, vector<7x32xf32> -> vector<7x32xf32>
    %325 = arith.addf %319, %324 : vector<7x32xf32>
    %326 = vector.extract_strided_slice %322 {offsets = [0, 8], sizes = [7, 4], strides = [1, 1]} : vector<7x28xf32> to vector<7x4xf32>
    %327 = arith.maximumf %321, %326 : vector<7x4xf32>
    %328 = vector.broadcast %145 : vector<1x32xf32> to vector<7x32xf32>
    %329 = arith.addf %325, %328 : vector<7x32xf32>
    %cst_229 = arith.constant 0.000000e+00 : f32
    %330 = vector.broadcast %cst_229 : f32 to vector<7x32xf32>
    %331 = arith.maximumf %329, %330 : vector<7x32xf32>
    %c0_230 = arith.constant 0 : index
    %c2_231 = arith.constant 2 : index
    %c0_232 = arith.constant 0 : index
    %c0_233 = arith.constant 0 : index
    %332 = vector.load %arg8[%c0_230, %c2_231, %c0_232, %c0_233] : memref<1x7x7x36xf32, #tpu.memory_space<vmem>>, vector<1x1x7x32xf32>
    %333 = vector.shape_cast %332 : vector<1x1x7x32xf32> to vector<7x32xf32>
    %334 = vector.shape_cast %331 : vector<7x32xf32> to vector<1x1x7x32xf32>
    tpu.vector_store %arg8[%c0_230, %c2_231, %c0_232, %c0_233], %334 {strides = array<i32>} : memref<1x7x7x36xf32, #tpu.memory_space<vmem>>, vector<1x1x7x32xf32>,
    %c0_234 = arith.constant 0 : index
    %c2_235 = arith.constant 2 : index
    %c0_236 = arith.constant 0 : index
    %c32_237 = arith.constant 32 : index
    %335 = vector.load %arg8[%c0_234, %c2_235, %c0_236, %c32_237] : memref<1x7x7x36xf32, #tpu.memory_space<vmem>>, vector<1x1x7x4xf32>
    %336 = vector.shape_cast %335 : vector<1x1x7x4xf32> to vector<7x4xf32>
    %337 = vector.shape_cast %327 : vector<7x4xf32> to vector<1x1x7x4xf32>
    tpu.vector_store %arg8[%c0_234, %c2_235, %c0_236, %c32_237], %337 {strides = array<i32>} : memref<1x7x7x36xf32, #tpu.memory_space<vmem>>, vector<1x1x7x4xf32>,
    %cst_238 = arith.constant 0.000000e+00 : f32
    %338 = vector.broadcast %cst_238 : f32 to vector<7x32xf32>
    %c48_239 = arith.constant 48 : index
    %c0_240 = arith.constant 0 : index
    %339 = vector.load %arg11[%c48_239, %c0_240] : memref<128x28xf32, #tpu.memory_space<vmem>>, vector<7x28xf32>
    %340 = arith.truncf %339 : vector<7x28xf32> to vector<7x28xbf16>
    %cst_241 = arith.constant dense<0.000000e+00> : vector<7x32xf32>
    %341 = tpu.matmul %340, %128, %cst_241 {dimension_numbers = #tpu.dot_dimension_numbers<[1], [0], [0], [1], [0, 0, 1, 1], [], []>} : vector<7x28xbf16>, vector<28x32xbf16>, vector<7x32xf32> -> vector<7x32xf32>
    %342 = arith.addf %338, %341 : vector<7x32xf32>
    %343 = vector.extract_strided_slice %339 {offsets = [0, 8], sizes = [7, 4], strides = [1, 1]} : vector<7x28xf32> to vector<7x4xf32>
    %c48_242 = arith.constant 48 : index
    %c0_243 = arith.constant 0 : index
    %344 = vector.load %arg12[%c48_242, %c0_243] : memref<128x28xf32, #tpu.memory_space<vmem>>, vector<7x28xf32>
    %345 = arith.truncf %344 : vector<7x28xf32> to vector<7x28xbf16>
    %cst_244 = arith.constant dense<0.000000e+00> : vector<7x32xf32>
    %346 = tpu.matmul %345, %130, %cst_244 {dimension_numbers = #tpu.dot_dimension_numbers<[1], [0], [0], [1], [0, 0, 1, 1], [], []>} : vector<7x28xbf16>, vector<28x32xbf16>, vector<7x32xf32> -> vector<7x32xf32>
    %347 = arith.addf %342, %346 : vector<7x32xf32>
    %348 = vector.extract_strided_slice %344 {offsets = [0, 8], sizes = [7, 4], strides = [1, 1]} : vector<7x28xf32> to vector<7x4xf32>
    %349 = arith.maximumf %343, %348 : vector<7x4xf32>
    %c48_245 = arith.constant 48 : index
    %c0_246 = arith.constant 0 : index
    %350 = vector.load %arg13[%c48_245, %c0_246] : memref<128x28xf32, #tpu.memory_space<vmem>>, vector<7x28xf32>
    %351 = arith.truncf %350 : vector<7x28xf32> to vector<7x28xbf16>
    %cst_247 = arith.constant dense<0.000000e+00> : vector<7x32xf32>
    %352 = tpu.matmul %351, %132, %cst_247 {dimension_numbers = #tpu.dot_dimension_numbers<[1], [0], [0], [1], [0, 0, 1, 1], [], []>} : vector<7x28xbf16>, vector<28x32xbf16>, vector<7x32xf32> -> vector<7x32xf32>
    %353 = arith.addf %347, %352 : vector<7x32xf32>
    %354 = vector.extract_strided_slice %350 {offsets = [0, 8], sizes = [7, 4], strides = [1, 1]} : vector<7x28xf32> to vector<7x4xf32>
    %355 = arith.maximumf %349, %354 : vector<7x4xf32>
    %c56 = arith.constant 56 : index
    %c0_248 = arith.constant 0 : index
    %356 = vector.load %arg11[%c56, %c0_248] : memref<128x28xf32, #tpu.memory_space<vmem>>, vector<7x28xf32>
    %357 = arith.truncf %356 : vector<7x28xf32> to vector<7x28xbf16>
    %cst_249 = arith.constant dense<0.000000e+00> : vector<7x32xf32>
    %358 = tpu.matmul %357, %134, %cst_249 {dimension_numbers = #tpu.dot_dimension_numbers<[1], [0], [0], [1], [0, 0, 1, 1], [], []>} : vector<7x28xbf16>, vector<28x32xbf16>, vector<7x32xf32> -> vector<7x32xf32>
    %359 = arith.addf %353, %358 : vector<7x32xf32>
    %360 = vector.extract_strided_slice %356 {offsets = [0, 8], sizes = [7, 4], strides = [1, 1]} : vector<7x28xf32> to vector<7x4xf32>
    %361 = arith.maximumf %355, %360 : vector<7x4xf32>
    %c56_250 = arith.constant 56 : index
    %c0_251 = arith.constant 0 : index
    %362 = vector.load %arg12[%c56_250, %c0_251] : memref<128x28xf32, #tpu.memory_space<vmem>>, vector<7x28xf32>
    %363 = arith.truncf %362 : vector<7x28xf32> to vector<7x28xbf16>
    %cst_252 = arith.constant dense<0.000000e+00> : vector<7x32xf32>
    %364 = tpu.matmul %363, %136, %cst_252 {dimension_numbers = #tpu.dot_dimension_numbers<[1], [0], [0], [1], [0, 0, 1, 1], [], []>} : vector<7x28xbf16>, vector<28x32xbf16>, vector<7x32xf32> -> vector<7x32xf32>
    %365 = arith.addf %359, %364 : vector<7x32xf32>
    %366 = vector.extract_strided_slice %362 {offsets = [0, 8], sizes = [7, 4], strides = [1, 1]} : vector<7x28xf32> to vector<7x4xf32>
    %367 = arith.maximumf %361, %366 : vector<7x4xf32>
    %c56_253 = arith.constant 56 : index
    %c0_254 = arith.constant 0 : index
    %368 = vector.load %arg13[%c56_253, %c0_254] : memref<128x28xf32, #tpu.memory_space<vmem>>, vector<7x28xf32>
    %369 = arith.truncf %368 : vector<7x28xf32> to vector<7x28xbf16>
    %cst_255 = arith.constant dense<0.000000e+00> : vector<7x32xf32>
    %370 = tpu.matmul %369, %138, %cst_255 {dimension_numbers = #tpu.dot_dimension_numbers<[1], [0], [0], [1], [0, 0, 1, 1], [], []>} : vector<7x28xbf16>, vector<28x32xbf16>, vector<7x32xf32> -> vector<7x32xf32>
    %371 = arith.addf %365, %370 : vector<7x32xf32>
    %372 = vector.extract_strided_slice %368 {offsets = [0, 8], sizes = [7, 4], strides = [1, 1]} : vector<7x28xf32> to vector<7x4xf32>
    %373 = arith.maximumf %367, %372 : vector<7x4xf32>
    %c64 = arith.constant 64 : index
    %c0_256 = arith.constant 0 : index
    %374 = vector.load %arg11[%c64, %c0_256] : memref<128x28xf32, #tpu.memory_space<vmem>>, vector<7x28xf32>
    %375 = arith.truncf %374 : vector<7x28xf32> to vector<7x28xbf16>
    %cst_257 = arith.constant dense<0.000000e+00> : vector<7x32xf32>
    %376 = tpu.matmul %375, %140, %cst_257 {dimension_numbers = #tpu.dot_dimension_numbers<[1], [0], [0], [1], [0, 0, 1, 1], [], []>} : vector<7x28xbf16>, vector<28x32xbf16>, vector<7x32xf32> -> vector<7x32xf32>
    %377 = arith.addf %371, %376 : vector<7x32xf32>
    %378 = vector.extract_strided_slice %374 {offsets = [0, 8], sizes = [7, 4], strides = [1, 1]} : vector<7x28xf32> to vector<7x4xf32>
    %379 = arith.maximumf %373, %378 : vector<7x4xf32>
    %c64_258 = arith.constant 64 : index
    %c0_259 = arith.constant 0 : index
    %380 = vector.load %arg12[%c64_258, %c0_259] : memref<128x28xf32, #tpu.memory_space<vmem>>, vector<7x28xf32>
    %381 = arith.truncf %380 : vector<7x28xf32> to vector<7x28xbf16>
    %cst_260 = arith.constant dense<0.000000e+00> : vector<7x32xf32>
    %382 = tpu.matmul %381, %142, %cst_260 {dimension_numbers = #tpu.dot_dimension_numbers<[1], [0], [0], [1], [0, 0, 1, 1], [], []>} : vector<7x28xbf16>, vector<28x32xbf16>, vector<7x32xf32> -> vector<7x32xf32>
    %383 = arith.addf %377, %382 : vector<7x32xf32>
    %384 = vector.extract_strided_slice %380 {offsets = [0, 8], sizes = [7, 4], strides = [1, 1]} : vector<7x28xf32> to vector<7x4xf32>
    %385 = arith.maximumf %379, %384 : vector<7x4xf32>
    %c64_261 = arith.constant 64 : index
    %c0_262 = arith.constant 0 : index
    %386 = vector.load %arg13[%c64_261, %c0_262] : memref<128x28xf32, #tpu.memory_space<vmem>>, vector<7x28xf32>
    %387 = arith.truncf %386 : vector<7x28xf32> to vector<7x28xbf16>
    %cst_263 = arith.constant dense<0.000000e+00> : vector<7x32xf32>
    %388 = tpu.matmul %387, %144, %cst_263 {dimension_numbers = #tpu.dot_dimension_numbers<[1], [0], [0], [1], [0, 0, 1, 1], [], []>} : vector<7x28xbf16>, vector<28x32xbf16>, vector<7x32xf32> -> vector<7x32xf32>
    %389 = arith.addf %383, %388 : vector<7x32xf32>
    %390 = vector.extract_strided_slice %386 {offsets = [0, 8], sizes = [7, 4], strides = [1, 1]} : vector<7x28xf32> to vector<7x4xf32>
    %391 = arith.maximumf %385, %390 : vector<7x4xf32>
    %392 = vector.broadcast %145 : vector<1x32xf32> to vector<7x32xf32>
    %393 = arith.addf %389, %392 : vector<7x32xf32>
    %cst_264 = arith.constant 0.000000e+00 : f32
    %394 = vector.broadcast %cst_264 : f32 to vector<7x32xf32>
    %395 = arith.maximumf %393, %394 : vector<7x32xf32>
    %c0_265 = arith.constant 0 : index
    %c3 = arith.constant 3 : index
    %c0_266 = arith.constant 0 : index
    %c0_267 = arith.constant 0 : index
    %396 = vector.load %arg8[%c0_265, %c3, %c0_266, %c0_267] : memref<1x7x7x36xf32, #tpu.memory_space<vmem>>, vector<1x1x7x32xf32>
    %397 = vector.shape_cast %396 : vector<1x1x7x32xf32> to vector<7x32xf32>
    %398 = vector.shape_cast %395 : vector<7x32xf32> to vector<1x1x7x32xf32>
    tpu.vector_store %arg8[%c0_265, %c3, %c0_266, %c0_267], %398 {strides = array<i32>} : memref<1x7x7x36xf32, #tpu.memory_space<vmem>>, vector<1x1x7x32xf32>,
    %c0_268 = arith.constant 0 : index
    %c3_269 = arith.constant 3 : index
    %c0_270 = arith.constant 0 : index
    %c32_271 = arith.constant 32 : index
    %399 = vector.load %arg8[%c0_268, %c3_269, %c0_270, %c32_271] : memref<1x7x7x36xf32, #tpu.memory_space<vmem>>, vector<1x1x7x4xf32>
    %400 = vector.shape_cast %399 : vector<1x1x7x4xf32> to vector<7x4xf32>
    %401 = vector.shape_cast %391 : vector<7x4xf32> to vector<1x1x7x4xf32>
    tpu.vector_store %arg8[%c0_268, %c3_269, %c0_270, %c32_271], %401 {strides = array<i32>} : memref<1x7x7x36xf32, #tpu.memory_space<vmem>>, vector<1x1x7x4xf32>,
    %cst_272 = arith.constant 0.000000e+00 : f32
    %402 = vector.broadcast %cst_272 : f32 to vector<7x32xf32>
    %c64_273 = arith.constant 64 : index
    %c0_274 = arith.constant 0 : index
    %403 = vector.load %arg11[%c64_273, %c0_274] : memref<128x28xf32, #tpu.memory_space<vmem>>, vector<7x28xf32>
    %404 = arith.truncf %403 : vector<7x28xf32> to vector<7x28xbf16>
    %cst_275 = arith.constant dense<0.000000e+00> : vector<7x32xf32>
    %405 = tpu.matmul %404, %128, %cst_275 {dimension_numbers = #tpu.dot_dimension_numbers<[1], [0], [0], [1], [0, 0, 1, 1], [], []>} : vector<7x28xbf16>, vector<28x32xbf16>, vector<7x32xf32> -> vector<7x32xf32>
    %406 = arith.addf %402, %405 : vector<7x32xf32>
    %407 = vector.extract_strided_slice %403 {offsets = [0, 8], sizes = [7, 4], strides = [1, 1]} : vector<7x28xf32> to vector<7x4xf32>
    %c64_276 = arith.constant 64 : index
    %c0_277 = arith.constant 0 : index
    %408 = vector.load %arg12[%c64_276, %c0_277] : memref<128x28xf32, #tpu.memory_space<vmem>>, vector<7x28xf32>
    %409 = arith.truncf %408 : vector<7x28xf32> to vector<7x28xbf16>
    %cst_278 = arith.constant dense<0.000000e+00> : vector<7x32xf32>
    %410 = tpu.matmul %409, %130, %cst_278 {dimension_numbers = #tpu.dot_dimension_numbers<[1], [0], [0], [1], [0, 0, 1, 1], [], []>} : vector<7x28xbf16>, vector<28x32xbf16>, vector<7x32xf32> -> vector<7x32xf32>
    %411 = arith.addf %406, %410 : vector<7x32xf32>
    %412 = vector.extract_strided_slice %408 {offsets = [0, 8], sizes = [7, 4], strides = [1, 1]} : vector<7x28xf32> to vector<7x4xf32>
    %413 = arith.maximumf %407, %412 : vector<7x4xf32>
    %c64_279 = arith.constant 64 : index
    %c0_280 = arith.constant 0 : index
    %414 = vector.load %arg13[%c64_279, %c0_280] : memref<128x28xf32, #tpu.memory_space<vmem>>, vector<7x28xf32>
    %415 = arith.truncf %414 : vector<7x28xf32> to vector<7x28xbf16>
    %cst_281 = arith.constant dense<0.000000e+00> : vector<7x32xf32>
    %416 = tpu.matmul %415, %132, %cst_281 {dimension_numbers = #tpu.dot_dimension_numbers<[1], [0], [0], [1], [0, 0, 1, 1], [], []>} : vector<7x28xbf16>, vector<28x32xbf16>, vector<7x32xf32> -> vector<7x32xf32>
    %417 = arith.addf %411, %416 : vector<7x32xf32>
    %418 = vector.extract_strided_slice %414 {offsets = [0, 8], sizes = [7, 4], strides = [1, 1]} : vector<7x28xf32> to vector<7x4xf32>
    %419 = arith.maximumf %413, %418 : vector<7x4xf32>
    %c72 = arith.constant 72 : index
    %c0_282 = arith.constant 0 : index
    %420 = vector.load %arg11[%c72, %c0_282] : memref<128x28xf32, #tpu.memory_space<vmem>>, vector<7x28xf32>
    %421 = arith.truncf %420 : vector<7x28xf32> to vector<7x28xbf16>
    %cst_283 = arith.constant dense<0.000000e+00> : vector<7x32xf32>
    %422 = tpu.matmul %421, %134, %cst_283 {dimension_numbers = #tpu.dot_dimension_numbers<[1], [0], [0], [1], [0, 0, 1, 1], [], []>} : vector<7x28xbf16>, vector<28x32xbf16>, vector<7x32xf32> -> vector<7x32xf32>
    %423 = arith.addf %417, %422 : vector<7x32xf32>
    %424 = vector.extract_strided_slice %420 {offsets = [0, 8], sizes = [7, 4], strides = [1, 1]} : vector<7x28xf32> to vector<7x4xf32>
    %425 = arith.maximumf %419, %424 : vector<7x4xf32>
    %c72_284 = arith.constant 72 : index
    %c0_285 = arith.constant 0 : index
    %426 = vector.load %arg12[%c72_284, %c0_285] : memref<128x28xf32, #tpu.memory_space<vmem>>, vector<7x28xf32>
    %427 = arith.truncf %426 : vector<7x28xf32> to vector<7x28xbf16>
    %cst_286 = arith.constant dense<0.000000e+00> : vector<7x32xf32>
    %428 = tpu.matmul %427, %136, %cst_286 {dimension_numbers = #tpu.dot_dimension_numbers<[1], [0], [0], [1], [0, 0, 1, 1], [], []>} : vector<7x28xbf16>, vector<28x32xbf16>, vector<7x32xf32> -> vector<7x32xf32>
    %429 = arith.addf %423, %428 : vector<7x32xf32>
    %430 = vector.extract_strided_slice %426 {offsets = [0, 8], sizes = [7, 4], strides = [1, 1]} : vector<7x28xf32> to vector<7x4xf32>
    %431 = arith.maximumf %425, %430 : vector<7x4xf32>
    %c72_287 = arith.constant 72 : index
    %c0_288 = arith.constant 0 : index
    %432 = vector.load %arg13[%c72_287, %c0_288] : memref<128x28xf32, #tpu.memory_space<vmem>>, vector<7x28xf32>
    %433 = arith.truncf %432 : vector<7x28xf32> to vector<7x28xbf16>
    %cst_289 = arith.constant dense<0.000000e+00> : vector<7x32xf32>
    %434 = tpu.matmul %433, %138, %cst_289 {dimension_numbers = #tpu.dot_dimension_numbers<[1], [0], [0], [1], [0, 0, 1, 1], [], []>} : vector<7x28xbf16>, vector<28x32xbf16>, vector<7x32xf32> -> vector<7x32xf32>
    %435 = arith.addf %429, %434 : vector<7x32xf32>
    %436 = vector.extract_strided_slice %432 {offsets = [0, 8], sizes = [7, 4], strides = [1, 1]} : vector<7x28xf32> to vector<7x4xf32>
    %437 = arith.maximumf %431, %436 : vector<7x4xf32>
    %c80 = arith.constant 80 : index
    %c0_290 = arith.constant 0 : index
    %438 = vector.load %arg11[%c80, %c0_290] : memref<128x28xf32, #tpu.memory_space<vmem>>, vector<7x28xf32>
    %439 = arith.truncf %438 : vector<7x28xf32> to vector<7x28xbf16>
    %cst_291 = arith.constant dense<0.000000e+00> : vector<7x32xf32>
    %440 = tpu.matmul %439, %140, %cst_291 {dimension_numbers = #tpu.dot_dimension_numbers<[1], [0], [0], [1], [0, 0, 1, 1], [], []>} : vector<7x28xbf16>, vector<28x32xbf16>, vector<7x32xf32> -> vector<7x32xf32>
    %441 = arith.addf %435, %440 : vector<7x32xf32>
    %442 = vector.extract_strided_slice %438 {offsets = [0, 8], sizes = [7, 4], strides = [1, 1]} : vector<7x28xf32> to vector<7x4xf32>
    %443 = arith.maximumf %437, %442 : vector<7x4xf32>
    %c80_292 = arith.constant 80 : index
    %c0_293 = arith.constant 0 : index
    %444 = vector.load %arg12[%c80_292, %c0_293] : memref<128x28xf32, #tpu.memory_space<vmem>>, vector<7x28xf32>
    %445 = arith.truncf %444 : vector<7x28xf32> to vector<7x28xbf16>
    %cst_294 = arith.constant dense<0.000000e+00> : vector<7x32xf32>
    %446 = tpu.matmul %445, %142, %cst_294 {dimension_numbers = #tpu.dot_dimension_numbers<[1], [0], [0], [1], [0, 0, 1, 1], [], []>} : vector<7x28xbf16>, vector<28x32xbf16>, vector<7x32xf32> -> vector<7x32xf32>
    %447 = arith.addf %441, %446 : vector<7x32xf32>
    %448 = vector.extract_strided_slice %444 {offsets = [0, 8], sizes = [7, 4], strides = [1, 1]} : vector<7x28xf32> to vector<7x4xf32>
    %449 = arith.maximumf %443, %448 : vector<7x4xf32>
    %c80_295 = arith.constant 80 : index
    %c0_296 = arith.constant 0 : index
    %450 = vector.load %arg13[%c80_295, %c0_296] : memref<128x28xf32, #tpu.memory_space<vmem>>, vector<7x28xf32>
    %451 = arith.truncf %450 : vector<7x28xf32> to vector<7x28xbf16>
    %cst_297 = arith.constant dense<0.000000e+00> : vector<7x32xf32>
    %452 = tpu.matmul %451, %144, %cst_297 {dimension_numbers = #tpu.dot_dimension_numbers<[1], [0], [0], [1], [0, 0, 1, 1], [], []>} : vector<7x28xbf16>, vector<28x32xbf16>, vector<7x32xf32> -> vector<7x32xf32>
    %453 = arith.addf %447, %452 : vector<7x32xf32>
    %454 = vector.extract_strided_slice %450 {offsets = [0, 8], sizes = [7, 4], strides = [1, 1]} : vector<7x28xf32> to vector<7x4xf32>
    %455 = arith.maximumf %449, %454 : vector<7x4xf32>
    %456 = vector.broadcast %145 : vector<1x32xf32> to vector<7x32xf32>
    %457 = arith.addf %453, %456 : vector<7x32xf32>
    %cst_298 = arith.constant 0.000000e+00 : f32
    %458 = vector.broadcast %cst_298 : f32 to vector<7x32xf32>
    %459 = arith.maximumf %457, %458 : vector<7x32xf32>
    %c0_299 = arith.constant 0 : index
    %c4 = arith.constant 4 : index
    %c0_300 = arith.constant 0 : index
    %c0_301 = arith.constant 0 : index
    %460 = vector.load %arg8[%c0_299, %c4, %c0_300, %c0_301] : memref<1x7x7x36xf32, #tpu.memory_space<vmem>>, vector<1x1x7x32xf32>
    %461 = vector.shape_cast %460 : vector<1x1x7x32xf32> to vector<7x32xf32>
    %462 = vector.shape_cast %459 : vector<7x32xf32> to vector<1x1x7x32xf32>
    tpu.vector_store %arg8[%c0_299, %c4, %c0_300, %c0_301], %462 {strides = array<i32>} : memref<1x7x7x36xf32, #tpu.memory_space<vmem>>, vector<1x1x7x32xf32>,
    %c0_302 = arith.constant 0 : index
    %c4_303 = arith.constant 4 : index
    %c0_304 = arith.constant 0 : index
    %c32_305 = arith.constant 32 : index
    %463 = vector.load %arg8[%c0_302, %c4_303, %c0_304, %c32_305] : memref<1x7x7x36xf32, #tpu.memory_space<vmem>>, vector<1x1x7x4xf32>
    %464 = vector.shape_cast %463 : vector<1x1x7x4xf32> to vector<7x4xf32>
    %465 = vector.shape_cast %455 : vector<7x4xf32> to vector<1x1x7x4xf32>
    tpu.vector_store %arg8[%c0_302, %c4_303, %c0_304, %c32_305], %465 {strides = array<i32>} : memref<1x7x7x36xf32, #tpu.memory_space<vmem>>, vector<1x1x7x4xf32>,
    %cst_306 = arith.constant 0.000000e+00 : f32
    %466 = vector.broadcast %cst_306 : f32 to vector<7x32xf32>
    %c80_307 = arith.constant 80 : index
    %c0_308 = arith.constant 0 : index
    %467 = vector.load %arg11[%c80_307, %c0_308] : memref<128x28xf32, #tpu.memory_space<vmem>>, vector<7x28xf32>
    %468 = arith.truncf %467 : vector<7x28xf32> to vector<7x28xbf16>
    %cst_309 = arith.constant dense<0.000000e+00> : vector<7x32xf32>
    %469 = tpu.matmul %468, %128, %cst_309 {dimension_numbers = #tpu.dot_dimension_numbers<[1], [0], [0], [1], [0, 0, 1, 1], [], []>} : vector<7x28xbf16>, vector<28x32xbf16>, vector<7x32xf32> -> vector<7x32xf32>
    %470 = arith.addf %466, %469 : vector<7x32xf32>
    %471 = vector.extract_strided_slice %467 {offsets = [0, 8], sizes = [7, 4], strides = [1, 1]} : vector<7x28xf32> to vector<7x4xf32>
    %c80_310 = arith.constant 80 : index
    %c0_311 = arith.constant 0 : index
    %472 = vector.load %arg12[%c80_310, %c0_311] : memref<128x28xf32, #tpu.memory_space<vmem>>, vector<7x28xf32>
    %473 = arith.truncf %472 : vector<7x28xf32> to vector<7x28xbf16>
    %cst_312 = arith.constant dense<0.000000e+00> : vector<7x32xf32>
    %474 = tpu.matmul %473, %130, %cst_312 {dimension_numbers = #tpu.dot_dimension_numbers<[1], [0], [0], [1], [0, 0, 1, 1], [], []>} : vector<7x28xbf16>, vector<28x32xbf16>, vector<7x32xf32> -> vector<7x32xf32>
    %475 = arith.addf %470, %474 : vector<7x32xf32>
    %476 = vector.extract_strided_slice %472 {offsets = [0, 8], sizes = [7, 4], strides = [1, 1]} : vector<7x28xf32> to vector<7x4xf32>
    %477 = arith.maximumf %471, %476 : vector<7x4xf32>
    %c80_313 = arith.constant 80 : index
    %c0_314 = arith.constant 0 : index
    %478 = vector.load %arg13[%c80_313, %c0_314] : memref<128x28xf32, #tpu.memory_space<vmem>>, vector<7x28xf32>
    %479 = arith.truncf %478 : vector<7x28xf32> to vector<7x28xbf16>
    %cst_315 = arith.constant dense<0.000000e+00> : vector<7x32xf32>
    %480 = tpu.matmul %479, %132, %cst_315 {dimension_numbers = #tpu.dot_dimension_numbers<[1], [0], [0], [1], [0, 0, 1, 1], [], []>} : vector<7x28xbf16>, vector<28x32xbf16>, vector<7x32xf32> -> vector<7x32xf32>
    %481 = arith.addf %475, %480 : vector<7x32xf32>
    %482 = vector.extract_strided_slice %478 {offsets = [0, 8], sizes = [7, 4], strides = [1, 1]} : vector<7x28xf32> to vector<7x4xf32>
    %483 = arith.maximumf %477, %482 : vector<7x4xf32>
    %c88 = arith.constant 88 : index
    %c0_316 = arith.constant 0 : index
    %484 = vector.load %arg11[%c88, %c0_316] : memref<128x28xf32, #tpu.memory_space<vmem>>, vector<7x28xf32>
    %485 = arith.truncf %484 : vector<7x28xf32> to vector<7x28xbf16>
    %cst_317 = arith.constant dense<0.000000e+00> : vector<7x32xf32>
    %486 = tpu.matmul %485, %134, %cst_317 {dimension_numbers = #tpu.dot_dimension_numbers<[1], [0], [0], [1], [0, 0, 1, 1], [], []>} : vector<7x28xbf16>, vector<28x32xbf16>, vector<7x32xf32> -> vector<7x32xf32>
    %487 = arith.addf %481, %486 : vector<7x32xf32>
    %488 = vector.extract_strided_slice %484 {offsets = [0, 8], sizes = [7, 4], strides = [1, 1]} : vector<7x28xf32> to vector<7x4xf32>
    %489 = arith.maximumf %483, %488 : vector<7x4xf32>
    %c88_318 = arith.constant 88 : index
    %c0_319 = arith.constant 0 : index
    %490 = vector.load %arg12[%c88_318, %c0_319] : memref<128x28xf32, #tpu.memory_space<vmem>>, vector<7x28xf32>
    %491 = arith.truncf %490 : vector<7x28xf32> to vector<7x28xbf16>
    %cst_320 = arith.constant dense<0.000000e+00> : vector<7x32xf32>
    %492 = tpu.matmul %491, %136, %cst_320 {dimension_numbers = #tpu.dot_dimension_numbers<[1], [0], [0], [1], [0, 0, 1, 1], [], []>} : vector<7x28xbf16>, vector<28x32xbf16>, vector<7x32xf32> -> vector<7x32xf32>
    %493 = arith.addf %487, %492 : vector<7x32xf32>
    %494 = vector.extract_strided_slice %490 {offsets = [0, 8], sizes = [7, 4], strides = [1, 1]} : vector<7x28xf32> to vector<7x4xf32>
    %495 = arith.maximumf %489, %494 : vector<7x4xf32>
    %c88_321 = arith.constant 88 : index
    %c0_322 = arith.constant 0 : index
    %496 = vector.load %arg13[%c88_321, %c0_322] : memref<128x28xf32, #tpu.memory_space<vmem>>, vector<7x28xf32>
    %497 = arith.truncf %496 : vector<7x28xf32> to vector<7x28xbf16>
    %cst_323 = arith.constant dense<0.000000e+00> : vector<7x32xf32>
    %498 = tpu.matmul %497, %138, %cst_323 {dimension_numbers = #tpu.dot_dimension_numbers<[1], [0], [0], [1], [0, 0, 1, 1], [], []>} : vector<7x28xbf16>, vector<28x32xbf16>, vector<7x32xf32> -> vector<7x32xf32>
    %499 = arith.addf %493, %498 : vector<7x32xf32>
    %500 = vector.extract_strided_slice %496 {offsets = [0, 8], sizes = [7, 4], strides = [1, 1]} : vector<7x28xf32> to vector<7x4xf32>
    %501 = arith.maximumf %495, %500 : vector<7x4xf32>
    %c96 = arith.constant 96 : index
    %c0_324 = arith.constant 0 : index
    %502 = vector.load %arg11[%c96, %c0_324] : memref<128x28xf32, #tpu.memory_space<vmem>>, vector<7x28xf32>
    %503 = arith.truncf %502 : vector<7x28xf32> to vector<7x28xbf16>
    %cst_325 = arith.constant dense<0.000000e+00> : vector<7x32xf32>
    %504 = tpu.matmul %503, %140, %cst_325 {dimension_numbers = #tpu.dot_dimension_numbers<[1], [0], [0], [1], [0, 0, 1, 1], [], []>} : vector<7x28xbf16>, vector<28x32xbf16>, vector<7x32xf32> -> vector<7x32xf32>
    %505 = arith.addf %499, %504 : vector<7x32xf32>
    %506 = vector.extract_strided_slice %502 {offsets = [0, 8], sizes = [7, 4], strides = [1, 1]} : vector<7x28xf32> to vector<7x4xf32>
    %507 = arith.maximumf %501, %506 : vector<7x4xf32>
    %c96_326 = arith.constant 96 : index
    %c0_327 = arith.constant 0 : index
    %508 = vector.load %arg12[%c96_326, %c0_327] : memref<128x28xf32, #tpu.memory_space<vmem>>, vector<7x28xf32>
    %509 = arith.truncf %508 : vector<7x28xf32> to vector<7x28xbf16>
    %cst_328 = arith.constant dense<0.000000e+00> : vector<7x32xf32>
    %510 = tpu.matmul %509, %142, %cst_328 {dimension_numbers = #tpu.dot_dimension_numbers<[1], [0], [0], [1], [0, 0, 1, 1], [], []>} : vector<7x28xbf16>, vector<28x32xbf16>, vector<7x32xf32> -> vector<7x32xf32>
    %511 = arith.addf %505, %510 : vector<7x32xf32>
    %512 = vector.extract_strided_slice %508 {offsets = [0, 8], sizes = [7, 4], strides = [1, 1]} : vector<7x28xf32> to vector<7x4xf32>
    %513 = arith.maximumf %507, %512 : vector<7x4xf32>
    %c96_329 = arith.constant 96 : index
    %c0_330 = arith.constant 0 : index
    %514 = vector.load %arg13[%c96_329, %c0_330] : memref<128x28xf32, #tpu.memory_space<vmem>>, vector<7x28xf32>
    %515 = arith.truncf %514 : vector<7x28xf32> to vector<7x28xbf16>
    %cst_331 = arith.constant dense<0.000000e+00> : vector<7x32xf32>
    %516 = tpu.matmul %515, %144, %cst_331 {dimension_numbers = #tpu.dot_dimension_numbers<[1], [0], [0], [1], [0, 0, 1, 1], [], []>} : vector<7x28xbf16>, vector<28x32xbf16>, vector<7x32xf32> -> vector<7x32xf32>
    %517 = arith.addf %511, %516 : vector<7x32xf32>
    %518 = vector.extract_strided_slice %514 {offsets = [0, 8], sizes = [7, 4], strides = [1, 1]} : vector<7x28xf32> to vector<7x4xf32>
    %519 = arith.maximumf %513, %518 : vector<7x4xf32>
    %520 = vector.broadcast %145 : vector<1x32xf32> to vector<7x32xf32>
    %521 = arith.addf %517, %520 : vector<7x32xf32>
    %cst_332 = arith.constant 0.000000e+00 : f32
    %522 = vector.broadcast %cst_332 : f32 to vector<7x32xf32>
    %523 = arith.maximumf %521, %522 : vector<7x32xf32>
    %c0_333 = arith.constant 0 : index
    %c5 = arith.constant 5 : index
    %c0_334 = arith.constant 0 : index
    %c0_335 = arith.constant 0 : index
    %524 = vector.load %arg8[%c0_333, %c5, %c0_334, %c0_335] : memref<1x7x7x36xf32, #tpu.memory_space<vmem>>, vector<1x1x7x32xf32>
    %525 = vector.shape_cast %524 : vector<1x1x7x32xf32> to vector<7x32xf32>
    %526 = vector.shape_cast %523 : vector<7x32xf32> to vector<1x1x7x32xf32>
    tpu.vector_store %arg8[%c0_333, %c5, %c0_334, %c0_335], %526 {strides = array<i32>} : memref<1x7x7x36xf32, #tpu.memory_space<vmem>>, vector<1x1x7x32xf32>,
    %c0_336 = arith.constant 0 : index
    %c5_337 = arith.constant 5 : index
    %c0_338 = arith.constant 0 : index
    %c32_339 = arith.constant 32 : index
    %527 = vector.load %arg8[%c0_336, %c5_337, %c0_338, %c32_339] : memref<1x7x7x36xf32, #tpu.memory_space<vmem>>, vector<1x1x7x4xf32>
    %528 = vector.shape_cast %527 : vector<1x1x7x4xf32> to vector<7x4xf32>
    %529 = vector.shape_cast %519 : vector<7x4xf32> to vector<1x1x7x4xf32>
    tpu.vector_store %arg8[%c0_336, %c5_337, %c0_338, %c32_339], %529 {strides = array<i32>} : memref<1x7x7x36xf32, #tpu.memory_space<vmem>>, vector<1x1x7x4xf32>,
    %cst_340 = arith.constant 0.000000e+00 : f32
    %530 = vector.broadcast %cst_340 : f32 to vector<7x32xf32>
    %c96_341 = arith.constant 96 : index
    %c0_342 = arith.constant 0 : index
    %531 = vector.load %arg11[%c96_341, %c0_342] : memref<128x28xf32, #tpu.memory_space<vmem>>, vector<7x28xf32>
    %532 = arith.truncf %531 : vector<7x28xf32> to vector<7x28xbf16>
    %cst_343 = arith.constant dense<0.000000e+00> : vector<7x32xf32>
    %533 = tpu.matmul %532, %128, %cst_343 {dimension_numbers = #tpu.dot_dimension_numbers<[1], [0], [0], [1], [0, 0, 1, 1], [], []>} : vector<7x28xbf16>, vector<28x32xbf16>, vector<7x32xf32> -> vector<7x32xf32>
    %534 = arith.addf %530, %533 : vector<7x32xf32>
    %535 = vector.extract_strided_slice %531 {offsets = [0, 8], sizes = [7, 4], strides = [1, 1]} : vector<7x28xf32> to vector<7x4xf32>
    %c96_344 = arith.constant 96 : index
    %c0_345 = arith.constant 0 : index
    %536 = vector.load %arg12[%c96_344, %c0_345] : memref<128x28xf32, #tpu.memory_space<vmem>>, vector<7x28xf32>
    %537 = arith.truncf %536 : vector<7x28xf32> to vector<7x28xbf16>
    %cst_346 = arith.constant dense<0.000000e+00> : vector<7x32xf32>
    %538 = tpu.matmul %537, %130, %cst_346 {dimension_numbers = #tpu.dot_dimension_numbers<[1], [0], [0], [1], [0, 0, 1, 1], [], []>} : vector<7x28xbf16>, vector<28x32xbf16>, vector<7x32xf32> -> vector<7x32xf32>
    %539 = arith.addf %534, %538 : vector<7x32xf32>
    %540 = vector.extract_strided_slice %536 {offsets = [0, 8], sizes = [7, 4], strides = [1, 1]} : vector<7x28xf32> to vector<7x4xf32>
    %541 = arith.maximumf %535, %540 : vector<7x4xf32>
    %c96_347 = arith.constant 96 : index
    %c0_348 = arith.constant 0 : index
    %542 = vector.load %arg13[%c96_347, %c0_348] : memref<128x28xf32, #tpu.memory_space<vmem>>, vector<7x28xf32>
    %543 = arith.truncf %542 : vector<7x28xf32> to vector<7x28xbf16>
    %cst_349 = arith.constant dense<0.000000e+00> : vector<7x32xf32>
    %544 = tpu.matmul %543, %132, %cst_349 {dimension_numbers = #tpu.dot_dimension_numbers<[1], [0], [0], [1], [0, 0, 1, 1], [], []>} : vector<7x28xbf16>, vector<28x32xbf16>, vector<7x32xf32> -> vector<7x32xf32>
    %545 = arith.addf %539, %544 : vector<7x32xf32>
    %546 = vector.extract_strided_slice %542 {offsets = [0, 8], sizes = [7, 4], strides = [1, 1]} : vector<7x28xf32> to vector<7x4xf32>
    %547 = arith.maximumf %541, %546 : vector<7x4xf32>
    %c104 = arith.constant 104 : index
    %c0_350 = arith.constant 0 : index
    %548 = vector.load %arg11[%c104, %c0_350] : memref<128x28xf32, #tpu.memory_space<vmem>>, vector<7x28xf32>
    %549 = arith.truncf %548 : vector<7x28xf32> to vector<7x28xbf16>
    %cst_351 = arith.constant dense<0.000000e+00> : vector<7x32xf32>
    %550 = tpu.matmul %549, %134, %cst_351 {dimension_numbers = #tpu.dot_dimension_numbers<[1], [0], [0], [1], [0, 0, 1, 1], [], []>} : vector<7x28xbf16>, vector<28x32xbf16>, vector<7x32xf32> -> vector<7x32xf32>
    %551 = arith.addf %545, %550 : vector<7x32xf32>
    %552 = vector.extract_strided_slice %548 {offsets = [0, 8], sizes = [7, 4], strides = [1, 1]} : vector<7x28xf32> to vector<7x4xf32>
    %553 = arith.maximumf %547, %552 : vector<7x4xf32>
    %c104_352 = arith.constant 104 : index
    %c0_353 = arith.constant 0 : index
    %554 = vector.load %arg12[%c104_352, %c0_353] : memref<128x28xf32, #tpu.memory_space<vmem>>, vector<7x28xf32>
    %555 = arith.truncf %554 : vector<7x28xf32> to vector<7x28xbf16>
    %cst_354 = arith.constant dense<0.000000e+00> : vector<7x32xf32>
    %556 = tpu.matmul %555, %136, %cst_354 {dimension_numbers = #tpu.dot_dimension_numbers<[1], [0], [0], [1], [0, 0, 1, 1], [], []>} : vector<7x28xbf16>, vector<28x32xbf16>, vector<7x32xf32> -> vector<7x32xf32>
    %557 = arith.addf %551, %556 : vector<7x32xf32>
    %558 = vector.extract_strided_slice %554 {offsets = [0, 8], sizes = [7, 4], strides = [1, 1]} : vector<7x28xf32> to vector<7x4xf32>
    %559 = arith.maximumf %553, %558 : vector<7x4xf32>
    %c104_355 = arith.constant 104 : index
    %c0_356 = arith.constant 0 : index
    %560 = vector.load %arg13[%c104_355, %c0_356] : memref<128x28xf32, #tpu.memory_space<vmem>>, vector<7x28xf32>
    %561 = arith.truncf %560 : vector<7x28xf32> to vector<7x28xbf16>
    %cst_357 = arith.constant dense<0.000000e+00> : vector<7x32xf32>
    %562 = tpu.matmul %561, %138, %cst_357 {dimension_numbers = #tpu.dot_dimension_numbers<[1], [0], [0], [1], [0, 0, 1, 1], [], []>} : vector<7x28xbf16>, vector<28x32xbf16>, vector<7x32xf32> -> vector<7x32xf32>
    %563 = arith.addf %557, %562 : vector<7x32xf32>
    %564 = vector.extract_strided_slice %560 {offsets = [0, 8], sizes = [7, 4], strides = [1, 1]} : vector<7x28xf32> to vector<7x4xf32>
    %565 = arith.maximumf %559, %564 : vector<7x4xf32>
    %c112 = arith.constant 112 : index
    %c0_358 = arith.constant 0 : index
    %566 = vector.load %arg11[%c112, %c0_358] : memref<128x28xf32, #tpu.memory_space<vmem>>, vector<7x28xf32>
    %567 = arith.truncf %566 : vector<7x28xf32> to vector<7x28xbf16>
    %cst_359 = arith.constant dense<0.000000e+00> : vector<7x32xf32>
    %568 = tpu.matmul %567, %140, %cst_359 {dimension_numbers = #tpu.dot_dimension_numbers<[1], [0], [0], [1], [0, 0, 1, 1], [], []>} : vector<7x28xbf16>, vector<28x32xbf16>, vector<7x32xf32> -> vector<7x32xf32>
    %569 = arith.addf %563, %568 : vector<7x32xf32>
    %570 = vector.extract_strided_slice %566 {offsets = [0, 8], sizes = [7, 4], strides = [1, 1]} : vector<7x28xf32> to vector<7x4xf32>
    %571 = arith.maximumf %565, %570 : vector<7x4xf32>
    %c112_360 = arith.constant 112 : index
    %c0_361 = arith.constant 0 : index
    %572 = vector.load %arg12[%c112_360, %c0_361] : memref<128x28xf32, #tpu.memory_space<vmem>>, vector<7x28xf32>
    %573 = arith.truncf %572 : vector<7x28xf32> to vector<7x28xbf16>
    %cst_362 = arith.constant dense<0.000000e+00> : vector<7x32xf32>
    %574 = tpu.matmul %573, %142, %cst_362 {dimension_numbers = #tpu.dot_dimension_numbers<[1], [0], [0], [1], [0, 0, 1, 1], [], []>} : vector<7x28xbf16>, vector<28x32xbf16>, vector<7x32xf32> -> vector<7x32xf32>
    %575 = arith.addf %569, %574 : vector<7x32xf32>
    %576 = vector.extract_strided_slice %572 {offsets = [0, 8], sizes = [7, 4], strides = [1, 1]} : vector<7x28xf32> to vector<7x4xf32>
    %577 = arith.maximumf %571, %576 : vector<7x4xf32>
    %c112_363 = arith.constant 112 : index
    %c0_364 = arith.constant 0 : index
    %578 = vector.load %arg13[%c112_363, %c0_364] : memref<128x28xf32, #tpu.memory_space<vmem>>, vector<7x28xf32>
    %579 = arith.truncf %578 : vector<7x28xf32> to vector<7x28xbf16>
    %cst_365 = arith.constant dense<0.000000e+00> : vector<7x32xf32>
    %580 = tpu.matmul %579, %144, %cst_365 {dimension_numbers = #tpu.dot_dimension_numbers<[1], [0], [0], [1], [0, 0, 1, 1], [], []>} : vector<7x28xbf16>, vector<28x32xbf16>, vector<7x32xf32> -> vector<7x32xf32>
    %581 = arith.addf %575, %580 : vector<7x32xf32>
    %582 = vector.extract_strided_slice %578 {offsets = [0, 8], sizes = [7, 4], strides = [1, 1]} : vector<7x28xf32> to vector<7x4xf32>
    %583 = arith.maximumf %577, %582 : vector<7x4xf32>
    %584 = vector.broadcast %145 : vector<1x32xf32> to vector<7x32xf32>
    %585 = arith.addf %581, %584 : vector<7x32xf32>
    %cst_366 = arith.constant 0.000000e+00 : f32
    %586 = vector.broadcast %cst_366 : f32 to vector<7x32xf32>
    %587 = arith.maximumf %585, %586 : vector<7x32xf32>
    %c0_367 = arith.constant 0 : index
    %c6 = arith.constant 6 : index
    %c0_368 = arith.constant 0 : index
    %c0_369 = arith.constant 0 : index
    %588 = vector.load %arg8[%c0_367, %c6, %c0_368, %c0_369] : memref<1x7x7x36xf32, #tpu.memory_space<vmem>>, vector<1x1x7x32xf32>
    %589 = vector.shape_cast %588 : vector<1x1x7x32xf32> to vector<7x32xf32>
    %590 = vector.shape_cast %587 : vector<7x32xf32> to vector<1x1x7x32xf32>
    tpu.vector_store %arg8[%c0_367, %c6, %c0_368, %c0_369], %590 {strides = array<i32>} : memref<1x7x7x36xf32, #tpu.memory_space<vmem>>, vector<1x1x7x32xf32>,
    %c0_370 = arith.constant 0 : index
    %c6_371 = arith.constant 6 : index
    %c0_372 = arith.constant 0 : index
    %c32_373 = arith.constant 32 : index
    %591 = vector.load %arg8[%c0_370, %c6_371, %c0_372, %c32_373] : memref<1x7x7x36xf32, #tpu.memory_space<vmem>>, vector<1x1x7x4xf32>
    %592 = vector.shape_cast %591 : vector<1x1x7x4xf32> to vector<7x4xf32>
    %593 = vector.shape_cast %583 : vector<7x4xf32> to vector<1x1x7x4xf32>
    tpu.vector_store %arg8[%c0_370, %c6_371, %c0_372, %c32_373], %593 {strides = array<i32>} : memref<1x7x7x36xf32, #tpu.memory_space<vmem>>, vector<1x1x7x4xf32>,
    return
  }
  func.func @transform_0(%arg0: i32) -> (i32, i32, i32) {
    %c0_i32 = arith.constant 0 : i32
    %c0_i32_0 = arith.constant 0 : i32
    %c0_i32_1 = arith.constant 0 : i32
    return %arg0, %c0_i32, %c0_i32_0 : i32, i32, i32
  }
  func.func @transform_1(%arg0: i32) -> (i32, i32) {
    %c0_i32 = arith.constant 0 : i32
    %c0_i32_0 = arith.constant 0 : i32
    %c0_i32_1 = arith.constant 0 : i32
    return %c0_i32, %c0_i32_0 : i32, i32
  }
  func.func @transform_2(%arg0: i32) -> (i32, i32) {
    %c0_i32 = arith.constant 0 : i32
    %c0_i32_0 = arith.constant 0 : i32
    %c0_i32_1 = arith.constant 0 : i32
    return %c0_i32, %c0_i32_0 : i32, i32
  }
  func.func @transform_3(%arg0: i32) -> (i32, i32, i32, i32) {
    %c0_i32 = arith.constant 0 : i32
    %c0_i32_0 = arith.constant 0 : i32
    %c0_i32_1 = arith.constant 0 : i32
    %c0_i32_2 = arith.constant 0 : i32
    %c0_i32_3 = arith.constant 0 : i32
    return %c0_i32, %c0_i32_0, %c0_i32_1, %c0_i32_2 : i32, i32, i32, i32
  }
  func.func @transform_4(%arg0: i32) -> (i32, i32) {
    %c0_i32 = arith.constant 0 : i32
    %c0_i32_0 = arith.constant 0 : i32
    %c0_i32_1 = arith.constant 0 : i32
    return %c0_i32, %c0_i32_0 : i32, i32
  }
  func.func @transform_5(%arg0: i32) -> (i32, i32, i32, i32) {
    %c0_i32 = arith.constant 0 : i32
    %c0_i32_0 = arith.constant 0 : i32
    %c0_i32_1 = arith.constant 0 : i32
    %c0_i32_2 = arith.constant 0 : i32
    %c0_i32_3 = arith.constant 0 : i32
    return %c0_i32, %c0_i32_0, %c0_i32_1, %c0_i32_2 : i32, i32, i32, i32
  }
  func.func @transform_6(%arg0: i32) -> (i32, i32) {
    %c0_i32 = arith.constant 0 : i32
    %c0_i32_0 = arith.constant 0 : i32
    %c0_i32_1 = arith.constant 0 : i32
    return %c0_i32, %c0_i32_0 : i32, i32
  }
  func.func @transform_7(%arg0: i32) -> (i32, i32, i32, i32) {
    %c0_i32 = arith.constant 0 : i32
    %c0_i32_0 = arith.constant 0 : i32
    %c0_i32_1 = arith.constant 0 : i32
    %c0_i32_2 = arith.constant 0 : i32
    return %arg0, %c0_i32, %c0_i32_0, %c0_i32_1 : i32, i32, i32, i32
  }
}

</mosaic_0001>

<bundles_post_ra>
// kernel: tpu_custom_call.1
= control target key start
LH: loop header
LB: loop body
LE: loop exit
PB: predicated region body
PF: predicated region fallthrough
CT: control target
= control target key end

     0   :  { %s6543_s24 = smov 0   ;;  %s8567_s0 = inlined_call_operand.vmem [shape: f32[2,256,4], index: 0, kind: input, shape index: {}]   ;;  %s8568_s1 = inlined_call_operand.vmem [shape: bf16[4,16], index: 1, kind: input, shape index: {}]   ;;  %s8569_s2 = inlined_call_operand.vmem [shape: f32[1,16], index: 2, kind: input, shape index: {}]   ;;  %s8570_s3 = inlined_call_operand.vmem [shape: bf16[3,3,8,16], index: 3, kind: input, shape index: {}]   ;;  %s8571_s4 = inlined_call_operand.vmem [shape: f32[1,16], index: 4, kind: input, shape index: {}]   ;;  %s8572_s5 = inlined_call_operand.vmem [shape: bf16[3,3,28,32], index: 5, kind: input, shape index: {}]   ;;  %s8573_s6 = inlined_call_operand.vmem [shape: f32[1,32], index: 6, kind: input, shape index: {}]   ;;  %s8574_s7 = inlined_call_operand.vmem [shape: f32[2,7,7,36], index: 7, kind: output, shape index: {}]  }
   0x1 LB: > { %s6020_s25 = sadd.s32 4294967295, %s6495_s24   ;;  %p6024_p0 = scmp.ge.s32.totalorder %s6495_s24, 1  ;;  %s6495_s24 = sphi %s6543_s24, %s17_s24  }
   0x2   : > { %p237_p1 = scmp.lt.s32.totalorder %s6495_s24, 3 }
   0x4   : > { %p238_p2 = pnand %p6024_p0, %p237_p1 }
   0x6   : > { %241 = sbr.rel (%p238_p2) target bundleno = 1553 (0x611), region = 48 }
   0xb   : > { %v287_v0 = vld [vmem:[%s8568_s1] sm:$0x3]  ;;  %vm390_vm0 = vcmask 1041408   ;;  %p269_p3 = scmp.lt.s32.totalorder %s6020_s25, 1  ;;  %vm341_vm1 = vcmask 31744   ;;  %vm280_vm2 = vcmask 64512  }
   0xc   : > { %v392_v1 = vsel %vm390_vm0, %v287_v0, 0  ;;  %v6591_v28 = vld [vmem:[%s8569_s2] ss:$0 sm:$0xff]  ;;  %s6497_s11 = smov 120   ;;  %vm1816_vm4 = vcmask 1043456   ;;  %s6500_s16 = smov 8  }
   0xd   : > { %401 = vmatpush.bf16.msra.mxu0 %v392_v1  ;;  %s8664_s25 = smov (!%p269_p3, %s6020_s25), 1  ;;  %v8575_v1 = vmov 0.0   ;;  %s6501_s29 = smov 12  }
   0xe   : > { %s6409_s28 = sshll.u32 %s8664_s25, 8  ;;  %281 = vst.msk [vmem:[#allocation2] sm:$0xff] %vm280_vm2, %v8575_v1  ;;  %s6428_s27 = smul.u32 56, %s8664_s25 }
   0xf   : > { %s6560_s8 = scalar_lea.vmem %s8567_s0, %s6409_s28  ;;  %282 = vst.msk [vmem:[#allocation2 + $0x8] sm:$0xff] %vm280_vm2, %v8575_v1 }
  0x10   : > { %v290_v2 = vld [vmem:[%s6560_s8] sm:$0xff]  ;;  %v291_v3 = vld [vmem:[%s6560_s8 + $0x8] sm:$0xff]  ;;  %v292_v5 = vld [vmem:[%s6560_s8 + $0x10] sm:$0xff]  ;;  %283 = vst.msk [vmem:[#allocation2 + $0x10] sm:$0xff] %vm280_vm2, %v8575_v1  ;;  %s8313_s10 = scalar_lea.vmem %s8574_s7, %s6428_s27 }
  0x11   : > { %v322_v4 = vpack.c.bf16 %v291_v3, %v290_v2  ;;  %v293_v6 = vld [vmem:[%s6560_s8 + $0x18] sm:$0xff]  ;;  %v294_v8 = vld [vmem:[%s6560_s8 + $0x20] sm:$0xff]  ;;  %v295_v9 = vld [vmem:[%s6560_s8 + $0x28] sm:$0xff]  ;;  %284 = vst.msk [vmem:[#allocation2 + $0x118] sm:$0xff] %vm280_vm2, %v8575_v1 }
  0x12   : > { %v323_v7 = vpack.c.bf16 %v293_v6, %v292_v5  ;;  %v324_v10 = vpack.c.bf16 %v295_v9, %v294_v8  ;;  %v296_v11 = vld [vmem:[%s6560_s8 + $0x30] sm:$0xff]  ;;  %v297_v12 = vld [vmem:[%s6560_s8 + $0x38] sm:$0xff]  ;;  %v298_v14 = vld [vmem:[%s6560_s8 + $0x40] sm:$0xff]  ;;  %285 = vst.msk [vmem:[#allocation2 + $0x120] sm:$0xff] %vm280_vm2, %v8575_v1 }
  0x13   : > { %6028 = vmatmul.msk.bf16.vlgmr.msra.gmra.mxu0 %vm341_vm1, %v322_v4  ;;  %v325_v13 = vpack.c.bf16 %v297_v12, %v296_v11  ;;  %v299_v15 = vld [vmem:[%s6560_s8 + $0x48] sm:$0xff]  ;;  %v300_v17 = vld [vmem:[%s6560_s8 + $0x50] sm:$0xff]  ;;  %v301_v18 = vld [vmem:[%s6560_s8 + $0x58] sm:$0xff]  ;;  %v868_v4 = vlaneseq  ;;  %286 = vst.msk [vmem:[#allocation2 + $0x128] sm:$0xff] %vm280_vm2, %v8575_v1 }
  0x14   : > { %v326_v16 = vpack.c.bf16 %v299_v15, %v298_v14  ;;  %v327_v19 = vpack.c.bf16 %v301_v18, %v300_v17  ;;  %v302_v20 = vld [vmem:[%s6560_s8 + $0x60] sm:$0xff]  ;;  %v303_v21 = vld [vmem:[%s6560_s8 + $0x68] sm:$0xff]  ;;  %v304_v23 = vld [vmem:[%s6560_s8 + $0x70] sm:$0xff]  ;;  %v6499_v15 = vmov 1.0|1.0  }
  0x15   : > { %v328_v22 = vpack.c.bf16 %v303_v21, %v302_v20  ;;  %v305_v24 = vld [vmem:[%s6560_s8 + $0x78] sm:$0xff]  ;;  %v306_v26 = vld [vmem:[%s6560_s8 + $0x80] sm:$0xff]  ;;  %v307_v27 = vld [vmem:[%s6560_s8 + $0x88] sm:$0xff]  ;;  %v6640_v6 = vshrl.u32 %v868_v4, 7 }
  0x16   : > { %v329_v25 = vpack.c.bf16 %v305_v24, %v304_v23  ;;  %v330_v29 = vpack.c.bf16 %v307_v27, %v306_v26  ;;  %v308_v36 = vld [vmem:[%s6560_s8 + $0x90] sm:$0xff]  ;;  %v309_v37 = vld [vmem:[%s6560_s8 + $0x98] sm:$0xff]  ;;  %v310_v45 = vld [vmem:[%s6560_s8 + $0xa0] sm:$0xff] }
  0x17   : > { %v331_v38 = vpack.c.bf16 %v309_v37, %v308_v36  ;;  %v311_v46 = vld [vmem:[%s6560_s8 + $0xa8] sm:$0xff]  ;;  %v312_v54 = vld [vmem:[%s6560_s8 + $0xb0] sm:$0xff]  ;;  %v313_v55 = vld [vmem:[%s6560_s8 + $0xb8] sm:$0xff]  ;;  %v905_v8 = vand.u32 15, %v6640_v6 }
  0x18   : > { %v332_v47 = vpack.c.bf16 %v311_v46, %v310_v45  ;;  %v333_v56 = vpack.c.bf16 %v313_v55, %v312_v54  ;;  %v314_v63 = vld [vmem:[%s6560_s8 + $0xc0] sm:$0xff]  ;;  %v315_v0 = vld [vmem:[%s6560_s8 + $0xc8] sm:$0xff]  ;;  %v317_v26 = vld [vmem:[%s6560_s8 + $0xd8] sm:$0xff] }
  0x19   : > { %v334_v2 = vpack.c.bf16 %v315_v0, %v314_v63  ;;  %v1541_v9 = vld [vmem:[#allocation2 + $0x7] sm:$0xff]  ;;  %vm1285_vm3 = vcmp.ne.s32.totalorder %v905_v8, 0  ;;  %v1717_v12 = vld [vmem:[%s8570_s3] sm:$0xf] }
  0x1a   : > { %v1573_v11 = vpack.c.bf16 %v1541_v9, %v1541_v9  ;;  %v1958_v18 = vsel %vm1816_vm4, %v1717_v12, 0  ;;  %v2049_v0 = vld [vmem:[#allocation2 + $0x9] sm:$0xff]  ;;  %v871_v9 = vadd.s32 16, %v6640_v6 }
  0x1b   : > { %1967 = vmatpush.bf16.msra.mxu2 %v1958_v18 }
  0x23   : > { %6029 = vmatmul.msk.bf16.gmra.mxu0 %vm341_vm1, %v323_v7 }
  0x33   : > { %6030 = vmatmul.msk.bf16.gmra.mxu0 %vm341_vm1, %v324_v10  ;;  %v1542_v10 = vld [vmem:[#allocation2 + $0xf] sm:$0xff] }
  0x34   : > { %v1574_v14 = vpack.c.bf16 %v1542_v10, %v1542_v10 }
  0x36   : > { %v1606_v21 = vunpack.c.l.bf16 %v1574_v14 }
  0x43   : > { %6031 = vmatmul.msk.bf16.gmra.mxu0 %vm341_vm1, %v325_v13  ;;  %v6652_v13 = vsel %vm1285_vm3, 1.0, %v8575_v1 }
  0x53   : > { %6032 = vmatmul.msk.bf16.gmra.mxu0 %vm341_vm1, %v326_v16  ;;  %v6654_v16 = vunpack.c.l.bf16 %v6499_v15 }
  0x55   : > { %v1670_v24 = vmul.f32 %v6654_v16, %v1606_v21 }
  0x63   : > { %6033 = vmatmul.msk.bf16.gmra.mxu0 %vm341_vm1, %v327_v19  ;;  %v1605_v19 = vunpack.c.l.bf16 %v1573_v11 }
  0x73   : > { %6034 = vmatmul.msk.bf16.gmra.mxu0 %vm341_vm1, %v328_v22  ;;  %v1669_v22 = vmul.f32 %v6652_v13, %v1605_v19 }
  0x75   : > { %v1701_v27 = vpack.c.bf16 %v1670_v24, %v1669_v22  ;;  %v919_v22 = vand.u32 15, %v871_v9 }
  0x77   : > { %6093 = vmatmul.msk.bf16.vlgmr.msra.gmra.mxu2 %vm280_vm2, %v1701_v27  ;;  %vm1287_vm6 = vcmp.ne.s32.totalorder %v919_v22, 0 }
  0x83   : > { %6035 = vmatmul.msk.bf16.gmra.mxu0 %vm341_vm1, %v329_v25  ;;  %v316_v25 = vld [vmem:[%s6560_s8 + $0xd0] sm:$0xff] }
  0x90   : > { %v403_v30 = vpop.f32.mrf.mxu0 }
  0x91   : > { %v404_v31 = vadd.f32 %v6591_v28, %v403_v30 }
  0x93   : > { %v483_v32 = vmax.f32 %v404_v31, 0.0  ;;  %6036 = vmatmul.msk.bf16.gmra.mxu0 %vm341_vm1, %v330_v29  ;;  %v6076_v29 = vld [vmem:[%s8570_s3 + $0x4] sm:$0xf]  ;;  %v335_v31 = vpack.c.bf16 %v317_v26, %v316_v25 }
  0x94   : > { %v1818_v30 = vsel %vm1816_vm4, %v6076_v29, 0 }
  0x95   : > { %515 = vst.msk [vmem:[#allocation3] sm:$0xff] %vm280_vm2, %v483_v32  ;;  %740 = vrot.lane.b32.xlu0 %v483_v32, %s6497_s11  ;;  %1827 = vmatpush.bf16.msra.mxu1 %v1818_v30  ;;  %v1718_v32 = vld [vmem:[#allocation2 + $0x8] sm:$0xff]  ;;  %v872_v30 = vadd.s32 24, %v6640_v6 }
  0x98   : > { %v405_v33 = vpop.f32.mrf.mxu0 }
  0x99   : > { %v406_v34 = vadd.f32 %v6591_v28, %v405_v33  ;;  %v1719_v33 = vld [vmem:[#allocation2 + $0x10] sm:$0xff] }
  0x9b   : > { %v484_v35 = vmax.f32 %v406_v34, 0.0 }
  0x9d   : > { %516 = vst.msk [vmem:[#allocation3 + $0x8] sm:$0xff] %vm280_vm2, %v484_v35  ;;  %742 = vrot.lane.b32.xlu0 %v484_v35, %s6497_s11  ;;  %v1750_v35 = vpack.c.bf16 %v1719_v33, %v1718_v32 }
  0x9f   : > { %6077 = vmatmul.msk.bf16.vlgmr.msra.gmra.mxu1 %vm280_vm2, %v1750_v35 }
  0xa0   : > { %v408_v39 = vpop.f32.mrf.mxu0 }
  0xa1   : > { %v409_v40 = vadd.f32 %v6591_v28, %v408_v39 }
  0xa3   : > { %v485_v41 = vmax.f32 %v409_v40, 0.0  ;;  %6037 = vmatmul.msk.bf16.gmra.mxu0 %vm341_vm1, %v331_v38 }
  0xa5   : > { %517 = vst.msk [vmem:[#allocation3 + $0x10] sm:$0xff] %vm280_vm2, %v485_v41  ;;  %744 = vrot.lane.b32.xlu1 %v485_v41, %s6497_s11  ;;  %v318_v41 = vld [vmem:[%s6560_s8 + $0xe0] sm:$0xff] }
  0xa8   : > { %v410_v42 = vpop.f32.mrf.mxu0 }
  0xa9   : > { %v411_v43 = vadd.f32 %v6591_v28, %v410_v42  ;;  %v319_v42 = vld [vmem:[%s6560_s8 + $0xe8] sm:$0xff] }
  0xab   : > { %v486_v44 = vmax.f32 %v411_v43, 0.0  ;;  %v6126_v43 = vld [vmem:[%s8570_s3 + $0xc] sm:$0xf] }
  0xac   : > { %v2594_v45 = vsel %vm1816_vm4, %v6126_v43, 0  ;;  %v926_v43 = vand.u32 15, %v872_v30 }
  0xad   : > { %518 = vst.msk [vmem:[#allocation3 + $0x18] sm:$0xff] %vm280_vm2, %v486_v44  ;;  %746 = vrot.lane.b32.xlu1 %v486_v44, %s6497_s11  ;;  %v6143_v44 = vld [vmem:[%s8570_s3 + $0x10] sm:$0xf]  ;;  %2603 = vmatpush.bf16.msrb.mxu0 %v2594_v45 }
  0xae   : > { %v2816_v46 = vsel %vm1816_vm4, %v6143_v44, 0  ;;  %vm1416_vm7 = vcmp.ne.s32.totalorder %v926_v43, 15 }
  0xaf   : > { %2825 = vmatpush.bf16.msrb.mxu1 %v2816_v46 }
  0xb0   : > { %v413_v48 = vpop.f32.mrf.mxu0 }
  0xb1   : > { %v414_v49 = vadd.f32 %v6591_v28, %v413_v48 }
  0xb3   : > { %v487_v50 = vmax.f32 %v414_v49, 0.0  ;;  %6038 = vmatmul.msk.bf16.gmra.mxu0 %vm341_vm1, %v332_v47  ;;  %v336_v47 = vpack.c.bf16 %v319_v42, %v318_v41 }
  0xb5   : > { %519 = vst.msk [vmem:[#allocation3 + $0x20] sm:$0xff] %vm280_vm2, %v487_v50  ;;  %748 = vrot.lane.b32.xlu2 %v487_v50, %s6497_s11 }
  0xb8   : > { %v415_v51 = vpop.f32.mrf.mxu0 }
  0xb9   : > { %v416_v52 = vadd.f32 %v6591_v28, %v415_v51  ;;  %v6109_v51 = vld [vmem:[%s8570_s3 + $0x8] sm:$0xf] }
  0xbb   : > { %v488_v53 = vmax.f32 %v416_v52, 0.0  ;;  %v2276_v52 = vsel %vm1816_vm4, %v6109_v51, 0 }
  0xbc   : > { %2285 = vmatpush.bf16.msra.mxu3 %v2276_v52 }
  0xbd   : > { %520 = vst.msk [vmem:[#allocation3 + $0x28] sm:$0xff] %vm280_vm2, %v488_v53  ;;  %750 = vrot.lane.b32.xlu2 %v488_v53, %s6497_s11 }
  0xc0   : > { %v418_v57 = vpop.f32.mrf.mxu0 }
  0xc1   : > { %v419_v58 = vadd.f32 %v6591_v28, %v418_v57  ;;  %v321_v57 = vld [vmem:[%s6560_s8 + $0xf8] sm:$0xff] }
  0xc3   : > { %v489_v59 = vmax.f32 %v419_v58, 0.0  ;;  %6039 = vmatmul.msk.bf16.gmra.mxu0 %vm341_vm1, %v333_v56  ;;  %v320_v56 = vld [vmem:[%s6560_s8 + $0xf0] sm:$0xff] }
  0xc4   : > { %v337_v58 = vpack.c.bf16 %v321_v57, %v320_v56 }
  0xc5   : > { %521 = vst.msk [vmem:[#allocation3 + $0x30] sm:$0xff] %vm280_vm2, %v489_v59  ;;  %752 = vrot.lane.b32.xlu0 %v489_v59, %s6497_s11 }
  0xc8   : > { %v420_v60 = vpop.f32.mrf.mxu0 }
  0xc9   : > { %v421_v61 = vadd.f32 %v6591_v28, %v420_v60 }
  0xcb   : > { %v490_v62 = vmax.f32 %v421_v61, 0.0 }
  0xcd   : > { %522 = vst.msk [vmem:[#allocation3 + $0x38] sm:$0xff] %vm280_vm2, %v490_v62  ;;  %754 = vrot.lane.b32.xlu1 %v490_v62, %s6497_s11  ;;  %v870_v62 = vadd.s32 8, %v6640_v6 }
  0xcf   : > { %v912_v4 = vand.u32 15, %v870_v62 }
  0xd0   : > { %v423_v3 = vpop.f32.mrf.mxu0 }
  0xd1   : > { %v424_v5 = vadd.f32 %v6591_v28, %v423_v3  ;;  %vm1414_vm5 = vcmp.ne.s32.totalorder %v912_v4, 15 }
  0xd2   : > { %v6714_v18 = vsel %vm1414_vm5, 1.0, %v8575_v1 }
  0xd3   : > { %v491_v7 = vmax.f32 %v424_v5, 0.0  ;;  %6040 = vmatmul.msk.bf16.gmra.mxu0 %vm341_vm1, %v334_v2  ;;  %v2081_v5 = vpack.c.bf16 %v2049_v0, %v2049_v0  ;;  %8602 = vst [vmem:[#allocation7_spill] sm:$0xff] %v6714_v18 }
  0xd5   : > { %523 = vst.msk [vmem:[#allocation3 + $0x40] sm:$0xff] %vm280_vm2, %v491_v7  ;;  %756 = vrot.lane.b32.xlu2 %v491_v7, %s6497_s11  ;;  %v2113_v8 = vunpack.c.l.bf16 %v2081_v5 }
  0xd7   : > { %v2177_v21 = vmul.f32 %v2113_v8, %v6654_v16 }
  0xd8   : > { %v425_v17 = vpop.f32.mrf.mxu0 }
  0xd9   : > { %v426_v20 = vadd.f32 %v6591_v28, %v425_v17 }
  0xdb   : > { %v492_v23 = vmax.f32 %v426_v20, 0.0 }
  0xdd   : > { %524 = vst.msk [vmem:[#allocation3 + $0x48] sm:$0xff] %vm280_vm2, %v492_v23  ;;  %758 = vrot.lane.b32.xlu0 %v492_v23, %s6497_s11 }
  0xe0   : > { %v428_v34 = vpop.f32.mrf.mxu0 }
  0xe1   : > { %v429_v36 = vadd.f32 %v6591_v28, %v428_v34 }
  0xe3   : > { %v493_v37 = vmax.f32 %v429_v36, 0.0  ;;  %6041 = vmatmul.msk.bf16.gmra.mxu0 %vm341_vm1, %v335_v31 }
  0xe5   : > { %525 = vst.msk [vmem:[#allocation3 + $0x50] sm:$0xff] %vm280_vm2, %v493_v37  ;;  %760 = vrot.lane.b32.xlu1 %v493_v37, %s6497_s11 }
  0xe8   : > { %v430_v38 = vpop.f32.mrf.mxu0 }
  0xe9   : > { %v431_v39 = vadd.f32 %v6591_v28, %v430_v38  ;;  %v6726_v38 = vsel %vm1287_vm6, 1.0, %v8575_v1 }
  0xeb   : > { %v494_v40 = vmax.f32 %v431_v39, 0.0 }
  0xed   : > { %526 = vst.msk [vmem:[#allocation3 + $0x58] sm:$0xff] %vm280_vm2, %v494_v40  ;;  %762 = vrot.lane.b32.xlu2 %v494_v40, %s6497_s11 }
  0xf0   : > { %v433_v48 = vpop.f32.mrf.mxu0 }
  0xf1   : > { %v434_v49 = vadd.f32 %v6591_v28, %v433_v48  ;;  %v873_v48 = vadd.s32 32, %v6640_v6 }
  0xf3   : > { %v495_v50 = vmax.f32 %v434_v49, 0.0  ;;  %6042 = vmatmul.msk.bf16.gmra.mxu0 %vm341_vm1, %v336_v47 }
  0xf5   : > { %527 = vst.msk [vmem:[#allocation3 + $0x60] sm:$0xff] %vm280_vm2, %v495_v50  ;;  %764 = vrot.lane.b32.xlu0 %v495_v50, %s6497_s11 }
  0xf8   : > { %v435_v53 = vpop.f32.mrf.mxu0 }
  0xf9   : > { %v436_v54 = vadd.f32 %v6591_v28, %v435_v53 }
  0xfb   : > { %v496_v55 = vmax.f32 %v436_v54, 0.0 }
  0xfd   : > { %528 = vst.msk [vmem:[#allocation3 + $0x68] sm:$0xff] %vm280_vm2, %v496_v55  ;;  %766 = vrot.lane.b32.xlu1 %v496_v55, %s6497_s11 }
 0x100   : > { %v438_v59 = vpop.f32.mrf.mxu0 }
 0x101   : > { %v439_v60 = vadd.f32 %v6591_v28, %v438_v59  ;;  %v933_v59 = vand.u32 15, %v873_v48  ;;  %v876_v48 = vadd.s32 56, %v6640_v6 }
 0x103   : > { %v497_v61 = vmax.f32 %v439_v60, 0.0  ;;  %6043 = vmatmul.msk.bf16.gmra.mxu0 %vm341_vm1, %v337_v58  ;;  %v6740_v58 = vsel %vm1416_vm7, 1.0, %v8575_v1  ;;  %vm1289_vm8 = vcmp.ne.s32.totalorder %v933_v59, 0 }
 0x105   : > { %529 = vst.msk [vmem:[#allocation3 + $0x70] sm:$0xff] %vm280_vm2, %v497_v61  ;;  %768 = vrot.lane.b32.xlu2 %v497_v61, %s6497_s11 }
 0x107   : > { %v741_v63 = vpop.permute.xlu0 %740 }
 0x108   : > { %836 = vst.msk [vmem:[#allocation2 + $0x18] sm:$0xff] %vm280_vm2, %v741_v63  ;;  %v440_v2 = vpop.f32.mrf.mxu0 }
 0x109   : > { %v441_v3 = vadd.f32 %v6591_v28, %v440_v2 }
 0x10b   : > { %v498_v7 = vmax.f32 %v441_v3, 0.0  ;;  %v874_v3 = vadd.s32 40, %v6640_v6 }
 0x10d   : > { %530 = vst.msk [vmem:[#allocation3 + $0x78] sm:$0xff] %vm280_vm2, %v498_v7  ;;  %770 = vrot.lane.b32.xlu0 %v498_v7, %s6497_s11 }
 0x10f   : > { %v749_v10 = vpop.permute.xlu2 %748  ;;  %v743_v11 = vpop.permute.xlu0 %742  ;;  %v2050_v12 = vld [vmem:[#allocation2 + $0x11] sm:$0xff] }
 0x110   : > { %840 = vst.msk [vmem:[#allocation2 + $0x38] sm:$0xff] %vm280_vm2, %v749_v10  ;;  %v443_v14 = vpop.f32.mrf.mxu0  ;;  %v2082_v15 = vpack.c.bf16 %v2050_v12, %v2050_v12  ;;  %v1543_v19 = vld [vmem:[#allocation2 + $0x17] sm:$0xff] }
 0x111   : > { %837 = vst.msk [vmem:[#allocation2 + $0x20] sm:$0xff] %vm280_vm2, %v743_v11  ;;  %v444_v17 = vadd.f32 %v6591_v28, %v443_v14  ;;  %v1575_v25 = vpack.c.bf16 %v1543_v19, %v1543_v19  ;;  %v1720_v32 = vld [vmem:[#allocation2 + $0x18] sm:$0xff]  ;;  %v6753_v19 = vsel %vm1289_vm8, 1.0, %v8575_v1 }
 0x112   : > { %v2114_v20 = vunpack.c.l.bf16 %v2082_v15 }
 0x113   : > { %v499_v23 = vmax.f32 %v444_v17, 0.0  ;;  %v1607_v35 = vunpack.c.l.bf16 %v1575_v25 }
 0x114   : > { %v2178_v24 = vmul.f32 %v6714_v18, %v2114_v20  ;;  %v940_v20 = vand.u32 15, %v874_v3 }
 0x115   : > { %531 = vst.msk [vmem:[#allocation3 + $0x80] sm:$0xff] %vm280_vm2, %v499_v23  ;;  %772 = vrot.lane.b32.xlu1 %v499_v23, %s6497_s11  ;;  %v1671_v44 = vmul.f32 %v6726_v38, %v1607_v35  ;;  %v2495_v45 = vmul.f32 %v6652_v13, %v1607_v35 }
 0x116   : > { %v2209_v26 = vpack.c.bf16 %v2178_v24, %v2177_v21  ;;  %vm1418_vm9 = vcmp.ne.s32.totalorder %v940_v20, 15 }
 0x117   : > { %v751_v27 = vpop.permute.xlu2 %750  ;;  %v745_v29 = vpop.permute.xlu1 %744 }
 0x118   : > { %841 = vst.msk [vmem:[#allocation2 + $0x40] sm:$0xff] %vm280_vm2, %v751_v27  ;;  %v445_v31 = vpop.f32.mrf.mxu0  ;;  %6110 = vmatmul.msk.bf16.vlgmr.msra.gmra.mxu3 %vm280_vm2, %v2209_v26  ;;  %v1721_v33 = vld [vmem:[#allocation2 + $0x20] sm:$0xff] }
 0x119   : > { %v1544_v34 = vld [vmem:[#allocation2 + $0x1f] sm:$0xff]  ;;  %838 = vst.msk [vmem:[#allocation2 + $0x28] sm:$0xff] %vm280_vm2, %v745_v29  ;;  %v446_v36 = vadd.f32 %v6591_v28, %v445_v31  ;;  %v1751_v37 = vpack.c.bf16 %v1721_v33, %v1720_v32  ;;  %v875_v29 = vadd.s32 48, %v6640_v6 }
 0x11a   : > { %v1576_v39 = vpack.c.bf16 %v1544_v34, %v1544_v34  ;;  %v2051_v40 = vld [vmem:[#allocation2 + $0x19] sm:$0xff] }
 0x11b   : > { %v500_v41 = vmax.f32 %v446_v36, 0.0  ;;  %6078 = vmatmul.msk.bf16.gmra.mxu1 %vm280_vm2, %v1751_v37  ;;  %v2083_v47 = vpack.c.bf16 %v2051_v40, %v2051_v40  ;;  %v6764_v36 = vsel %vm1418_vm9, 1.0, %v8575_v1  ;;  %v947_v40 = vand.u32 15, %v875_v29 }
 0x11c   : > { %v1608_v42 = vunpack.c.l.bf16 %v1576_v39  ;;  %8603 = vst [vmem:[#allocation8_spill] sm:$0xff] %v6764_v36 }
 0x11d   : > { %532 = vst.msk [vmem:[#allocation3 + $0x88] sm:$0xff] %vm280_vm2, %v500_v41  ;;  %774 = vrot.lane.b32.xlu2 %v500_v41, %s6497_s11  ;;  %v2115_v56 = vunpack.c.l.bf16 %v2083_v47  ;;  %vm1291_vm10 = vcmp.ne.s32.totalorder %v947_v40, 0 }
 0x11e   : > { %v1672_v46 = vmul.f32 %v6654_v16, %v1608_v42 }
 0x11f   : > { %v747_v49 = vpop.permute.xlu1 %746  ;;  %v2179_v0 = vmul.f32 %v2115_v56, %v6654_v16  ;;  %v1548_v41 = vld [vmem:[#allocation2 + $0x3f] sm:$0xff] }
 0x120   : > { %v1702_v50 = vpack.c.bf16 %v1672_v46, %v1671_v44  ;;  %v2527_v51 = vpack.c.bf16 %v1672_v46, %v2495_v45  ;;  %v2940_v52 = vld [vmem:[#allocation2 + $0x21] sm:$0xff]  ;;  %839 = vst.msk [vmem:[#allocation2 + $0x30] sm:$0xff] %vm280_vm2, %v747_v49  ;;  %v448_v53 = vpop.f32.mrf.mxu0  ;;  %v1580_v46 = vpack.c.bf16 %v1548_v41, %v1548_v41  ;;  %v2055_v59 = vld [vmem:[#allocation2 + $0x39] sm:$0xff] }
 0x121   : > { %v2972_v54 = vpack.c.bf16 %v2940_v52, %v2940_v52  ;;  %v449_v55 = vadd.f32 %v6591_v28, %v448_v53  ;;  %v1545_v57 = vld [vmem:[#allocation2 + $0x27] sm:$0xff]  ;;  %v1724_v53 = vld [vmem:[#allocation2 + $0x38] sm:$0xff] }
 0x122   : > { %6094 = vmatmul.msk.bf16.gmra.mxu2 %vm280_vm2, %v1702_v50  ;;  %6127 = vmatmul.msk.bf16.vlgmr.msrb.gmra.mxu0 %vm280_vm2, %v2527_v51  ;;  %v1577_v62 = vpack.c.bf16 %v1545_v57, %v1545_v57  ;;  %v1722_v5 = vld [vmem:[#allocation2 + $0x28] sm:$0xff]  ;;  %v1725_v47 = vld [vmem:[#allocation2 + $0x40] sm:$0xff]  ;;  %v1612_v57 = vunpack.c.l.bf16 %v1580_v46 }
 0x123   : > { %v3004_v60 = vunpack.c.l.bf16 %v2972_v54  ;;  %v501_v61 = vmax.f32 %v449_v55, 0.0  ;;  %v6776_v54 = vsel %vm1291_vm10, 1.0, %v8575_v1  ;;  %v1753_v56 = vpack.c.bf16 %v1725_v47, %v1724_v53 }
 0x124   : > { %v1609_v12 = vunpack.c.l.bf16 %v1577_v62  ;;  %v1676_v3 = vmul.f32 %v6654_v16, %v1612_v57 }
 0x125   : > { %v6743_v63 = vmul.f32 %v6714_v18, %v3004_v60  ;;  %533 = vst.msk [vmem:[#allocation3 + $0x90] sm:$0xff] %vm280_vm2, %v501_v61  ;;  %776 = vrot.lane.b32.xlu0 %v501_v61, %s6497_s11  ;;  %v2180_v2 = vmul.f32 %v6740_v58, %v3004_v60  ;;  %v954_v60 = vand.u32 15, %v876_v48 }
 0x126   : > { %v1673_v25 = vmul.f32 %v6753_v19, %v1609_v12  ;;  %v2497_v27 = vmul.f32 %v6726_v38, %v1609_v12 }
 0x127   : > { %v2210_v4 = vpack.c.bf16 %v2180_v2, %v2179_v0  ;;  %v1723_v7 = vld [vmem:[#allocation2 + $0x30] sm:$0xff]  ;;  %v2087_v2 = vpack.c.bf16 %v2055_v59, %v2055_v59  ;;  %vm1420_vm11 = vcmp.ne.s32.totalorder %v954_v60, 15 }
 0x128   : > { %v1546_v8 = vld [vmem:[#allocation2 + $0x2f] sm:$0xff]  ;;  %v450_v9 = vpop.f32.mrf.mxu0  ;;  %v1752_v10 = vpack.c.bf16 %v1723_v7, %v1722_v5  ;;  %v1547_v37 = vld [vmem:[#allocation2 + $0x37] sm:$0xff] }
 0x129   : > { %v1578_v11 = vpack.c.bf16 %v1546_v8, %v1546_v8  ;;  %v2053_v14 = vld [vmem:[#allocation2 + $0x29] sm:$0xff]  ;;  %v2054_v15 = vld [vmem:[#allocation2 + $0x31] sm:$0xff]  ;;  %v451_v17 = vadd.f32 %v6591_v28, %v450_v9  ;;  %6111 = vmatmul.msk.bf16.gmra.mxu3 %vm280_vm2, %v2210_v4  ;;  %v1579_v45 = vpack.c.bf16 %v1547_v37, %v1547_v37  ;;  %v877_v4 = vadd.s32 64, %v6640_v6 }
 0x12a   : > { %v2085_v23 = vpack.c.bf16 %v2053_v14, %v2053_v14  ;;  %v2086_v24 = vpack.c.bf16 %v2054_v15, %v2054_v15  ;;  %v2119_v12 = vunpack.c.l.bf16 %v2087_v2  ;;  %v6792_v15 = vsel %vm1420_vm11, 1.0, %v8575_v1 }
 0x12b   : > { %v1610_v21 = vunpack.c.l.bf16 %v1578_v11  ;;  %v502_v22 = vmax.f32 %v451_v17, 0.0  ;;  %6079 = vmatmul.msk.bf16.gmra.mxu1 %vm280_vm2, %v1752_v10  ;;  %v1611_v51 = vunpack.c.l.bf16 %v1579_v45  ;;  %8604 = vst [vmem:[#allocation9_spill] sm:$0xff] %v6792_v15 }
 0x12c   : > { %v2117_v33 = vunpack.c.l.bf16 %v2085_v23  ;;  %v2118_v34 = vunpack.c.l.bf16 %v2086_v24  ;;  %v2183_v23 = vmul.f32 %v2119_v12, %v6654_v16 }
 0x12d   : > { %v1674_v26 = vmul.f32 %v6654_v16, %v1610_v21  ;;  %534 = vst.msk [vmem:[#allocation3 + $0x98] sm:$0xff] %vm280_vm2, %v502_v22  ;;  %778 = vrot.lane.b32.xlu1 %v502_v22, %s6497_s11  ;;  %v1675_v62 = vmul.f32 %v6776_v54, %v1611_v51  ;;  %v2499_v0 = vmul.f32 %v6753_v19, %v1611_v51  ;;  %v961_v21 = vand.u32 15, %v877_v4 }
 0x12e   : > { %v2181_v43 = vmul.f32 %v2117_v33, %v6654_v16  ;;  %v2182_v44 = vmul.f32 %v6764_v36, %v2118_v34  ;;  %v879_v51 = vadd.s32 80, %v6640_v6 }
 0x12f   : > { %v1703_v30 = vpack.c.bf16 %v1674_v26, %v1673_v25  ;;  %v2528_v31 = vpack.c.bf16 %v1674_v26, %v2497_v27  ;;  %v757_v32 = vpop.permute.xlu2 %756  ;;  %v1704_v7 = vpack.c.bf16 %v1676_v3, %v1675_v62  ;;  %v2529_v8 = vpack.c.bf16 %v1676_v3, %v2499_v0 }
 0x130   : > { %844 = vst.msk [vmem:[#allocation2 + $0x58] sm:$0xff] %vm280_vm2, %v757_v32  ;;  %v453_v35 = vpop.f32.mrf.mxu0  ;;  %v2211_v50 = vpack.c.bf16 %v2182_v44, %v2181_v43  ;;  %v878_v26 = vadd.s32 72, %v6640_v6  ;;  %vm1293_vm12 = vcmp.ne.s32.totalorder %v961_v21, 0  ;;  %v975_v0 = vand.u32 15, %v879_v51  ;;  %v1829_v51 = vpop.f32.mrf.mxu1 }
 0x131   : > { %v454_v39 = vadd.f32 %v6591_v28, %v453_v35 }
 0x132   : > { %6095 = vmatmul.msk.bf16.gmra.mxu2 %vm280_vm2, %v1703_v30  ;;  %6128 = vmatmul.msk.bf16.gmra.mxu0 %vm280_vm2, %v2528_v31  ;;  %v968_v43 = vand.u32 15, %v878_v26  ;;  %vm1295_vm14 = vcmp.ne.s32.totalorder %v975_v0, 0 }
 0x133   : > { %v503_v42 = vmax.f32 %v454_v39, 0.0  ;;  %v6826_v21 = vsel %vm1295_vm14, 1.0, %v8575_v1 }
 0x134   : > { %vm1422_vm13 = vcmp.ne.s32.totalorder %v968_v43, 15 }
 0x135   : > { %535 = vst.msk [vmem:[#allocation3 + $0xa0] sm:$0xff] %vm280_vm2, %v503_v42  ;;  %780 = vrot.lane.b32.xlu2 %v503_v42, %s6497_s11  ;;  %v6803_v42 = vsel %vm1293_vm12, 1.0, %v8575_v1  ;;  %v6814_v60 = vsel %vm1422_vm13, 1.0, %v8575_v1 }
 0x137   : > { %v753_v49 = vpop.permute.xlu0 %752 }
 0x138   : > { %842 = vst.msk [vmem:[#allocation2 + $0x48] sm:$0xff] %vm280_vm2, %v753_v49  ;;  %v455_v52 = vpop.f32.mrf.mxu0 }
 0x139   : > { %v456_v55 = vadd.f32 %v6591_v28, %v455_v52  ;;  %6112 = vmatmul.msk.bf16.gmra.mxu3 %vm280_vm2, %v2211_v50 }
 0x13b   : > { %v504_v61 = vmax.f32 %v456_v55, 0.0  ;;  %6080 = vmatmul.msk.bf16.gmra.mxu1 %vm280_vm2, %v1753_v56 }
 0x13d   : > { %536 = vst.msk [vmem:[#allocation3 + $0xa8] sm:$0xff] %vm280_vm2, %v504_v61  ;;  %782 = vrot.lane.b32.xlu0 %v504_v61, %s6497_s11 }
 0x13f   : > { %v755_v5 = vpop.permute.xlu1 %754  ;;  %v2056_v9 = vld [vmem:[#allocation2 + $0x41] sm:$0xff] }
 0x140   : > { %843 = vst.msk [vmem:[#allocation2 + $0x50] sm:$0xff] %vm280_vm2, %v755_v5  ;;  %v458_v10 = vpop.f32.mrf.mxu0  ;;  %v2088_v11 = vpack.c.bf16 %v2056_v9, %v2056_v9  ;;  %v1549_v17 = vld [vmem:[#allocation2 + $0x47] sm:$0xff] }
 0x141   : > { %v459_v14 = vadd.f32 %v6591_v28, %v458_v10  ;;  %v1581_v25 = vpack.c.bf16 %v1549_v17, %v1549_v17  ;;  %v1726_v30 = vld [vmem:[#allocation2 + $0x48] sm:$0xff]  ;;  %v1728_v10 = vld [vmem:[#allocation2 + $0x58] sm:$0xff] }
 0x142   : > { %6096 = vmatmul.msk.bf16.gmra.mxu2 %vm280_vm2, %v1704_v7  ;;  %6129 = vmatmul.msk.bf16.gmra.mxu0 %vm280_vm2, %v2529_v8  ;;  %v2120_v20 = vunpack.c.l.bf16 %v2088_v11  ;;  %v880_v7 = vadd.s32 88, %v6640_v6 }
 0x143   : > { %v505_v22 = vmax.f32 %v459_v14, 0.0  ;;  %v1613_v37 = vunpack.c.l.bf16 %v1581_v25 }
 0x144   : > { %v2184_v24 = vmul.f32 %v6792_v15, %v2120_v20  ;;  %v982_v26 = vand.u32 15, %v880_v7 }
 0x145   : > { %537 = vst.msk [vmem:[#allocation3 + $0xb0] sm:$0xff] %vm280_vm2, %v505_v22  ;;  %784 = vrot.lane.b32.xlu1 %v505_v22, %s6497_s11  ;;  %v1677_v48 = vmul.f32 %v6803_v42, %v1613_v37  ;;  %v2501_v50 = vmul.f32 %v6776_v54, %v1613_v37 }
 0x146   : > { %v2212_v27 = vpack.c.bf16 %v2184_v24, %v2183_v23  ;;  %vm1424_vm15 = vcmp.ne.s32.totalorder %v982_v26, 15 }
 0x147   : > { %v763_v29 = vpop.permute.xlu2 %762  ;;  %v1727_v31 = vld [vmem:[#allocation2 + $0x50] sm:$0xff] }
 0x148   : > { %v1550_v32 = vld [vmem:[#allocation2 + $0x4f] sm:$0xff]  ;;  %847 = vst.msk [vmem:[#allocation2 + $0x70] sm:$0xff] %vm280_vm2, %v763_v29  ;;  %v460_v33 = vpop.f32.mrf.mxu0  ;;  %v1754_v34 = vpack.c.bf16 %v1727_v31, %v1726_v30  ;;  %v1551_v61 = vld [vmem:[#allocation2 + $0x57] sm:$0xff]  ;;  %v881_v30 = vadd.s32 96, %v6640_v6 }
 0x149   : > { %v1582_v35 = vpack.c.bf16 %v1550_v32, %v1550_v32  ;;  %v2057_v39 = vld [vmem:[#allocation2 + $0x49] sm:$0xff]  ;;  %v2058_v40 = vld [vmem:[#allocation2 + $0x51] sm:$0xff]  ;;  %v461_v41 = vadd.f32 %v6591_v28, %v460_v33  ;;  %6113 = vmatmul.msk.bf16.gmra.mxu3 %vm280_vm2, %v2212_v27  ;;  %v1583_v5 = vpack.c.bf16 %v1551_v61, %v1551_v61 }
 0x14a   : > { %v2089_v46 = vpack.c.bf16 %v2057_v39, %v2057_v39  ;;  %v2090_v47 = vpack.c.bf16 %v2058_v40, %v2058_v40 }
 0x14b   : > { %v1614_v44 = vunpack.c.l.bf16 %v1582_v35  ;;  %v506_v45 = vmax.f32 %v461_v41, 0.0  ;;  %6081 = vmatmul.msk.bf16.gmra.mxu1 %vm280_vm2, %v1754_v34  ;;  %v1615_v14 = vunpack.c.l.bf16 %v1583_v5 }
 0x14c   : > { %v2121_v56 = vunpack.c.l.bf16 %v2089_v46  ;;  %v2122_v57 = vunpack.c.l.bf16 %v2090_v47 }
 0x14d   : > { %v1678_v49 = vmul.f32 %v6654_v16, %v1614_v44  ;;  %538 = vst.msk [vmem:[#allocation3 + $0xb8] sm:$0xff] %vm280_vm2, %v506_v45  ;;  %786 = vrot.lane.b32.xlu2 %v506_v45, %s6497_s11  ;;  %v1679_v29 = vmul.f32 %v6826_v21, %v1615_v14  ;;  %v2503_v32 = vmul.f32 %v6803_v42, %v1615_v14  ;;  %v989_v45 = vand.u32 15, %v881_v30 }
 0x14e   : > { %v2185_v3 = vmul.f32 %v2121_v56, %v6654_v16  ;;  %v2186_v4 = vmul.f32 %v6814_v60, %v2122_v57 }
 0x14f   : > { %v1705_v52 = vpack.c.bf16 %v1678_v49, %v1677_v48  ;;  %v2530_v53 = vpack.c.bf16 %v1678_v49, %v2501_v50  ;;  %v759_v55 = vpop.permute.xlu0 %758  ;;  %v6842_v48 = vsel %vm1424_vm15, 1.0, %v8575_v1  ;;  %vm1297_vm0 = vcmp.ne.s32.totalorder %v989_v45, 0 }
 0x150   : > { %845 = vst.msk [vmem:[#allocation2 + $0x60] sm:$0xff] %vm280_vm2, %v759_v55  ;;  %v463_v59 = vpop.f32.mrf.mxu0  ;;  %v2213_v9 = vpack.c.bf16 %v2186_v4, %v2185_v3  ;;  %v6852_v4 = vsel %vm1297_vm0, 1.0, %v8575_v1  ;;  %v884_v45 = vadd.s32 120, %v6640_v6 }
 0x151   : > { %v464_v62 = vadd.f32 %v6591_v28, %v463_v59  ;;  %8605 = vst [vmem:[#allocation10_spill] sm:$0xff] %v6842_v48 }
 0x152   : > { %6097 = vmatmul.msk.bf16.gmra.mxu2 %vm280_vm2, %v1705_v52  ;;  %6130 = vmatmul.msk.bf16.gmra.mxu0 %vm280_vm2, %v2530_v53  ;;  %v1969_v52 = vpop.f32.mrf.mxu2 }
 0x153   : > { %v507_v2 = vmax.f32 %v464_v62, 0.0  ;;  %v6844_v56 = vadd.f32 %v1969_v52, %v1829_v51 }
 0x155   : > { %539 = vst.msk [vmem:[#allocation3 + $0xc0] sm:$0xff] %vm280_vm2, %v507_v2  ;;  %788 = vrot.lane.b32.xlu0 %v507_v2, %s6497_s11  ;;  %v882_v2 = vadd.s32 104, %v6640_v6 }
 0x157   : > { %v761_v8 = vpop.permute.xlu1 %760  ;;  %v1729_v11 = vld [vmem:[#allocation2 + $0x60] sm:$0xff]  ;;  %v996_v14 = vand.u32 15, %v882_v2  ;;  %v1010_v2 = vand.u32 15, %v884_v45 }
 0x158   : > { %v1552_v12 = vld [vmem:[#allocation2 + $0x5f] sm:$0xff]  ;;  %846 = vst.msk [vmem:[#allocation2 + $0x68] sm:$0xff] %vm280_vm2, %v761_v8  ;;  %v465_v17 = vpop.f32.mrf.mxu0  ;;  %v1755_v20 = vpack.c.bf16 %v1729_v11, %v1728_v10  ;;  %v1731_v8 = vld [vmem:[#allocation2 + $0x70] sm:$0xff] }
 0x159   : > { %v1584_v22 = vpack.c.bf16 %v1552_v12, %v1552_v12  ;;  %v466_v23 = vadd.f32 %v6591_v28, %v465_v17  ;;  %6114 = vmatmul.msk.bf16.gmra.mxu3 %vm280_vm2, %v2213_v9  ;;  %v2059_v24 = vld [vmem:[#allocation2 + $0x59] sm:$0xff]  ;;  %vm1426_vm1 = vcmp.ne.s32.totalorder %v996_v14, 15  ;;  %vm1428_vm5 = vcmp.ne.s32.totalorder %v1010_v2, 15 }
 0x15a   : > { %v2091_v33 = vpack.c.bf16 %v2059_v24, %v2059_v24  ;;  %v883_v24 = vadd.s32 112, %v6640_v6  ;;  %v887_v2 = vadd.s32 144, %v6640_v6 }
 0x15b   : > { %v1616_v25 = vunpack.c.l.bf16 %v1584_v22  ;;  %v508_v27 = vmax.f32 %v466_v23, 0.0  ;;  %6082 = vmatmul.msk.bf16.gmra.mxu1 %vm280_vm2, %v1755_v20 }
 0x15c   : > { %v2123_v44 = vunpack.c.l.bf16 %v2091_v33 }
 0x15d   : > { %v1680_v31 = vmul.f32 %v6654_v16, %v1616_v25  ;;  %540 = vst.msk [vmem:[#allocation3 + $0xc8] sm:$0xff] %vm280_vm2, %v508_v27  ;;  %790 = vrot.lane.b32.xlu1 %v508_v27, %s6497_s11 }
 0x15e   : > { %v2187_v57 = vmul.f32 %v2123_v44, %v6654_v16 }
 0x15f   : > { %v1706_v34 = vpack.c.bf16 %v1680_v31, %v1679_v29  ;;  %v2531_v35 = vpack.c.bf16 %v1680_v31, %v2503_v32  ;;  %v769_v37 = vpop.permute.xlu2 %768  ;;  %v2060_v39 = vld [vmem:[#allocation2 + $0x61] sm:$0xff]  ;;  %v1554_v46 = vld [vmem:[#allocation2 + $0x6f] sm:$0xff] }
 0x160   : > { %v1553_v40 = vld [vmem:[#allocation2 + $0x67] sm:$0xff]  ;;  %850 = vst.msk [vmem:[#allocation2 + $0x88] sm:$0xff] %vm280_vm2, %v769_v37  ;;  %v468_v41 = vpop.f32.mrf.mxu0  ;;  %v2092_v43 = vpack.c.bf16 %v2060_v39, %v2060_v39  ;;  %v1586_v55 = vpack.c.bf16 %v1554_v46, %v1554_v46  ;;  %v1003_v39 = vand.u32 15, %v883_v24  ;;  %v6891_v24 = vsel %vm1428_vm5, 1.0, %v8575_v1 }
 0x161   : > { %v469_v47 = vadd.f32 %v6591_v28, %v468_v41  ;;  %v1585_v50 = vpack.c.bf16 %v1553_v40, %v1553_v40  ;;  %v1730_v62 = vld [vmem:[#allocation2 + $0x68] sm:$0xff]  ;;  %8607 = vst [vmem:[#allocation12_spill] sm:$0xff] %v6891_v24 }
 0x162   : > { %6098 = vmatmul.msk.bf16.gmra.mxu2 %vm280_vm2, %v1706_v34  ;;  %6131 = vmatmul.msk.bf16.gmra.mxu0 %vm280_vm2, %v2531_v35  ;;  %v2124_v49 = vunpack.c.l.bf16 %v2092_v43  ;;  %v1618_v5 = vunpack.c.l.bf16 %v1586_v55  ;;  %v1756_v10 = vpack.c.bf16 %v1731_v8, %v1730_v62  ;;  %v2061_v11 = vld [vmem:[#allocation2 + $0x69] sm:$0xff]  ;;  %v6869_v34 = vsel %vm1426_vm1, 1.0, %v8575_v1 }
 0x163   : > { %v509_v53 = vmax.f32 %v469_v47, 0.0  ;;  %v1617_v0 = vunpack.c.l.bf16 %v1585_v50  ;;  %v2093_v23 = vpack.c.bf16 %v2061_v11, %v2061_v11  ;;  %8606 = vst [vmem:[#allocation11_spill] sm:$0xff] %v6869_v34  ;;  %vm1299_vm3 = vcmp.ne.s32.totalorder %v1003_v39, 0 }
 0x164   : > { %v2188_v59 = vmul.f32 %v6842_v48, %v2124_v49  ;;  %v1682_v20 = vmul.f32 %v6654_v16, %v1618_v5 }
 0x165   : > { %541 = vst.msk [vmem:[#allocation3 + $0xd0] sm:$0xff] %vm280_vm2, %v509_v53  ;;  %792 = vrot.lane.b32.xlu2 %v509_v53, %s6497_s11  ;;  %v1681_v12 = vmul.f32 %v6852_v4, %v1617_v0  ;;  %v2505_v22 = vmul.f32 %v6826_v21, %v1617_v0  ;;  %v2125_v32 = vunpack.c.l.bf16 %v2093_v23  ;;  %v6880_v0 = vsel %vm1299_vm3, 1.0, %v8575_v1 }
 0x166   : > { %v2214_v61 = vpack.c.bf16 %v2188_v59, %v2187_v57 }
 0x167   : > { %v765_v3 = vpop.permute.xlu0 %764  ;;  %v1707_v26 = vpack.c.bf16 %v1682_v20, %v1681_v12  ;;  %v2532_v27 = vpack.c.bf16 %v1682_v20, %v2505_v22  ;;  %v2189_v41 = vmul.f32 %v2125_v32, %v6654_v16 }
 0x168   : > { %848 = vst.msk [vmem:[#allocation2 + $0x78] sm:$0xff] %vm280_vm2, %v765_v3  ;;  %v470_v7 = vpop.f32.mrf.mxu0 }
 0x169   : > { %v471_v9 = vadd.f32 %v6591_v28, %v470_v7  ;;  %6115 = vmatmul.msk.bf16.gmra.mxu3 %vm280_vm2, %v2214_v61 }
 0x16b   : > { %v510_v17 = vmax.f32 %v471_v9, 0.0  ;;  %6083 = vmatmul.msk.bf16.gmra.mxu1 %vm280_vm2, %v1756_v10 }
 0x16d   : > { %542 = vst.msk [vmem:[#allocation3 + $0xd8] sm:$0xff] %vm280_vm2, %v510_v17  ;;  %794 = vrot.lane.b32.xlu0 %v510_v17, %s6497_s11 }
 0x16f   : > { %v767_v25 = vpop.permute.xlu1 %766  ;;  %v2062_v29 = vld [vmem:[#allocation2 + $0x71] sm:$0xff] }
 0x170   : > { %849 = vst.msk [vmem:[#allocation2 + $0x80] sm:$0xff] %vm280_vm2, %v767_v25  ;;  %v473_v30 = vpop.f32.mrf.mxu0  ;;  %v2094_v31 = vpack.c.bf16 %v2062_v29, %v2062_v29  ;;  %v1555_v35 = vld [vmem:[#allocation2 + $0x77] sm:$0xff] }
 0x171   : > { %v474_v33 = vadd.f32 %v6591_v28, %v473_v30  ;;  %v1587_v44 = vpack.c.bf16 %v1555_v35, %v1555_v35  ;;  %v1732_v49 = vld [vmem:[#allocation2 + $0x78] sm:$0xff]  ;;  %v886_v35 = vadd.s32 136, %v6640_v6 }
 0x172   : > { %6099 = vmatmul.msk.bf16.gmra.mxu2 %vm280_vm2, %v1707_v26  ;;  %6132 = vmatmul.msk.bf16.gmra.mxu0 %vm280_vm2, %v2532_v27  ;;  %v2126_v37 = vunpack.c.l.bf16 %v2094_v31  ;;  %v6446_v26 = vld [vmem:[%s8569_s2] ss:$0 sm:$0xff] }
 0x173   : > { %v511_v40 = vmax.f32 %v474_v33, 0.0  ;;  %v1619_v57 = vunpack.c.l.bf16 %v1587_v44 }
 0x174   : > { %v2190_v43 = vmul.f32 %v6869_v34, %v2126_v37 }
 0x175   : > { %543 = vst.msk [vmem:[#allocation3 + $0xe0] sm:$0xff] %vm280_vm2, %v511_v40  ;;  %796 = vrot.lane.b32.xlu1 %v511_v40, %s6497_s11  ;;  %v1683_v9 = vmul.f32 %v6880_v0, %v1619_v57  ;;  %v2507_v11 = vmul.f32 %v6852_v4, %v1619_v57  ;;  %v1734_v40 = vld [vmem:[#allocation2 + $0x88] sm:$0xff] }
 0x176   : > { %v2215_v46 = vpack.c.bf16 %v2190_v43, %v2189_v41 }
 0x177   : > { %v775_v47 = vpop.permute.xlu2 %774  ;;  %v1733_v50 = vld [vmem:[#allocation2 + $0x80] sm:$0xff] }
 0x178   : > { %v1556_v51 = vld [vmem:[#allocation2 + $0x7f] sm:$0xff]  ;;  %853 = vst.msk [vmem:[#allocation2 + $0xa0] sm:$0xff] %vm280_vm2, %v775_v47  ;;  %v475_v52 = vpop.f32.mrf.mxu0  ;;  %v1757_v53 = vpack.c.bf16 %v1733_v50, %v1732_v49  ;;  %v1557_v25 = vld [vmem:[#allocation2 + $0x87] sm:$0xff] }
 0x179   : > { %v1588_v55 = vpack.c.bf16 %v1556_v51, %v1556_v51  ;;  %v2063_v59 = vld [vmem:[#allocation2 + $0x79] sm:$0xff]  ;;  %v2064_v61 = vld [vmem:[#allocation2 + $0x81] sm:$0xff]  ;;  %v476_v62 = vadd.f32 %v6591_v28, %v475_v52  ;;  %6116 = vmatmul.msk.bf16.gmra.mxu3 %vm280_vm2, %v2215_v46  ;;  %v885_v28 = vadd.s32 128, %v6640_v6  ;;  %v1589_v33 = vpack.c.bf16 %v1557_v25, %v1557_v25 }
 0x17a   : > { %v2095_v7 = vpack.c.bf16 %v2063_v59, %v2063_v59  ;;  %v2096_v8 = vpack.c.bf16 %v2064_v61, %v2064_v61 }
 0x17b   : > { %v1620_v3 = vunpack.c.l.bf16 %v1588_v55  ;;  %v512_v5 = vmax.f32 %v476_v62, 0.0  ;;  %6084 = vmatmul.msk.bf16.gmra.mxu1 %vm280_vm2, %v1757_v53  ;;  %v1017_v29 = vand.u32 15, %v885_v28  ;;  %v1621_v44 = vunpack.c.l.bf16 %v1589_v33 }
 0x17c   : > { %v2127_v20 = vunpack.c.l.bf16 %v2095_v7  ;;  %v2128_v22 = vunpack.c.l.bf16 %v2096_v8  ;;  %v1024_v53 = vand.u32 15, %v886_v35 }
 0x17d   : > { %v1684_v10 = vmul.f32 %v6654_v16, %v1620_v3  ;;  %544 = vst.msk [vmem:[#allocation3 + $0xe8] sm:$0xff] %vm280_vm2, %v512_v5  ;;  %798 = vrot.lane.b32.xlu2 %v512_v5, %s6497_s11  ;;  %vm1301_vm6 = vcmp.ne.s32.totalorder %v1017_v29, 0  ;;  %v2509_v61 = vmul.f32 %v6880_v0, %v1621_v44 }
 0x17e   : > { %v2191_v31 = vmul.f32 %v2127_v20, %v6654_v16  ;;  %v2192_v32 = vmul.f32 %v6891_v24, %v2128_v22  ;;  %v6905_v47 = vsel %vm1301_vm6, 1.0, %v8575_v1  ;;  %vm1430_vm7 = vcmp.ne.s32.totalorder %v1024_v53, 15 }
 0x17f   : > { %v1708_v12 = vpack.c.bf16 %v1684_v10, %v1683_v9  ;;  %v2533_v14 = vpack.c.bf16 %v1684_v10, %v2507_v11  ;;  %v771_v17 = vpop.permute.xlu0 %770  ;;  %v1685_v57 = vmul.f32 %v6905_v47, %v1621_v44  ;;  %v1831_v9 = vpop.f32.mrf.mxu1 }
 0x180   : > { %851 = vst.msk [vmem:[#allocation2 + $0x90] sm:$0xff] %vm280_vm2, %v771_v17  ;;  %v478_v23 = vpop.f32.mrf.mxu0  ;;  %v2216_v39 = vpack.c.bf16 %v2192_v32, %v2191_v31  ;;  %v1031_v17 = vand.u32 15, %v887_v2 }
 0x181   : > { %v479_v27 = vadd.f32 %v6446_v26, %v478_v23 }
 0x182   : > { %6100 = vmatmul.msk.bf16.gmra.mxu2 %vm280_vm2, %v1708_v12  ;;  %6133 = vmatmul.msk.bf16.gmra.mxu0 %vm280_vm2, %v2533_v14  ;;  %v6919_v14 = vsel %vm1430_vm7, 1.0, %v8575_v1  ;;  %vm1303_vm8 = vcmp.ne.s32.totalorder %v1031_v17, 0  ;;  %vm4550_vm7 = vcmask 1045504  }
 0x183   : > { %v513_v30 = vmax.f32 %v479_v27, 0.0 }
 0x185   : > { %545 = vst.msk [vmem:[#allocation3 + $0xf0] sm:$0xff] %vm280_vm2, %v513_v30  ;;  %800 = vrot.lane.b32.xlu0 %v513_v30, %s6497_s11  ;;  %v888_v30 = vadd.s32 152, %v6640_v6 }
 0x187   : > { %v773_v37 = vpop.permute.xlu1 %772  ;;  %v1735_v41 = vld [vmem:[#allocation2 + $0x90] sm:$0xff] }
 0x188   : > { %v1558_v43 = vld [vmem:[#allocation2 + $0x8f] sm:$0xff]  ;;  %852 = vst.msk [vmem:[#allocation2 + $0x98] sm:$0xff] %vm280_vm2, %v773_v37  ;;  %v480_v45 = vpop.f32.mrf.mxu0  ;;  %v1758_v46 = vpack.c.bf16 %v1735_v41, %v1734_v40  ;;  %v1737_v37 = vld [vmem:[#allocation2 + $0xa0] sm:$0xff] }
 0x189   : > { %v1590_v49 = vpack.c.bf16 %v1558_v43, %v1558_v43  ;;  %v481_v50 = vadd.f32 %v6446_v26, %v480_v45  ;;  %6117 = vmatmul.msk.bf16.gmra.mxu3 %vm280_vm2, %v2216_v39  ;;  %v2065_v51 = vld [vmem:[#allocation2 + $0x89] sm:$0xff]  ;;  %v6926_v39 = vsel %vm1303_vm8, 1.0, %v8575_v1  ;;  %v1038_v43 = vand.u32 15, %v888_v30 }
 0x18a   : > { %v2097_v62 = vpack.c.bf16 %v2065_v51, %v2065_v51  ;;  %vm675_vm8 = vcmask 97344  }
 0x18b   : > { %v1622_v52 = vunpack.c.l.bf16 %v1590_v49  ;;  %v514_v55 = vmax.f32 %v481_v50, 0.0  ;;  %6085 = vmatmul.msk.bf16.gmra.mxu1 %vm280_vm2, %v1758_v46  ;;  %v1971_v50 = vpop.f32.mrf.mxu2  ;;  %vm1432_vm9 = vcmp.ne.s32.totalorder %v1038_v43, 15 }
 0x18c   : > { %v2129_v11 = vunpack.c.l.bf16 %v2097_v62 }
 0x18d   : > { %v1686_v59 = vmul.f32 %v6654_v16, %v1622_v52  ;;  %546 = vst.msk [vmem:[#allocation3 + $0xf8] sm:$0xff] %vm280_vm2, %v514_v55  ;;  %802 = vrot.lane.b32.xlu1 %v514_v55, %s6497_s11  ;;  %v889_v55 = vadd.s32 160, %v6640_v6 }
 0x18e   : > { %v2193_v25 = vmul.f32 %v2129_v11, %v6654_v16 }
 0x18f   : > { %v1709_v3 = vpack.c.bf16 %v1686_v59, %v1685_v57  ;;  %v2534_v5 = vpack.c.bf16 %v1686_v59, %v2509_v61  ;;  %v781_v7 = vpop.permute.xlu2 %780  ;;  %v2066_v8 = vld [vmem:[#allocation2 + $0x91] sm:$0xff]  ;;  %v1560_v12 = vld [vmem:[#allocation2 + $0x9f] sm:$0xff] }
 0x190   : > { %856 = vst.msk [vmem:[#allocation2 + $0xb8] sm:$0xff] %vm280_vm2, %v781_v7  ;;  %v2098_v10 = vpack.c.bf16 %v2066_v8, %v2066_v8  ;;  %v1559_v28 = vld [vmem:[#allocation2 + $0x97] sm:$0xff]  ;;  %v1592_v23 = vpack.c.bf16 %v1560_v12, %v1560_v12 }
 0x191   : > { %v1591_v22 = vpack.c.bf16 %v1559_v28, %v1559_v28  ;;  %v1736_v29 = vld [vmem:[#allocation2 + $0x98] sm:$0xff]  ;;  %v1045_v28 = vand.u32 15, %v889_v55 }
 0x192   : > { %6101 = vmatmul.msk.bf16.gmra.mxu2 %vm280_vm2, %v1709_v3  ;;  %6134 = vmatmul.msk.bf16.gmra.mxu0 %vm280_vm2, %v2534_v5  ;;  %v2130_v20 = vunpack.c.l.bf16 %v2098_v10  ;;  %v1624_v33 = vunpack.c.l.bf16 %v1592_v23  ;;  %v1759_v40 = vpack.c.bf16 %v1737_v37, %v1736_v29  ;;  %v2067_v41 = vld [vmem:[#allocation2 + $0x99] sm:$0xff]  ;;  %v1972_v10 = vadd.f32 %v1971_v50, %v1831_v9 }
 0x193   : > { %v1623_v32 = vunpack.c.l.bf16 %v1591_v22  ;;  %v2099_v52 = vpack.c.bf16 %v2067_v41, %v2067_v41  ;;  %vm1305_vm10 = vcmp.ne.s32.totalorder %v1045_v28, 0 }
 0x194   : > { %v2194_v26 = vmul.f32 %v6919_v14, %v2130_v20  ;;  %v1688_v46 = vmul.f32 %v6654_v16, %v1624_v33 }
 0x195   : > { %v1687_v45 = vmul.f32 %v6926_v39, %v1623_v32  ;;  %v2511_v49 = vmul.f32 %v6905_v47, %v1623_v32  ;;  %v2131_v7 = vunpack.c.l.bf16 %v2099_v52 }
 0x196   : > { %v2217_v27 = vpack.c.bf16 %v2194_v26, %v2193_v25 }
 0x197   : > { %v777_v31 = vpop.permute.xlu0 %776  ;;  %v1710_v61 = vpack.c.bf16 %v1688_v46, %v1687_v45  ;;  %v2535_v62 = vpack.c.bf16 %v1688_v46, %v2511_v49  ;;  %v2195_v22 = vmul.f32 %v2131_v7, %v6654_v16  ;;  %v891_v7 = vadd.s32 176, %v6640_v6 }
 0x198   : > { %v1834_v35 = vpop.f32.mrf.mxu1  ;;  %854 = vst.msk [vmem:[#allocation2 + $0xa8] sm:$0xff] %vm280_vm2, %v777_v31 }
 0x199   : > { %6118 = vmatmul.msk.bf16.gmra.mxu3 %vm280_vm2, %v2217_v27  ;;  %v890_v27 = vadd.s32 168, %v6640_v6 }
 0x19b   : > { %6086 = vmatmul.msk.bf16.gmra.mxu1 %vm280_vm2, %v1759_v40  ;;  %v2287_v44 = vpop.f32.mrf.mxu3  ;;  %v1052_v49 = vand.u32 15, %v890_v27 }
 0x19c   : > { %v2367_v51 = vadd.f32 %v2287_v44, %v6844_v56  ;;  %v6941_v56 = vsel %vm1432_vm9, 1.0, %v8575_v1  ;;  %vm4310_vm9 = vcmask 228448  }
 0x19d   : > { %vm1434_vm11 = vcmp.ne.s32.totalorder %v1052_v49, 15 }
 0x19f   : > { %v2605_v53 = vpop.f32.mrf.mxu0  ;;  %v779_v59 = vpop.permute.xlu1 %778  ;;  %v2068_v2 = vld [vmem:[#allocation2 + $0xa1] sm:$0xff] }
 0x1a0   : > { %v6935_v57 = vadd.f32 %v2605_v53, %v2367_v51  ;;  %855 = vst.msk [vmem:[#allocation2 + $0xb0] sm:$0xff] %vm280_vm2, %v779_v59  ;;  %v1836_v3 = vpop.f32.mrf.mxu1  ;;  %v2100_v5 = vpack.c.bf16 %v2068_v2, %v2068_v2  ;;  %v1561_v8 = vld [vmem:[#allocation2 + $0xa7] sm:$0xff] }
 0x1a1   : > { %v1593_v25 = vpack.c.bf16 %v1561_v8, %v1561_v8  ;;  %v1738_v9 = vld [vmem:[#allocation2 + $0xa8] sm:$0xff] }
 0x1a2   : > { %6102 = vmatmul.msk.bf16.gmra.mxu2 %vm280_vm2, %v1710_v61  ;;  %6135 = vmatmul.msk.bf16.gmra.mxu0 %vm280_vm2, %v2535_v62  ;;  %v2132_v11 = vunpack.c.l.bf16 %v2100_v5 }
 0x1a3   : > { %v2289_v12 = vpop.f32.mrf.mxu3  ;;  %v1625_v44 = vunpack.c.l.bf16 %v1593_v25 }
 0x1a4   : > { %v2368_v20 = vadd.f32 %v2289_v12, %v1972_v10  ;;  %v2196_v23 = vmul.f32 %v6941_v56, %v2132_v11 }
 0x1a5   : > { %v1974_v17 = vpop.f32.mrf.mxu2  ;;  %v2513_v62 = vmul.f32 %v6926_v39, %v1625_v44 }
 0x1a6   : > { %v1975_v26 = vadd.f32 %v1974_v17, %v1834_v35  ;;  %v2218_v30 = vpack.c.bf16 %v2196_v23, %v2195_v22  ;;  %v6951_v35 = vsel %vm1305_vm10, 1.0, %v8575_v1  ;;  %v6962_v23 = vsel %vm1434_vm11, 1.0, %v8575_v1 }
 0x1a7   : > { %v2607_v29 = vpop.f32.mrf.mxu0  ;;  %v787_v32 = vpop.permute.xlu2 %786  ;;  %v1739_v33 = vld [vmem:[#allocation2 + $0xb0] sm:$0xff]  ;;  %v1689_v59 = vmul.f32 %v6951_v35, %v1625_v44  ;;  %vm4841_vm10 = vcmask 260096   ;;  %vm4847_vm11 = vcmask 293120  }
 0x1a8   : > { %v6946_v31 = vadd.f32 %v2607_v29, %v2368_v20  ;;  %v1562_v37 = vld [vmem:[#allocation2 + $0xaf] sm:$0xff]  ;;  %859 = vst.msk [vmem:[#allocation2 + $0xd0] sm:$0xff] %vm280_vm2, %v787_v32  ;;  %v1839_v40 = vpop.f32.mrf.mxu1  ;;  %v1760_v41 = vpack.c.bf16 %v1739_v33, %v1738_v9  ;;  %v1563_v25 = vld [vmem:[#allocation2 + $0xb7] sm:$0xff] }
 0x1a9   : > { %v1594_v43 = vpack.c.bf16 %v1562_v37, %v1562_v37  ;;  %v2069_v45 = vld [vmem:[#allocation2 + $0xa9] sm:$0xff]  ;;  %v2070_v46 = vld [vmem:[#allocation2 + $0xb1] sm:$0xff]  ;;  %6119 = vmatmul.msk.bf16.gmra.mxu3 %vm280_vm2, %v2218_v30  ;;  %v1595_v29 = vpack.c.bf16 %v1563_v25, %v1563_v25 }
 0x1aa   : > { %v2101_v51 = vpack.c.bf16 %v2069_v45, %v2069_v45  ;;  %v2102_v52 = vpack.c.bf16 %v2070_v46, %v2070_v46  ;;  %v1740_v46 = vld [vmem:[#allocation2 + $0xb8] sm:$0xff] }
 0x1ab   : > { %v1626_v50 = vunpack.c.l.bf16 %v1594_v43  ;;  %6087 = vmatmul.msk.bf16.gmra.mxu1 %vm280_vm2, %v1760_v41  ;;  %v892_v41 = vadd.s32 184, %v6640_v6 }
 0x1ac   : > { %v2292_v55 = vpop.f32.mrf.mxu3  ;;  %v2133_v17 = vunpack.c.l.bf16 %v2101_v51  ;;  %v2134_v20 = vunpack.c.l.bf16 %v2102_v52  ;;  %v1627_v51 = vunpack.c.l.bf16 %v1595_v29 }
 0x1ad   : > { %v1976_v53 = vpop.f32.mrf.mxu2  ;;  %v1690_v61 = vmul.f32 %v6654_v16, %v1626_v50  ;;  %v2369_v5 = vadd.f32 %v2292_v55, %v1975_v26 }
 0x1ae   : > { %v1977_v2 = vadd.f32 %v1976_v53, %v1836_v3  ;;  %v1059_v3 = vand.u32 15, %v891_v7  ;;  %v2197_v26 = vmul.f32 %v2133_v17, %v6654_v16  ;;  %v2198_v27 = vmul.f32 %v6962_v23, %v2134_v20 }
 0x1af   : > { %v2610_v8 = vpop.f32.mrf.mxu0  ;;  %v1711_v10 = vpack.c.bf16 %v1690_v61, %v1689_v59  ;;  %v2536_v11 = vpack.c.bf16 %v1690_v61, %v2513_v62  ;;  %v783_v12 = vpop.permute.xlu0 %782  ;;  %v1066_v62 = vand.u32 15, %v892_v41  ;;  %v893_v20 = vadd.s32 192, %v6640_v6 }
 0x1b0   : > { %v6958_v28 = vadd.f32 %v2610_v8, %v2369_v5  ;;  %v1841_v22 = vpop.f32.mrf.mxu1  ;;  %857 = vst.msk [vmem:[#allocation2 + $0xc0] sm:$0xff] %vm280_vm2, %v783_v12  ;;  %vm1307_vm12 = vcmp.ne.s32.totalorder %v1059_v3, 0  ;;  %v2219_v45 = vpack.c.bf16 %v2198_v27, %v2197_v26 }
 0x1b1   : > { %v6973_v55 = vsel %vm1307_vm12, 1.0, %v8575_v1  ;;  %vm1436_vm13 = vcmp.ne.s32.totalorder %v1066_v62, 15 }
 0x1b2   : > { %6103 = vmatmul.msk.bf16.gmra.mxu2 %vm280_vm2, %v1711_v10  ;;  %6136 = vmatmul.msk.bf16.gmra.mxu0 %vm280_vm2, %v2536_v11  ;;  %8608 = vst [vmem:[#allocation13_spill] sm:$0xff] %v6973_v55  ;;  %v2515_v10 = vmul.f32 %v6951_v35, %v1627_v51 }
 0x1b4   : > { %v2294_v32 = vpop.f32.mrf.mxu3 }
 0x1b5   : > { %v1979_v30 = vpop.f32.mrf.mxu2  ;;  %v2370_v33 = vadd.f32 %v2294_v32, %v1977_v2  ;;  %v1691_v2 = vmul.f32 %v6973_v55, %v1627_v51 }
 0x1b6   : > { %v1980_v9 = vadd.f32 %v1979_v30, %v1839_v40 }
 0x1b7   : > { %v2612_v37 = vpop.f32.mrf.mxu0  ;;  %v785_v44 = vpop.permute.xlu1 %784  ;;  %v1741_v49 = vld [vmem:[#allocation2 + $0xc0] sm:$0xff] }
 0x1b8   : > { %v6969_v43 = vadd.f32 %v2612_v37, %v2370_v33  ;;  %v1564_v50 = vld [vmem:[#allocation2 + $0xbf] sm:$0xff]  ;;  %858 = vst.msk [vmem:[#allocation2 + $0xc8] sm:$0xff] %vm280_vm2, %v785_v44  ;;  %v1844_v52 = vpop.f32.mrf.mxu1  ;;  %v1761_v53 = vpack.c.bf16 %v1741_v49, %v1740_v46 }
 0x1b9   : > { %v1596_v40 = vpack.c.bf16 %v1564_v50, %v1564_v50  ;;  %6120 = vmatmul.msk.bf16.gmra.mxu3 %vm280_vm2, %v2219_v45  ;;  %v2071_v59 = vld [vmem:[#allocation2 + $0xb9] sm:$0xff] }
 0x1ba   : > { %v2103_v11 = vpack.c.bf16 %v2071_v59, %v2071_v59 }
 0x1bb   : > { %v1628_v61 = vunpack.c.l.bf16 %v1596_v40  ;;  %6088 = vmatmul.msk.bf16.gmra.mxu1 %vm280_vm2, %v1761_v53 }
 0x1bc   : > { %v2297_v7 = vpop.f32.mrf.mxu3  ;;  %v2135_v37 = vunpack.c.l.bf16 %v2103_v11 }
 0x1bd   : > { %v1981_v5 = vpop.f32.mrf.mxu2  ;;  %v1692_v8 = vmul.f32 %v6654_v16, %v1628_v61  ;;  %v2371_v17 = vadd.f32 %v2297_v7, %v1980_v9  ;;  %v1073_v9 = vand.u32 15, %v893_v20  ;;  %v894_v7 = vadd.s32 200, %v6640_v6 }
 0x1be   : > { %v1982_v12 = vadd.f32 %v1981_v5, %v1841_v22  ;;  %v6987_v22 = vsel %vm1436_vm13, 1.0, %v8575_v1  ;;  %v2199_v53 = vmul.f32 %v2135_v37, %v6654_v16 }
 0x1bf   : > { %v2615_v25 = vpop.f32.mrf.mxu0  ;;  %v1712_v3 = vpack.c.bf16 %v1692_v8, %v1691_v2  ;;  %v2537_v26 = vpack.c.bf16 %v1692_v8, %v2515_v10  ;;  %v793_v29 = vpop.permute.xlu2 %792  ;;  %v2072_v30 = vld [vmem:[#allocation2 + $0xc1] sm:$0xff]  ;;  %v1566_v44 = vld [vmem:[#allocation2 + $0xcf] sm:$0xff]  ;;  %8609 = vst [vmem:[#allocation14_spill] sm:$0xff] %v6987_v22  ;;  %vm1309_vm14 = vcmp.ne.s32.totalorder %v1073_v9, 0 }
 0x1c0   : > { %v6981_v27 = vadd.f32 %v2615_v25, %v2371_v17  ;;  %862 = vst.msk [vmem:[#allocation2 + $0xe8] sm:$0xff] %vm280_vm2, %v793_v29  ;;  %v1846_v32 = vpop.f32.mrf.mxu1  ;;  %v2104_v33 = vpack.c.bf16 %v2072_v30, %v2072_v30  ;;  %v1565_v41 = vld [vmem:[#allocation2 + $0xc7] sm:$0xff]  ;;  %v1598_v49 = vpack.c.bf16 %v1566_v44, %v1566_v44  ;;  %v1743_v25 = vld [vmem:[#allocation2 + $0xd0] sm:$0xff] }
 0x1c1   : > { %v1597_v46 = vpack.c.bf16 %v1565_v41, %v1565_v41  ;;  %v1742_v5 = vld [vmem:[#allocation2 + $0xc8] sm:$0xff] }
 0x1c2   : > { %6104 = vmatmul.msk.bf16.gmra.mxu2 %vm280_vm2, %v1712_v3  ;;  %6137 = vmatmul.msk.bf16.gmra.mxu0 %vm280_vm2, %v2537_v26  ;;  %v2136_v45 = vunpack.c.l.bf16 %v2104_v33  ;;  %v1630_v17 = vunpack.c.l.bf16 %v1598_v49  ;;  %v6996_v3 = vsel %vm1309_vm14, 1.0, %v8575_v1  ;;  %v1080_v26 = vand.u32 15, %v894_v7  ;;  %v2961_v9 = vld [vmem:[#allocation2 + $0xc9] sm:$0xff] }
 0x1c3   : > { %v1629_v11 = vunpack.c.l.bf16 %v1597_v46  ;;  %8610 = vst [vmem:[#allocation15_spill] sm:$0xff] %v6996_v3  ;;  %v895_v49 = vadd.s32 208, %v6640_v6 }
 0x1c4   : > { %v2299_v51 = vpop.f32.mrf.mxu3  ;;  %v2200_v40 = vmul.f32 %v6987_v22, %v2136_v45  ;;  %v1694_v30 = vmul.f32 %v6654_v16, %v1630_v17  ;;  %vm1438_vm15 = vcmp.ne.s32.totalorder %v1080_v26, 15 }
 0x1c5   : > { %v1984_v50 = vpop.f32.mrf.mxu2  ;;  %v2372_v61 = vadd.f32 %v2299_v51, %v1982_v12  ;;  %v2073_v12 = vld [vmem:[#allocation2 + $0xc9] sm:$0xff]  ;;  %v1693_v29 = vmul.f32 %v6996_v3, %v1629_v11  ;;  %v2517_v33 = vmul.f32 %v6973_v55, %v1629_v11 }
 0x1c6   : > { %v1985_v59 = vadd.f32 %v1984_v50, %v1844_v52  ;;  %v2220_v2 = vpack.c.bf16 %v2200_v40, %v2199_v53  ;;  %v1762_v52 = vpack.c.bf16 %v1743_v25, %v1742_v5  ;;  %v2105_v44 = vpack.c.bf16 %v2073_v12, %v2073_v12 }
 0x1c7   : > { %v2617_v62 = vpop.f32.mrf.mxu0  ;;  %v789_v10 = vpop.permute.xlu0 %788  ;;  %v1713_v40 = vpack.c.bf16 %v1694_v30, %v1693_v29 }
 0x1c8   : > { %v6992_v8 = vadd.f32 %v2617_v62, %v2372_v61  ;;  %v1849_v20 = vpop.f32.mrf.mxu1  ;;  %860 = vst.msk [vmem:[#allocation2 + $0xd8] sm:$0xff] %vm280_vm2, %v789_v10  ;;  %v2538_v61 = vpack.c.bf16 %v1694_v30, %v2517_v33  ;;  %v2137_v10 = vunpack.c.l.bf16 %v2105_v44 }
 0x1c9   : > { %6121 = vmatmul.msk.bf16.gmra.mxu3 %vm280_vm2, %v2220_v2  ;;  %v2993_v2 = vpack.c.bf16 %v2961_v9, %v2961_v9 }
 0x1cb   : > { %6089 = vmatmul.msk.bf16.gmra.mxu1 %vm280_vm2, %v1762_v52  ;;  %v3025_v26 = vunpack.c.l.bf16 %v2993_v2 }
 0x1cc   : > { %v2302_v41 = vpop.f32.mrf.mxu3 }
 0x1cd   : > { %v1986_v37 = vpop.f32.mrf.mxu2  ;;  %v2373_v46 = vadd.f32 %v2302_v41, %v1985_v59  ;;  %v1087_v59 = vand.u32 15, %v895_v49  ;;  %v896_v49 = vadd.s32 216, %v6640_v6 }
 0x1ce   : > { %v1987_v45 = vadd.f32 %v1986_v37, %v1846_v32  ;;  %v7010_v32 = vsel %vm1438_vm15, 1.0, %v8575_v1  ;;  %v2201_v37 = vmul.f32 %v2137_v10, %v6654_v16 }
 0x1cf   : > { %v2620_v50 = vpop.f32.mrf.mxu0  ;;  %v791_v53 = vpop.permute.xlu1 %790  ;;  %v2074_v62 = vld [vmem:[#allocation2 + $0xd1] sm:$0xff]  ;;  %vm7016_vm0 = vcmp.ne.s32.totalorder %v1087_v59, 0 }
 0x1d0   : > { %v7004_v51 = vadd.f32 %v2620_v50, %v2373_v46  ;;  %861 = vst.msk [vmem:[#allocation2 + $0xe0] sm:$0xff] %vm280_vm2, %v791_v53  ;;  %v1851_v5 = vpop.f32.mrf.mxu1  ;;  %v2106_v7 = vpack.c.bf16 %v2074_v62, %v2074_v62  ;;  %v1567_v11 = vld [vmem:[#allocation2 + $0xd7] sm:$0xff] }
 0x1d1   : > { %v2962_v17 = vld [vmem:[#allocation2 + $0xd1] sm:$0xff]  ;;  %v1599_v12 = vpack.c.bf16 %v1567_v11, %v1567_v11 }
 0x1d2   : > { %6105 = vmatmul.msk.bf16.gmra.mxu2 %vm280_vm2, %v1713_v40  ;;  %6138 = vmatmul.msk.bf16.gmra.mxu0 %vm280_vm2, %v2538_v61  ;;  %v2994_v25 = vpack.c.bf16 %v2962_v17, %v2962_v17  ;;  %v2138_v52 = vunpack.c.l.bf16 %v2106_v7  ;;  %v1744_v40 = vld [vmem:[#allocation2 + $0xd8] sm:$0xff]  ;;  %v7024_v17 = vmul.f32 %v3025_v26, %v6654_v16 }
 0x1d3   : > { %v1631_v11 = vunpack.c.l.bf16 %v1599_v12  ;;  %v1094_v12 = vand.u32 15, %v896_v49 }
 0x1d4   : > { %v7012_v29 = vunpack.c.l.bf16 %v2994_v25  ;;  %v2304_v33 = vpop.f32.mrf.mxu3  ;;  %v2202_v41 = vmul.f32 %v7010_v32, %v2138_v52  ;;  %8614 = vst [vmem:[#allocation17_spill] sm:$0xff] %v7024_v17  ;;  %v7034_v25 = vsel %vm7016_vm0, 1.0, %v8575_v1 }
 0x1d5   : > { %v1989_v30 = vpop.f32.mrf.mxu2  ;;  %v2374_v9 = vadd.f32 %v2304_v33, %v1987_v45  ;;  %8616 = vst [vmem:[#allocation19_spill] sm:$0xff] %v7034_v25  ;;  %v2519_v49 = vmul.f32 %v6996_v3, %v1631_v11  ;;  %vm1440_vm1 = vcmp.ne.s32.totalorder %v1094_v12, 15 }
 0x1d6   : > { %v1990_v44 = vadd.f32 %v1989_v30, %v1849_v20  ;;  %v2221_v53 = vpack.c.bf16 %v2202_v41, %v2201_v37  ;;  %v7028_v20 = vmul.f32 %v6962_v23, %v7012_v29 }
 0x1d7   : > { %v2622_v50 = vpop.f32.mrf.mxu0  ;;  %v799_v62 = vpop.permute.xlu2 %798  ;;  %v1745_v2 = vld [vmem:[#allocation2 + $0xe0] sm:$0xff] }
 0x1d8   : > { %v7021_v61 = vadd.f32 %v2622_v50, %v2374_v9  ;;  %v1568_v7 = vld [vmem:[#allocation2 + $0xdf] sm:$0xff]  ;;  %8615 = vst [vmem:[#allocation18_spill] sm:$0xff] %v7028_v20  ;;  %v1854_v45 = vpop.f32.mrf.mxu1  ;;  %v1763_v59 = vpack.c.bf16 %v1745_v2, %v1744_v40  ;;  %v1695_v40 = vmul.f32 %v7034_v25, %v1631_v11  ;;  %v8620_v11 = vmov 0.0  }
 0x1d9   : > { %v2075_v10 = vld [vmem:[#allocation2 + $0xd9] sm:$0xff]  ;;  %865 = vst.msk [vmem:[#allocation2 + $0x100] sm:$0xff] %vm280_vm2, %v799_v62  ;;  %v1600_v52 = vpack.c.bf16 %v1568_v7, %v1568_v7  ;;  %v2076_v30 = vld [vmem:[#allocation2 + $0xe1] sm:$0xff]  ;;  %6122 = vmatmul.msk.bf16.gmra.mxu3 %vm280_vm2, %v2221_v53  ;;  %v7056_v12 = vsel %vm1440_vm1, 1.0, %v8620_v11 }
 0x1da   : > { %8613 = vst [vmem:[#allocation16_spill] sm:$0xff] %v7021_v61  ;;  %v2963_v26 = vld [vmem:[#allocation2 + $0xd9] sm:$0xff]  ;;  %v2964_v33 = vld [vmem:[#allocation2 + $0xe1] sm:$0xff]  ;;  %v2107_v9 = vpack.c.bf16 %v2075_v10, %v2075_v10  ;;  %v2108_v46 = vpack.c.bf16 %v2076_v30, %v2076_v30 }
 0x1db   : > { %v1632_v41 = vunpack.c.l.bf16 %v1600_v52  ;;  %v2995_v50 = vpack.c.bf16 %v2963_v26, %v2963_v26  ;;  %6090 = vmatmul.msk.bf16.gmra.mxu1 %vm280_vm2, %v1763_v59  ;;  %v2996_v62 = vpack.c.bf16 %v2964_v33, %v2964_v33  ;;  %v897_v52 = vadd.s32 224, %v6640_v6 }
 0x1dc   : > { %v2307_v7 = vpop.f32.mrf.mxu3  ;;  %v2139_v59 = vunpack.c.l.bf16 %v2107_v9  ;;  %v2140_v33 = vunpack.c.l.bf16 %v2108_v46 }
 0x1dd   : > { %v1991_v2 = vpop.f32.mrf.mxu2  ;;  %v1696_v1 = vmul.f32 %v6654_v16, %v1632_v41  ;;  %v3027_v53 = vunpack.c.l.bf16 %v2995_v50  ;;  %v2375_v55 = vadd.f32 %v2307_v7, %v1990_v44  ;;  %v6160_v41 = vld [vmem:[%s8570_s3 + $0x14] sm:$0xf]  ;;  %v7049_v61 = vunpack.c.l.bf16 %v2996_v62  ;;  %v6177_v50 = vld [vmem:[%s8570_s3 + $0x18] sm:$0xf] }
 0x1de   : > { %v1992_v18 = vadd.f32 %v1991_v2, %v1851_v5  ;;  %v1101_v9 = vand.u32 15, %v897_v52  ;;  %v3452_v46 = vsel %vm1816_vm4, %v6177_v50, 0  ;;  %v2203_v62 = vmul.f32 %v2139_v59, %v6654_v16  ;;  %v1746_v59 = vld [vmem:[#allocation2 + $0xe8] sm:$0xff] }
 0x1df   : > { %v2625_v10 = vpop.f32.mrf.mxu0  ;;  %v1714_v26 = vpack.c.bf16 %v1696_v1, %v1695_v40  ;;  %v2539_v37 = vpack.c.bf16 %v1696_v1, %v2519_v49  ;;  %v795_v30 = vpop.permute.xlu0 %794  ;;  %8618 = vst [vmem:[#allocation21_spill] sm:$0xff] %v7049_v61  ;;  %v7052_v5 = vmul.f32 %v3027_v53, %v6654_v16  ;;  %v1569_v1 = vld [vmem:[#allocation2 + $0xe7] sm:$0xff]  ;;  %v7066_v40 = vmul.f32 %v6987_v22, %v7049_v61 }
 0x1e0   : > { %v7044_v20 = vadd.f32 %v2625_v10, %v2375_v55  ;;  %v1856_v44 = vpop.f32.mrf.mxu1  ;;  %863 = vst.msk [vmem:[#allocation2 + $0xf0] sm:$0xff] %vm280_vm2, %v795_v30  ;;  %v3134_v55 = vsel %vm1816_vm4, %v6160_v41, 0  ;;  %v2204_v2 = vmul.f32 %v7056_v12, %v2140_v33  ;;  %v1601_v7 = vpack.c.bf16 %v1569_v1, %v1569_v1  ;;  %3461 = vmatpush.bf16.msrb.mxu3 %v3452_v46 }
 0x1e1   : > { %8619 = vst [vmem:[#allocation22_spill] sm:$0xff] %v7052_v5  ;;  %3143 = vmatpush.bf16.msrb.mxu2 %v3134_v55  ;;  %vm1313_vm3 = vcmp.ne.s32.totalorder %v1101_v9, 0  ;;  %v898_v30 = vadd.s32 232, %v6640_v6  ;;  %v6194_v9 = vld [vmem:[%s8570_s3 + $0x1c] sm:$0xf] }
 0x1e2   : > { %8617 = vst [vmem:[#allocation20_spill] sm:$0xff] %v7044_v20  ;;  %6106 = vmatmul.msk.bf16.gmra.mxu2 %vm280_vm2, %v1714_v26  ;;  %6139 = vmatmul.msk.bf16.gmra.mxu0 %vm280_vm2, %v2539_v37  ;;  %v2222_v50 = vpack.c.bf16 %v2204_v2, %v2203_v62  ;;  %v1633_v1 = vunpack.c.l.bf16 %v1601_v7 }
 0x1e3   : > { %8621 = vst [vmem:[#allocation23_spill] sm:$0xff] %v7066_v40  ;;  %v7078_v40 = vsel %vm1313_vm3, 1.0, %v8620_v11  ;;  %v1108_v2 = vand.u32 15, %v898_v30 }
 0x1e4   : > { %v2309_v53 = vpop.f32.mrf.mxu3  ;;  %8623 = vst [vmem:[#allocation25_spill] sm:$0xff] %v7078_v40  ;;  %v1697_v7 = vmul.f32 %v7078_v40, %v1633_v1 }
 0x1e5   : > { %v1994_v49 = vpop.f32.mrf.mxu2  ;;  %v2376_v10 = vadd.f32 %v2309_v53, %v1992_v18  ;;  %v6211_v53 = vld [vmem:[%s8570_s3 + $0x20] sm:$0xf]  ;;  %vm1442_vm5 = vcmp.ne.s32.totalorder %v1108_v2, 15 }
 0x1e6   : > { %v1995_v52 = vadd.f32 %v1994_v49, %v1854_v45  ;;  %v3674_v49 = vsel %vm1816_vm4, %v6194_v9, 0  ;;  %v3992_v30 = vsel %vm1816_vm4, %v6211_v53, 0 }
 0x1e7   : > { %v2627_v26 = vpop.f32.mrf.mxu0  ;;  %v797_v55 = vpop.permute.xlu1 %796  ;;  %v1747_v3 = vld [vmem:[#allocation2 + $0xf0] sm:$0xff]  ;;  %3683 = vmatpush.bf16.msra.mxu0 %v3674_v49  ;;  %4001 = vmatpush.bf16.msra.mxu1 %v3992_v30 }
 0x1e8   : > { %v7074_v41 = vadd.f32 %v2627_v26, %v2376_v10  ;;  %v1570_v33 = vld [vmem:[#allocation2 + $0xef] sm:$0xff]  ;;  %864 = vst.msk [vmem:[#allocation2 + $0xf8] sm:$0xff] %vm280_vm2, %v797_v55  ;;  %v1859_v46 = vpop.f32.mrf.mxu1  ;;  %v1764_v37 = vpack.c.bf16 %v1747_v3, %v1746_v59  ;;  %v2521_v3 = vmul.f32 %v7034_v25, %v1633_v1 }
 0x1e9   : > { %v1602_v18 = vpack.c.bf16 %v1570_v33, %v1570_v33  ;;  %6123 = vmatmul.msk.bf16.gmra.mxu3 %vm280_vm2, %v2222_v50  ;;  %v2077_v45 = vld [vmem:[#allocation2 + $0xe9] sm:$0xff] }
 0x1ea   : > { %8622 = vst [vmem:[#allocation24_spill] sm:$0xff] %v7074_v41  ;;  %v2109_v50 = vpack.c.bf16 %v2077_v45, %v2077_v45 }
 0x1eb   : > { %v1634_v62 = vunpack.c.l.bf16 %v1602_v18  ;;  %6091 = vmatmul.msk.bf16.gmra.mxu1 %vm280_vm2, %v1764_v37  ;;  %v899_v37 = vadd.s32 240, %v6640_v6  ;;  %v2965_v18 = vld [vmem:[#allocation2 + $0xe9] sm:$0xff] }
 0x1ec   : > { %v2312_v26 = vpop.f32.mrf.mxu3  ;;  %v2141_v20 = vunpack.c.l.bf16 %v2109_v50  ;;  %v2997_v53 = vpack.c.bf16 %v2965_v18, %v2965_v18 }
 0x1ed   : > { %v1996_v10 = vpop.f32.mrf.mxu2  ;;  %v1698_v55 = vmul.f32 %v6654_v16, %v1634_v62  ;;  %v2377_v33 = vadd.f32 %v2312_v26, %v1995_v52  ;;  %v1115_v52 = vand.u32 15, %v899_v37 }
 0x1ee   : > { %v1997_v59 = vadd.f32 %v1996_v10, %v1856_v44  ;;  %v7099_v44 = vsel %vm1442_vm5, 1.0, %v8620_v11  ;;  %v3029_v30 = vunpack.c.l.bf16 %v2997_v53  ;;  %v1749_v53 = vld [vmem:[#allocation2 + $0x100] sm:$0xff] }
 0x1ef   : > { %v2630_v9 = vpop.f32.mrf.mxu0  ;;  %v1715_v1 = vpack.c.bf16 %v1698_v55, %v1697_v7  ;;  %v2540_v49 = vpack.c.bf16 %v1698_v55, %v2521_v3  ;;  %v2078_v41 = vld [vmem:[#allocation2 + $0xf1] sm:$0xff]  ;;  %v1572_v45 = vld [vmem:[#allocation2 + $0xff] sm:$0xff]  ;;  %8625 = vst [vmem:[#allocation27_spill] sm:$0xff] %v7099_v44  ;;  %vm1315_vm4 = vcmp.ne.s32.totalorder %v1115_v52, 0 }
 0x1f0   : > { %v7094_v25 = vadd.f32 %v2630_v9, %v2377_v33  ;;  %v1861_v5 = vpop.f32.mrf.mxu1  ;;  %v2110_v61 = vpack.c.bf16 %v2078_v41, %v2078_v41  ;;  %v1571_v62 = vld [vmem:[#allocation2 + $0xf7] sm:$0xff]  ;;  %v1604_v10 = vpack.c.bf16 %v1572_v45, %v1572_v45  ;;  %v2205_v41 = vmul.f32 %v2141_v20, %v6654_v16 }
 0x1f1   : > { %v2966_v17 = vld [vmem:[#allocation2 + $0xf1] sm:$0xff]  ;;  %v1603_v3 = vpack.c.bf16 %v1571_v62, %v1571_v62  ;;  %v2079_v22 = vld [vmem:[#allocation2 + $0xf9] sm:$0xff] }
 0x1f2   : > { %8624 = vst [vmem:[#allocation26_spill] sm:$0xff] %v7094_v25  ;;  %6107 = vmatmul.msk.bf16.gmra.mxu2 %vm280_vm2, %v1715_v1  ;;  %6140 = vmatmul.msk.bf16.gmra.mxu0 %vm280_vm2, %v2540_v49  ;;  %v2998_v7 = vpack.c.bf16 %v2966_v17, %v2966_v17  ;;  %v2142_v2 = vunpack.c.l.bf16 %v2110_v61  ;;  %v1748_v25 = vld [vmem:[#allocation2 + $0xf8] sm:$0xff]  ;;  %v900_v17 = vadd.s32 248, %v6640_v6  ;;  %v1636_v45 = vunpack.c.l.bf16 %v1604_v10 }
 0x1f3   : > { %v1635_v62 = vunpack.c.l.bf16 %v1603_v3  ;;  %v1765_v6 = vpack.c.bf16 %v1749_v53, %v1748_v25  ;;  %v2967_v52 = vld [vmem:[#allocation2 + $0xf9] sm:$0xff]  ;;  %v2111_v3 = vpack.c.bf16 %v2079_v22, %v2079_v22 }
 0x1f4   : > { %v2314_v55 = vpop.f32.mrf.mxu3  ;;  %v2206_v50 = vmul.f32 %v7099_v44, %v2142_v2  ;;  %v7103_v33 = vunpack.c.l.bf16 %v2998_v7  ;;  %v7110_v7 = vsel %vm1315_vm4, 1.0, %v8620_v11  ;;  %v1122_v2 = vand.u32 15, %v900_v17 }
 0x1f5   : > { %v1999_v26 = vpop.f32.mrf.mxu2  ;;  %v2378_v9 = vadd.f32 %v2314_v55, %v1997_v59  ;;  %v1700_v55 = vmul.f32 %v6654_v16, %v1636_v45 }
 0x1f6   : > { %v2000_v18 = vadd.f32 %v1999_v26, %v1859_v46  ;;  %v2223_v49 = vpack.c.bf16 %v2206_v50, %v2205_v41  ;;  %v7113_v46 = vmul.f32 %v3029_v30, %v6654_v16  ;;  %v7117_v59 = vmul.f32 %v7010_v32, %v7103_v33 }
 0x1f7   : > { %v2632_v1 = vpop.f32.mrf.mxu0  ;;  %v801_v37 = vpop.permute.xlu0 %800  ;;  %v1699_v26 = vmul.f32 %v7110_v7, %v1635_v62  ;;  %v2523_v41 = vmul.f32 %v7078_v40, %v1635_v62  ;;  %vm1444_vm6 = vcmp.ne.s32.totalorder %v1122_v2, 15  ;;  %v2939_v2 = vld [vmem:[#allocation2 + $0x19] sm:$0xff] }
 0x1f8   : > { %v7106_v61 = vadd.f32 %v2632_v1, %v2378_v9  ;;  %v1864_v20 = vpop.f32.mrf.mxu1  ;;  %866 = vst.msk [vmem:[#allocation2 + $0x108] sm:$0xff] %vm280_vm2, %v801_v37  ;;  %v2999_v9 = vpack.c.bf16 %v2967_v52, %v2967_v52 }
 0x1f9   : > { %8626 = vst [vmem:[#allocation28_spill] sm:$0xff] %v7117_v59  ;;  %6124 = vmatmul.msk.bf16.gmra.mxu3 %vm280_vm2, %v2223_v49  ;;  %v1716_v37 = vpack.c.bf16 %v1700_v55, %v1699_v26  ;;  %v2541_v53 = vpack.c.bf16 %v1700_v55, %v2523_v41 }
 0x1fa   : > { %v3031_v40 = vunpack.c.l.bf16 %v2999_v9 }
 0x1fb   : > { %6092 = vmatmul.msk.bf16.gmra.mxu1 %vm280_vm2, %v1765_v6  ;;  %v2143_v6 = vunpack.c.l.bf16 %v2111_v3 }
 0x1fc   : > { %v2317_v30 = vpop.f32.mrf.mxu3 }
 0x1fd   : > { %v2001_v50 = vpop.f32.mrf.mxu2  ;;  %v2379_v49 = vadd.f32 %v2317_v30, %v2000_v18  ;;  %v2207_v3 = vmul.f32 %v2143_v6, %v6654_v16 }
 0x1fe   : > { %v2002_v1 = vadd.f32 %v2001_v50, %v1861_v5  ;;  %v7132_v5 = vsel %vm1444_vm6, 1.0, %v8620_v11  ;;  %v7139_v50 = vmul.f32 %v3031_v40, %v6654_v16 }
 0x1ff   : > { %v2635_v25 = vpop.f32.mrf.mxu0  ;;  %v803_v22 = vpop.permute.xlu1 %802  ;;  %v2080_v10 = vld [vmem:[#allocation2 + $0x101] sm:$0xff]  ;;  %8627 = vst [vmem:[#allocation29_spill] sm:$0xff] %v7132_v5 }
 0x200   : > { %v7126_v17 = vadd.f32 %v2635_v25, %v2379_v49  ;;  %v2968_v59 = vld [vmem:[#allocation2 + $0x101] sm:$0xff]  ;;  %867 = vst.msk [vmem:[#allocation2 + $0x110] sm:$0xff] %vm280_vm2, %v803_v22  ;;  %v1866_v45 = vpop.f32.mrf.mxu1  ;;  %v2112_v44 = vpack.c.bf16 %v2080_v10, %v2080_v10 }
 0x201   : > { %v3000_v62 = vpack.c.bf16 %v2968_v59, %v2968_v59  ;;  %v2429_v18 = vld [vmem:[#allocation2 + $0x107] sm:$0xff] }
 0x202   : > { %6108 = vmatmul.msk.bf16.gmra.mxu2 %vm280_vm2, %v1716_v37  ;;  %6141 = vmatmul.msk.bf16.gmra.mxu0 %vm280_vm2, %v2541_v53  ;;  %v2144_v52 = vunpack.c.l.bf16 %v2112_v44  ;;  %v2461_v59 = vpack.c.bf16 %v2429_v18, %v2429_v18  ;;  %v2971_v44 = vpack.c.bf16 %v2939_v2, %v2939_v2  ;;  %v2718_v22 = vld [vmem:[#allocation2 + $0x20] sm:$0xff]  ;;  %v2717_v18 = vld [vmem:[#allocation2 + $0x18] sm:$0xff] }
 0x203   : > { %v7134_v26 = vunpack.c.l.bf16 %v3000_v62  ;;  %v3257_v2 = vld [vmem:[#allocation2 + $0x27] sm:$0xff] }
 0x204   : > { %v2319_v41 = vpop.f32.mrf.mxu3  ;;  %v2208_v10 = vmul.f32 %v7132_v5, %v2144_v52  ;;  %v2493_v52 = vunpack.c.l.bf16 %v2461_v59  ;;  %v3258_v5 = vld [vmem:[#allocation2 + $0x2f] sm:$0xff] }
 0x205   : > { %8628 = vst [vmem:[#allocation30_spill] sm:$0xff] %v7134_v26  ;;  %v2004_v55 = vpop.f32.mrf.mxu2  ;;  %v7143_v30 = vmul.f32 %v7056_v12, %v7134_v26  ;;  %v2380_v9 = vadd.f32 %v2319_v41, %v2002_v1  ;;  %v2749_v26 = vpack.c.bf16 %v2718_v22, %v2717_v18 }
 0x206   : > { %v2005_v11 = vadd.f32 %v2004_v55, %v1864_v20  ;;  %v2224_v25 = vpack.c.bf16 %v2208_v10, %v2207_v3  ;;  %v3003_v20 = vunpack.c.l.bf16 %v2971_v44  ;;  %v3290_v3 = vpack.c.bf16 %v3258_v5, %v3258_v5  ;;  %v2941_v5 = vld [vmem:[#allocation2 + $0x29] sm:$0xff] }
 0x207   : > { %8629 = vst [vmem:[#allocation31_spill] sm:$0xff] %v7143_v30  ;;  %v2637_v49 = vpop.f32.mrf.mxu0  ;;  %v2430_v6 = vld [vmem:[#allocation2 + $0x10f] sm:$0xff]  ;;  %v2525_v10 = vmul.f32 %v7110_v7, %v2493_v52 }
 0x208   : > { %v7147_v53 = vadd.f32 %v2637_v49, %v2380_v9  ;;  %v1869_v62 = vpop.f32.mrf.mxu1  ;;  %v2462_v40 = vpack.c.bf16 %v2430_v6, %v2430_v6  ;;  %v3035_v59 = vmul.f32 %v3003_v20, %v6654_v16  ;;  %v3289_v6 = vpack.c.bf16 %v3257_v2, %v3257_v2 }
 0x209   : > { %6125 = vmatmul.msk.bf16.gmra.mxu3 %vm280_vm2, %v2224_v25  ;;  %v3322_v18 = vunpack.c.l.bf16 %v3290_v3  ;;  %v2720_v3 = vld [vmem:[#allocation2 + $0x30] sm:$0xff] }
 0x20a   : > { %v2494_v1 = vunpack.c.l.bf16 %v2462_v40  ;;  %v3067_v44 = vpack.c.bf16 %v6743_v63, %v3035_v59  ;;  %v2942_v40 = vld [vmem:[#allocation2 + $0x31] sm:$0xff]  ;;  %v3321_v52 = vunpack.c.l.bf16 %v3289_v6 }
 0x20b   : > { %6144 = vmatmul.msk.bf16.vlgmr.msrb.gmra.mxu1 %vm280_vm2, %v2749_v26  ;;  %v2974_v20 = vpack.c.bf16 %v2942_v40, %v2942_v40  ;;  %v3259_v6 = vld [vmem:[#allocation2 + $0x37] sm:$0xff] }
 0x20c   : > { %v2322_v41 = vpop.f32.mrf.mxu3  ;;  %v2526_v9 = vmul.f32 %v2494_v1, %v6654_v16 }
 0x20d   : > { %v2006_v55 = vpop.f32.mrf.mxu2  ;;  %v2381_v37 = vadd.f32 %v2322_v41, %v2005_v11  ;;  %v2973_v11 = vpack.c.bf16 %v2941_v5, %v2941_v5  ;;  %v3006_v59 = vunpack.c.l.bf16 %v2974_v20  ;;  %v3260_v5 = vld [vmem:[#allocation2 + $0x3f] sm:$0xff] }
 0x20e   : > { %v2007_v49 = vadd.f32 %v2006_v55, %v1866_v45  ;;  %v2542_v25 = vpack.c.bf16 %v2526_v9, %v2525_v10  ;;  %v3354_v45 = vmul.f32 %v3322_v18, %v6654_v16 }
 0x20f   : > { %v2640_v30 = vpop.f32.mrf.mxu0  ;;  %v3005_v9 = vunpack.c.l.bf16 %v2973_v11  ;;  %v3292_v11 = vpack.c.bf16 %v3260_v5, %v3260_v5 }
 0x210   : > { %v7154_v22 = vadd.f32 %v2640_v30, %v2381_v37  ;;  %v1871_v26 = vpop.f32.mrf.mxu1  ;;  %v3353_v37 = vmul.f32 %v6652_v13, %v3321_v52  ;;  %v3038_v13 = vmul.f32 %v6740_v58, %v3006_v59 }
 0x212   : > { %6142 = vmatmul.msk.bf16.gmra.mxu0 %vm280_vm2, %v2542_v25  ;;  %6161 = vmatmul.msk.bf16.vlgmr.msrb.gmra.mxu2 %vm280_vm2, %v3067_v44  ;;  %v3385_v10 = vpack.c.bf16 %v3354_v45, %v3353_v37  ;;  %v2719_v44 = vld [vmem:[#allocation2 + $0x28] sm:$0xff] }
 0x213   : > { %v2750_v18 = vpack.c.bf16 %v2720_v3, %v2719_v44  ;;  %v2944_v3 = vld [vmem:[#allocation2 + $0x41] sm:$0xff] }
 0x214   : > { %v2324_v2 = vpop.f32.mrf.mxu3  ;;  %v2976_v44 = vpack.c.bf16 %v2944_v3, %v2944_v3  ;;  %v3261_v3 = vld [vmem:[#allocation2 + $0x47] sm:$0xff] }
 0x215   : > { %v2009_v1 = vpop.f32.mrf.mxu2  ;;  %v2382_v30 = vadd.f32 %v2324_v2, %v2007_v49  ;;  %v3291_v49 = vpack.c.bf16 %v3259_v6, %v3259_v6 }
 0x216   : > { %v2010_v55 = vadd.f32 %v2009_v1, %v1869_v62  ;;  %v3037_v62 = vmul.f32 %v3005_v9, %v6654_v16  ;;  %v2943_v9 = vld [vmem:[#allocation2 + $0x39] sm:$0xff] }
 0x217   : > { %v2642_v63 = vpop.f32.mrf.mxu0  ;;  %v3323_v37 = vunpack.c.l.bf16 %v3291_v49 }
 0x218   : > { %v7161_v41 = vadd.f32 %v2642_v63, %v2382_v30  ;;  %v1874_v25 = vpop.f32.mrf.mxu1  ;;  %v3068_v30 = vpack.c.bf16 %v3038_v13, %v3037_v62  ;;  %v2722_v13 = vld [vmem:[#allocation2 + $0x40] sm:$0xff] }
 0x219   : > { %6178 = vmatmul.msk.bf16.vlgmr.msrb.gmra.mxu3 %vm280_vm2, %v3385_v10  ;;  %v3324_v10 = vunpack.c.l.bf16 %v3292_v11  ;;  %v3355_v59 = vmul.f32 %v6726_v38, %v3323_v37  ;;  %v3262_v11 = vld [vmem:[#allocation2 + $0x4f] sm:$0xff] }
 0x21b   : > { %6145 = vmatmul.msk.bf16.gmra.mxu1 %vm280_vm2, %v2750_v18 }
 0x21c   : > { %v2327_v52 = vpop.f32.mrf.mxu3 }
 0x21d   : > { %v2011_v40 = vpop.f32.mrf.mxu2  ;;  %v2383_v45 = vadd.f32 %v2327_v52, %v2010_v55  ;;  %v2975_v52 = vpack.c.bf16 %v2943_v9, %v2943_v9 }
 0x21e   : > { %v2012_v1 = vadd.f32 %v2011_v40, %v1871_v26  ;;  %v3356_v40 = vmul.f32 %v3324_v10, %v6654_v16 }
 0x21f   : > { %v2645_v20 = vpop.f32.mrf.mxu0  ;;  %v3007_v37 = vunpack.c.l.bf16 %v2975_v52  ;;  %v2945_v52 = vld [vmem:[#allocation2 + $0x49] sm:$0xff] }
 0x220   : > { %v7167_v2 = vadd.f32 %v2645_v20, %v2383_v45  ;;  %v1876_v63 = vpop.f32.mrf.mxu1  ;;  %v3386_v45 = vpack.c.bf16 %v3356_v40, %v3355_v59  ;;  %v3008_v20 = vunpack.c.l.bf16 %v2976_v44  ;;  %v3293_v44 = vpack.c.bf16 %v3261_v3, %v3261_v3 }
 0x221   : > { %v3039_v59 = vmul.f32 %v3007_v37, %v6654_v16 }
 0x222   : > { %6162 = vmatmul.msk.bf16.gmra.mxu2 %vm280_vm2, %v3068_v30  ;;  %6195 = vmatmul.msk.bf16.vlgmr.msra.gmra.mxu0 %vm280_vm2, %v2750_v18  ;;  %v2721_v18 = vld [vmem:[#allocation2 + $0x38] sm:$0xff] }
 0x223   : > { %v2751_v38 = vpack.c.bf16 %v2722_v13, %v2721_v18  ;;  %v2946_v18 = vld [vmem:[#allocation2 + $0x51] sm:$0xff] }
 0x224   : > { %v2329_v26 = vpop.f32.mrf.mxu3 }
 0x225   : > { %v2014_v6 = vpop.f32.mrf.mxu2  ;;  %v2384_v5 = vadd.f32 %v2329_v26, %v2012_v1  ;;  %v3294_v1 = vpack.c.bf16 %v3262_v11, %v3262_v11 }
 0x226   : > { %v2015_v55 = vadd.f32 %v2014_v6, %v1874_v25  ;;  %v3040_v25 = vmul.f32 %v6764_v36, %v3008_v20  ;;  %v3325_v20 = vunpack.c.l.bf16 %v3293_v44  ;;  %v3264_v44 = vld [vmem:[#allocation2 + $0x5f] sm:$0xff] }
 0x227   : > { %v2647_v62 = vpop.f32.mrf.mxu0 }
 0x228   : > { %v7173_v49 = vadd.f32 %v2647_v62, %v2384_v5  ;;  %v1879_v30 = vpop.f32.mrf.mxu1  ;;  %v3069_v62 = vpack.c.bf16 %v3040_v25, %v3039_v59 }
 0x229   : > { %6179 = vmatmul.msk.bf16.gmra.mxu3 %vm280_vm2, %v3386_v45  ;;  %v3326_v45 = vunpack.c.l.bf16 %v3294_v1  ;;  %v2724_v1 = vld [vmem:[#allocation2 + $0x50] sm:$0xff] }
 0x22b   : > { %6146 = vmatmul.msk.bf16.gmra.mxu1 %vm280_vm2, %v2751_v38  ;;  %v3358_v11 = vmul.f32 %v3326_v45, %v6654_v16 }
 0x22c   : > { %v2332_v9 = vpop.f32.mrf.mxu3 }
 0x22d   : > { %v2016_v10 = vpop.f32.mrf.mxu2  ;;  %v2385_v26 = vadd.f32 %v2332_v9, %v2015_v55  ;;  %v2978_v55 = vpack.c.bf16 %v2946_v18, %v2946_v18 }
 0x22e   : > { %v2017_v6 = vadd.f32 %v2016_v10, %v1876_v63  ;;  %v2977_v63 = vpack.c.bf16 %v2945_v52, %v2945_v52  ;;  %v3263_v52 = vld [vmem:[#allocation2 + $0x57] sm:$0xff] }
 0x22f   : > { %v2650_v5 = vpop.f32.mrf.mxu0 }
 0x230   : > { %v7179_v40 = vadd.f32 %v2650_v5, %v2385_v26  ;;  %v1881_v13 = vpop.f32.mrf.mxu1  ;;  %v3357_v26 = vmul.f32 %v6753_v19, %v3325_v20  ;;  %v3009_v36 = vunpack.c.l.bf16 %v2977_v63  ;;  %v3295_v63 = vpack.c.bf16 %v3263_v52, %v3263_v52 }
 0x232   : > { %8630 = vst [vmem:[#allocation32_spill] sm:$0xff] %v7179_v40  ;;  %6163 = vmatmul.msk.bf16.gmra.mxu2 %vm280_vm2, %v3069_v62  ;;  %6196 = vmatmul.msk.bf16.gmra.mxu0 %vm280_vm2, %v2751_v38  ;;  %v3387_v5 = vpack.c.bf16 %v3358_v11, %v3357_v26  ;;  %v3010_v62 = vunpack.c.l.bf16 %v2978_v55  ;;  %v2723_v38 = vld [vmem:[#allocation2 + $0x48] sm:$0xff] }
 0x233   : > { %v2752_v45 = vpack.c.bf16 %v2724_v1, %v2723_v38  ;;  %v2948_v1 = vld [vmem:[#allocation2 + $0x61] sm:$0xff] }
 0x234   : > { %v2334_v37 = vpop.f32.mrf.mxu3  ;;  %v3042_v19 = vmul.f32 %v6792_v15, %v3010_v62  ;;  %v2980_v38 = vpack.c.bf16 %v2948_v1, %v2948_v1  ;;  %v3266_v15 = vld [vmem:[#allocation2 + $0x6f] sm:$0xff] }
 0x235   : > { %v2019_v10 = vpop.f32.mrf.mxu2  ;;  %v2386_v9 = vadd.f32 %v2334_v37, %v2017_v6  ;;  %v3296_v6 = vpack.c.bf16 %v3264_v44, %v3264_v44 }
 0x236   : > { %v2020_v3 = vadd.f32 %v2019_v10, %v1879_v30  ;;  %v3041_v30 = vmul.f32 %v3009_v36, %v6654_v16  ;;  %v3327_v36 = vunpack.c.l.bf16 %v3295_v63  ;;  %v3265_v63 = vld [vmem:[#allocation2 + $0x67] sm:$0xff] }
 0x237   : > { %v2652_v25 = vpop.f32.mrf.mxu0  ;;  %v3328_v26 = vunpack.c.l.bf16 %v3296_v6 }
 0x238   : > { %v7185_v59 = vadd.f32 %v2652_v25, %v2386_v9  ;;  %v1884_v40 = vpop.f32.mrf.mxu1  ;;  %v3070_v9 = vpack.c.bf16 %v3042_v19, %v3041_v30  ;;  %v2726_v19 = vld [vmem:[#allocation2 + $0x60] sm:$0xff] }
 0x239   : > { %6180 = vmatmul.msk.bf16.gmra.mxu3 %vm280_vm2, %v3387_v5  ;;  %v2947_v5 = vld [vmem:[#allocation2 + $0x59] sm:$0xff]  ;;  %v3360_v62 = vmul.f32 %v3328_v26, %v6654_v16 }
 0x23b   : > { %6147 = vmatmul.msk.bf16.gmra.mxu1 %vm280_vm2, %v2752_v45 }
 0x23c   : > { %v2337_v20 = vpop.f32.mrf.mxu3 }
 0x23d   : > { %v2021_v18 = vpop.f32.mrf.mxu2  ;;  %v2387_v11 = vadd.f32 %v2337_v20, %v2020_v3  ;;  %v2979_v20 = vpack.c.bf16 %v2947_v5, %v2947_v5 }
 0x23e   : > { %v2022_v10 = vadd.f32 %v2021_v18, %v1881_v13  ;;  %v3359_v18 = vmul.f32 %v6776_v54, %v3327_v36  ;;  %v3297_v54 = vpack.c.bf16 %v3265_v63, %v3265_v63 }
 0x23f   : > { %v2655_v55 = vpop.f32.mrf.mxu0  ;;  %v3011_v1 = vunpack.c.l.bf16 %v2979_v20  ;;  %v2950_v20 = vld [vmem:[#allocation2 + $0x71] sm:$0xff] }
 0x240   : > { %v7191_v37 = vadd.f32 %v2655_v55, %v2387_v11  ;;  %v1886_v25 = vpop.f32.mrf.mxu1  ;;  %v3388_v11 = vpack.c.bf16 %v3360_v62, %v3359_v18  ;;  %v3012_v55 = vunpack.c.l.bf16 %v2980_v38 }
 0x241   : > { %v3043_v62 = vmul.f32 %v3011_v1, %v6654_v16 }
 0x242   : > { %6164 = vmatmul.msk.bf16.gmra.mxu2 %vm280_vm2, %v3070_v9  ;;  %6197 = vmatmul.msk.bf16.gmra.mxu0 %vm280_vm2, %v2752_v45  ;;  %v2725_v45 = vld [vmem:[#allocation2 + $0x58] sm:$0xff] }
 0x243   : > { %v2753_v26 = vpack.c.bf16 %v2726_v19, %v2725_v45 }
 0x244   : > { %v2339_v13 = vpop.f32.mrf.mxu3 }
 0x245   : > { %v2024_v44 = vpop.f32.mrf.mxu2  ;;  %v2388_v52 = vadd.f32 %v2339_v13, %v2022_v10  ;;  %v3298_v10 = vpack.c.bf16 %v3266_v15, %v3266_v15 }
 0x246   : > { %v2025_v3 = vadd.f32 %v2024_v44, %v1884_v40  ;;  %v3044_v40 = vmul.f32 %v6814_v60, %v3012_v55  ;;  %v2949_v55 = vld [vmem:[#allocation2 + $0x69] sm:$0xff] }
 0x247   : > { %v2657_v30 = vpop.f32.mrf.mxu0 }
 0x248   : > { %v7197_v6 = vadd.f32 %v2657_v30, %v2388_v52  ;;  %v1889_v9 = vpop.f32.mrf.mxu1  ;;  %v3071_v18 = vpack.c.bf16 %v3044_v40, %v3043_v62  ;;  %v3329_v30 = vunpack.c.l.bf16 %v3297_v54  ;;  %v2727_v54 = vld [vmem:[#allocation2 + $0x68] sm:$0xff] }
 0x249   : > { %6181 = vmatmul.msk.bf16.gmra.mxu3 %vm280_vm2, %v3388_v11  ;;  %v3330_v11 = vunpack.c.l.bf16 %v3298_v10 }
 0x24a   : > { %v3361_v15 = vmul.f32 %v6803_v42, %v3329_v30 }
 0x24b   : > { %6148 = vmatmul.msk.bf16.gmra.mxu1 %vm280_vm2, %v2753_v26 }
 0x24c   : > { %v2342_v5 = vpop.f32.mrf.mxu3 }
 0x24d   : > { %v2026_v36 = vpop.f32.mrf.mxu2  ;;  %v2389_v13 = vadd.f32 %v2342_v5, %v2025_v3  ;;  %v2982_v3 = vpack.c.bf16 %v2950_v20, %v2950_v20  ;;  %v2981_v5 = vpack.c.bf16 %v2949_v55, %v2949_v55 }
 0x24e   : > { %v2027_v44 = vadd.f32 %v2026_v36, %v1886_v25  ;;  %v3362_v25 = vmul.f32 %v3330_v11, %v6654_v16  ;;  %v3267_v11 = vld [vmem:[#allocation2 + $0x77] sm:$0xff] }
 0x24f   : > { %v2660_v38 = vpop.f32.mrf.mxu0  ;;  %v3014_v62 = vunpack.c.l.bf16 %v2982_v3  ;;  %v3013_v30 = vunpack.c.l.bf16 %v2981_v5  ;;  %v2951_v5 = vld [vmem:[#allocation2 + $0x79] sm:$0xff] }
 0x250   : > { %v7203_v52 = vadd.f32 %v2660_v38, %v2389_v13  ;;  %v1891_v19 = vpop.f32.mrf.mxu1  ;;  %v3389_v13 = vpack.c.bf16 %v3362_v25, %v3361_v15  ;;  %v3299_v25 = vpack.c.bf16 %v3267_v11, %v3267_v11 }
 0x251   : > { %v3045_v15 = vmul.f32 %v3013_v30, %v6654_v16 }
 0x252   : > { %6165 = vmatmul.msk.bf16.gmra.mxu2 %vm280_vm2, %v3071_v18  ;;  %6198 = vmatmul.msk.bf16.gmra.mxu0 %vm280_vm2, %v2753_v26  ;;  %v2728_v18 = vld [vmem:[#allocation2 + $0x70] sm:$0xff]  ;;  %v3268_v26 = vld [vmem:[#allocation2 + $0x7f] sm:$0xff] }
 0x253   : > { %v2754_v42 = vpack.c.bf16 %v2728_v18, %v2727_v54  ;;  %v2952_v18 = vld [vmem:[#allocation2 + $0x81] sm:$0xff] }
 0x254   : > { %v2344_v63 = vpop.f32.mrf.mxu3 }
 0x255   : > { %v2029_v45 = vpop.f32.mrf.mxu2  ;;  %v2390_v36 = vadd.f32 %v2344_v63, %v2027_v44  ;;  %v3300_v44 = vpack.c.bf16 %v3268_v26, %v3268_v26 }
 0x256   : > { %v2030_v1 = vadd.f32 %v2029_v45, %v1889_v9  ;;  %v3046_v9 = vmul.f32 %v6842_v48, %v3014_v62  ;;  %v3331_v62 = vunpack.c.l.bf16 %v3299_v25  ;;  %v3270_v25 = vld [vmem:[#allocation2 + $0x8f] sm:$0xff] }
 0x257   : > { %v2662_v40 = vpop.f32.mrf.mxu0 }
 0x258   : > { %v7209_v10 = vadd.f32 %v2662_v40, %v2390_v36  ;;  %v1894_v38 = vpop.f32.mrf.mxu1  ;;  %v3072_v40 = vpack.c.bf16 %v3046_v9, %v3045_v15 }
 0x259   : > { %6182 = vmatmul.msk.bf16.gmra.mxu3 %vm280_vm2, %v3389_v13  ;;  %v3332_v13 = vunpack.c.l.bf16 %v3300_v44  ;;  %v2730_v44 = vld [vmem:[#allocation2 + $0x80] sm:$0xff] }
 0x25b   : > { %6149 = vmatmul.msk.bf16.gmra.mxu1 %vm280_vm2, %v2754_v42  ;;  %v3364_v26 = vmul.f32 %v3332_v13, %v6654_v16 }
 0x25c   : > { %v2347_v55 = vpop.f32.mrf.mxu3 }
 0x25d   : > { %v2031_v20 = vpop.f32.mrf.mxu2  ;;  %v2391_v63 = vadd.f32 %v2347_v55, %v2030_v1  ;;  %v2984_v1 = vpack.c.bf16 %v2952_v18, %v2952_v18 }
 0x25e   : > { %v2032_v45 = vadd.f32 %v2031_v20, %v1891_v19  ;;  %v2983_v19 = vpack.c.bf16 %v2951_v5, %v2951_v5  ;;  %v3269_v5 = vld [vmem:[#allocation2 + $0x87] sm:$0xff] }
 0x25f   : > { %v2665_v3 = vpop.f32.mrf.mxu0 }
 0x260   : > { %v7215_v36 = vadd.f32 %v2665_v3, %v2391_v63  ;;  %v1896_v54 = vpop.f32.mrf.mxu1  ;;  %v3363_v63 = vmul.f32 %v6826_v21, %v3331_v62  ;;  %v3015_v48 = vunpack.c.l.bf16 %v2983_v19  ;;  %v3301_v19 = vpack.c.bf16 %v3269_v5, %v3269_v5 }
 0x262   : > { %8631 = vst [vmem:[#allocation33_spill] sm:$0xff] %v7215_v36  ;;  %6166 = vmatmul.msk.bf16.gmra.mxu2 %vm280_vm2, %v3072_v40  ;;  %6199 = vmatmul.msk.bf16.gmra.mxu0 %vm280_vm2, %v2754_v42  ;;  %v3390_v3 = vpack.c.bf16 %v3364_v26, %v3363_v63  ;;  %v3016_v40 = vunpack.c.l.bf16 %v2984_v1  ;;  %v2729_v42 = vld [vmem:[#allocation2 + $0x78] sm:$0xff] }
 0x263   : > { %v2755_v13 = vpack.c.bf16 %v2730_v44, %v2729_v42  ;;  %v2954_v44 = vld [vmem:[#allocation2 + $0x91] sm:$0xff] }
 0x264   : > { %v2349_v30 = vpop.f32.mrf.mxu3  ;;  %v3048_v21 = vmul.f32 %v6869_v34, %v3016_v40  ;;  %v2986_v42 = vpack.c.bf16 %v2954_v44, %v2954_v44  ;;  %v3272_v34 = vld [vmem:[#allocation2 + $0x9f] sm:$0xff] }
 0x265   : > { %v2034_v20 = vpop.f32.mrf.mxu2  ;;  %v2392_v55 = vadd.f32 %v2349_v30, %v2032_v45  ;;  %v3302_v45 = vpack.c.bf16 %v3270_v25, %v3270_v25 }
 0x266   : > { %v2035_v11 = vadd.f32 %v2034_v20, %v1894_v38  ;;  %v3047_v38 = vmul.f32 %v3015_v48, %v6654_v16  ;;  %v3333_v48 = vunpack.c.l.bf16 %v3301_v19  ;;  %v3271_v19 = vld [vmem:[#allocation2 + $0x97] sm:$0xff] }
 0x267   : > { %v2667_v9 = vpop.f32.mrf.mxu0  ;;  %v3334_v63 = vunpack.c.l.bf16 %v3302_v45 }
 0x268   : > { %v7221_v15 = vadd.f32 %v2667_v9, %v2392_v55  ;;  %v1899_v36 = vpop.f32.mrf.mxu1  ;;  %v3073_v55 = vpack.c.bf16 %v3048_v21, %v3047_v38  ;;  %v2732_v21 = vld [vmem:[#allocation2 + $0x90] sm:$0xff] }
 0x269   : > { %6183 = vmatmul.msk.bf16.gmra.mxu3 %vm280_vm2, %v3390_v3  ;;  %v2953_v3 = vld [vmem:[#allocation2 + $0x89] sm:$0xff]  ;;  %v3366_v40 = vmul.f32 %v3334_v63, %v6654_v16 }
 0x26b   : > { %6150 = vmatmul.msk.bf16.gmra.mxu1 %vm280_vm2, %v2755_v13 }
 0x26c   : > { %v2352_v62 = vpop.f32.mrf.mxu3 }
 0x26d   : > { %v2036_v18 = vpop.f32.mrf.mxu2  ;;  %v2393_v26 = vadd.f32 %v2352_v62, %v2035_v11  ;;  %v2985_v62 = vpack.c.bf16 %v2953_v3, %v2953_v3 }
 0x26e   : > { %v2037_v20 = vadd.f32 %v2036_v18, %v1896_v54  ;;  %v3365_v18 = vmul.f32 %v6852_v4, %v3333_v48  ;;  %v3303_v4 = vpack.c.bf16 %v3271_v19, %v3271_v19 }
 0x26f   : > { %v2670_v1 = vpop.f32.mrf.mxu0  ;;  %v3017_v44 = vunpack.c.l.bf16 %v2985_v62  ;;  %v2956_v62 = vld [vmem:[#allocation2 + $0xa1] sm:$0xff] }
 0x270   : > { %v7227_v30 = vadd.f32 %v2670_v1, %v2393_v26  ;;  %v1901_v9 = vpop.f32.mrf.mxu1  ;;  %v3391_v26 = vpack.c.bf16 %v3366_v40, %v3365_v18  ;;  %v3018_v1 = vunpack.c.l.bf16 %v2986_v42 }
 0x271   : > { %v3049_v40 = vmul.f32 %v3017_v44, %v6654_v16 }
 0x272   : > { %6167 = vmatmul.msk.bf16.gmra.mxu2 %vm280_vm2, %v3073_v55  ;;  %6200 = vmatmul.msk.bf16.gmra.mxu0 %vm280_vm2, %v2755_v13  ;;  %v2731_v13 = vld [vmem:[#allocation2 + $0x88] sm:$0xff] }
 0x273   : > { %v2756_v63 = vpack.c.bf16 %v2732_v21, %v2731_v13 }
 0x274   : > { %v2354_v54 = vpop.f32.mrf.mxu3 }
 0x275   : > { %v2039_v25 = vpop.f32.mrf.mxu2  ;;  %v2394_v5 = vadd.f32 %v2354_v54, %v2037_v20  ;;  %v3304_v20 = vpack.c.bf16 %v3272_v34, %v3272_v34 }
 0x276   : > { %v2040_v11 = vadd.f32 %v2039_v25, %v1899_v36  ;;  %v3050_v36 = vmul.f32 %v6891_v24, %v3018_v1  ;;  %v2955_v1 = vld [vmem:[#allocation2 + $0x99] sm:$0xff] }
 0x277   : > { %v2672_v38 = vpop.f32.mrf.mxu0 }
 0x278   : > { %v7233_v45 = vadd.f32 %v2672_v38, %v2394_v5  ;;  %v1904_v55 = vpop.f32.mrf.mxu1  ;;  %v3074_v18 = vpack.c.bf16 %v3050_v36, %v3049_v40  ;;  %v3335_v38 = vunpack.c.l.bf16 %v3303_v4  ;;  %v2733_v4 = vld [vmem:[#allocation2 + $0x98] sm:$0xff] }
 0x279   : > { %6184 = vmatmul.msk.bf16.gmra.mxu3 %vm280_vm2, %v3391_v26  ;;  %v3336_v26 = vunpack.c.l.bf16 %v3304_v20 }
 0x27a   : > { %v3367_v34 = vmul.f32 %v6880_v0, %v3335_v38 }
 0x27b   : > { %6151 = vmatmul.msk.bf16.gmra.mxu1 %vm280_vm2, %v2756_v63 }
 0x27c   : > { %v2357_v3 = vpop.f32.mrf.mxu3 }
 0x27d   : > { %v2041_v48 = vpop.f32.mrf.mxu2  ;;  %v2395_v54 = vadd.f32 %v2357_v3, %v2040_v11  ;;  %v2988_v11 = vpack.c.bf16 %v2956_v62, %v2956_v62  ;;  %v2987_v3 = vpack.c.bf16 %v2955_v1, %v2955_v1 }
 0x27e   : > { %v2042_v25 = vadd.f32 %v2041_v48, %v1901_v9  ;;  %v3368_v9 = vmul.f32 %v3336_v26, %v6654_v16  ;;  %v3273_v26 = vld [vmem:[#allocation2 + $0xa7] sm:$0xff] }
 0x27f   : > { %v2675_v42 = vpop.f32.mrf.mxu0  ;;  %v3020_v40 = vunpack.c.l.bf16 %v2988_v11  ;;  %v3019_v38 = vunpack.c.l.bf16 %v2987_v3  ;;  %v3305_v11 = vpack.c.bf16 %v3273_v26, %v3273_v26  ;;  %v2957_v3 = vld [vmem:[#allocation2 + $0xa9] sm:$0xff] }
 0x280   : > { %v7239_v5 = vadd.f32 %v2675_v42, %v2395_v54  ;;  %v1906_v21 = vpop.f32.mrf.mxu1  ;;  %v3392_v54 = vpack.c.bf16 %v3368_v9, %v3367_v34 }
 0x281   : > { %v3051_v9 = vmul.f32 %v3019_v38, %v6654_v16 }
 0x282   : > { %6168 = vmatmul.msk.bf16.gmra.mxu2 %vm280_vm2, %v3074_v18  ;;  %6201 = vmatmul.msk.bf16.gmra.mxu0 %vm280_vm2, %v2756_v63  ;;  %v2734_v18 = vld [vmem:[#allocation2 + $0xa0] sm:$0xff]  ;;  %v3274_v63 = vld [vmem:[#allocation2 + $0xaf] sm:$0xff] }
 0x283   : > { %v2757_v0 = vpack.c.bf16 %v2734_v18, %v2733_v4 }
 0x284   : > { %v2359_v19 = vpop.f32.mrf.mxu3 }
 0x285   : > { %v2044_v13 = vpop.f32.mrf.mxu2  ;;  %v2396_v48 = vadd.f32 %v2359_v19, %v2042_v25  ;;  %v3306_v25 = vpack.c.bf16 %v3274_v63, %v3274_v63 }
 0x286   : > { %v2045_v44 = vadd.f32 %v2044_v13, %v1904_v55  ;;  %v3052_v55 = vmul.f32 %v6919_v14, %v3020_v40  ;;  %v3337_v40 = vunpack.c.l.bf16 %v3305_v11  ;;  %v3276_v11 = vld [vmem:[#allocation2 + $0xbf] sm:$0xff] }
 0x287   : > { %v2677_v36 = vpop.f32.mrf.mxu0 }
 0x288   : > { %v7245_v20 = vadd.f32 %v2677_v36, %v2396_v48  ;;  %v2827_v42 = vpop.f32.mrf.mxu1  ;;  %v3338_v36 = vunpack.c.l.bf16 %v3306_v25 }
 0x289   : > { %v2907_v24 = vadd.f32 %v2827_v42, %v6935_v57  ;;  %6185 = vmatmul.msk.bf16.gmra.mxu3 %vm280_vm2, %v3392_v54  ;;  %v3075_v57 = vpack.c.bf16 %v3052_v55, %v3051_v9  ;;  %v2958_v54 = vld [vmem:[#allocation2 + $0xb1] sm:$0xff]  ;;  %v3369_v55 = vmul.f32 %v6905_v47, %v3337_v40 }
 0x28a   : > { %v2990_v18 = vpack.c.bf16 %v2958_v54, %v2958_v54 }
 0x28b   : > { %6152 = vmatmul.msk.bf16.gmra.mxu1 %vm280_vm2, %v2757_v0 }
 0x28c   : > { %v2362_v1 = vpop.f32.mrf.mxu3 }
 0x28d   : > { %v2046_v62 = vpop.f32.mrf.mxu2  ;;  %v2397_v34 = vadd.f32 %v2362_v1, %v2045_v44  ;;  %v2989_v44 = vpack.c.bf16 %v2957_v3, %v2957_v3  ;;  %v2736_v1 = vld [vmem:[#allocation2 + $0xb0] sm:$0xff] }
 0x28e   : > { %v2047_v13 = vadd.f32 %v2046_v62, %v1906_v21  ;;  %v3370_v21 = vmul.f32 %v3338_v36, %v6654_v16  ;;  %v3275_v3 = vld [vmem:[#allocation2 + $0xb7] sm:$0xff] }
 0x28f   : > { %v2680_v19 = vpop.f32.mrf.mxu0  ;;  %v3021_v9 = vunpack.c.l.bf16 %v2989_v44 }
 0x290   : > { %v7252_v48 = vadd.f32 %v2680_v19, %v2397_v34  ;;  %v2829_v4 = vpop.f32.mrf.mxu1  ;;  %v3022_v19 = vunpack.c.l.bf16 %v2990_v18  ;;  %v3307_v18 = vpack.c.bf16 %v3275_v3, %v3275_v3 }
 0x291   : > { %v2908_v42 = vadd.f32 %v2829_v4, %v6946_v31  ;;  %v3393_v31 = vpack.c.bf16 %v3370_v21, %v3369_v55 }
 0x292   : > { %6169 = vmatmul.msk.bf16.gmra.mxu2 %vm280_vm2, %v3075_v57  ;;  %6202 = vmatmul.msk.bf16.gmra.mxu0 %vm280_vm2, %v2757_v0  ;;  %v2735_v0 = vld [vmem:[#allocation2 + $0xa8] sm:$0xff]  ;;  %v3054_v47 = vmul.f32 %v6941_v56, %v3022_v19 }
 0x293   : > { %v2758_v4 = vpack.c.bf16 %v2736_v1, %v2735_v0 }
 0x294   : > { %v2364_v63 = vpop.f32.mrf.mxu3 }
 0x295   : > { %v3145_v38 = vpop.f32.mrf.mxu2  ;;  %v2398_v26 = vadd.f32 %v2364_v63, %v2047_v13  ;;  %v3308_v13 = vpack.c.bf16 %v3276_v11, %v3276_v11 }
 0x296   : > { %v3225_v62 = vadd.f32 %v3145_v38, %v2907_v24  ;;  %v3053_v24 = vmul.f32 %v3021_v9, %v6654_v16  ;;  %v2959_v9 = vld [vmem:[#allocation2 + $0xb9] sm:$0xff] }
 0x297   : > { %v2682_v25 = vpop.f32.mrf.mxu0 }
 0x298   : > { %v7259_v34 = vadd.f32 %v2682_v25, %v2398_v26  ;;  %v2832_v57 = vpop.f32.mrf.mxu1  ;;  %v3340_v26 = vunpack.c.l.bf16 %v3308_v13  ;;  %v2960_v25 = vld [vmem:[#allocation2 + $0xc1] sm:$0xff] }
 0x299   : > { %v2909_v36 = vadd.f32 %v2832_v57, %v6958_v28  ;;  %6186 = vmatmul.msk.bf16.gmra.mxu3 %vm280_vm2, %v3393_v31  ;;  %v3076_v28 = vpack.c.bf16 %v3054_v47, %v3053_v24  ;;  %v3339_v31 = vunpack.c.l.bf16 %v3307_v18  ;;  %v2991_v24 = vpack.c.bf16 %v2959_v9, %v2959_v9  ;;  %v2738_v13 = vld [vmem:[#allocation2 + $0xc0] sm:$0xff] }
 0x29a   : > { %v3372_v19 = vmul.f32 %v3340_v26, %v6654_v16  ;;  %v3277_v18 = vld [vmem:[#allocation2 + $0xc7] sm:$0xff] }
 0x29b   : > { %6153 = vmatmul.msk.bf16.gmra.mxu1 %vm280_vm2, %v2758_v4  ;;  %v3371_v3 = vmul.f32 %v6926_v39, %v3339_v31 }
 0x29c   : > { %v3463_v40 = vpop.f32.mrf.mxu3 }
 0x29d   : > { %v3147_v54 = vpop.f32.mrf.mxu2  ;;  %v3543_v44 = vadd.f32 %v3463_v40, %v3225_v62 }
 0x29e   : > { %v3226_v21 = vadd.f32 %v3147_v54, %v2908_v42  ;;  %v2992_v42 = vpack.c.bf16 %v2960_v25, %v2960_v25 }
 0x29f   : > { %v3685_v63 = vpop.f32.mrf.mxu0 }
 0x2a0   : > { %v7266_v38 = vadd.f32 %v3685_v63, %v3543_v44  ;;  %v2834_v55 = vpop.f32.mrf.mxu1  ;;  %v3024_v40 = vunpack.c.l.bf16 %v2992_v42  ;;  %v3278_v63 = vld [vmem:[#allocation2 + $0xcf] sm:$0xff] }
 0x2a1   : > { %v2910_v1 = vadd.f32 %v2834_v55, %v6969_v43  ;;  %v3394_v43 = vpack.c.bf16 %v3372_v19, %v3371_v3  ;;  %v3310_v55 = vpack.c.bf16 %v3278_v63, %v3278_v63 }
 0x2a2   : > { %6170 = vmatmul.msk.bf16.gmra.mxu2 %vm280_vm2, %v3076_v28  ;;  %6203 = vmatmul.msk.bf16.gmra.mxu0 %vm280_vm2, %v2758_v4  ;;  %v2737_v4 = vld [vmem:[#allocation2 + $0xb8] sm:$0xff]  ;;  %v3056_v39 = vmul.f32 %v6962_v23, %v3024_v40 }
 0x2a3   : > { %v2759_v26 = vpack.c.bf16 %v2738_v13, %v2737_v4  ;;  %v3342_v3 = vunpack.c.l.bf16 %v3310_v55  ;;  %v2739_v4 = vld [vmem:[#allocation2 + $0xc8] sm:$0xff]  ;;  %v8632_v55 = vld [vmem:[#allocation14_spill] sm:$0xff] }
 0x2a4   : > { %v3465_v57 = vpop.f32.mrf.mxu3 }
 0x2a5   : > { %v3150_v62 = vpop.f32.mrf.mxu2  ;;  %v3544_v11 = vadd.f32 %v3465_v57, %v3226_v21  ;;  %v3309_v21 = vpack.c.bf16 %v3277_v18, %v3277_v18 }
 0x2a6   : > { %v3227_v0 = vadd.f32 %v3150_v62, %v2909_v36  ;;  %v3023_v36 = vunpack.c.l.bf16 %v2991_v24 }
 0x2a7   : > { %v3687_v47 = vpop.f32.mrf.mxu0 }
 0x2a8   : > { %v7273_v54 = vadd.f32 %v3687_v47, %v3544_v11  ;;  %v2837_v44 = vpop.f32.mrf.mxu1  ;;  %v3055_v42 = vmul.f32 %v3023_v36, %v6654_v16  ;;  %v3341_v11 = vunpack.c.l.bf16 %v3309_v21 }
 0x2a9   : > { %v2911_v28 = vadd.f32 %v2837_v44, %v6981_v27  ;;  %6187 = vmatmul.msk.bf16.gmra.mxu3 %vm280_vm2, %v3394_v43 }
 0x2aa   : > { %v3077_v27 = vpack.c.bf16 %v3056_v39, %v3055_v42  ;;  %v3373_v23 = vmul.f32 %v6951_v35, %v3341_v11  ;;  %v2740_v39 = vld [vmem:[#allocation2 + $0xd0] sm:$0xff] }
 0x2ab   : > { %6154 = vmatmul.msk.bf16.gmra.mxu1 %vm280_vm2, %v2759_v26  ;;  %v3279_v35 = vld [vmem:[#allocation2 + $0xd7] sm:$0xff] }
 0x2ac   : > { %v3468_v31 = vpop.f32.mrf.mxu3 }
 0x2ad   : > { %v3152_v25 = vpop.f32.mrf.mxu2  ;;  %v3545_v19 = vadd.f32 %v3468_v31, %v3227_v0 }
 0x2ae   : > { %v3228_v9 = vadd.f32 %v3152_v25, %v2910_v1  ;;  %v3374_v1 = vmul.f32 %v3342_v3, %v6654_v16  ;;  %v8633_v3 = vld [vmem:[#allocation17_spill] sm:$0xff] }
 0x2af   : > { %v3690_v62 = vpop.f32.mrf.mxu0 }
 0x2b0   : > { %v7280_v57 = vadd.f32 %v3690_v62, %v3545_v19  ;;  %v2839_v47 = vpop.f32.mrf.mxu1  ;;  %v3395_v63 = vpack.c.bf16 %v3374_v1, %v3373_v23  ;;  %v3311_v62 = vpack.c.bf16 %v3279_v35, %v3279_v35  ;;  %v8634_v1 = vld [vmem:[#allocation16_spill] sm:$0xff] }
 0x2b1   : > { %v2912_v24 = vadd.f32 %v2839_v47, %v6992_v8  ;;  %v3280_v8 = vld [vmem:[#allocation2 + $0xdf] sm:$0xff] }
 0x2b2   : > { %6171 = vmatmul.msk.bf16.gmra.mxu2 %vm280_vm2, %v3077_v27  ;;  %6204 = vmatmul.msk.bf16.gmra.mxu0 %vm280_vm2, %v2759_v26  ;;  %v2760_v26 = vpack.c.bf16 %v2740_v39, %v2739_v4  ;;  %v3312_v25 = vpack.c.bf16 %v3280_v8, %v3280_v8  ;;  %v8635_v4 = vld [vmem:[#allocation13_spill] sm:$0xff]  ;;  %v2742_v39 = vld [vmem:[#allocation2 + $0xe0] sm:$0xff] }
 0x2b4   : > { %v3470_v13 = vpop.f32.mrf.mxu3  ;;  %v3344_v47 = vunpack.c.l.bf16 %v3312_v25  ;;  %v3282_v25 = vld [vmem:[#allocation2 + $0xef] sm:$0xff] }
 0x2b5   : > { %v3155_v0 = vpop.f32.mrf.mxu2  ;;  %v3546_v40 = vadd.f32 %v3470_v13, %v3228_v9 }
 0x2b6   : > { %v3229_v43 = vadd.f32 %v3155_v0, %v2911_v28  ;;  %v3058_v28 = vmul.f32 %v8632_v55, %v7012_v29  ;;  %v3343_v29 = vunpack.c.l.bf16 %v3311_v62  ;;  %v3376_v13 = vmul.f32 %v3344_v47, %v6654_v16 }
 0x2b7   : > { %v3692_v44 = vpop.f32.mrf.mxu0  ;;  %v3314_v62 = vpack.c.bf16 %v3282_v25, %v3282_v25  ;;  %v2744_v25 = vld [vmem:[#allocation2 + $0xf0] sm:$0xff] }
 0x2b8   : > { %v7287_v18 = vadd.f32 %v3692_v44, %v3546_v40  ;;  %v2842_v36 = vpop.f32.mrf.mxu1 }
 0x2b9   : > { %v2913_v21 = vadd.f32 %v2842_v36, %v7004_v51  ;;  %6188 = vmatmul.msk.bf16.gmra.mxu3 %vm280_vm2, %v3395_v63  ;;  %v3078_v51 = vpack.c.bf16 %v3058_v28, %v8633_v3  ;;  %v3375_v63 = vmul.f32 %v8635_v4, %v3343_v29  ;;  %v2741_v28 = vld [vmem:[#allocation2 + $0xd8] sm:$0xff] }
 0x2bb   : > { %6155 = vmatmul.msk.bf16.gmra.mxu1 %vm280_vm2, %v2760_v26  ;;  %v3396_v35 = vpack.c.bf16 %v3376_v13, %v3375_v63  ;;  %v8639_v63 = vld [vmem:[#allocation24_spill] sm:$0xff] }
 0x2bc   : > { %v3473_v9 = vpop.f32.mrf.mxu3 }
 0x2bd   : > { %v3157_v31 = vpop.f32.mrf.mxu2  ;;  %v3547_v42 = vadd.f32 %v3473_v9, %v3229_v43 }
 0x2be   : > { %v3230_v19 = vadd.f32 %v3157_v31, %v2912_v24  ;;  %v8636_v31 = vld [vmem:[#allocation20_spill] sm:$0xff] }
 0x2bf   : > { %v3695_v27 = vpop.f32.mrf.mxu0 }
 0x2c0   : > { %v7294_v11 = vadd.f32 %v3695_v27, %v3547_v42  ;;  %v2844_v23 = vpop.f32.mrf.mxu1  ;;  %v3281_v42 = vld [vmem:[#allocation2 + $0xe7] sm:$0xff] }
 0x2c1   : > { %v2914_v0 = vadd.f32 %v2844_v23, %v8634_v1  ;;  %v3313_v1 = vpack.c.bf16 %v3281_v42, %v3281_v42 }
 0x2c2   : > { %6172 = vmatmul.msk.bf16.gmra.mxu2 %vm280_vm2, %v3078_v51  ;;  %6205 = vmatmul.msk.bf16.gmra.mxu0 %vm280_vm2, %v2760_v26  ;;  %v2761_v26 = vpack.c.bf16 %v2742_v39, %v2741_v28 }
 0x2c4   : > { %v3475_v24 = vpop.f32.mrf.mxu3 }
 0x2c5   : > { %v3160_v40 = vpop.f32.mrf.mxu2  ;;  %v3548_v44 = vadd.f32 %v3475_v24, %v3230_v19 }
 0x2c6   : > { %v3231_v43 = vadd.f32 %v3160_v40, %v2913_v21  ;;  %v8637_v21 = vld [vmem:[#allocation21_spill] sm:$0xff]  ;;  %v8638_v40 = vld [vmem:[#allocation22_spill] sm:$0xff] }
 0x2c7   : > { %v3697_v36 = vpop.f32.mrf.mxu0  ;;  %v3060_v19 = vmul.f32 %v7010_v32, %v8637_v21  ;;  %v3345_v32 = vunpack.c.l.bf16 %v3313_v1  ;;  %v2969_v1 = vld [vmem:[#allocation2 + $0x109] sm:$0xff] }
 0x2c8   : > { %v7302_v8 = vadd.f32 %v3697_v36, %v3548_v44  ;;  %v2847_v55 = vpop.f32.mrf.mxu1  ;;  %v3346_v44 = vunpack.c.l.bf16 %v3314_v62  ;;  %v3283_v62 = vld [vmem:[#allocation2 + $0xf7] sm:$0xff] }
 0x2c9   : > { %v7305_v9 = vadd.f32 %v2847_v55, %v8636_v31  ;;  %6189 = vmatmul.msk.bf16.gmra.mxu3 %vm280_vm2, %v3396_v35  ;;  %v3079_v24 = vpack.c.bf16 %v3060_v19, %v8638_v40  ;;  %v8640_v35 = vld [vmem:[#allocation15_spill] sm:$0xff]  ;;  %v2743_v19 = vld [vmem:[#allocation2 + $0xe8] sm:$0xff] }
 0x2ca   : > { %v3378_v39 = vmul.f32 %v3346_v44, %v6654_v16  ;;  %v3377_v55 = vmul.f32 %v8640_v35, %v3345_v32  ;;  %v3315_v44 = vpack.c.bf16 %v3283_v62, %v3283_v62 }
 0x2cb   : > { %6156 = vmatmul.msk.bf16.gmra.mxu1 %vm280_vm2, %v2761_v26 }
 0x2cc   : > { %v3478_v51 = vpop.f32.mrf.mxu3  ;;  %v3397_v42 = vpack.c.bf16 %v3378_v39, %v3377_v55 }
 0x2cd   : > { %v3162_v27 = vpop.f32.mrf.mxu2  ;;  %v3549_v23 = vadd.f32 %v3478_v51, %v3231_v43  ;;  %v8641_v51 = vld [vmem:[#allocation26_spill] sm:$0xff] }
 0x2ce   : > { %v3232_v47 = vadd.f32 %v3162_v27, %v2914_v0  ;;  %v3284_v27 = vld [vmem:[#allocation2 + $0xff] sm:$0xff] }
 0x2cf   : > { %v3700_v29 = vpop.f32.mrf.mxu0 }
 0x2d0   : > { %v7311_v13 = vadd.f32 %v3700_v29, %v3549_v23  ;;  %v2849_v4 = vpop.f32.mrf.mxu1  ;;  %v2970_v29 = vld [vmem:[#allocation2 + $0x111] sm:$0xff] }
 0x2d1   : > { %v7315_v36 = vadd.f32 %v2849_v4, %v8639_v63  ;;  %v3316_v4 = vpack.c.bf16 %v3284_v27, %v3284_v27  ;;  %v3002_v63 = vpack.c.bf16 %v2970_v29, %v2970_v29  ;;  %v2745_v27 = vld [vmem:[#allocation2 + $0xf8] sm:$0xff]  ;;  %v2746_v29 = vld [vmem:[#allocation2 + $0x100] sm:$0xff] }
 0x2d2   : > { %6173 = vmatmul.msk.bf16.gmra.mxu2 %vm280_vm2, %v3079_v24  ;;  %6206 = vmatmul.msk.bf16.gmra.mxu0 %vm280_vm2, %v2761_v26  ;;  %v2762_v26 = vpack.c.bf16 %v2744_v25, %v2743_v19  ;;  %v3062_v24 = vmul.f32 %v7056_v12, %v7103_v33  ;;  %v8642_v12 = vld [vmem:[#allocation27_spill] sm:$0xff] }
 0x2d3   : > { %v3034_v39 = vunpack.c.l.bf16 %v3002_v63  ;;  %v3348_v35 = vunpack.c.l.bf16 %v3316_v4 }
 0x2d4   : > { %v3480_v0 = vpop.f32.mrf.mxu3 }
 0x2d5   : > { %v3550_v43 = vadd.f32 %v3480_v0, %v3232_v47  ;;  %v3001_v47 = vpack.c.bf16 %v2969_v1, %v2969_v1  ;;  %v3080_v0 = vpack.c.bf16 %v3062_v24, %v7113_v46  ;;  %v7340_v33 = vmul.f32 %v8642_v12, %v3034_v39  ;;  %v3285_v24 = vld [vmem:[#allocation2 + $0x107] sm:$0xff] }
 0x2d6   : > { %v3380_v19 = vmul.f32 %v3348_v35, %v6654_v16 }
 0x2d7   : > { %v3702_v28 = vpop.f32.mrf.mxu0  ;;  %v3033_v32 = vunpack.c.l.bf16 %v3001_v47 }
 0x2d8   : > { %v7321_v31 = vadd.f32 %v3702_v28, %v3550_v43  ;;  %v2852_v21 = vpop.f32.mrf.mxu1  ;;  %v3347_v43 = vunpack.c.l.bf16 %v3315_v44  ;;  %v8644_v44 = vld [vmem:[#allocation30_spill] sm:$0xff] }
 0x2d9   : > { %v7324_v23 = vadd.f32 %v2852_v21, %v8641_v51  ;;  %6190 = vmatmul.msk.bf16.gmra.mxu3 %vm280_vm2, %v3397_v42  ;;  %v7332_v55 = vmul.f32 %v3033_v32, %v6654_v16  ;;  %v8643_v42 = vld [vmem:[#allocation19_spill] sm:$0xff]  ;;  %v3064_v4 = vmul.f32 %v8642_v12, %v8644_v44  ;;  %v3317_v32 = vpack.c.bf16 %v3285_v24, %v3285_v24 }
 0x2da   : > { %v3379_v21 = vmul.f32 %v8643_v42, %v3347_v43  ;;  %v6266_v12 = vld [vmem:[%s8572_s5 + $0x18] sm:$0xf]  ;;  %v3288_v24 = vld [vmem:[#allocation2 + $0x11f] sm:$0xff] }
 0x2db   : > { %6157 = vmatmul.msk.bf16.gmra.mxu1 %vm280_vm2, %v2762_v26  ;;  %v3939_v62 = vpack.c.bf16 %v7340_v33, %v7332_v55 }
 0x2dc   : > { %v3398_v51 = vpack.c.bf16 %v3380_v19, %v3379_v21  ;;  %v8645_v21 = vld [vmem:[#allocation25_spill] sm:$0xff] }
 0x2e0   : > { %v2854_v28 = vpop.f32.mrf.mxu1 }
 0x2e1   : > { %v7335_v25 = vadd.f32 %v2854_v28, %v7106_v61  ;;  %v3286_v61 = vld [vmem:[#allocation2 + $0x10f] sm:$0xff] }
 0x2e2   : > { %6174 = vmatmul.msk.bf16.gmra.mxu2 %vm280_vm2, %v3080_v0  ;;  %6207 = vmatmul.msk.bf16.gmra.mxu0 %vm280_vm2, %v2762_v26  ;;  %v2763_v26 = vpack.c.bf16 %v2746_v29, %v2745_v27  ;;  %v3318_v63 = vpack.c.bf16 %v3286_v61, %v3286_v61  ;;  %v3081_v0 = vpack.c.bf16 %v3064_v4, %v7139_v50  ;;  %v6413_v27 = vld [vmem:[%s8572_s5 + $0x18] sm:$0x30] }
 0x2e4   : > { %v3350_v43 = vunpack.c.l.bf16 %v3318_v63 }
 0x2e6   : > { %v3382_v42 = vmul.f32 %v3350_v43, %v6654_v16  ;;  %v8646_v43 = vld [vmem:[#allocation29_spill] sm:$0xff] }
 0x2e8   : > { %v2857_v1 = vpop.f32.mrf.mxu1 }
 0x2e9   : > { %v7347_v47 = vadd.f32 %v2857_v1, %v7126_v17  ;;  %6191 = vmatmul.msk.bf16.gmra.mxu3 %vm280_vm2, %v3398_v51  ;;  %v3349_v17 = vunpack.c.l.bf16 %v3317_v32  ;;  %v2748_v51 = vld [vmem:[#allocation2 + $0x110] sm:$0xff]  ;;  %v6267_v1 = vor.u32 %v6413_v27, %v6266_v12  ;;  %v6447_v12 = vld [vmem:[%s6560_s8 + $0x8] sm:$0xff] }
 0x2ea   : > { %v3797_v32 = vld [vmem:[#allocation2 + $0x29] sm:$0xff]  ;;  %581 = vrot.lane.b32.xlu0 %v6447_v12, %s6500_s16  ;;  %v8647_v12 = vld [vmem:[#allocation7_spill] sm:$0xff] }
 0x2eb   : > { %6158 = vmatmul.msk.bf16.gmra.mxu1 %vm280_vm2, %v2763_v26  ;;  %v3381_v19 = vmul.f32 %v8645_v21, %v3349_v17  ;;  %v7368_v44 = vsel %vm4550_vm7, %v6267_v1, 0  ;;  %v3829_v21 = vpack.c.bf16 %v3797_v32, %v3797_v32  ;;  %v6411_v1 = vld [vmem:[%s8572_s5 + $0x8] sm:$0x30] }
 0x2ec   : > { %4560 = vmatpush.bf16.msra.mxu2 %v7368_v44 }
 0x2ed   : > { %v3399_v29 = vpack.c.bf16 %v3382_v42, %v3381_v19  ;;  %v3320_v42 = vpack.c.bf16 %v3288_v24, %v3288_v24  ;;  %v3861_v24 = vunpack.c.l.bf16 %v3829_v21 }
 0x2f0   : > { %v2859_v35 = vpop.f32.mrf.mxu1 }
 0x2f1   : > { %v7355_v28 = vadd.f32 %v2859_v35, %v7147_v53  ;;  %v2747_v53 = vld [vmem:[#allocation2 + $0x108] sm:$0xff]  ;;  %v3066_v35 = vmul.f32 %v8646_v43, %v3034_v39 }
 0x2f2   : > { %6175 = vmatmul.msk.bf16.gmra.mxu2 %vm280_vm2, %v3081_v0  ;;  %6208 = vmatmul.msk.bf16.gmra.mxu0 %vm280_vm2, %v2763_v26  ;;  %v3287_v26 = vld [vmem:[#allocation2 + $0x117] sm:$0xff]  ;;  %v2764_v63 = vpack.c.bf16 %v2748_v51, %v2747_v53  ;;  %v3352_v51 = vunpack.c.l.bf16 %v3320_v42  ;;  %v6275_v39 = vld [vmem:[%s8572_s5 + $0x8] sm:$0xf]  ;;  %v3893_v42 = vmul.f32 %v3861_v24, %v6654_v16 }
 0x2f3   : > { %v3798_v0 = vld [vmem:[#allocation2 + $0x31] sm:$0xff]  ;;  %v3319_v17 = vpack.c.bf16 %v3287_v26, %v3287_v26  ;;  %v3082_v27 = vpack.c.bf16 %v3066_v35, %v7332_v55 }
 0x2f4   : > { %v3830_v19 = vpack.c.bf16 %v3798_v0, %v3798_v0 }
 0x2f5   : > { %v3351_v53 = vunpack.c.l.bf16 %v3319_v17  ;;  %v3384_v17 = vmul.f32 %v3352_v51, %v6654_v16  ;;  %v3800_v51 = vld [vmem:[#allocation2 + $0x41] sm:$0xff] }
 0x2f6   : > { %v3862_v32 = vunpack.c.l.bf16 %v3830_v19 }
 0x2f7   : > { %v3383_v35 = vmul.f32 %v7110_v7, %v3351_v53  ;;  %v3605_v7 = vld [vmem:[#allocation2 + $0x118] sm:$0xff]  ;;  %v3606_v53 = vld [vmem:[#allocation2 + $0x120] sm:$0xff] }
 0x2f8   : > { %v2862_v61 = vpop.f32.mrf.mxu1 }
 0x2f9   : > { %v7371_v4 = vadd.f32 %v2862_v61, %v7154_v22  ;;  %6192 = vmatmul.msk.bf16.gmra.mxu3 %vm280_vm2, %v3399_v29  ;;  %v6448_v22 = vld [vmem:[%s6560_s8] sm:$0xff]  ;;  %v6276_v61 = vor.u32 %v6411_v1, %v6275_v39  ;;  %v3622_v1 = vpack.c.bf16 %v3606_v53, %v3605_v7 }
 0x2fa   : > { %579 = vrot.lane.b32.xlu2 %v6448_v22, %s6500_s16  ;;  %v6449_v22 = vld [vmem:[%s6560_s8 + $0x10] sm:$0xff]  ;;  %v3799_v39 = vld [vmem:[#allocation2 + $0x39] sm:$0xff] }
 0x2fb   : > { %6159 = vmatmul.msk.bf16.gmra.mxu1 %vm280_vm2, %v2764_v63  ;;  %v7394_v0 = vsel %vm4550_vm7, %v6276_v61, 0  ;;  %583 = vrot.lane.b32.xlu0 %v6449_v22, %s6500_s16  ;;  %v3831_v61 = vpack.c.bf16 %v3799_v39, %v3799_v39 }
 0x2fc   : > { %4590 = vmatpush.bf16.msra.mxu3 %v7394_v0 }
 0x300   : > { %v2864_v29 = vpop.f32.mrf.mxu1 }
 0x301   : > { %v7389_v26 = vadd.f32 %v2864_v29, %v7161_v41  ;;  %v3894_v41 = vmul.f32 %v8647_v12, %v3862_v32  ;;  %v3832_v29 = vpack.c.bf16 %v3800_v51, %v3800_v51 }
 0x302   : > { %6176 = vmatmul.msk.bf16.gmra.mxu2 %vm280_vm2, %v3082_v27  ;;  %6209 = vmatmul.msk.bf16.gmra.mxu0 %vm280_vm2, %v2764_v63  ;;  %v3400_v27 = vpack.c.bf16 %v3384_v17, %v3383_v35  ;;  %v3863_v35 = vunpack.c.l.bf16 %v3831_v61 }
 0x303   : > { %v3925_v19 = vpack.c.bf16 %v3894_v41, %v3893_v42  ;;  %v8648_v41 = vld [vmem:[#allocation32_spill] sm:$0xff] }
 0x304   : > { %v3895_v42 = vmul.f32 %v3863_v35, %v6654_v16 }
 0x308   : > { %v2867_v63 = vpop.f32.mrf.mxu1 }
 0x309   : > { %v7404_v21 = vadd.f32 %v2867_v63, %v7167_v2  ;;  %6193 = vmatmul.msk.bf16.gmra.mxu3 %vm280_vm2, %v3400_v27  ;;  %v3864_v2 = vunpack.c.l.bf16 %v3832_v29  ;;  %v3801_v63 = vld [vmem:[#allocation2 + $0x49] sm:$0xff]  ;;  %v8649_v29 = vld [vmem:[#allocation8_spill] sm:$0xff] }
 0x30a   : > { %v3833_v7 = vpack.c.bf16 %v3801_v63, %v3801_v63 }
 0x30b   : > { %6212 = vmatmul.msk.bf16.vlgmr.msra.gmra.mxu1 %vm280_vm2, %v3925_v19  ;;  %v3896_v17 = vmul.f32 %v6740_v58, %v3864_v2  ;;  %v3802_v19 = vld [vmem:[#allocation2 + $0x51] sm:$0xff] }
 0x30c   : > { %v3865_v39 = vunpack.c.l.bf16 %v3833_v7  ;;  %v8650_v7 = vld [vmem:[#allocation9_spill] sm:$0xff] }
 0x30d   : > { %v3926_v27 = vpack.c.bf16 %v3896_v17, %v3895_v42  ;;  %v3804_v17 = vld [vmem:[#allocation2 + $0x61] sm:$0xff]  ;;  %v3803_v42 = vld [vmem:[#allocation2 + $0x59] sm:$0xff] }
 0x30e   : > { %v3897_v58 = vmul.f32 %v3865_v39, %v6654_v16 }
 0x310   : > { %v2869_v24 = vpop.f32.mrf.mxu1 }
 0x311   : > { %v7409_v32 = vadd.f32 %v2869_v24, %v7173_v49  ;;  %v3834_v49 = vpack.c.bf16 %v3802_v19, %v3802_v19 }
 0x312   : > { %6210 = vmatmul.msk.bf16.gmra.mxu0 %vm280_vm2, %v3622_v1 }
 0x313   : > { %v3866_v1 = vunpack.c.l.bf16 %v3834_v49 }
 0x315   : > { %v3898_v61 = vmul.f32 %v8649_v29, %v3866_v1  ;;  %v3805_v29 = vld [vmem:[#allocation2 + $0x69] sm:$0xff] }
 0x317   : > { %v3927_v35 = vpack.c.bf16 %v3898_v61, %v3897_v58  ;;  %v3806_v58 = vld [vmem:[#allocation2 + $0x71] sm:$0xff] }
 0x318   : > { %v2872_v12 = vpop.f32.mrf.mxu1  ;;  %v3838_v61 = vpack.c.bf16 %v3806_v58, %v3806_v58 }
 0x319   : > { %v7415_v22 = vadd.f32 %v2872_v12, %v8648_v41  ;;  %v3836_v12 = vpack.c.bf16 %v3804_v17, %v3804_v17  ;;  %v3835_v41 = vpack.c.bf16 %v3803_v42, %v3803_v42 }
 0x31a   : > { %v3870_v17 = vunpack.c.l.bf16 %v3838_v61  ;;  %v8652_v61 = vld [vmem:[#allocation10_spill] sm:$0xff] }
 0x31b   : > { %6213 = vmatmul.msk.bf16.gmra.mxu1 %vm280_vm2, %v3926_v27  ;;  %v3868_v63 = vunpack.c.l.bf16 %v3836_v12  ;;  %v3867_v19 = vunpack.c.l.bf16 %v3835_v41 }
 0x31c   : > { %v3902_v12 = vmul.f32 %v6814_v60, %v3870_v17 }
 0x31d   : > { %v3900_v49 = vmul.f32 %v8650_v7, %v3868_v63  ;;  %v3807_v7 = vld [vmem:[#allocation2 + $0x79] sm:$0xff] }
 0x320   : > { %v2874_v53 = vpop.f32.mrf.mxu1 }
 0x321   : > { %v7419_v51 = vadd.f32 %v2874_v53, %v7185_v59  ;;  %v3899_v53 = vmul.f32 %v3867_v19, %v6654_v16 }
 0x323   : > { %v3928_v1 = vpack.c.bf16 %v3900_v49, %v3899_v53  ;;  %v3808_v49 = vld [vmem:[#allocation2 + $0x81] sm:$0xff]  ;;  %v3839_v53 = vpack.c.bf16 %v3807_v7, %v3807_v7 }
 0x325   : > { %v3871_v58 = vunpack.c.l.bf16 %v3839_v53  ;;  %v8653_v53 = vld [vmem:[#allocation11_spill] sm:$0xff] }
 0x327   : > { %v3903_v60 = vmul.f32 %v3871_v58, %v6654_v16 }
 0x328   : > { %v2877_v24 = vpop.f32.mrf.mxu1 }
 0x329   : > { %v7424_v2 = vadd.f32 %v2877_v24, %v7191_v37  ;;  %v3837_v24 = vpack.c.bf16 %v3805_v29, %v3805_v29 }
 0x32b   : > { %6214 = vmatmul.msk.bf16.gmra.mxu1 %vm280_vm2, %v3927_v35  ;;  %v3869_v42 = vunpack.c.l.bf16 %v3837_v24 }
 0x32d   : > { %v3901_v41 = vmul.f32 %v3869_v42, %v6654_v16 }
 0x32f   : > { %v3929_v19 = vpack.c.bf16 %v3902_v12, %v3901_v41  ;;  %v3810_v12 = vld [vmem:[#allocation2 + $0x91] sm:$0xff]  ;;  %v3809_v41 = vld [vmem:[#allocation2 + $0x89] sm:$0xff] }
 0x330   : > { %v2879_v27 = vpop.f32.mrf.mxu1 }
 0x331   : > { %v7428_v59 = vadd.f32 %v2879_v27, %v7197_v6 }
 0x338   : > { %v2882_v39 = vpop.f32.mrf.mxu1 }
 0x339   : > { %v7433_v37 = vadd.f32 %v2882_v39, %v7203_v52  ;;  %v8651_v52 = vld [vmem:[#allocation33_spill] sm:$0xff]  ;;  %v3840_v39 = vpack.c.bf16 %v3808_v49, %v3808_v49 }
 0x33b   : > { %6215 = vmatmul.msk.bf16.gmra.mxu1 %vm280_vm2, %v3928_v1  ;;  %v3872_v29 = vunpack.c.l.bf16 %v3840_v39 }
 0x33d   : > { %v3904_v24 = vmul.f32 %v8652_v61, %v3872_v29  ;;  %v3811_v61 = vld [vmem:[#allocation2 + $0x99] sm:$0xff] }
 0x33f   : > { %v3930_v42 = vpack.c.bf16 %v3904_v24, %v3903_v60  ;;  %v3812_v60 = vld [vmem:[#allocation2 + $0xa1] sm:$0xff] }
 0x340   : > { %v2884_v35 = vpop.f32.mrf.mxu1  ;;  %v3844_v24 = vpack.c.bf16 %v3812_v60, %v3812_v60 }
 0x341   : > { %v7437_v6 = vadd.f32 %v2884_v35, %v7209_v10 }
 0x348   : > { %v2887_v27 = vpop.f32.mrf.mxu1 }
 0x349   : > { %v7442_v63 = vadd.f32 %v2887_v27, %v8651_v52  ;;  %v3842_v27 = vpack.c.bf16 %v3810_v12, %v3810_v12  ;;  %v3841_v52 = vpack.c.bf16 %v3809_v41, %v3809_v41  ;;  %v3876_v12 = vunpack.c.l.bf16 %v3844_v24 }
 0x34b   : > { %6216 = vmatmul.msk.bf16.gmra.mxu1 %vm280_vm2, %v3929_v19  ;;  %v3874_v7 = vunpack.c.l.bf16 %v3842_v27  ;;  %v3873_v49 = vunpack.c.l.bf16 %v3841_v52  ;;  %v8654_v27 = vld [vmem:[#allocation12_spill] sm:$0xff] }
 0x34c   : > { %v3908_v52 = vmul.f32 %v8654_v27, %v3876_v12  ;;  %v7492_v12 = vld [vmem:[%s8571_s4] ss:$0 sm:$0xff] }
 0x34d   : > { %v3906_v39 = vmul.f32 %v8653_v53, %v3874_v7 }
 0x350   : > { %v2889_v1 = vpop.f32.mrf.mxu1 }
 0x351   : > { %v7446_v10 = vadd.f32 %v2889_v1, %v7221_v15  ;;  %v3905_v1 = vmul.f32 %v3873_v49, %v6654_v16 }
 0x353   : > { %v3931_v29 = vpack.c.bf16 %v3906_v39, %v3905_v1  ;;  %v3814_v39 = vld [vmem:[#allocation2 + $0xb1] sm:$0xff] }
 0x358   : > { %v2892_v35 = vpop.f32.mrf.mxu1 }
 0x359   : > { %v7451_v17 = vadd.f32 %v2892_v35, %v7227_v30  ;;  %v3843_v35 = vpack.c.bf16 %v3811_v61, %v3811_v61 }
 0x35b   : > { %6217 = vmatmul.msk.bf16.gmra.mxu1 %vm280_vm2, %v3930_v42  ;;  %v3875_v41 = vunpack.c.l.bf16 %v3843_v35 }
 0x360   : > { %v2894_v19 = vpop.f32.mrf.mxu1 }
 0x361   : > { %v7455_v15 = vadd.f32 %v2894_v19, %v7233_v45  ;;  %v3907_v19 = vmul.f32 %v3875_v41, %v6654_v16 }
 0x363   : > { %v3932_v53 = vpack.c.bf16 %v3908_v52, %v3907_v19  ;;  %v3816_v19 = vld [vmem:[#allocation2 + $0xc1] sm:$0xff] }
 0x368   : > { %v2897_v58 = vpop.f32.mrf.mxu1 }
 0x369   : > { %v7460_v30 = vadd.f32 %v2897_v58, %v7239_v5  ;;  %v7470_v5 = vld [vmem:[%s8572_s5 + $0x10] sm:$0xff]  ;;  %v3846_v58 = vpack.c.bf16 %v3814_v39, %v3814_v39  ;;  %v7498_v39 = vpop.f32.mrf.mxu2 }
 0x36a   : > { %4561 = vmatpush.bf16.msra.mxu2 %v7470_v5 }
 0x36b   : > { %6218 = vmatmul.msk.bf16.gmra.mxu1 %vm280_vm2, %v3931_v29  ;;  %v7481_v29 = vld [vmem:[%s8572_s5] sm:$0xff]  ;;  %v3878_v24 = vunpack.c.l.bf16 %v3846_v58 }
 0x36c   : > { %4591 = vmatpush.bf16.msra.mxu3 %v7481_v29 }
 0x370   : > { %v2899_v42 = vpop.f32.mrf.mxu1 }
 0x371   : > { %v7464_v45 = vadd.f32 %v2899_v42, %v7245_v20  ;;  %v3813_v20 = vld [vmem:[#allocation2 + $0xa9] sm:$0xff]  ;;  %v3910_v42 = vmul.f32 %v6919_v14, %v3878_v24 }
 0x372   : > { %v3845_v1 = vpack.c.bf16 %v3813_v20, %v3813_v20  ;;  %v3848_v20 = vpack.c.bf16 %v3816_v19, %v3816_v19 }
 0x378   : > { %v2902_v7 = vpop.f32.mrf.mxu1 }
 0x379   : > { %v7475_v49 = vadd.f32 %v2902_v7, %v7252_v48  ;;  %v3877_v48 = vunpack.c.l.bf16 %v3845_v1 }
 0x37b   : > { %6219 = vmatmul.msk.bf16.gmra.mxu1 %vm280_vm2, %v3932_v53  ;;  %v3909_v35 = vmul.f32 %v3877_v48, %v6654_v16 }
 0x37d   : > { %v3933_v52 = vpack.c.bf16 %v3910_v42, %v3909_v35 }
 0x380   : > { %v2904_v60 = vpop.f32.mrf.mxu1 }
 0x381   : > { %v7485_v61 = vadd.f32 %v2904_v60, %v7259_v34  ;;  %v3815_v34 = vld [vmem:[#allocation2 + $0xb9] sm:$0xff]  ;;  %v3880_v60 = vunpack.c.l.bf16 %v3848_v20 }
 0x382   : > { %v3847_v14 = vpack.c.bf16 %v3815_v34, %v3815_v34 }
 0x383   : > { %v3912_v42 = vmul.f32 %v6941_v56, %v3880_v60  ;;  %v6450_v56 = vld [vmem:[%s6560_s8 + $0x18] sm:$0xff] }
 0x384   : > { %v3879_v24 = vunpack.c.l.bf16 %v3847_v14 }
 0x388   : > { %v4003_v41 = vpop.f32.mrf.mxu1 }
 0x389   : > { %v4083_v27 = vadd.f32 %v4003_v41, %v7266_v38  ;;  %v7501_v38 = vpop.f32.mrf.mxu3  ;;  %v3705_v41 = vpop.f32.mrf.mxu0 }
 0x38b   : > { %v4118_v7 = vadd.f32 %v7492_v12, %v4083_v27  ;;  %6220 = vmatmul.msk.bf16.gmra.mxu1 %vm280_vm2, %v3933_v52  ;;  %v3911_v27 = vmul.f32 %v3879_v24, %v6654_v16 }
 0x38d   : > { %v4150_v53 = vmax.f32 %v4118_v7, 0.0  ;;  %v3934_v7 = vpack.c.bf16 %v3912_v42, %v3911_v27 }
 0x38f   : > { %4214 = vrot.lane.b32.xlu1 %v4150_v53, %s6501_s29 }
 0x390   : > { %v4005_v1 = vpop.f32.mrf.mxu1 }
 0x391   : > { %v4084_v58 = vadd.f32 %v4005_v1, %v7273_v54  ;;  %v3167_v54 = vpop.f32.mrf.mxu2  ;;  %v3485_v53 = vpop.f32.mrf.mxu3 }
 0x392   : > { %v7513_v14 = vpop.f32.mrf.mxu0 }
 0x393   : > { %v4119_v48 = vadd.f32 %v7492_v12, %v4084_v58 }
 0x395   : > { %v4151_v35 = vmax.f32 %v4119_v48, 0.0 }
 0x397   : > { %4216 = vrot.lane.b32.xlu2 %v4151_v35, %s6501_s29  ;;  %v6451_v35 = vld [vmem:[%s6560_s8 + $0x20] sm:$0xff] }
 0x398   : > { %v4008_v52 = vpop.f32.mrf.mxu1 }
 0x399   : > { %v4085_v19 = vadd.f32 %v4008_v52, %v7280_v57  ;;  %v7517_v60 = vpop.f32.mrf.mxu2  ;;  %v7519_v24 = vpop.f32.mrf.mxu3 }
 0x39a   : > { %v7525_v52 = vpop.f32.mrf.mxu0 }
 0x39b   : > { %v4120_v34 = vadd.f32 %v7492_v12, %v4085_v19  ;;  %6221 = vmatmul.msk.bf16.gmra.mxu1 %vm280_vm2, %v3934_v7  ;;  %v8655_v19 = vld [vmem:[#allocation18_spill] sm:$0xff] }
 0x39c   : > { %v8656_v7 = vpack.c.bf16 %v8655_v19, %v8633_v3 }
 0x39d   : > { %v4152_v20 = vmax.f32 %v4120_v34, 0.0 }
 0x39f   : > { %4218 = vrot.lane.b32.xlu1 %v4152_v20, %s6501_s29  ;;  %585 = vrot.lane.b32.xlu2 %v6450_v56, %s6500_s16  ;;  %v6452_v56 = vld [vmem:[%s6560_s8 + $0x28] sm:$0xff] }
 0x3a0   : > { %v4010_v1 = vpop.f32.mrf.mxu1 }
 0x3a1   : > { %v4086_v58 = vadd.f32 %v4010_v1, %v7287_v18  ;;  %v7532_v20 = vpop.f32.mrf.mxu2  ;;  %v7537_v1 = vpop.f32.mrf.mxu3 }
 0x3a3   : > { %v4121_v57 = vadd.f32 %v7492_v12, %v4086_v58 }
 0x3a5   : > { %v4153_v48 = vmax.f32 %v4121_v57, 0.0 }
 0x3a7   : > { %587 = vrot.lane.b32.xlu1 %v6451_v35, %s6500_s16  ;;  %4220 = vrot.lane.b32.xlu0 %v4153_v48, %s6501_s29  ;;  %v7541_v48 = vpop.f32.mrf.mxu0  ;;  %v6453_v35 = vld [vmem:[%s6560_s8 + $0x30] sm:$0xff] }
 0x3a8   : > { %v4013_v42 = vpop.f32.mrf.mxu1 }
 0x3a9   : > { %v4087_v27 = vadd.f32 %v4013_v42, %v7294_v11  ;;  %v7546_v42 = vpop.f32.mrf.mxu2  ;;  %v7549_v19 = vpop.f32.mrf.mxu3 }
 0x3ab   : > { %v4122_v18 = vadd.f32 %v7492_v12, %v4087_v27  ;;  %6222 = vmatmul.msk.bf16.gmra.mxu1 %vm280_vm2, %v8656_v7 }
 0x3ad   : > { %v4154_v34 = vmax.f32 %v4122_v18, 0.0 }
 0x3af   : > { %4222 = vrot.lane.b32.xlu2 %v4154_v34, %s6501_s29  ;;  %589 = vrot.lane.b32.xlu0 %v6452_v56, %s6500_s16 }
 0x3b0   : > { %v4015_v11 = vpop.f32.mrf.mxu1 }
 0x3b1   : > { %v4088_v58 = vadd.f32 %v4015_v11, %v7302_v8  ;;  %v8657_v8 = vld [vmem:[#allocation23_spill] sm:$0xff]  ;;  %v7556_v11 = vpop.f32.mrf.mxu0 }
 0x3b2   : > { %v8658_v34 = vpack.c.bf16 %v8657_v8, %v8638_v40 }
 0x3b3   : > { %v4123_v57 = vadd.f32 %v7492_v12, %v4088_v58  ;;  %v6454_v58 = vld [vmem:[%s6560_s8 + $0x38] sm:$0xff] }
 0x3b5   : > { %v4155_v3 = vmax.f32 %v4123_v57, 0.0 }
 0x3b7   : > { %4224 = vrot.lane.b32.xlu1 %v4155_v3, %s6501_s29  ;;  %591 = vrot.lane.b32.xlu2 %v6453_v35, %s6500_s16  ;;  %v7564_v35 = vpop.f32.mrf.mxu2 }
 0x3b8   : > { %v4018_v27 = vpop.f32.mrf.mxu1 }
 0x3b9   : > { %v4089_v18 = vadd.f32 %v4018_v27, %v7311_v13  ;;  %v3233_v13 = vadd.f32 %v7498_v39, %v7305_v9 }
 0x3bb   : > { %v4124_v7 = vadd.f32 %v7492_v12, %v4089_v18  ;;  %6223 = vmatmul.msk.bf16.gmra.mxu1 %vm280_vm2, %v8658_v34  ;;  %v3551_v40 = vadd.f32 %v7501_v38, %v3233_v13  ;;  %v7568_v18 = vpop.f32.mrf.mxu3  ;;  %v6455_v34 = vld [vmem:[%s6560_s8 + $0x40] sm:$0xff] }
 0x3bd   : > { %v4156_v56 = vmax.f32 %v4124_v7, 0.0  ;;  %v3773_v8 = vadd.f32 %v3705_v41, %v3551_v40  ;;  %v580_v40 = vpop.permute.xlu2 %579 }
 0x3be   : > { %676 = vst.msk [vmem:[#allocation3] sm:$0xff] %vm675_vm8, %v580_v40  ;;  %v8661_v40 = vld [vmem:[#allocation31_spill] sm:$0xff] }
 0x3bf   : > { %593 = vrot.lane.b32.xlu1 %v6454_v58, %s6500_s16  ;;  %4226 = vrot.lane.b32.xlu0 %v4156_v56, %s6501_s29  ;;  %v7573_v56 = vpop.f32.mrf.mxu0  ;;  %v7581_v41 = vpop.f32.mrf.mxu2 }
 0x3c0   : > { %v4020_v57 = vpop.f32.mrf.mxu1  ;;  %v3239_v33 = vadd.f32 %v7581_v41, %v7371_v4 }
 0x3c1   : > { %v4090_v3 = vadd.f32 %v4020_v57, %v7321_v31  ;;  %v3234_v31 = vadd.f32 %v3167_v54, %v7315_v36  ;;  %v8659_v57 = vld [vmem:[#allocation28_spill] sm:$0xff]  ;;  %v6456_v54 = vld [vmem:[%s6560_s8 + $0x48] sm:$0xff] }
 0x3c2   : > { %v8660_v13 = vpack.c.bf16 %v8659_v57, %v7113_v46 }
 0x3c3   : > { %v4125_v27 = vadd.f32 %v7492_v12, %v4090_v3  ;;  %v3552_v58 = vadd.f32 %v3485_v53, %v3234_v31  ;;  %v3235_v53 = vadd.f32 %v7517_v60, %v7324_v23  ;;  %v582_v31 = vpop.permute.xlu0 %581 }
 0x3c4   : > { %677 = vst.msk [vmem:[#allocation3 + $0x8] sm:$0xff] %vm675_vm8, %v582_v31 }
 0x3c5   : > { %v4157_v7 = vmax.f32 %v4125_v27, 0.0  ;;  %v7583_v27 = vpop.f32.mrf.mxu3  ;;  %v3774_v36 = vadd.f32 %v7513_v14, %v3552_v58 }
 0x3c7   : > { %4228 = vrot.lane.b32.xlu2 %v4157_v7, %s6501_s29  ;;  %595 = vrot.lane.b32.xlu0 %v6455_v34, %s6500_s16  ;;  %v3553_v34 = vadd.f32 %v7519_v24, %v3235_v53  ;;  %v3236_v24 = vadd.f32 %v7532_v20, %v7335_v25  ;;  %v6458_v53 = vld [vmem:[%s6560_s8 + $0x58] sm:$0xff] }
 0x3c8   : > { %v4023_v9 = vpop.f32.mrf.mxu1 }
 0x3c9   : > { %v4091_v39 = vadd.f32 %v4023_v9, %v3773_v8  ;;  %v7592_v8 = vpop.f32.mrf.mxu0  ;;  %v3775_v58 = vadd.f32 %v7525_v52, %v3553_v34 }
 0x3cb   : > { %v4126_v38 = vadd.f32 %v7492_v12, %v4091_v39  ;;  %6224 = vmatmul.msk.bf16.gmra.mxu1 %vm280_vm2, %v8660_v13  ;;  %v7597_v39 = vpop.f32.mrf.mxu2  ;;  %v3554_v13 = vadd.f32 %v7537_v1, %v3236_v24  ;;  %v3237_v1 = vadd.f32 %v7546_v42, %v7347_v47  ;;  %v3827_v47 = vld [vmem:[#allocation2 + $0x119] sm:$0xff]  ;;  %v3828_v42 = vld [vmem:[#allocation2 + $0x121] sm:$0xff] }
 0x3cd   : > { %v4158_v3 = vmax.f32 %v4126_v38, 0.0  ;;  %v6457_v38 = vld [vmem:[%s6560_s8 + $0x50] sm:$0xff]  ;;  %v7603_v23 = vpop.f32.mrf.mxu3  ;;  %v3555_v34 = vadd.f32 %v7549_v19, %v3237_v1 }
 0x3cf   : > { %4230 = vrot.lane.b32.xlu1 %v4158_v3, %s6501_s29  ;;  %597 = vrot.lane.b32.xlu2 %v6456_v54, %s6500_s16 }
 0x3d0   : > { %v4025_v46 = vpop.f32.mrf.mxu1 }
 0x3d1   : > { %v4092_v7 = vadd.f32 %v4025_v46, %v3774_v36  ;;  %v8662_v36 = vpack.c.bf16 %v8661_v40, %v7139_v50  ;;  %v7613_v52 = vpop.f32.mrf.mxu0  ;;  %v3776_v46 = vadd.f32 %v7541_v48, %v3554_v13 }
 0x3d3   : > { %v4127_v9 = vadd.f32 %v7492_v12, %v4092_v7  ;;  %v7619_v25 = vpop.f32.mrf.mxu2 }
 0x3d5   : > { %v4159_v14 = vmax.f32 %v4127_v9, 0.0  ;;  %v7623_v7 = vpop.f32.mrf.mxu3 }
 0x3d7   : > { %599 = vrot.lane.b32.xlu1 %v6457_v38, %s6500_s16  ;;  %4232 = vrot.lane.b32.xlu0 %v4159_v14, %s6501_s29  ;;  %v3777_v14 = vadd.f32 %v7556_v11, %v3555_v34  ;;  %v3859_v11 = vpack.c.bf16 %v3827_v47, %v3827_v47  ;;  %v584_v34 = vpop.permute.xlu0 %583 }
 0x3d8   : > { %v4028_v60 = vpop.f32.mrf.mxu1  ;;  %678 = vst.msk [vmem:[#allocation3 + $0x10] sm:$0xff] %vm675_vm8, %v584_v34 }
 0x3d9   : > { %v4093_v57 = vadd.f32 %v4028_v60, %v3775_v58  ;;  %v7627_v48 = vpop.f32.mrf.mxu0  ;;  %v6459_v58 = vld [vmem:[%s6560_s8 + $0x60] sm:$0xff]  ;;  %v3238_v60 = vadd.f32 %v7564_v35, %v7355_v28  ;;  %v6460_v28 = vld [vmem:[%s6560_s8 + $0x68] sm:$0xff]  ;;  %v3891_v35 = vunpack.c.l.bf16 %v3859_v11 }
 0x3db   : > { %v4128_v3 = vadd.f32 %v7492_v12, %v4093_v57  ;;  %6225 = vmatmul.msk.bf16.gmra.mxu1 %vm280_vm2, %v8662_v36  ;;  %v7635_v24 = vpop.f32.mrf.mxu2  ;;  %v3556_v57 = vadd.f32 %v7568_v18, %v3238_v60  ;;  %v3923_v1 = vmul.f32 %v3891_v35, %v6654_v16  ;;  %v3240_v16 = vadd.f32 %v7597_v39, %v7389_v26  ;;  %v6311_v39 = vld [vmem:[%s8572_s5 + $0x58] sm:$0xf] }
 0x3dd   : > { %v4160_v54 = vmax.f32 %v4128_v3, 0.0  ;;  %v3860_v3 = vpack.c.bf16 %v3828_v42, %v3828_v42  ;;  %v7643_v40 = vpop.f32.mrf.mxu3  ;;  %v6415_v42 = vld [vmem:[%s8572_s5 + $0x28] sm:$0x30]  ;;  %v3558_v60 = vadd.f32 %v7603_v23, %v3240_v16  ;;  %v6320_v23 = vld [vmem:[%s8572_s5 + $0x68] sm:$0xf]  ;;  %v3242_v16 = vadd.f32 %v7635_v24, %v7409_v32 }
 0x3de   : > { %v6302_v24 = vld [vmem:[%s8572_s5 + $0x48] sm:$0xf] }
 0x3df   : > { %4234 = vrot.lane.b32.xlu2 %v4160_v54, %s6501_s29  ;;  %601 = vrot.lane.b32.xlu0 %v6458_v53, %s6500_s16  ;;  %v3778_v54 = vadd.f32 %v7573_v56, %v3556_v57  ;;  %v3892_v18 = vunpack.c.l.bf16 %v3860_v3  ;;  %v3557_v56 = vadd.f32 %v7583_v27, %v3239_v33  ;;  %v6461_v27 = vld [vmem:[%s6560_s8 + $0x70] sm:$0xff]  ;;  %v6421_v57 = vld [vmem:[%s8572_s5 + $0x58] sm:$0x30]  ;;  %v3780_v35 = vadd.f32 %v7613_v52, %v3558_v60 }
 0x3e0   : > { %v4030_v20 = vpop.f32.mrf.mxu1  ;;  %v3241_v52 = vadd.f32 %v7619_v25, %v7404_v21  ;;  %v6463_v21 = vld [vmem:[%s6560_s8 + $0x80] sm:$0xff] }
 0x3e1   : > { %v4094_v50 = vadd.f32 %v4030_v20, %v3776_v46  ;;  %v7649_v46 = vpop.f32.mrf.mxu0  ;;  %v3779_v41 = vadd.f32 %v7592_v8, %v3557_v56  ;;  %v6284_v8 = vld [vmem:[%s8572_s5 + $0x28] sm:$0xf]  ;;  %v7727_v25 = vld [vmem:[%s8572_s5 + $0x20] sm:$0xff] }
 0x3e2   : > { %v6285_v26 = vor.u32 %v6415_v42, %v6284_v8 }
 0x3e3   : > { %v4129_v9 = vadd.f32 %v7492_v12, %v4094_v50  ;;  %v3924_v50 = vmul.f32 %v8646_v43, %v3892_v18  ;;  %v6462_v18 = vld [vmem:[%s6560_s8 + $0x78] sm:$0xff] }
 0x3e4   : > { %v7688_v3 = vsel %vm4550_vm7, %v6285_v26, 0  ;;  %v3560_v26 = vadd.f32 %v7643_v40, %v3242_v16  ;;  %v7761_v40 = vld [vmem:[%s8572_s5 + $0x30] sm:$0xff] }
 0x3e5   : > { %v4161_v31 = vmax.f32 %v4129_v9, 0.0  ;;  %v7658_v9 = vpop.f32.mrf.mxu2  ;;  %v7661_v4 = vpop.f32.mrf.mxu3  ;;  %4623 = vmatpush.bf16.msrb.mxu2 %v7688_v3 }
 0x3e7   : > { %4236 = vrot.lane.b32.xlu1 %v4161_v31, %s6501_s29  ;;  %603 = vrot.lane.b32.xlu2 %v6459_v58, %s6500_s16 }
 0x3e8   : > { %v4033_v38 = vpop.f32.mrf.mxu1 }
 0x3e9   : > { %v4095_v19 = vadd.f32 %v4033_v38, %v3777_v14  ;;  %v3940_v14 = vpack.c.bf16 %v3924_v50, %v3923_v1  ;;  %v7669_v47 = vpop.f32.mrf.mxu0  ;;  %v3559_v1 = vadd.f32 %v7623_v7, %v3241_v52  ;;  %v6293_v7 = vld [vmem:[%s8572_s5 + $0x38] sm:$0xf]  ;;  %4624 = vmatpush.bf16.msrb.mxu2 %v7727_v25 }
 0x3eb   : > { %v4130_v13 = vadd.f32 %v7492_v12, %v4095_v19  ;;  %6226 = vmatmul.msk.bf16.gmra.mxu1 %vm280_vm2, %v3939_v62 }
 0x3ed   : > { %v4162_v36 = vmax.f32 %v4130_v13, 0.0  ;;  %v6312_v13 = vor.u32 %v6421_v57, %v6311_v39  ;;  %v7706_v33 = vpop.f32.mrf.mxu3  ;;  %v6419_v57 = vld [vmem:[%s8572_s5 + $0x48] sm:$0x30] }
 0x3ef   : > { %605 = vrot.lane.b32.xlu1 %v6460_v28, %s6500_s16  ;;  %4238 = vrot.lane.b32.xlu0 %v4162_v36, %s6501_s29  ;;  %v6423_v36 = vld [vmem:[%s8572_s5 + $0x68] sm:$0x30] }
 0x3f0   : > { %v4035_v55 = vpop.f32.mrf.mxu1  ;;  %v6321_v28 = vor.u32 %v6423_v36, %v6320_v23  ;;  %v3782_v23 = vadd.f32 %v7649_v46, %v3560_v26  ;;  %v6303_v36 = vor.u32 %v6419_v57, %v6302_v24 }
 0x3f1   : > { %v4096_v62 = vadd.f32 %v4035_v55, %v3778_v54  ;;  %v4217_v53 = vpop.permute.xlu2 %4216  ;;  %v7696_v54 = vpop.f32.mrf.mxu2  ;;  %v7704_v55 = vsel %vm4550_vm7, %v6312_v13, 0 }
 0x3f2   : > { %4312 = vst.msk [vmem:[#allocation3 + $0x8] sm:$0xff] %vm4310_vm9, %v4217_v53  ;;  %5329 = vmatpush.bf16.msrb.mxu0 %v7704_v55  ;;  %v7710_v53 = vsel %vm4550_vm7, %v6321_v28, 0  ;;  %v7718_v34 = vpop.f32.mrf.mxu0  ;;  %v3243_v28 = vadd.f32 %v7658_v9, %v7415_v22 }
 0x3f3   : > { %v4131_v20 = vadd.f32 %v7492_v12, %v4096_v62  ;;  %5349 = vmatpush.bf16.msrb.mxu1 %v7710_v53 }
 0x3f5   : > { %v4163_v31 = vmax.f32 %v4131_v20, 0.0  ;;  %v7742_v60 = vpop.f32.mrf.mxu3 }
 0x3f7   : > { %4240 = vrot.lane.b32.xlu2 %v4163_v31, %s6501_s29  ;;  %607 = vrot.lane.b32.xlu0 %v6461_v27, %s6500_s16 }
 0x3f8   : > { %v4038_v58 = vpop.f32.mrf.mxu1 }
 0x3f9   : > { %v4097_v43 = vadd.f32 %v4038_v58, %v3779_v41  ;;  %v586_v38 = vpop.permute.xlu2 %585  ;;  %v3781_v41 = vadd.f32 %v7627_v48, %v3559_v1  ;;  %v6464_v58 = vld [vmem:[%s6560_s8 + $0x88] sm:$0xff]  ;;  %v6417_v48 = vld [vmem:[%s8572_s5 + $0x38] sm:$0x30] }
 0x3fa   : > { %679 = vst.msk [vmem:[#allocation3 + $0x18] sm:$0xff] %vm675_vm8, %v586_v38  ;;  %v6294_v42 = vor.u32 %v6417_v48, %v6293_v7 }
 0x3fb   : > { %v4132_v19 = vadd.f32 %v7492_v12, %v4097_v43  ;;  %6227 = vmatmul.msk.bf16.gmra.mxu1 %vm280_vm2, %v3940_v14  ;;  %vm4374_vm2 = vcmask 228352   ;;  %v7732_v14 = vpop.f32.mrf.mxu2 }
 0x3fc   : > { %v7749_v32 = vsel %vm4550_vm7, %v6294_v42, 0 }
 0x3fd   : > { %v4164_v11 = vmax.f32 %v4132_v19, 0.0  ;;  %4657 = vmatpush.bf16.msrb.mxu3 %v7749_v32  ;;  %v7781_v7 = vpop.f32.mrf.mxu3 }
 0x3ff   : > { %4242 = vrot.lane.b32.xlu1 %v4164_v11, %s6501_s29  ;;  %609 = vrot.lane.b32.xlu2 %v6462_v18, %s6500_s16  ;;  %v7763_v11 = vpop.f32.mrf.mxu0  ;;  %v6465_v18 = vld [vmem:[%s6560_s8 + $0x90] sm:$0xff] }
 0x400   : > { %v4040_v62 = vpop.f32.mrf.mxu1 }
 0x401   : > { %v4098_v56 = vadd.f32 %v4040_v62, %v3780_v35  ;;  %v4215_v20 = vpop.permute.xlu1 %4214  ;;  %4658 = vmatpush.bf16.msrb.mxu3 %v7761_v40 }
 0x402   : > { %4311 = vst.msk [vmem:[#allocation3] sm:$0xff] %vm4310_vm9, %v4215_v20  ;;  %v3561_v20 = vadd.f32 %v7661_v4, %v3243_v28 }
 0x403   : > { %v4133_v50 = vadd.f32 %v7492_v12, %v4098_v56  ;;  %v7773_v1 = vpop.f32.mrf.mxu2 }
 0x405   : > { %v4165_v31 = vmax.f32 %v4133_v50, 0.0 }
 0x407   : > { %4244 = vrot.lane.b32.xlu0 %v4165_v31, %s6501_s29  ;;  %611 = vrot.lane.b32.xlu1 %v6463_v21, %s6500_s16  ;;  %v7794_v48 = vpop.f32.mrf.mxu0 }
 0x408   : > { %v4043_v27 = vpop.f32.mrf.mxu1  ;;  %613 = vrot.lane.b32.xlu2 %v6464_v58, %s6500_s16  ;;  %v3783_v58 = vadd.f32 %v7669_v47, %v3561_v20 }
 0x409   : > { %v4343_v43 = vld [vmem:[#allocation3] ss:$2 sm:$0xff]  ;;  %v4392_v38 = vld [vmem:[#allocation3 + $0x1] ss:$2 sm:$0xff]  ;;  %v4099_v8 = vadd.f32 %v4043_v27, %v3781_v41  ;;  %v4223_v19 = vpop.permute.xlu2 %4222  ;;  %v7779_v41 = vsel %vm4550_vm7, %v6303_v36, 0  ;;  %v7790_v27 = vld [vmem:[%s8572_s5 + $0x40] sm:$0xff] }
 0x40a   : > { %4375 = vst.msk [vmem:[#allocation4] sm:$0xff] %vm4374_vm2, %v4343_v43  ;;  %v3244_v43 = vadd.f32 %v7696_v54, %v7419_v51  ;;  %v7807_v54 = vpop.f32.mrf.mxu3 }
 0x40b   : > { %4423 = vst.msk [vmem:[#allocation5] sm:$0xff] %vm4374_vm2, %v4392_v38  ;;  %v4134_v39 = vadd.f32 %v7492_v12, %v4099_v8  ;;  %v7803_v24 = vpop.f32.mrf.mxu2 }
 0x40d   : > { %v4166_v13 = vmax.f32 %v4134_v39, 0.0  ;;  %v3562_v39 = vadd.f32 %v7706_v33, %v3244_v43 }
 0x40f   : > { %4246 = vrot.lane.b32.xlu0 %v4166_v13, %s6501_s29  ;;  %v3784_v57 = vadd.f32 %v7718_v34, %v3562_v39  ;;  %v6466_v13 = vld [vmem:[%s6560_s8 + $0x98] sm:$0xff]  ;;  %v7823_v34 = vld [vmem:[%s8572_s5 + $0x60] sm:$0xff] }
 0x410   : > { %v4045_v35 = vpop.f32.mrf.mxu1  ;;  %615 = vrot.lane.b32.xlu2 %v6465_v18, %s6500_s16  ;;  %5350 = vmatpush.bf16.msrb.mxu1 %v7823_v34 }
 0x411   : > { %v4100_v62 = vadd.f32 %v4045_v35, %v3782_v23  ;;  %v4219_v52 = vpop.permute.xlu1 %4218  ;;  %v4532_v56 = vld [vmem:[#allocation4] sm:$0x7f]  ;;  %v592_v31 = vpop.permute.xlu2 %591  ;;  %v7816_v23 = vld [vmem:[%s8572_s5 + $0x50] sm:$0xff] }
 0x412   : > { %4313 = vst.msk [vmem:[#allocation3 + $0x10] sm:$0xff] %vm4310_vm9, %v4219_v52  ;;  %v4534_v46 = vld [vmem:[#allocation5] sm:$0x7f]  ;;  %v4533_v50 = vpack.c.bf16 %v4532_v56, %v4532_v56  ;;  %5330 = vmatpush.bf16.msrb.mxu0 %v7816_v23 }
 0x413   : > { %v4135_v22 = vadd.f32 %v7492_v12, %v4100_v62  ;;  %v4535_v9 = vpack.c.bf16 %v4534_v46, %v4534_v46  ;;  %682 = vst.msk [vmem:[#allocation3 + $0x30] sm:$0xff] %vm675_vm8, %v592_v31  ;;  %v4597_v21 = vmax.f32 %v4532_v56, %v4534_v46  ;;  %v7839_v31 = vpop.f32.mrf.mxu2 }
 0x414   : > { %6277 = vmatmul.msk.bf16.vlgmr.msra.gmra.mxu3 %vm4374_vm2, %v4533_v50  ;;  %5436 = vmatpush.bf16.msra.mxu1 %v7394_v0 }
 0x415   : > { %6268 = vmatmul.msk.bf16.vlgmr.msra.gmra.mxu2 %vm4374_vm2, %v4535_v9  ;;  %v4167_v4 = vmax.f32 %v4135_v22, 0.0  ;;  %4725 = vmatpush.bf16.msra.mxu3 %v7704_v55  ;;  %v6329_v22 = vld [vmem:[%s8572_s5 + $0x78] sm:$0xf]  ;;  %v6425_v9 = vld [vmem:[%s8572_s5 + $0x78] sm:$0x30] }
 0x416   : > { %4691 = vmatpush.bf16.msra.mxu2 %v7779_v41  ;;  %5420 = vmatpush.bf16.msra.mxu0 %v7368_v44 }
 0x417   : > { %4248 = vrot.lane.b32.xlu1 %v4167_v4, %s6501_s29  ;;  %v6467_v4 = vld [vmem:[%s6560_s8 + $0xa8] sm:$0xff] }
 0x418   : > { %v4048_v16 = vpop.f32.mrf.mxu1  ;;  %5437 = vmatpush.bf16.msra.mxu1 %v7481_v29 }
 0x419   : > { %v4440_v38 = vld [vmem:[#allocation3 + $0x2] ss:$2 sm:$0xff]  ;;  %v4101_v8 = vadd.f32 %v4048_v16, %v3783_v58  ;;  %v588_v42 = vpop.permute.xlu1 %587  ;;  %v4221_v26 = vpop.permute.xlu0 %4220  ;;  %4726 = vmatpush.bf16.msra.mxu3 %v7816_v23 }
 0x41a   : > { %4471 = vst.msk [vmem:[#allocation6] sm:$0xff] %vm4374_vm2, %v4440_v38  ;;  %4692 = vmatpush.bf16.msra.mxu2 %v7790_v27  ;;  %v6468_v58 = vld [vmem:[%s6560_s8 + $0xa0] sm:$0xff]  ;;  %v7855_v16 = vpop.f32.mrf.mxu3  ;;  %5421 = vmatpush.bf16.msra.mxu0 %v7470_v5  ;;  %v3246_v38 = vadd.f32 %v7773_v1, %v7428_v59  ;;  %v6338_v59 = vld [vmem:[%s8572_s5 + $0x88] sm:$0xf]  ;;  %v6427_v1 = vld [vmem:[%s8572_s5 + $0x88] sm:$0x30] }
 0x41b   : > { %v4136_v47 = vadd.f32 %v7492_v12, %v4101_v8  ;;  %680 = vst.msk [vmem:[#allocation3 + $0x20] sm:$0xff] %vm675_vm8, %v588_v42  ;;  %v6330_v42 = vor.u32 %v6425_v9, %v6329_v22 }
 0x41c   : > { %4315 = vst.msk [vmem:[#allocation3 + $0x20] sm:$0xff] %vm4310_vm9, %v4223_v19  ;;  %v3245_v19 = vadd.f32 %v7732_v14, %v7424_v2  ;;  %v7831_v14 = vpop.f32.mrf.mxu0  ;;  %v3564_v39 = vadd.f32 %v7781_v7, %v3246_v38 }
 0x41d   : > { %v4168_v51 = vmax.f32 %v4136_v47, 0.0  ;;  %4314 = vst.msk [vmem:[#allocation3 + $0x18] sm:$0xff] %vm4310_vm9, %v4221_v26 }
 0x41e   : > { %v3563_v2 = vadd.f32 %v7742_v60, %v3245_v19  ;;  %v7874_v19 = vsel %vm4550_vm7, %v6330_v42, 0  ;;  %v6470_v42 = vld [vmem:[%s6560_s8 + $0xc0] sm:$0xff] }
 0x41f   : > { %617 = vrot.lane.b32.xlu1 %v6466_v13, %s6500_s16  ;;  %4250 = vrot.lane.b32.xlu0 %v4168_v51, %s6501_s29 }
 0x420   : > { %v4050_v33 = vpop.f32.mrf.mxu1 }
 0x421   : > { %v4102_v36 = vadd.f32 %v4050_v33, %v3784_v57  ;;  %v4598_v28 = vld [vmem:[#allocation6] sm:$0x7f]  ;;  %v590_v35 = vpop.permute.xlu0 %589  ;;  %v7825_v18 = vpop.permute.xlu2 %4228 }
 0x422   : > { %v4599_v62 = vpack.c.bf16 %v4598_v28, %v4598_v28  ;;  %681 = vst.msk [vmem:[#allocation3 + $0x28] sm:$0xff] %vm675_vm8, %v590_v35  ;;  %v4631_v52 = vmax.f32 %v4597_v21, %v4598_v28  ;;  %v3785_v21 = vadd.f32 %v7763_v11, %v3563_v2  ;;  %v3786_v28 = vadd.f32 %v7794_v48, %v3564_v39  ;;  %v6469_v35 = vld [vmem:[%s6560_s8 + $0xb0] sm:$0xff] }
 0x423   : > { %v4137_v56 = vadd.f32 %v7492_v12, %v4102_v36  ;;  %v7889_v48 = vld [vmem:[%s8572_s5 + $0x70] sm:$0xff]  ;;  %v3248_v39 = vadd.f32 %v7839_v31, %v7437_v6 }
 0x424   : > { %v4345_v20 = vld [vmem:[#allocation3 + $0x10] ss:$2 sm:$0xff]  ;;  %v4394_v46 = vld [vmem:[#allocation3 + $0x11] ss:$2 sm:$0xff]  ;;  %v3742_v57 = vpop.f32.mrf.mxu0 }
 0x425   : > { %v4442_v50 = vld [vmem:[#allocation3 + $0x12] ss:$2 sm:$0xff]  ;;  %4376 = vst.msk [vmem:[#allocation4 + $0x8] sm:$0xff] %vm4374_vm2, %v4345_v20  ;;  %6286 = vmatmul.msk.bf16.vlgmr.msrb.gmra.mxu2 %vm4374_vm2, %v4599_v62  ;;  %v4169_v60 = vmax.f32 %v4137_v56, 0.0  ;;  %v6339_v62 = vor.u32 %v6427_v1, %v6338_v59  ;;  %v3205_v56 = vpop.f32.mrf.mxu2  ;;  %v3566_v1 = vadd.f32 %v7855_v16, %v3248_v39  ;;  %v6472_v16 = vld [vmem:[%s6560_s8 + $0xb8] sm:$0xff] }
 0x426   : > { %4424 = vst.msk [vmem:[#allocation5 + $0x8] sm:$0xff] %vm4374_vm2, %v4394_v46  ;;  %4759 = vmatpush.bf16.msrb.mxu2 %v7710_v53 }
 0x427   : > { %4472 = vst.msk [vmem:[#allocation6 + $0x8] sm:$0xff] %vm4374_vm2, %v4442_v50  ;;  %621 = vrot.lane.b32.xlu1 %v6467_v4, %s6500_s16  ;;  %619 = vrot.lane.b32.xlu0 %v6468_v58, %s6500_s16  ;;  %v3523_v58 = vpop.f32.mrf.mxu3 }
 0x428   : > { %4252 = vrot.lane.b32.xlu2 %v4169_v60, %s6501_s29  ;;  %v4053_v43 = vpop.f32.mrf.mxu1 }
 0x429   : > { %v4103_v8 = vadd.f32 %v4053_v43, %v3785_v21  ;;  %v4225_v11 = vpop.permute.xlu1 %4224  ;;  %v598_v26 = vpop.permute.xlu2 %597 }
 0x42a   : > { %4316 = vst.msk [vmem:[#allocation3 + $0x28] sm:$0xff] %vm4310_vm9, %v4225_v11  ;;  %4760 = vmatpush.bf16.msrb.mxu2 %v7823_v34 }
 0x42b   : > { %v4138_v47 = vadd.f32 %v7492_v12, %v4103_v8  ;;  %685 = vst.msk [vmem:[#allocation3 + $0x48] sm:$0xff] %vm675_vm8, %v598_v26  ;;  %v7916_v26 = vld [vmem:[%s8572_s5 + $0x80] sm:$0xff] }
 0x42c   : > { %v4632_v51 = vld [vmem:[#allocation4 + $0x8] sm:$0x7f]  ;;  %v3745_v11 = vpop.f32.mrf.mxu0 }
 0x42d   : > { %v4170_v13 = vmax.f32 %v4138_v47, 0.0  ;;  %v4633_v33 = vpack.c.bf16 %v4632_v51, %v4632_v51  ;;  %v4665_v7 = vmax.f32 %v4631_v52, %v4632_v51  ;;  %v4666_v36 = vld [vmem:[#allocation5 + $0x8] sm:$0x7f]  ;;  %v3247_v52 = vadd.f32 %v7803_v24, %v7433_v37  ;;  %v3207_v59 = vpop.f32.mrf.mxu2 }
 0x42e   : > { %v7883_v46 = vld [vmem:[#allocation6 + $0x8] sm:$0x7f]  ;;  %v4667_v8 = vpack.c.bf16 %v4666_v36, %v4666_v36  ;;  %v7900_v37 = vsel %vm4550_vm7, %v6339_v62, 0  ;;  %v6471_v62 = vld [vmem:[%s6560_s8 + $0xc8] sm:$0xff] }
 0x42f   : > { %6295 = vmatmul.msk.bf16.vlgmr.msrb.gmra.mxu3 %vm4374_vm2, %v4633_v33  ;;  %623 = vrot.lane.b32.xlu1 %v6469_v35, %s6500_s16  ;;  %v7880_v2 = vmax.f32 %v4665_v7, %v4666_v36  ;;  %v3565_v43 = vadd.f32 %v7807_v54, %v3247_v52  ;;  %v3525_v33 = vpop.f32.mrf.mxu3  ;;  %v4701_v6 = vpack.c.bf16 %v7883_v46, %v7883_v46 }
 0x430   : > { %4254 = vrot.lane.b32.xlu2 %v4170_v13, %s6501_s29  ;;  %v4055_v20 = vpop.f32.mrf.mxu1  ;;  %4793 = vmatpush.bf16.msrb.mxu3 %v7874_v19  ;;  %v3788_v35 = vadd.f32 %v3742_v57, %v3566_v1 }
 0x431   : > { %v4347_v50 = vld [vmem:[#allocation3 + $0x20] ss:$2 sm:$0xff]  ;;  %v4396_v60 = vld [vmem:[#allocation3 + $0x21] ss:$2 sm:$0xff]  ;;  %v4104_v22 = vadd.f32 %v4055_v20, %v3786_v28  ;;  %v594_v9 = vpop.permute.xlu1 %593  ;;  %v4227_v21 = vpop.permute.xlu0 %4226  ;;  %v4733_v4 = vmax.f32 %v7880_v2, %v7883_v46  ;;  %v3787_v54 = vadd.f32 %v7831_v14, %v3565_v43 }
 0x432   : > { %4377 = vst.msk [vmem:[#allocation4 + $0x10] sm:$0xff] %vm4374_vm2, %v4347_v50  ;;  %v3249_v50 = vadd.f32 %v3205_v56, %v7442_v63 }
 0x433   : > { %4425 = vst.msk [vmem:[#allocation5 + $0x10] sm:$0xff] %vm4374_vm2, %v4396_v60  ;;  %v4139_v38 = vadd.f32 %v7492_v12, %v4104_v22 }
 0x434   : > { %683 = vst.msk [vmem:[#allocation3 + $0x38] sm:$0xff] %vm675_vm8, %v594_v9  ;;  %4794 = vmatpush.bf16.msrb.mxu3 %v7889_v48  ;;  %v3747_v57 = vpop.f32.mrf.mxu0 }
 0x435   : > { %4318 = vst.msk [vmem:[#allocation3 + $0x38] sm:$0xff] %vm4310_vm9, %v7825_v18  ;;  %6304 = vmatmul.msk.bf16.vlgmr.msra.gmra.mxu2 %vm4374_vm2, %v4667_v8  ;;  %v4171_v24 = vmax.f32 %v4139_v38, 0.0  ;;  %v3210_v8 = vpop.f32.mrf.mxu2 }
 0x436   : > { %4317 = vst.msk [vmem:[#allocation3 + $0x30] sm:$0xff] %vm4310_vm9, %v4227_v21  ;;  %4827 = vmatpush.bf16.msra.mxu2 %v7900_v37  ;;  %v3567_v21 = vadd.f32 %v3523_v58, %v3249_v50 }
 0x437   : > { %627 = vrot.lane.b32.xlu1 %v6470_v42, %s6500_s16  ;;  %4256 = vrot.lane.b32.xlu0 %v4171_v24, %s6501_s29  ;;  %v3528_v56 = vpop.f32.mrf.mxu3 }
 0x438   : > { %v4058_v18 = vpop.f32.mrf.mxu1  ;;  %v3789_v24 = vadd.f32 %v3745_v11, %v3567_v21 }
 0x439   : > { %v4105_v47 = vadd.f32 %v4058_v18, %v3787_v54  ;;  %v596_v51 = vpop.permute.xlu0 %595  ;;  %v4235_v14 = vpop.permute.xlu2 %4234  ;;  %v7935_v52 = vld [vmem:[#allocation4 + $0x10] sm:$0x7f]  ;;  %v3250_v54 = vadd.f32 %v3207_v59, %v7446_v10 }
 0x43a   : > { %684 = vst.msk [vmem:[#allocation3 + $0x40] sm:$0xff] %vm675_vm8, %v596_v51  ;;  %4828 = vmatpush.bf16.msra.mxu2 %v7916_v26  ;;  %v4735_v38 = vpack.c.bf16 %v7935_v52, %v7935_v52  ;;  %v7950_v51 = vld [vmem:[#allocation5 + $0x10] sm:$0x7f] }
 0x43b   : > { %v4140_v13 = vadd.f32 %v7492_v12, %v4105_v47  ;;  %v4769_v10 = vpack.c.bf16 %v7950_v51, %v7950_v51 }
 0x43c   : > { %v3750_v1 = vpop.f32.mrf.mxu0 }
 0x43d   : > { %v4349_v7 = vld [vmem:[#allocation3 + $0x30] ss:$2 sm:$0xff]  ;;  %v4398_v36 = vld [vmem:[#allocation3 + $0x31] ss:$2 sm:$0xff]  ;;  %v4172_v31 = vmax.f32 %v4140_v13, 0.0  ;;  %v3212_v59 = vpop.f32.mrf.mxu2 }
 0x43e   : > { %v4444_v28 = vld [vmem:[#allocation3 + $0x22] ss:$2 sm:$0xff]  ;;  %4378 = vst.msk [vmem:[#allocation4 + $0x18] sm:$0xff] %vm4374_vm2, %v4349_v7 }
 0x43f   : > { %4426 = vst.msk [vmem:[#allocation5 + $0x18] sm:$0xff] %vm4374_vm2, %v4398_v36  ;;  %6313 = vmatmul.msk.bf16.vlgmr.msra.gmra.mxu3 %vm4374_vm2, %v4701_v6  ;;  %629 = vrot.lane.b32.xlu1 %v6471_v62, %s6500_s16 }
 0x440   : > { %4473 = vst.msk [vmem:[#allocation6 + $0x10] sm:$0xff] %vm4374_vm2, %v4444_v28  ;;  %625 = vrot.lane.b32.xlu0 %v6472_v16, %s6500_s16  ;;  %4258 = vrot.lane.b32.xlu2 %v4172_v31, %s6501_s29  ;;  %v4060_v20 = vpop.f32.mrf.mxu1 }
 0x441   : > { %v4106_v60 = vadd.f32 %v4060_v20, %v3788_v35  ;;  %v4231_v22 = vpop.permute.xlu1 %4230  ;;  %4862 = vmatpush.bf16.msra.mxu3 %v7368_v44  ;;  %v604_v9 = vpop.permute.xlu2 %603 }
 0x442   : > { %4319 = vst.msk [vmem:[#allocation3 + $0x40] sm:$0xff] %vm4310_vm9, %v4231_v22 }
 0x443   : > { %v4141_v43 = vadd.f32 %v7492_v12, %v4106_v60  ;;  %688 = vst.msk [vmem:[#allocation3 + $0x60] sm:$0xff] %vm675_vm8, %v604_v9  ;;  %v6473_v9 = vld [vmem:[%s6560_s8 + $0xd0] sm:$0xff] }
 0x444   : > { %v3752_v60 = vpop.f32.mrf.mxu0 }
 0x445   : > { %6322 = vmatmul.msk.bf16.vlgmr.msrb.gmra.mxu2 %vm4374_vm2, %v4735_v38  ;;  %v4173_v63 = vmax.f32 %v4141_v43, 0.0  ;;  %4863 = vmatpush.bf16.msra.mxu3 %v7470_v5  ;;  %v3568_v5 = vadd.f32 %v3525_v33, %v3250_v54  ;;  %v3215_v21 = vpop.f32.mrf.mxu2  ;;  %v3252_v38 = vadd.f32 %v3212_v59, %v7455_v15 }
 0x446   : > { %4878 = vmatpush.bf16.msrb.mxu2 %v7394_v0 }
 0x447   : > { %v3790_v7 = vadd.f32 %v3747_v57, %v3568_v5  ;;  %v7961_v36 = vld [vmem:[#allocation6 + $0x10] sm:$0x7f] }
 0x448   : > { %4260 = vrot.lane.b32.xlu2 %v4173_v63, %s6501_s29  ;;  %v4063_v58 = vpop.f32.mrf.mxu1  ;;  %v4803_v16 = vpack.c.bf16 %v7961_v36, %v7961_v36 }
 0x449   : > { %v4446_v42 = vld [vmem:[#allocation3 + $0x32] ss:$2 sm:$0xff]  ;;  %v4107_v18 = vadd.f32 %v4063_v58, %v3789_v24  ;;  %v600_v39 = vpop.permute.xlu1 %599  ;;  %v4233_v47 = vpop.permute.xlu0 %4232 }
 0x44a   : > { %4474 = vst.msk [vmem:[#allocation6 + $0x18] sm:$0xff] %vm4374_vm2, %v4446_v42  ;;  %4879 = vmatpush.bf16.msrb.mxu2 %v7481_v29  ;;  %v3530_v29 = vpop.f32.mrf.mxu3  ;;  %v4851_v58 = vld [vmem:[#allocation5 + $0x10] sm:$0x7f] }
 0x44b   : > { %v4142_v13 = vadd.f32 %v7492_v12, %v4107_v18  ;;  %686 = vst.msk [vmem:[#allocation3 + $0x50] sm:$0xff] %vm675_vm8, %v600_v39  ;;  %v3570_v54 = vadd.f32 %v3530_v29, %v3252_v38  ;;  %v4852_v39 = vpack.c.bf16 %v4851_v58, %v4851_v58 }
 0x44c   : > { %4321 = vst.msk [vmem:[#allocation3 + $0x50] sm:$0xff] %vm4310_vm9, %v4235_v14  ;;  %v3251_v14 = vadd.f32 %v3210_v8, %v7451_v17  ;;  %v3755_v5 = vpop.f32.mrf.mxu0 }
 0x44d   : > { %v4174_v11 = vmax.f32 %v4142_v13, 0.0  ;;  %4320 = vst.msk [vmem:[#allocation3 + $0x48] sm:$0xff] %vm4310_vm9, %v4233_v47  ;;  %v3792_v47 = vadd.f32 %v3752_v60, %v3570_v54  ;;  %v6474_v13 = vld [vmem:[%s6560_s8 + $0xd8] sm:$0xff]  ;;  %v4906_v54 = vld [vmem:[#allocation4 + $0x18] sm:$0x7f] }
 0x44e   : > { %v3569_v35 = vadd.f32 %v3528_v56, %v3251_v14  ;;  %v3217_v14 = vpop.f32.mrf.mxu2 }
 0x44f   : > { %6331 = vmatmul.msk.bf16.vlgmr.msrb.gmra.mxu3 %vm4374_vm2, %v4769_v10  ;;  %4262 = vrot.lane.b32.xlu0 %v4174_v11, %s6501_s29  ;;  %v3253_v11 = vadd.f32 %v3215_v21, %v7460_v30 }
 0x450   : > { %v4065_v33 = vpop.f32.mrf.mxu1  ;;  %4897 = vmatpush.bf16.msrb.mxu3 %v7688_v3  ;;  %v3791_v22 = vadd.f32 %v3750_v1, %v3569_v35  ;;  %v4849_v1 = vld [vmem:[#allocation4 + $0x10] sm:$0x7f] }
 0x451   : > { %v4108_v28 = vadd.f32 %v4065_v33, %v3790_v7  ;;  %v7965_v6 = vpop.permute.xlu2 %4240  ;;  %v602_v31 = vpop.permute.xlu0 %601  ;;  %v4850_v35 = vpack.c.bf16 %v4849_v1, %v4849_v1 }
 0x452   : > { %687 = vst.msk [vmem:[#allocation3 + $0x58] sm:$0xff] %vm675_vm8, %v602_v31  ;;  %v3533_v24 = vpop.f32.mrf.mxu3  ;;  %v7996_v31 = vld [vmem:[%s8571_s4] ss:$0 sm:$0xff] }
 0x453   : > { %v4143_v62 = vadd.f32 %v7492_v12, %v4108_v28  ;;  %v3571_v28 = vadd.f32 %v3533_v24, %v3253_v11 }
 0x454   : > { %v4351_v20 = vld [vmem:[#allocation3 + $0x40] ss:$2 sm:$0xff]  ;;  %v4400_v50 = vld [vmem:[#allocation3 + $0x41] ss:$2 sm:$0xff]  ;;  %4898 = vmatpush.bf16.msrb.mxu3 %v7727_v25 }
 0x455   : > { %v4448_v57 = vld [vmem:[#allocation3 + $0x42] ss:$2 sm:$0xff]  ;;  %4379 = vst.msk [vmem:[#allocation4 + $0x20] sm:$0xff] %vm4374_vm2, %v4351_v20  ;;  %v4175_v17 = vmax.f32 %v4143_v62, 0.0  ;;  %6340 = vmatmul.msk.bf16.vlgmr.msra.gmra.mxu2 %vm4374_vm2, %v4803_v16  ;;  %v3793_v20 = vadd.f32 %v3755_v5, %v3571_v28 }
 0x456   : > { %4427 = vst.msk [vmem:[#allocation5 + $0x20] sm:$0xff] %vm4374_vm2, %v4400_v50  ;;  %4917 = vmatpush.bf16.msra.mxu2 %v7749_v32  ;;  %v6476_v50 = vld [vmem:[%s6560_s8 + $0xe0] sm:$0xff] }
 0x457   : > { %4475 = vst.msk [vmem:[#allocation6 + $0x20] sm:$0xff] %vm4374_vm2, %v4448_v57  ;;  %4264 = vrot.lane.b32.xlu2 %v4175_v17, %s6501_s29  ;;  %631 = vrot.lane.b32.xlu0 %v6473_v9, %s6500_s16  ;;  %v4886_v57 = vld [vmem:[#allocation6 + $0x10] sm:$0x7f]  ;;  %v4885_v17 = vmax.f32 %v4849_v1, %v4851_v58 }
 0x458   : > { %v4068_v43 = vpop.f32.mrf.mxu1  ;;  %v4887_v5 = vpack.c.bf16 %v4886_v57, %v4886_v57 }
 0x459   : > { %v4109_v8 = vadd.f32 %v4068_v43, %v3791_v22  ;;  %v4237_v63 = vpop.permute.xlu1 %4236  ;;  %v610_v56 = vpop.permute.xlu2 %609  ;;  %v3254_v22 = vadd.f32 %v3217_v14, %v7464_v45 }
 0x45a   : > { %4322 = vst.msk [vmem:[#allocation3 + $0x58] sm:$0xff] %vm4310_vm9, %v4237_v63  ;;  %4918 = vmatpush.bf16.msra.mxu2 %v7761_v40  ;;  %v3535_v62 = vpop.f32.mrf.mxu3  ;;  %v4905_v63 = vmax.f32 %v4885_v17, %v4886_v57 }
 0x45b   : > { %v4144_v42 = vadd.f32 %v7492_v12, %v4109_v8  ;;  %691 = vst.msk [vmem:[#allocation3 + $0x78] sm:$0xff] %vm675_vm8, %v610_v56  ;;  %v3572_v56 = vadd.f32 %v3535_v62, %v3254_v22 }
 0x45c   : > { %v8011_v43 = vld [vmem:[#allocation4 + $0x20] sm:$0x7f] }
 0x45d   : > { %v4176_v18 = vmax.f32 %v4144_v42, 0.0  ;;  %v8013_v38 = vld [vmem:[#allocation5 + $0x20] sm:$0x7f]  ;;  %v3220_v42 = vpop.f32.mrf.mxu2 }
 0x45e   : > { %v5071_v45 = vmax.f32 %v8011_v43, %v8013_v38  ;;  %v8021_v58 = vld [vmem:[#allocation6 + $0x20] sm:$0x7f] }
 0x45f   : > { %6341 = vmatmul.msk.bf16.vlgmr.msra.gmra.mxu3 %vm4374_vm2, %v4852_v39  ;;  %4266 = vrot.lane.b32.xlu1 %v4176_v18, %s6501_s29  ;;  %v8042_v17 = vld [vmem:[#allocation4 + $0x20] sm:$0x7f] }
 0x460   : > { %v4070_v15 = vpop.f32.mrf.mxu1  ;;  %633 = vrot.lane.b32.xlu2 %v6474_v13, %s6500_s16  ;;  %4937 = vmatpush.bf16.msra.mxu3 %v7779_v41  ;;  %v4925_v13 = vmax.f32 %v4905_v63, %v4906_v54 }
 0x461   : > { %v4353_v12 = vld [vmem:[#allocation3 + $0x50] ss:$2 sm:$0xff]  ;;  %v4402_v10 = vld [vmem:[#allocation3 + $0x51] ss:$2 sm:$0xff]  ;;  %v4110_v59 = vadd.f32 %v4070_v15, %v3792_v47  ;;  %v606_v7 = vpop.permute.xlu1 %605  ;;  %v4239_v29 = vpop.permute.xlu0 %4238 }
 0x462   : > { %4380 = vst.msk [vmem:[#allocation4 + $0x28] sm:$0xff] %vm4374_vm2, %v4353_v12  ;;  %v614_v33 = vpop.permute.xlu2 %613  ;;  %v3538_v15 = vpop.f32.mrf.mxu3  ;;  %v6477_v12 = vld [vmem:[%s6560_s8 + $0xf0] sm:$0xff] }
 0x463   : > { %4428 = vst.msk [vmem:[#allocation5 + $0x28] sm:$0xff] %vm4374_vm2, %v4402_v10  ;;  %v4145_v30 = vadd.f32 %v7996_v31, %v4110_v59  ;;  %v6478_v59 = vld [vmem:[%s6560_s8 + $0xe8] sm:$0xff] }
 0x464   : > { %689 = vst.msk [vmem:[#allocation3 + $0x68] sm:$0xff] %vm675_vm8, %v606_v7  ;;  %4938 = vmatpush.bf16.msra.mxu3 %v7790_v27 }
 0x465   : > { %v4177_v16 = vmax.f32 %v4145_v30, 0.0  ;;  %4324 = vst.msk [vmem:[#allocation3 + $0x68] sm:$0xff] %vm4310_vm9, %v7965_v6  ;;  %6342 = vmatmul.msk.bf16.vlgmr.msrb.gmra.mxu2 %vm4374_vm2, %v4850_v35  ;;  %v3757_v6 = vpop.f32.mrf.mxu0  ;;  %v4926_v30 = vld [vmem:[#allocation5 + $0x18] sm:$0x7f] }
 0x466   : > { %4323 = vst.msk [vmem:[#allocation3 + $0x60] sm:$0xff] %vm4310_vm9, %v4239_v29  ;;  %4957 = vmatpush.bf16.msrb.mxu2 %v7704_v55  ;;  %v3794_v11 = vadd.f32 %v3757_v6, %v3572_v56  ;;  %v5091_v29 = vmax.f32 %v5071_v45, %v8021_v58  ;;  %v8037_v35 = vld [vmem:[#allocation6 + $0x18] sm:$0x7f]  ;;  %v4945_v62 = vmax.f32 %v4925_v13, %v4926_v30  ;;  %v6479_v56 = vld [vmem:[%s6560_s8 + $0xf8] sm:$0xff]  ;;  %s6502_s8 = smov 24  }
 0x467   : > { %635 = vrot.lane.b32.xlu1 %v6476_v50, %s6500_s16  ;;  %4268 = vrot.lane.b32.xlu0 %v4177_v16, %s6501_s29  ;;  %693 = vst.msk [vmem:[#allocation3 + $0x88] sm:$0xff] %vm675_vm8, %v614_v33  ;;  %v3255_v33 = vadd.f32 %v3220_v42, %v7475_v49  ;;  %v4947_v46 = vpack.c.bf16 %v8037_v35, %v8037_v35 }
 0x468   : > { %v4073_v60 = vpop.f32.mrf.mxu1  ;;  %v4965_v49 = vmax.f32 %v4945_v62, %v8037_v35 }
 0x469   : > { %v4111_v9 = vadd.f32 %v4073_v60, %v3793_v20  ;;  %v608_v21 = vpop.permute.xlu0 %607  ;;  %v8028_v10 = vld [vmem:[#allocation4 + $0x28] sm:$0x7f]  ;;  %v3573_v20 = vadd.f32 %v3538_v15, %v3255_v33  ;;  %v4907_v60 = vpack.c.bf16 %v4906_v54, %v4906_v54 }
 0x46a   : > { %690 = vst.msk [vmem:[#allocation3 + $0x70] sm:$0xff] %vm675_vm8, %v608_v21  ;;  %v616_v8 = vpop.permute.xlu2 %615  ;;  %4958 = vmatpush.bf16.msrb.mxu2 %v7816_v23  ;;  %v5111_v16 = vmax.f32 %v5091_v29, %v8028_v10  ;;  %v8046_v6 = vld [vmem:[#allocation5 + $0x28] sm:$0x7f]  ;;  %v3540_v54 = vpop.f32.mrf.mxu3 }
 0x46b   : > { %v4146_v24 = vadd.f32 %v7996_v31, %v4111_v9  ;;  %694 = vst.msk [vmem:[#allocation3 + $0x90] sm:$0xff] %vm675_vm8, %v616_v8  ;;  %v4985_v9 = vmax.f32 %v4965_v49, %v8042_v17  ;;  %v3222_v8 = vpop.f32.mrf.mxu2 }
 0x46c   : > { %v5131_v21 = vmax.f32 %v5111_v16, %v8046_v6  ;;  %v3256_v13 = vadd.f32 %v3222_v8, %v7485_v61  ;;  %v4767_v16 = vmax.f32 %v4733_v4, %v7935_v52 }
 0x46d   : > { %v4355_v18 = vld [vmem:[#allocation3 + $0x60] ss:$2 sm:$0xff]  ;;  %v4404_v39 = vld [vmem:[#allocation3 + $0x61] ss:$2 sm:$0xff]  ;;  %v4178_v1 = vmax.f32 %v4146_v24, 0.0  ;;  %v3760_v50 = vpop.f32.mrf.mxu0 }
 0x46e   : > { %v4450_v47 = vld [vmem:[#allocation3 + $0x52] ss:$2 sm:$0xff]  ;;  %4381 = vst.msk [vmem:[#allocation4 + $0x30] sm:$0xff] %vm4374_vm2, %v4355_v18  ;;  %v3795_v63 = vadd.f32 %v3760_v50, %v3573_v20  ;;  %v4801_v4 = vmax.f32 %v4767_v16, %v7950_v51 }
 0x46f   : > { %4429 = vst.msk [vmem:[#allocation5 + $0x30] sm:$0xff] %vm4374_vm2, %v4404_v39  ;;  %6343 = vmatmul.msk.bf16.vlgmr.msrb.gmra.mxu3 %vm4374_vm2, %v4887_v5  ;;  %639 = vrot.lane.b32.xlu1 %v6477_v12, %s6500_s16  ;;  %v8058_v5 = vld [vmem:[#allocation5 + $0x20] sm:$0x7f]  ;;  %v8104_v51 = vld [vmem:[%s8572_s5 + $0x10] sm:$0xff] }
 0x470   : > { %4476 = vst.msk [vmem:[#allocation6 + $0x28] sm:$0xff] %vm4374_vm2, %v4450_v47  ;;  %637 = vrot.lane.b32.xlu0 %v6478_v59, %s6500_s16  ;;  %4270 = vrot.lane.b32.xlu2 %v4178_v1, %s6501_s29  ;;  %v4075_v7 = vpop.f32.mrf.mxu1  ;;  %v3574_v59 = vadd.f32 %v3540_v54, %v3256_v13  ;;  %v4835_v52 = vmax.f32 %v4801_v4, %v7961_v36  ;;  %v8126_v13 = vld [vmem:[%s8572_s5] sm:$0xff] }
 0x471   : > { %v4112_v14 = vadd.f32 %v4075_v7, %v3794_v11  ;;  %v4243_v28 = vpop.permute.xlu1 %4242  ;;  %4977 = vmatpush.bf16.msrb.mxu3 %v7710_v53  ;;  %v5005_v11 = vmax.f32 %v4985_v9, %v8058_v5  ;;  %v4967_v36 = vpack.c.bf16 %v8042_v17, %v8042_v17 }
 0x472   : > { %4325 = vst.msk [vmem:[#allocation3 + $0x70] sm:$0xff] %vm4310_vm9, %v4243_v28  ;;  %v8070_v28 = vld [vmem:[#allocation6 + $0x20] sm:$0x7f] }
 0x473   : > { %v4147_v57 = vadd.f32 %v7996_v31, %v4112_v14  ;;  %v4927_v14 = vpack.c.bf16 %v4926_v30, %v4926_v30  ;;  %v5025_v61 = vmax.f32 %v5005_v11, %v8070_v28 }
 0x475   : > { %v4179_v22 = vmax.f32 %v4147_v57, 0.0  ;;  %6344 = vmatmul.msk.bf16.vlgmr.msra.gmra.mxu2 %vm4374_vm2, %v4907_v60  ;;  %4978 = vmatpush.bf16.msrb.mxu3 %v7823_v34  ;;  %v8060_v1 = vld [vmem:[#allocation4 + $0x30] sm:$0x7f]  ;;  %v3762_v29 = vpop.f32.mrf.mxu0 }
 0x476   : > { %4997 = vmatpush.bf16.msra.mxu2 %v7874_v19  ;;  %v8075_v62 = vld [vmem:[#allocation5 + $0x30] sm:$0x7f]  ;;  %v3796_v20 = vadd.f32 %v3762_v29, %v3574_v59 }
 0x477   : > { %641 = vrot.lane.b32.xlu1 %v6479_v56, %s6500_s16  ;;  %v8054_v24 = vld [vmem:[#allocation6 + $0x28] sm:$0x7f]  ;;  %v8119_v17 = vld [vmem:[#allocation5 + $0x30] sm:$0x7f] }
 0x478   : > { %4272 = vrot.lane.b32.xlu2 %v4179_v22, %s6501_s29  ;;  %v4078_v45 = vpop.f32.mrf.mxu1  ;;  %v5151_v42 = vmax.f32 %v5131_v21, %v8054_v24 }
 0x479   : > { %v4452_v18 = vld [vmem:[#allocation3 + $0x62] ss:$2 sm:$0xff]  ;;  %v4113_v39 = vadd.f32 %v4078_v45, %v3795_v63  ;;  %v4245_v47 = vpop.permute.xlu0 %4244  ;;  %v612_v15 = vpop.permute.xlu1 %611 }
 0x47a   : > { %4477 = vst.msk [vmem:[#allocation6 + $0x30] sm:$0xff] %vm4374_vm2, %v4452_v18  ;;  %4998 = vmatpush.bf16.msra.mxu2 %v7889_v48  ;;  %v5171_v7 = vmax.f32 %v5151_v42, %v8060_v1 }
 0x47b   : > { %v4148_v12 = vadd.f32 %v7996_v31, %v4113_v39  ;;  %4326 = vst.msk [vmem:[#allocation3 + $0x78] sm:$0xff] %vm4310_vm9, %v4245_v47  ;;  %v4987_v47 = vpack.c.bf16 %v8058_v5, %v8058_v5 }
 0x47c   : > { %692 = vst.msk [vmem:[#allocation3 + $0x80] sm:$0xff] %vm675_vm8, %v612_v15  ;;  %v5191_v50 = vmax.f32 %v5171_v7, %v8075_v62  ;;  %v8117_v15 = vld [vmem:[#allocation4 + $0x30] sm:$0x7f] }
 0x47d   : > { %v4180_v33 = vmax.f32 %v4148_v12, 0.0  ;;  %v5257_v11 = vmax.f32 %v8117_v15, %v8119_v17 }
 0x47f   : > { %6345 = vmatmul.msk.bf16.vlgmr.msra.gmra.mxu3 %vm4374_vm2, %v4927_v14  ;;  %4274 = vrot.lane.b32.xlu0 %v4180_v33, %s6501_s29 }
 0x480   : > { %5031 = vrot.lane.b32.xlu1 %v5025_v61, %s6502_s8  ;;  %v4080_v30 = vpop.f32.mrf.mxu1  ;;  %5017 = vmatpush.bf16.msra.mxu3 %v7900_v37 }
 0x481   : > { %v4247_v57 = vpop.permute.xlu0 %4246  ;;  %v8084_v60 = vld [vmem:[#allocation6 + $0x30] sm:$0x7f]  ;;  %v4114_v9 = vadd.f32 %v4080_v30, %v3796_v20 }
 0x482   : > { %v4357_v49 = vld [vmem:[#allocation3 + $0x70] ss:$2 sm:$0xff]  ;;  %v4406_v22 = vld [vmem:[#allocation3 + $0x71] ss:$2 sm:$0xff]  ;;  %4327 = vst.msk [vmem:[#allocation3 + $0x80] sm:$0xff] %vm4310_vm9, %v4247_v57  ;;  %v5211_v2 = vmax.f32 %v5191_v50, %v8084_v60  ;;  %v5007_v57 = vpack.c.bf16 %v8070_v28, %v8070_v28 }
 0x483   : > { %4382 = vst.msk [vmem:[#allocation4 + $0x38] sm:$0xff] %vm4374_vm2, %v4357_v49  ;;  %v4149_v21 = vadd.f32 %v7996_v31, %v4114_v9  ;;  %v4253_v31 = vpop.permute.xlu2 %4252  ;;  %v8131_v5 = vld [vmem:[#allocation6 + $0x30] sm:$0x7f] }
 0x484   : > { %4430 = vst.msk [vmem:[#allocation5 + $0x38] sm:$0xff] %vm4374_vm2, %v4406_v22  ;;  %5217 = vrot.lane.b32.xlu2 %v5211_v2, %s6502_s8  ;;  %5018 = vmatpush.bf16.msra.mxu3 %v7916_v26  ;;  %v5277_v33 = vmax.f32 %v5257_v11, %v8131_v5 }
 0x485   : > { %6346 = vmatmul.msk.bf16.vlgmr.msrb.gmra.mxu2 %vm4374_vm2, %v4947_v46  ;;  %v4181_v63 = vmax.f32 %v4149_v21, 0.0 }
 0x486   : > { %5048 = vmatpush.bf16.msrb.mxu2 %v7368_v44 }
 0x487   : > { %4844 = vrot.lane.b32.xlu0 %v4835_v52, %s6502_s8 }
 0x489   : > { %v4454_v8 = vld [vmem:[#allocation3 + $0x72] ss:$2 sm:$0xff]  ;;  %v4249_v35 = vpop.permute.xlu1 %4248 }
 0x48a   : > { %4478 = vst.msk [vmem:[#allocation6 + $0x38] sm:$0xff] %vm4374_vm2, %v4454_v8  ;;  %5049 = vmatpush.bf16.msrb.mxu2 %v8104_v51  ;;  %v8140_v59 = vld [vmem:[#allocation4 + $0x38] sm:$0x7f] }
 0x48b   : > { %4328 = vst.msk [vmem:[#allocation3 + $0x88] sm:$0xff] %vm4310_vm9, %v4249_v35  ;;  %v4255_v7 = vpop.permute.xlu2 %4254  ;;  %v5297_v20 = vmax.f32 %v5277_v33, %v8140_v59  ;;  %v8151_v50 = vld [vmem:[#allocation5 + $0x38] sm:$0x7f] }
 0x48c   : > { %4276 = vrot.lane.b32.xlu2 %v4181_v63, %s6501_s29 }
 0x48d   : > { %v5317_v2 = vmax.f32 %v5297_v20, %v8151_v50 }
 0x48f   : > { %6347 = vmatmul.msk.bf16.vlgmr.msrb.gmra.mxu3 %vm4374_vm2, %v4967_v36  ;;  %v5038_v36 = vpack.c.bf16 %v8013_v38, %v8013_v38 }
 0x490   : > { %5064 = vmatpush.bf16.msrb.mxu3 %v7394_v0 }
 0x491   : > { %v618_v56 = vpop.permute.xlu1 %617  ;;  %v4251_v54 = vpop.permute.xlu0 %4250  ;;  %v5318_v45 = vld [vmem:[#allocation6 + $0x38] sm:$0x7f] }
 0x492   : > { %v4359_v42 = vld [vmem:[#allocation3 + $0x80] ss:$2 sm:$0xff]  ;;  %v4408_v18 = vld [vmem:[#allocation3 + $0x81] ss:$2 sm:$0xff]  ;;  %695 = vst.msk [vmem:[#allocation3 + $0x98] sm:$0xff] %vm675_vm8, %v618_v56  ;;  %v5319_v39 = vpack.c.bf16 %v5318_v45, %v5318_v45  ;;  %v5337_v52 = vmax.f32 %v5317_v2, %v5318_v45  ;;  %v5073_v2 = vpack.c.bf16 %v8021_v58, %v8021_v58 }
 0x493   : > { %4383 = vst.msk [vmem:[#allocation4 + $0x40] sm:$0xff] %vm4374_vm2, %v4359_v42 }
 0x494   : > { %4431 = vst.msk [vmem:[#allocation5 + $0x40] sm:$0xff] %vm4374_vm2, %v4408_v18  ;;  %6368 = vmatmul.msk.bf16.vlgmr.msrb.gmra.mxu0 %vm4374_vm2, %v5319_v39  ;;  %5065 = vmatpush.bf16.msrb.mxu3 %v8126_v13 }
 0x495   : > { %4330 = vst.msk [vmem:[#allocation3 + $0x98] sm:$0xff] %vm4310_vm9, %v4253_v31  ;;  %6348 = vmatmul.msk.bf16.vlgmr.msra.gmra.mxu2 %vm4374_vm2, %v4987_v47  ;;  %5495 = vmatpush.bf16.msrb.mxu0 %v7779_v41 }
 0x496   : > { %4329 = vst.msk [vmem:[#allocation3 + $0x90] sm:$0xff] %vm4310_vm9, %v4251_v54  ;;  %5083 = vmatpush.bf16.msra.mxu2 %v7688_v3 }
 0x497   : > { %v8138_v12 = vpop.f32.mrf.mxu3 }
 0x498   : > { %v8142_v29 = vpop.f32.mrf.mxu2 }
 0x499   : > { %v622_v14 = vpop.permute.xlu1 %621  ;;  %v620_v61 = vpop.permute.xlu0 %619  ;;  %5496 = vmatpush.bf16.msrb.mxu0 %v7790_v27 }
 0x49a   : > { %697 = vst.msk [vmem:[#allocation3 + $0xa8] sm:$0xff] %vm675_vm8, %v622_v14  ;;  %v5338_v16 = vld [vmem:[#allocation4 + $0x40] sm:$0x7f]  ;;  %5084 = vmatpush.bf16.msra.mxu2 %v7727_v25  ;;  %v4259_v28 = vpop.permute.xlu2 %4258 }
 0x49b   : > { %696 = vst.msk [vmem:[#allocation3 + $0xa0] sm:$0xff] %vm675_vm8, %v620_v61  ;;  %v5339_v30 = vpack.c.bf16 %v5338_v16, %v5338_v16  ;;  %v5409_v46 = vld [vmem:[#allocation5 + $0x40] sm:$0x7f]  ;;  %v5357_v35 = vmax.f32 %v5337_v52, %v5338_v16  ;;  %v8221_v52 = vld [vmem:[%s8572_s5 + $0x30] sm:$0xff] }
 0x49c   : > { %4331 = vst.msk [vmem:[#allocation3 + $0xa0] sm:$0xff] %vm4310_vm9, %v4255_v7  ;;  %v5410_v8 = vpack.c.bf16 %v5409_v46, %v5409_v46  ;;  %v8172_v31 = vld [vmem:[#allocation5 + $0x40] sm:$0x7f]  ;;  %v5036_v7 = vpack.c.bf16 %v8011_v43, %v8011_v43 }
 0x49d   : > { %v4361_v49 = vld [vmem:[#allocation3 + $0x90] ss:$2 sm:$0xff]  ;;  %v4410_v22 = vld [vmem:[#allocation3 + $0x91] ss:$2 sm:$0xff]  ;;  %6369 = vmatmul.msk.bf16.vlgmr.msrb.gmra.mxu1 %vm4374_vm2, %v5339_v30  ;;  %v5377_v56 = vmax.f32 %v5357_v35, %v8172_v31  ;;  %v5407_v42 = vld [vmem:[#allocation4 + $0x40] sm:$0x7f] }
 0x49e   : > { %v4456_v9 = vld [vmem:[#allocation3 + $0x82] ss:$2 sm:$0xff]  ;;  %4384 = vst.msk [vmem:[#allocation4 + $0x48] sm:$0xff] %vm4374_vm2, %v4361_v49  ;;  %5515 = vmatpush.bf16.msrb.mxu1 %v7704_v55  ;;  %v5408_v47 = vpack.c.bf16 %v5407_v42, %v5407_v42  ;;  %v5443_v33 = vmax.f32 %v5407_v42, %v5409_v46 }
 0x49f   : > { %4432 = vst.msk [vmem:[#allocation5 + $0x48] sm:$0xff] %vm4374_vm2, %v4410_v22  ;;  %6349 = vmatmul.msk.bf16.vlgmr.msra.gmra.mxu3 %vm4374_vm2, %v5007_v57  ;;  %v4595_v25 = vpop.f32.mrf.mxu3 }
 0x4a0   : > { %4479 = vst.msk [vmem:[#allocation6 + $0x40] sm:$0xff] %vm4374_vm2, %v4456_v9  ;;  %v4565_v4 = vpop.f32.mrf.mxu2  ;;  %5103 = vmatpush.bf16.msra.mxu3 %v7749_v32 }
 0x4a1   : > { %v624_v21 = vpop.permute.xlu1 %623 }
 0x4a2   : > { %698 = vst.msk [vmem:[#allocation3 + $0xb0] sm:$0xff] %vm675_vm8, %v624_v21  ;;  %5516 = vmatpush.bf16.msrb.mxu1 %v7816_v23 }
 0x4a3   : > { %v4458_v63 = vld [vmem:[#allocation3 + $0x92] ss:$2 sm:$0xff]  ;;  %4333 = vst.msk [vmem:[#allocation3 + $0xb0] sm:$0xff] %vm4310_vm9, %v4259_v28 }
 0x4a4   : > { %4480 = vst.msk [vmem:[#allocation6 + $0x48] sm:$0xff] %vm4374_vm2, %v4458_v63  ;;  %6374 = vmatmul.msk.bf16.vlgmr.msra.gmra.mxu0 %vm4374_vm2, %v5410_v8  ;;  %5104 = vmatpush.bf16.msra.mxu3 %v7761_v40  ;;  %v4261_v40 = vpop.permute.xlu2 %4260 }
 0x4a5   : > { %6352 = vmatmul.msk.bf16.vlgmr.msrb.gmra.mxu2 %vm4374_vm2, %v5038_v36  ;;  %5575 = vmatpush.bf16.msra.mxu0 %v7900_v37 }
 0x4a6   : > { %5123 = vmatpush.bf16.msrb.mxu2 %v7779_v41  ;;  %v5484_v14 = vld [vmem:[#allocation5 + $0x48] sm:$0x7f] }
 0x4a7   : > { %v8177_v54 = vld [vmem:[#allocation6 + $0x40] sm:$0x7f]  ;;  %v5485_v22 = vpack.c.bf16 %v5484_v14, %v5484_v14 }
 0x4a8   : > { %v5397_v38 = vmax.f32 %v5377_v56, %v8177_v54  ;;  %v8180_v45 = vpop.f32.mrf.mxu2  ;;  %v8187_v11 = vld [vmem:[#allocation6 + $0x40] sm:$0x7f] }
 0x4a9   : > { %v628_v18 = vpop.permute.xlu1 %627  ;;  %v4257_v39 = vpop.permute.xlu0 %4256  ;;  %5576 = vmatpush.bf16.msra.mxu0 %v7916_v26  ;;  %v5463_v61 = vmax.f32 %v5443_v33, %v8187_v11 }
 0x4aa   : > { %5403 = vrot.lane.b32.xlu0 %v5397_v38, %s6502_s8  ;;  %700 = vst.msk [vmem:[#allocation3 + $0xc0] sm:$0xff] %vm675_vm8, %v628_v18  ;;  %5124 = vmatpush.bf16.msrb.mxu2 %v7790_v27  ;;  %v8196_v27 = vld [vmem:[#allocation4 + $0x48] sm:$0x7f]  ;;  %v5093_v38 = vpack.c.bf16 %v8028_v10, %v8028_v10 }
 0x4ab   : > { %4332 = vst.msk [vmem:[#allocation3 + $0xa8] sm:$0xff] %vm4310_vm9, %v4257_v39  ;;  %v5483_v25 = vmax.f32 %v5463_v61, %v8196_v27  ;;  %v5504_v28 = vld [vmem:[#allocation6 + $0x48] sm:$0x7f]  ;;  %v5113_v61 = vpack.c.bf16 %v8046_v6, %v8046_v6 }
 0x4ac   : > { %v5505_v63 = vpack.c.bf16 %v5504_v28, %v5504_v28 }
 0x4ad   : > { %6375 = vmatmul.msk.bf16.vlgmr.msra.gmra.mxu1 %vm4374_vm2, %v5408_v47  ;;  %v5503_v58 = vmax.f32 %v5483_v25, %v5484_v14  ;;  %v8244_v14 = vld [vmem:[%s8572_s5 + $0x40] sm:$0xff] }
 0x4ae   : > { %5606 = vmatpush.bf16.msra.mxu1 %v7368_v44 }
 0x4af   : > { %6353 = vmatmul.msk.bf16.vlgmr.msrb.gmra.mxu3 %vm4374_vm2, %v5036_v7 }
 0x4b0   : > { %v4628_v16 = vpop.f32.mrf.mxu2  ;;  %5143 = vmatpush.bf16.msrb.mxu3 %v7704_v55 }
 0x4b1   : > { %v4265_v43 = vpop.permute.xlu2 %4264  ;;  %v630_v9 = vpop.permute.xlu1 %629 }
 0x4b2   : > { %v4363_v20 = vld [vmem:[#allocation3 + $0xa0] ss:$2 sm:$0xff]  ;;  %v4412_v30 = vld [vmem:[#allocation3 + $0xa1] ss:$2 sm:$0xff]  ;;  %v8198_v49 = vpop.f32.mrf.mxu3  ;;  %5607 = vmatpush.bf16.msra.mxu1 %v8104_v51  ;;  %v626_v46 = vpop.permute.xlu0 %625  ;;  %701 = vst.msk [vmem:[#allocation3 + $0xc8] sm:$0xff] %vm675_vm8, %v630_v9  ;;  %v4594_v9 = vadd.f32 %v8138_v12, %v8142_v29 }
 0x4b3   : > { %v4460_v57 = vld [vmem:[#allocation3 + $0xa2] ss:$2 sm:$0xff]  ;;  %4385 = vst.msk [vmem:[#allocation4 + $0x50] sm:$0xff] %vm4374_vm2, %v4363_v20 }
 0x4b4   : > { %4433 = vst.msk [vmem:[#allocation5 + $0x50] sm:$0xff] %vm4374_vm2, %v4412_v30  ;;  %6378 = vmatmul.msk.bf16.vlgmr.msrb.gmra.mxu0 %vm4374_vm2, %v5485_v22  ;;  %5144 = vmatpush.bf16.msrb.mxu3 %v7816_v23  ;;  %v5523_v23 = vmax.f32 %v5503_v58, %v5504_v28  ;;  %v4630_v28 = vadd.f32 %v8180_v45, %v4594_v9 }
 0x4b5   : > { %4481 = vst.msk [vmem:[#allocation6 + $0x50] sm:$0xff] %vm4374_vm2, %v4460_v57  ;;  %6354 = vmatmul.msk.bf16.vlgmr.msra.gmra.mxu2 %vm4374_vm2, %v5073_v2  ;;  %5661 = vmatpush.bf16.msrb.mxu0 %v7749_v32 }
 0x4b6   : > { %5163 = vmatpush.bf16.msra.mxu2 %v7710_v53  ;;  %4336 = vst.msk [vmem:[#allocation3 + $0xc8] sm:$0xff] %vm4310_vm9, %v4265_v43  ;;  %v4664_v12 = vadd.f32 %v8198_v49, %v4630_v28  ;;  %v5153_v49 = vpack.c.bf16 %v8060_v1, %v8060_v1  ;;  %v8292_v1 = vld [vmem:[%s8573_s6] ss:$0 sm:$0xff] }
 0x4b7   : > { %699 = vst.msk [vmem:[#allocation3 + $0xb8] sm:$0xff] %vm675_vm8, %v626_v46 }
 0x4b8   : > { %v8215_v4 = vpop.f32.mrf.mxu2  ;;  %4334 = vst.msk [vmem:[#allocation3 + $0xb8] sm:$0xff] %vm4310_vm9, %v4261_v40 }
 0x4b9   : > { %5662 = vmatpush.bf16.msrb.mxu0 %v8221_v52  ;;  %v4698_v45 = vadd.f32 %v8215_v4, %v4664_v12 }
 0x4ba   : > { %v4662_v21 = vpop.f32.mrf.mxu3  ;;  %v8224_v8 = vld [vmem:[#allocation4 + $0x50] sm:$0x7f]  ;;  %v634_v35 = vpop.permute.xlu2 %633  ;;  %5164 = vmatpush.bf16.msra.mxu2 %v7823_v34 }
 0x4bb   : > { %v5543_v36 = vmax.f32 %v5523_v23, %v8224_v8  ;;  %703 = vst.msk [vmem:[#allocation3 + $0xd8] sm:$0xff] %vm675_vm8, %v634_v35  ;;  %v8229_v56 = vld [vmem:[#allocation5 + $0x50] sm:$0x7f] }
 0x4bc   : > { %v5564_v18 = vld [vmem:[#allocation6 + $0x50] sm:$0x7f] }
 0x4bd   : > { %6379 = vmatmul.msk.bf16.vlgmr.msrb.gmra.mxu1 %vm4374_vm2, %v5505_v63  ;;  %v5563_v42 = vmax.f32 %v5543_v36, %v8229_v56  ;;  %v5565_v33 = vpack.c.bf16 %v5564_v18, %v5564_v18  ;;  %v5595_v20 = vld [vmem:[#allocation5 + $0x50] sm:$0x7f] }
 0x4be   : > { %5681 = vmatpush.bf16.msrb.mxu1 %v7779_v41  ;;  %v8256_v30 = vld [vmem:[#allocation4 + $0x50] sm:$0x7f]  ;;  %v5596_v2 = vpack.c.bf16 %v5595_v20, %v5595_v20 }
 0x4bf   : > { %6355 = vmatmul.msk.bf16.vlgmr.msra.gmra.mxu3 %vm4374_vm2, %v5093_v38  ;;  %v5583_v34 = vmax.f32 %v5563_v42, %v5564_v18  ;;  %v4365_v39 = vld [vmem:[#allocation3 + $0xb0] ss:$2 sm:$0xff]  ;;  %v4414_v40 = vld [vmem:[#allocation3 + $0xb1] ss:$2 sm:$0xff]  ;;  %v5629_v46 = vmax.f32 %v8256_v30, %v5595_v20 }
 0x4c0   : > { %v4696_v47 = vpop.f32.mrf.mxu2  ;;  %5183 = vmatpush.bf16.msra.mxu3 %v7874_v19  ;;  %4386 = vst.msk [vmem:[#allocation4 + $0x58] sm:$0xff] %vm4374_vm2, %v4365_v39  ;;  %v8273_v23 = vld [vmem:[#allocation6 + $0x50] sm:$0x7f]  ;;  %v8299_v20 = vld [vmem:[%s8572_s5 + $0x20] sm:$0xff] }
 0x4c1   : > { %5589 = vrot.lane.b32.xlu1 %v5583_v34, %s6502_s8  ;;  %v4263_v10 = vpop.permute.xlu0 %4262  ;;  %4434 = vst.msk [vmem:[#allocation5 + $0x58] sm:$0xff] %vm4374_vm2, %v4414_v40 }
 0x4c2   : > { %v4728_v7 = vpop.f32.mrf.mxu3  ;;  %5682 = vmatpush.bf16.msrb.mxu1 %v8244_v14  ;;  %4335 = vst.msk [vmem:[#allocation3 + $0xc0] sm:$0xff] %vm4310_vm9, %v4263_v10 }
 0x4c3   : > { %v4732_v42 = vadd.f32 %v4728_v7, %v4698_v45 }
 0x4c4   : > { %6382 = vmatmul.msk.bf16.vlgmr.msra.gmra.mxu0 %vm4374_vm2, %v5565_v33  ;;  %5184 = vmatpush.bf16.msra.mxu3 %v7889_v48 }
 0x4c5   : > { %6356 = vmatmul.msk.bf16.vlgmr.msrb.gmra.mxu2 %vm4374_vm2, %v5113_v61  ;;  %5741 = vmatpush.bf16.msra.mxu0 %v7874_v19 }
 0x4c6   : > { %5203 = vmatpush.bf16.msrb.mxu2 %v7900_v37 }
 0x4c7   : > { %v5650_v29 = vld [vmem:[#allocation4 + $0x58] sm:$0x7f] }
 0x4c8   : > { %v4762_v16 = vpop.f32.mrf.mxu2  ;;  %v5651_v36 = vpack.c.bf16 %v5650_v29, %v5650_v29  ;;  %v5670_v4 = vld [vmem:[#allocation5 + $0x58] sm:$0x7f] }
 0x4c9   : > { %5742 = vmatpush.bf16.msra.mxu0 %v7889_v48  ;;  %v4367_v57 = vld [vmem:[#allocation3 + $0xc0] ss:$2 sm:$0xff]  ;;  %v4416_v6 = vld [vmem:[#allocation3 + $0xc1] ss:$2 sm:$0xff]  ;;  %v632_v25 = vpop.permute.xlu0 %631  ;;  %v5133_v48 = vpack.c.bf16 %v8054_v24, %v8054_v24  ;;  %v5649_v24 = vmax.f32 %v5629_v46, %v8273_v23  ;;  %v4766_v18 = vadd.f32 %v4762_v16, %v4732_v42 }
 0x4ca   : > { %v4462_v43 = vld [vmem:[#allocation3 + $0xb2] ss:$2 sm:$0xff]  ;;  %v4730_v22 = vpop.f32.mrf.mxu3  ;;  %5204 = vmatpush.bf16.msrb.mxu2 %v7916_v26  ;;  %4387 = vst.msk [vmem:[#allocation4 + $0x60] sm:$0xff] %vm4374_vm2, %v4367_v57  ;;  %v4271_v58 = vpop.permute.xlu2 %4270 }
 0x4cb   : > { %4435 = vst.msk [vmem:[#allocation5 + $0x60] sm:$0xff] %vm4374_vm2, %v4416_v6  ;;  %v5669_v38 = vmax.f32 %v5649_v24, %v5650_v29 }
 0x4cc   : > { %4482 = vst.msk [vmem:[#allocation6 + $0x58] sm:$0xff] %vm4374_vm2, %v4462_v43  ;;  %v5671_v43 = vpack.c.bf16 %v5670_v4, %v5670_v4 }
 0x4cd   : > { %6385 = vmatmul.msk.bf16.vlgmr.msra.gmra.mxu1 %vm4374_vm2, %v5596_v2  ;;  %702 = vst.msk [vmem:[#allocation3 + $0xd0] sm:$0xff] %vm675_vm8, %v632_v25  ;;  %v5689_v39 = vmax.f32 %v5669_v38, %v5670_v4  ;;  %v5173_v2 = vpack.c.bf16 %v8075_v62, %v8075_v62  ;;  %v8350_v4 = vld [vmem:[%s8572_s5 + $0x60] sm:$0xff] }
 0x4ce   : > { %5761 = vmatpush.bf16.msra.mxu1 %v7900_v37 }
 0x4cf   : > { %6357 = vmatmul.msk.bf16.vlgmr.msrb.gmra.mxu3 %vm4374_vm2, %v5133_v48 }
 0x4d0   : > { %v4764_v21 = vpop.f32.mrf.mxu2  ;;  %5234 = vmatpush.bf16.msrb.mxu3 %v7368_v44 }
 0x4d1   : > { %v4267_v35 = vpop.permute.xlu1 %4266  ;;  %v8306_v22 = vld [vmem:[#allocation4 + $0x60] sm:$0x7f] }
 0x4d2   : > { %v4796_v63 = vpop.f32.mrf.mxu3  ;;  %4337 = vst.msk [vmem:[#allocation3 + $0xd0] sm:$0xff] %vm4310_vm9, %v4267_v35  ;;  %5762 = vmatpush.bf16.msra.mxu1 %v7916_v26  ;;  %v4273_v40 = vpop.permute.xlu2 %4272  ;;  %v5730_v46 = vld [vmem:[#allocation5 + $0x60] sm:$0x7f]  ;;  %v5193_v35 = vpack.c.bf16 %v8084_v60, %v8084_v60 }
 0x4d3   : > { %v8285_v34 = vld [vmem:[#allocation6 + $0x58] sm:$0x7f]  ;;  %v4800_v26 = vadd.f32 %v4796_v63, %v4766_v18  ;;  %v5731_v24 = vpack.c.bf16 %v5730_v46, %v5730_v46 }
 0x4d4   : > { %6388 = vmatmul.msk.bf16.vlgmr.msrb.gmra.mxu0 %vm4374_vm2, %v5651_v36  ;;  %5235 = vmatpush.bf16.msrb.mxu3 %v8104_v51  ;;  %v5709_v10 = vmax.f32 %v5689_v39, %v8285_v34 }
 0x4d5   : > { %6358 = vmatmul.msk.bf16.vlgmr.msra.gmra.mxu2 %vm4374_vm2, %v5153_v49  ;;  %5827 = vmatpush.bf16.msrb.mxu0 %v7688_v3 }
 0x4d6   : > { %5250 = vmatpush.bf16.msra.mxu2 %v7394_v0  ;;  %v5729_v9 = vmax.f32 %v5709_v10, %v8306_v22 }
 0x4d8   : > { %v4830_v47 = vpop.f32.mrf.mxu2 }
 0x4d9   : > { %v4464_v7 = vld [vmem:[#allocation3 + $0xc2] ss:$2 sm:$0xff]  ;;  %v4834_v33 = vadd.f32 %v4830_v47, %v4800_v26  ;;  %v636_v61 = vpop.permute.xlu1 %635  ;;  %v4269_v16 = vpop.permute.xlu0 %4268  ;;  %5828 = vmatpush.bf16.msrb.mxu0 %v8299_v20  ;;  %v5224_v26 = vpack.c.bf16 %v8119_v17, %v8119_v17 }
 0x4da   : > { %4483 = vst.msk [vmem:[#allocation6 + $0x60] sm:$0xff] %vm4374_vm2, %v4464_v7  ;;  %v4798_v57 = vpop.f32.mrf.mxu3  ;;  %5251 = vmatpush.bf16.msra.mxu2 %v8126_v13  ;;  %v8359_v47 = vld [vmem:[#allocation5 + $0x60] sm:$0x7f] }
 0x4db   : > { %v4839_v6 = vadd.f32 %v8292_v1, %v4834_v33  ;;  %704 = vst.msk [vmem:[#allocation3 + $0xe0] sm:$0xff] %vm675_vm8, %v636_v61 }
 0x4dc   : > { %4339 = vst.msk [vmem:[#allocation3 + $0xe0] sm:$0xff] %vm4310_vm9, %v4271_v58  ;;  %v5749_v58 = vmax.f32 %v5729_v9, %v5730_v46 }
 0x4dd   : > { %v4840_v25 = vmax.f32 %v4839_v6, 0.0  ;;  %4338 = vst.msk [vmem:[#allocation3 + $0xd8] sm:$0xff] %vm4310_vm9, %v4269_v16  ;;  %6389 = vmatmul.msk.bf16.vlgmr.msrb.gmra.mxu1 %vm4374_vm2, %v5671_v43 }
 0x4de   : > { %5847 = vmatpush.bf16.msrb.mxu1 %v7749_v32  ;;  %v8323_v48 = vpop.permute.xlu2 %5217 }
 0x4df   : > { %6359 = vmatmul.msk.bf16.vlgmr.msra.gmra.mxu3 %vm4374_vm2, %v5173_v2  ;;  %4842 = vst.msk [vmem:[%s8313_s10] sm:$0x7f] %vm4841_vm10, %v4840_v25  ;;  %v8372_v2 = vld [vmem:[%s8572_s5 + $0x70] sm:$0xff]  ;;  %v5222_v25 = vpack.c.bf16 %v8117_v15, %v8117_v15 }
 0x4e0   : > { %v4832_v28 = vpop.f32.mrf.mxu2  ;;  %5269 = vmatpush.bf16.msra.mxu3 %v7688_v3 }
 0x4e1   : > { %v640_v12 = vpop.permute.xlu1 %639  ;;  %v5750_v62 = vld [vmem:[#allocation6 + $0x60] sm:$0x7f] }
 0x4e2   : > { %v8326_v29 = vpop.f32.mrf.mxu3  ;;  %706 = vst.msk [vmem:[#allocation3 + $0xf0] sm:$0xff] %vm675_vm8, %v640_v12  ;;  %v638_v21 = vpop.permute.xlu0 %637  ;;  %v5769_v45 = vmax.f32 %v5749_v58, %v5750_v62  ;;  %5848 = vmatpush.bf16.msrb.mxu1 %v8221_v52  ;;  %v5751_v39 = vpack.c.bf16 %v5750_v62, %v5750_v62  ;;  %v5816_v33 = vld [vmem:[#allocation6 + $0x60] sm:$0x7f] }
 0x4e3   : > { %705 = vst.msk [vmem:[#allocation3 + $0xe8] sm:$0xff] %vm675_vm8, %v638_v21  ;;  %v5817_v43 = vpack.c.bf16 %v5816_v33, %v5816_v33 }
 0x4e4   : > { %v4369_v63 = vld [vmem:[#allocation3 + $0xd0] ss:$2 sm:$0xff]  ;;  %v4418_v36 = vld [vmem:[#allocation3 + $0xd1] ss:$2 sm:$0xff]  ;;  %6392 = vmatmul.msk.bf16.vlgmr.msra.gmra.mxu0 %vm4374_vm2, %v5731_v24  ;;  %5775 = vrot.lane.b32.xlu2 %v5769_v45, %s6502_s8  ;;  %4340 = vst.msk [vmem:[#allocation3 + $0xe8] sm:$0xff] %vm4310_vm9, %v4273_v40 }
 0x4e5   : > { %v4466_v38 = vld [vmem:[#allocation3 + $0xd2] ss:$2 sm:$0xff]  ;;  %4388 = vst.msk [vmem:[#allocation4 + $0x68] sm:$0xff] %vm4374_vm2, %v4369_v63  ;;  %6360 = vmatmul.msk.bf16.vlgmr.msrb.gmra.mxu2 %vm4374_vm2, %v5193_v35  ;;  %5270 = vmatpush.bf16.msra.mxu3 %v8299_v20  ;;  %v8357_v40 = vld [vmem:[#allocation4 + $0x60] sm:$0x7f] }
 0x4e6   : > { %4436 = vst.msk [vmem:[#allocation5 + $0x68] sm:$0xff] %vm4374_vm2, %v4418_v36  ;;  %5289 = vmatpush.bf16.msrb.mxu2 %v7749_v32  ;;  %5907 = vmatpush.bf16.msra.mxu0 %v7710_v53  ;;  %v4277_v42 = vpop.permute.xlu2 %4276  ;;  %v5815_v17 = vmax.f32 %v8357_v40, %v8359_v47  ;;  %v5259_v36 = vpack.c.bf16 %v8131_v5, %v8131_v5 }
 0x4e7   : > { %4484 = vst.msk [vmem:[#allocation6 + $0x68] sm:$0xff] %vm4374_vm2, %v4466_v38 }
 0x4e8   : > { %v8343_v60 = vpop.f32.mrf.mxu2  ;;  %v5835_v9 = vmax.f32 %v5815_v17, %v5816_v33  ;;  %v8405_v33 = vld [vmem:[%s8572_s5 + $0x80] sm:$0xff] }
 0x4e9   : > { %v642_v49 = vpop.permute.xlu1 %641 }
 0x4ea   : > { %v4867_v18 = vpop.f32.mrf.mxu3  ;;  %707 = vst.msk [vmem:[#allocation3 + $0xf8] sm:$0xff] %vm675_vm8, %v642_v49  ;;  %5290 = vmatpush.bf16.msrb.mxu2 %v8221_v52  ;;  %5908 = vmatpush.bf16.msra.mxu0 %v8350_v4 }
 0x4eb   : > { %4342 = vst.msk [vmem:[#allocation3 + $0xf8] sm:$0xff] %vm4310_vm9, %v4277_v42  ;;  %v4371_v10 = vld [vmem:[#allocation3 + $0xe0] ss:$2 sm:$0xff]  ;;  %v4420_v7 = vld [vmem:[#allocation3 + $0xe1] ss:$2 sm:$0xff] }
 0x4ec   : > { %4389 = vst.msk [vmem:[#allocation4 + $0x70] sm:$0xff] %vm4374_vm2, %v4371_v10  ;;  %v5836_v57 = vld [vmem:[#allocation4 + $0x68] sm:$0x7f]  ;;  %v5279_v10 = vpack.c.bf16 %v8140_v59, %v8140_v59 }
 0x4ed   : > { %6393 = vmatmul.msk.bf16.vlgmr.msra.gmra.mxu1 %vm4374_vm2, %v5751_v39  ;;  %4437 = vst.msk [vmem:[#allocation5 + $0x70] sm:$0xff] %vm4374_vm2, %v4420_v7  ;;  %v5855_v46 = vmax.f32 %v5835_v9, %v5836_v57  ;;  %v8381_v28 = vld [vmem:[#allocation5 + $0x68] sm:$0x7f]  ;;  %v5837_v24 = vpack.c.bf16 %v5836_v57, %v5836_v57 }
 0x4ee   : > { %5927 = vmatpush.bf16.msra.mxu1 %v7874_v19  ;;  %v8385_v35 = vld [vmem:[#allocation6 + $0x68] sm:$0x7f] }
 0x4ef   : > { %6363 = vmatmul.msk.bf16.vlgmr.msrb.gmra.mxu3 %vm4374_vm2, %v5224_v26  ;;  %v5875_v12 = vmax.f32 %v5855_v46, %v8381_v28  ;;  %v4882_v46 = vadd.f32 %v8343_v60, %v8326_v29 }
 0x4f0   : > { %v4883_v61 = vpop.f32.mrf.mxu2  ;;  %5309 = vmatpush.bf16.msrb.mxu3 %v7779_v41 }
 0x4f1   : > { %v4275_v16 = vpop.permute.xlu0 %4274  ;;  %v5895_v63 = vmax.f32 %v5875_v12, %v8385_v35 }
 0x4f2   : > { %v4900_v6 = vpop.f32.mrf.mxu3  ;;  %4341 = vst.msk [vmem:[#allocation3 + $0xf0] sm:$0xff] %vm4310_vm9, %v4275_v16  ;;  %5928 = vmatpush.bf16.msra.mxu1 %v8372_v2  ;;  %v5299_v16 = vpack.c.bf16 %v8151_v50, %v8151_v50 }
 0x4f3   : > { %v5896_v45 = vld [vmem:[#allocation4 + $0x70] sm:$0x7f]  ;;  %v4904_v50 = vadd.f32 %v4900_v6, %v4882_v46 }
 0x4f4   : > { %6398 = vmatmul.msk.bf16.vlgmr.msrb.gmra.mxu0 %vm4374_vm2, %v5817_v43  ;;  %5310 = vmatpush.bf16.msrb.mxu3 %v8244_v14  ;;  %v5915_v38 = vmax.f32 %v5895_v63, %v5896_v45  ;;  %v5916_v42 = vld [vmem:[#allocation5 + $0x70] sm:$0x7f]  ;;  %v5897_v39 = vpack.c.bf16 %v5896_v45, %v5896_v45 }
 0x4f5   : > { %6364 = vmatmul.msk.bf16.vlgmr.msra.gmra.mxu2 %vm4374_vm2, %v5222_v25  ;;  %v5917_v17 = vpack.c.bf16 %v5916_v42, %v5916_v42  ;;  %v5359_v25 = vpack.c.bf16 %v8172_v31, %v8172_v31  ;;  %v5379_v31 = vpack.c.bf16 %v8177_v54, %v8177_v54 }
 0x4f6   : > { %5369 = vmatpush.bf16.msra.mxu2 %v7874_v19  ;;  %v5935_v26 = vmax.f32 %v5915_v38, %v5916_v42  ;;  %v5445_v38 = vpack.c.bf16 %v8187_v11, %v8187_v11 }
 0x4f8   : > { %v4920_v58 = vpop.f32.mrf.mxu2 }
 0x4f9   : > { %v4468_v62 = vld [vmem:[#allocation3 + $0xe2] ss:$2 sm:$0xff]  ;;  %v4845_v15 = vpop.permute.xlu0 %4844 }
 0x4fa   : > { %v4902_v21 = vpop.f32.mrf.mxu3  ;;  %5370 = vmatpush.bf16.msra.mxu2 %v8372_v2  ;;  %4485 = vst.msk [vmem:[#allocation6 + $0x70] sm:$0xff] %vm4374_vm2, %v4468_v62  ;;  %v4924_v62 = vadd.f32 %v4920_v58, %v4904_v50 }
 0x4fb   : > { %4848 = vst.msk [vmem:[%s8313_s10] sm:$0x7f] %vm4847_vm11, %v4845_v15 }
 0x4fd   : > { %6399 = vmatmul.msk.bf16.vlgmr.msrb.gmra.mxu1 %vm4374_vm2, %v5837_v24 }
 0x4ff   : > { %6365 = vmatmul.msk.bf16.vlgmr.msra.gmra.mxu3 %vm4374_vm2, %v5259_v36 }
 0x500   : > { %v4922_v49 = vpop.f32.mrf.mxu2  ;;  %5389 = vmatpush.bf16.msra.mxu3 %v7900_v37 }
 0x501   : > { %v8398_v7 = vld [vmem:[#allocation6 + $0x70] sm:$0x7f] }
 0x502   : > { %v4940_v18 = vpop.f32.mrf.mxu3  ;;  %v5955_v5 = vmax.f32 %v5935_v26, %v8398_v7 }
 0x503   : > { %v4944_v24 = vadd.f32 %v4940_v18, %v4924_v62 }
 0x504   : > { %6402 = vmatmul.msk.bf16.vlgmr.msra.gmra.mxu0 %vm4374_vm2, %v5897_v39  ;;  %5390 = vmatpush.bf16.msra.mxu3 %v8405_v33 }
 0x505   : > { %6366 = vmatmul.msk.bf16.vlgmr.msrb.gmra.mxu2 %vm4374_vm2, %v5279_v10  ;;  %5961 = vrot.lane.b32.xlu0 %v5955_v5, %s6502_s8 }
 0x506   : > { %5455 = vmatpush.bf16.msrb.mxu2 %v7688_v3 }
 0x508   : > { %v4960_v59 = vpop.f32.mrf.mxu2 }
 0x50a   : > { %v4942_v61 = vpop.f32.mrf.mxu3  ;;  %5456 = vmatpush.bf16.msrb.mxu2 %v8299_v20 }
 0x50d   : > { %6403 = vmatmul.msk.bf16.vlgmr.msra.gmra.mxu1 %vm4374_vm2, %v5917_v17  ;;  %v5525_v17 = vpack.c.bf16 %v8224_v8, %v8224_v8 }
 0x50f   : > { %6367 = vmatmul.msk.bf16.vlgmr.msrb.gmra.mxu3 %vm4374_vm2, %v5299_v16 }
 0x510   : > { %v4962_v57 = vpop.f32.mrf.mxu2  ;;  %5475 = vmatpush.bf16.msrb.mxu3 %v7749_v32 }
 0x511   : > { %v8417_v43 = vpop.f32.mrf.mxu0 }
 0x512   : > { %v4980_v9 = vpop.f32.mrf.mxu3 }
 0x514   : > { %5476 = vmatpush.bf16.msrb.mxu3 %v8221_v52  ;;  %v4964_v52 = vadd.f32 %v4960_v59, %v4944_v24 }
 0x515   : > { %6370 = vmatmul.msk.bf16.vlgmr.msra.gmra.mxu2 %vm4374_vm2, %v5359_v25  ;;  %v5545_v25 = vpack.c.bf16 %v8229_v56, %v8229_v56 }
 0x516   : > { %5535 = vmatpush.bf16.msra.mxu2 %v7710_v53  ;;  %v4984_v45 = vadd.f32 %v4980_v9, %v4964_v52 }
 0x518   : > { %v5000_v12 = vpop.f32.mrf.mxu2 }
 0x519   : > { %v5334_v21 = vpop.f32.mrf.mxu0  ;;  %v5004_v60 = vadd.f32 %v5000_v12, %v4984_v45  ;;  %v5594_v12 = vpack.c.bf16 %v8256_v30, %v8256_v30 }
 0x51a   : > { %v4982_v32 = vpop.f32.mrf.mxu3  ;;  %v8426_v15 = vpop.f32.mrf.mxu1  ;;  %5536 = vmatpush.bf16.msra.mxu2 %v8350_v4 }
 0x51f   : > { %6371 = vmatmul.msk.bf16.vlgmr.msra.gmra.mxu3 %vm4374_vm2, %v5379_v31 }
 0x520   : > { %v5002_v29 = vpop.f32.mrf.mxu2  ;;  %5555 = vmatpush.bf16.msra.mxu3 %v7874_v19  ;;  %v5032_v19 = vpop.permute.xlu1 %5031 }
 0x521   : > { %v5423_v6 = vpop.f32.mrf.mxu0  ;;  %v5711_v29 = vpack.c.bf16 %v8306_v22, %v8306_v22 }
 0x522   : > { %v5020_v58 = vpop.f32.mrf.mxu3  ;;  %v5354_v63 = vpop.f32.mrf.mxu1 }
 0x523   : > { %v5024_v36 = vadd.f32 %v5020_v58, %v5004_v60 }
 0x524   : > { %5556 = vmatpush.bf16.msra.mxu3 %v8372_v2  ;;  %v5465_v2 = vpack.c.bf16 %v8196_v27, %v8196_v27 }
 0x525   : > { %v5026_v54 = vadd.f32 %v8292_v1, %v5024_v36  ;;  %6376 = vmatmul.msk.bf16.vlgmr.msrb.gmra.mxu2 %vm4374_vm2, %v5445_v38 }
 0x526   : > { %5622 = vmatpush.bf16.msrb.mxu2 %v7394_v0 }
 0x527   : > { %v5027_v49 = vmax.f32 %v5026_v54, 0.0 }
 0x528   : > { %v5051_v42 = vpop.f32.mrf.mxu2 }
 0x529   : > { %6350 = vst.msk [vmem:[%s8313_s10 + $0x8] sm:$0x7f] %vm4841_vm10, %v5027_v49  ;;  %v5425_v18 = vpop.f32.mrf.mxu0 }
 0x52a   : > { %6351 = vst.msk [vmem:[%s8313_s10 + $0x8] sm:$0x7f] %vm4847_vm11, %v5032_v19  ;;  %v5022_v39 = vpop.f32.mrf.mxu3  ;;  %v5439_v26 = vpop.f32.mrf.mxu1  ;;  %5623 = vmatpush.bf16.msrb.mxu2 %v8126_v13 }
 0x52b   : > { %v8444_v11 = vadd.f32 %v5439_v26, %v5423_v6 }
 0x52f   : > { %6377 = vmatmul.msk.bf16.vlgmr.msrb.gmra.mxu3 %vm4374_vm2, %v5465_v2 }
 0x530   : > { %v5053_v10 = vpop.f32.mrf.mxu2  ;;  %5641 = vmatpush.bf16.msrb.mxu3 %v7688_v3  ;;  %v6488_v3 = vld [vmem:[%s8572_s5 + $0x50] sm:$0xff] }
 0x531   : > { %v8450_v5 = vpop.f32.mrf.mxu0 }
 0x532   : > { %v5067_v59 = vpop.f32.mrf.mxu3  ;;  %v5441_v61 = vpop.f32.mrf.mxu1 }
 0x534   : > { %5642 = vmatpush.bf16.msrb.mxu3 %v8299_v20 }
 0x535   : > { %6380 = vmatmul.msk.bf16.vlgmr.msra.gmra.mxu2 %vm4374_vm2, %v5525_v17 }
 0x536   : > { %5701 = vmatpush.bf16.msra.mxu2 %v7704_v55 }
 0x538   : > { %v5086_v16 = vpop.f32.mrf.mxu2 }
 0x539   : > { %v5500_v27 = vpop.f32.mrf.mxu0 }
 0x53a   : > { %v5069_v57 = vpop.f32.mrf.mxu3  ;;  %v8457_v9 = vpop.f32.mrf.mxu1  ;;  %5702 = vmatpush.bf16.msra.mxu2 %v6488_v3 }
 0x53f   : > { %6381 = vmatmul.msk.bf16.vlgmr.msra.gmra.mxu3 %vm4374_vm2, %v5545_v25 }
 0x540   : > { %v5088_v8 = vpop.f32.mrf.mxu2  ;;  %5721 = vmatpush.bf16.msra.mxu3 %v7710_v53  ;;  %v5631_v53 = vpack.c.bf16 %v8273_v23, %v8273_v23 }
 0x541   : > { %v8466_v20 = vpop.f32.mrf.mxu0 }
 0x542   : > { %v5106_v46 = vpop.f32.mrf.mxu3  ;;  %v5520_v50 = vpop.f32.mrf.mxu1 }
 0x544   : > { %5722 = vmatpush.bf16.msra.mxu3 %v8350_v4 }
 0x545   : > { %6386 = vmatmul.msk.bf16.vlgmr.msrb.gmra.mxu2 %vm4374_vm2, %v5594_v12 }
 0x546   : > { %5792 = vmatpush.bf16.msrb.mxu2 %v7368_v44  ;;  %v5691_v44 = vpack.c.bf16 %v8285_v34, %v8285_v34 }
 0x548   : > { %v5126_v62 = vpop.f32.mrf.mxu2 }
 0x549   : > { %v5580_v56 = vpop.f32.mrf.mxu0 }
 0x54a   : > { %v5108_v21 = vpop.f32.mrf.mxu3  ;;  %v8473_v32 = vpop.f32.mrf.mxu1  ;;  %5793 = vmatpush.bf16.msrb.mxu2 %v8104_v51 }
 0x54f   : > { %6387 = vmatmul.msk.bf16.vlgmr.msrb.gmra.mxu3 %vm4374_vm2, %v5631_v53 }
 0x550   : > { %v5128_v24 = vpop.f32.mrf.mxu2  ;;  %5808 = vmatpush.bf16.msrb.mxu3 %v7394_v0  ;;  %v5068_v0 = vadd.f32 %v5067_v59, %v5051_v42 }
 0x551   : > { %v8480_v30 = vpop.f32.mrf.mxu0 }
 0x552   : > { %v5146_v4 = vpop.f32.mrf.mxu3  ;;  %v5611_v31 = vpop.f32.mrf.mxu1  ;;  %v5090_v60 = vadd.f32 %v5086_v16, %v5068_v0  ;;  %v5877_v16 = vpack.c.bf16 %v8385_v35, %v8385_v35 }
 0x554   : > { %5809 = vmatpush.bf16.msrb.mxu3 %v8126_v13  ;;  %v5110_v6 = vadd.f32 %v5106_v46, %v5090_v60 }
 0x555   : > { %6390 = vmatmul.msk.bf16.vlgmr.msra.gmra.mxu2 %vm4374_vm2, %v5691_v44 }
 0x556   : > { %5867 = vmatpush.bf16.msra.mxu2 %v7779_v41  ;;  %v5130_v34 = vadd.f32 %v5126_v62, %v5110_v6 }
 0x558   : > { %v5166_v51 = vpop.f32.mrf.mxu2  ;;  %v5150_v36 = vadd.f32 %v5146_v4, %v5130_v34 }
 0x559   : > { %v5666_v23 = vpop.f32.mrf.mxu0 }
 0x55a   : > { %v5148_v52 = vpop.f32.mrf.mxu3  ;;  %v8487_v45 = vpop.f32.mrf.mxu1  ;;  %5868 = vmatpush.bf16.msra.mxu2 %v8244_v14  ;;  %v5782_v14 = vpack.c.bf16 %v8359_v47, %v8359_v47  ;;  %v5170_v22 = vadd.f32 %v5166_v51, %v5150_v36  ;;  %v5780_v47 = vpack.c.bf16 %v8357_v40, %v8357_v40 }
 0x55f   : > { %6391 = vmatmul.msk.bf16.vlgmr.msra.gmra.mxu3 %vm4374_vm2, %v5711_v29 }
 0x560   : > { %v5168_v13 = vpop.f32.mrf.mxu2  ;;  %5887 = vmatpush.bf16.msra.mxu3 %v7704_v55 }
 0x561   : > { %v8494_v41 = vpop.f32.mrf.mxu0  ;;  %v5404_v13 = vpop.permute.xlu0 %5403 }
 0x562   : > { %v5186_v58 = vpop.f32.mrf.mxu3  ;;  %v5686_v63 = vpop.f32.mrf.mxu1 }
 0x563   : > { %v5190_v38 = vadd.f32 %v5186_v58, %v5170_v22 }
 0x564   : > { %5888 = vmatpush.bf16.msra.mxu3 %v6488_v3 }
 0x565   : > { %6396 = vmatmul.msk.bf16.vlgmr.msrb.gmra.mxu2 %vm4374_vm2, %v5782_v14 }
 0x566   : > { %5947 = vmatpush.bf16.msrb.mxu2 %v7900_v37 }
 0x568   : > { %v5206_v54 = vpop.f32.mrf.mxu2 }
 0x569   : > { %v5210_v55 = vadd.f32 %v5206_v54, %v5190_v38  ;;  %v5746_v49 = vpop.f32.mrf.mxu0 }
 0x56a   : > { %v5188_v42 = vpop.f32.mrf.mxu3  ;;  %v8500_v19 = vpop.f32.mrf.mxu1  ;;  %5948 = vmatpush.bf16.msrb.mxu2 %v8405_v33  ;;  %v5857_v33 = vpack.c.bf16 %v8381_v28, %v8381_v28  ;;  %v5937_v28 = vpack.c.bf16 %v8398_v7, %v8398_v7 }
 0x56b   : > { %v5212_v18 = vadd.f32 %v8292_v1, %v5210_v55 }
 0x56d   : > { %v5213_v39 = vmax.f32 %v5212_v18, 0.0 }
 0x56f   : > { %6361 = vst.msk [vmem:[%s8313_s10 + $0x10] sm:$0x7f] %vm4841_vm10, %v5213_v39  ;;  %6397 = vmatmul.msk.bf16.vlgmr.msrb.gmra.mxu3 %vm4374_vm2, %v5780_v47 }
 0x570   : > { %6362 = vst.msk [vmem:[%s8313_s10 + $0x10] sm:$0x7f] %vm4847_vm11, %v8323_v48  ;;  %v5208_v37 = vpop.f32.mrf.mxu2 }
 0x571   : > { %v8512_v26 = vpop.f32.mrf.mxu0 }
 0x572   : > { %v5237_v2 = vpop.f32.mrf.mxu3  ;;  %v5766_v10 = vpop.f32.mrf.mxu1 }
 0x575   : > { %6400 = vmatmul.msk.bf16.vlgmr.msra.gmra.mxu2 %vm4374_vm2, %v5857_v33 }
 0x578   : > { %v5253_v59 = vpop.f32.mrf.mxu2 }
 0x579   : > { %v5832_v61 = vpop.f32.mrf.mxu0  ;;  %v5254_v62 = vadd.f32 %v5253_v59, %v5237_v2  ;;  %v5590_v2 = vpop.permute.xlu1 %5589 }
 0x57a   : > { %v5239_v40 = vpop.f32.mrf.mxu3  ;;  %v8517_v17 = vpop.f32.mrf.mxu1 }
 0x57f   : > { %6401 = vmatmul.msk.bf16.vlgmr.msra.gmra.mxu3 %vm4374_vm2, %v5877_v16 }
 0x580   : > { %v5255_v48 = vpop.f32.mrf.mxu2 }
 0x581   : > { %v8522_v27 = vpop.f32.mrf.mxu0 }
 0x582   : > { %v5272_v57 = vpop.f32.mrf.mxu3  ;;  %v5852_v3 = vpop.f32.mrf.mxu1 }
 0x583   : > { %v5276_v21 = vadd.f32 %v5272_v57, %v5254_v62  ;;  %v5776_v62 = vpop.permute.xlu2 %5775 }
 0x585   : > { %6404 = vmatmul.msk.bf16.vlgmr.msrb.gmra.mxu2 %vm4374_vm2, %v5937_v28 }
 0x588   : > { %v5292_v25 = vpop.f32.mrf.mxu2 }
 0x589   : > { %v5912_v8 = vpop.f32.mrf.mxu0  ;;  %v5296_v53 = vadd.f32 %v5292_v25, %v5276_v21 }
 0x58a   : > { %v5274_v46 = vpop.f32.mrf.mxu3  ;;  %v8527_v50 = vpop.f32.mrf.mxu1 }
 0x590   : > { %v5294_v12 = vpop.f32.mrf.mxu2 }
 0x592   : > { %v5312_v35 = vpop.f32.mrf.mxu3  ;;  %v5932_v56 = vpop.f32.mrf.mxu1 }
 0x593   : > { %v5316_v24 = vadd.f32 %v5312_v35, %v5296_v53 }
 0x595   : > { %v5336_v7 = vadd.f32 %v8417_v43, %v5316_v24 }
 0x597   : > { %v5356_v44 = vadd.f32 %v8426_v15, %v5336_v7 }
 0x598   : > { %v5372_v4 = vpop.f32.mrf.mxu2 }
 0x599   : > { %v5376_v23 = vadd.f32 %v5372_v4, %v5356_v44 }
 0x59a   : > { %v5314_v31 = vpop.f32.mrf.mxu3 }
 0x5a0   : > { %v5374_v51 = vpop.f32.mrf.mxu2 }
 0x5a2   : > { %v5392_v52 = vpop.f32.mrf.mxu3 }
 0x5a3   : > { %v5396_v0 = vadd.f32 %v5392_v52, %v5376_v23 }
 0x5a5   : > { %v5398_v29 = vadd.f32 %v8292_v1, %v5396_v0 }
 0x5a7   : > { %v5399_v60 = vmax.f32 %v5398_v29, 0.0 }
 0x5a8   : > { %v5458_v6 = vpop.f32.mrf.mxu2 }
 0x5a9   : > { %6372 = vst.msk [vmem:[%s8313_s10 + $0x18] sm:$0x7f] %vm4841_vm10, %v5399_v60  ;;  %v5462_v43 = vadd.f32 %v5458_v6, %v8444_v11  ;;  %v5962_v60 = vpop.permute.xlu0 %5961 }
 0x5aa   : > { %6373 = vst.msk [vmem:[%s8313_s10 + $0x18] sm:$0x7f] %vm4847_vm11, %v5404_v13  ;;  %v5394_v34 = vpop.f32.mrf.mxu3 }
 0x5b0   : > { %v5460_v58 = vpop.f32.mrf.mxu2 }
 0x5b2   : > { %v5478_v63 = vpop.f32.mrf.mxu3 }
 0x5b3   : > { %v5482_v15 = vadd.f32 %v5478_v63, %v5462_v43 }
 0x5b5   : > { %v5502_v22 = vadd.f32 %v8450_v5, %v5482_v15 }
 0x5b7   : > { %v5522_v38 = vadd.f32 %v8457_v9, %v5502_v22 }
 0x5b8   : > { %v5538_v36 = vpop.f32.mrf.mxu2 }
 0x5b9   : > { %v5542_v55 = vadd.f32 %v5538_v36, %v5522_v38 }
 0x5ba   : > { %v5480_v14 = vpop.f32.mrf.mxu3 }
 0x5c0   : > { %v5540_v54 = vpop.f32.mrf.mxu2 }
 0x5c2   : > { %v5558_v49 = vpop.f32.mrf.mxu3 }
 0x5c3   : > { %v5562_v42 = vadd.f32 %v5558_v49, %v5542_v55 }
 0x5c5   : > { %v5582_v18 = vadd.f32 %v8466_v20, %v5562_v42 }
 0x5c7   : > { %v5584_v39 = vadd.f32 %v8292_v1, %v5582_v18 }
 0x5c8   : > { %v5625_v47 = vpop.f32.mrf.mxu2 }
 0x5c9   : > { %v5585_v37 = vmax.f32 %v5584_v39, 0.0  ;;  %v5626_v9 = vadd.f32 %v5625_v47, %v8473_v32 }
 0x5ca   : > { %v5560_v11 = vpop.f32.mrf.mxu3 }
 0x5cb   : > { %6383 = vst.msk [vmem:[%s8313_s10 + $0x20] sm:$0x7f] %vm4841_vm10, %v5585_v37 }
 0x5cc   : > { %6384 = vst.msk [vmem:[%s8313_s10 + $0x20] sm:$0x7f] %vm4847_vm11, %v5590_v2 }
 0x5d0   : > { %v5627_v10 = vpop.f32.mrf.mxu2 }
 0x5d2   : > { %v5644_v5 = vpop.f32.mrf.mxu3 }
 0x5d3   : > { %v5648_v33 = vadd.f32 %v5644_v5, %v5626_v9 }
 0x5d5   : > { %v5668_v20 = vadd.f32 %v8480_v30, %v5648_v33 }
 0x5d7   : > { %v5688_v40 = vadd.f32 %v8487_v45, %v5668_v20 }
 0x5d8   : > { %v5704_v59 = vpop.f32.mrf.mxu2 }
 0x5d9   : > { %v5708_v48 = vadd.f32 %v5704_v59, %v5688_v40 }
 0x5da   : > { %v5646_v61 = vpop.f32.mrf.mxu3 }
 0x5e0   : > { %v5706_v16 = vpop.f32.mrf.mxu2 }
 0x5e2   : > { %v5724_v57 = vpop.f32.mrf.mxu3 }
 0x5e3   : > { %v5728_v3 = vadd.f32 %v5724_v57, %v5708_v48 }
 0x5e5   : > { %v5748_v28 = vadd.f32 %v8494_v41, %v5728_v3 }
 0x5e7   : > { %v5768_v25 = vadd.f32 %v8500_v19, %v5748_v28 }
 0x5e8   : > { %v5795_v8 = vpop.f32.mrf.mxu2 }
 0x5e9   : > { %v5770_v32 = vadd.f32 %v8292_v1, %v5768_v25 }
 0x5ea   : > { %v5726_v46 = vpop.f32.mrf.mxu3 }
 0x5eb   : > { %v5771_v12 = vmax.f32 %v5770_v32, 0.0 }
 0x5ed   : > { %6394 = vst.msk [vmem:[%s8313_s10 + $0x28] sm:$0x7f] %vm4841_vm10, %v5771_v12 }
 0x5ee   : > { %6395 = vst.msk [vmem:[%s8313_s10 + $0x28] sm:$0x7f] %vm4847_vm11, %v5776_v62 }
 0x5f0   : > { %v5797_v30 = vpop.f32.mrf.mxu2 }
 0x5f2   : > { %v5811_v45 = vpop.f32.mrf.mxu3 }
 0x5f3   : > { %v5812_v35 = vadd.f32 %v5811_v45, %v5795_v8 }
 0x5f5   : > { %v5834_v41 = vadd.f32 %v8512_v26, %v5812_v35 }
 0x5f7   : > { %v5854_v19 = vadd.f32 %v8517_v17, %v5834_v41 }
 0x5f8   : > { %v5870_v56 = vpop.f32.mrf.mxu2 }
 0x5f9   : > { %v5874_v24 = vadd.f32 %v5870_v56, %v5854_v19 }
 0x5fa   : > { %v5813_v21 = vpop.f32.mrf.mxu3 }
 0x600   : > { %v5872_v53 = vpop.f32.mrf.mxu2 }
 0x602   : > { %v5890_v4 = vpop.f32.mrf.mxu3 }
 0x603   : > { %v5894_v31 = vadd.f32 %v5890_v4, %v5874_v24 }
 0x605   : > { %v5914_v7 = vadd.f32 %v8522_v27, %v5894_v31 }
 0x607   : > { %v5934_v44 = vadd.f32 %v8527_v50, %v5914_v7 }
 0x608   : > { %v5950_v51 = vpop.f32.mrf.mxu2 }
 0x609   : > { %v5954_v23 = vadd.f32 %v5950_v51, %v5934_v44 }
 0x60a   : > { %v5892_v52 = vpop.f32.mrf.mxu3 }
 0x60b   : > { %v5956_v0 = vadd.f32 %v8292_v1, %v5954_v23 }
 0x60d   : > { %v5957_v29 = vmax.f32 %v5956_v0, 0.0 }
 0x60f   : > { %6405 = vst.msk [vmem:[%s8313_s10 + $0x30] sm:$0x7f] %vm4841_vm10, %v5957_v29 }
 0x610   : > { %6406 = vst.msk [vmem:[%s8313_s10 + $0x30] sm:$0x7f] %vm4847_vm11, %v5962_v60  ;;  %v5952_v26 = vpop.f32.mrf.mxu2 }
 0x611 PF: > { %s17_s24 = sadd.s32 1, %s6495_s24  }
 0x612   : > { %p14_p4 = scmp.ge.s32.totalorder %s17_s24, 4  }
 0x614   :  { %16 = sbr.rel (!%p14_p4) target bundleno = 1 (0x1), region = 147 }

</bundles_post_ra>
